<compile_context>
chip_gen: v7x
topology: tpu7x:2x2x1
jax: 0.10.0
libtpu: 0.0.40
codegen_flags: <defaults>
</compile_context>

<pallas_src>
import functools

import jax
import jax.numpy as jnp
from jax import lax
from jax.experimental import pallas as pl
from jax.experimental.pallas import tpu as pltpu

HALO = 6  # 3 stacked 5x5 / stride-1 / pad-2 pools -> receptive radius 3 * 2


def _round_up(x, m):
    return (x + m - 1) // m * m


# ----------------------------------- kernel -----------------------------------

def _sppf_kernel(hh_ref, x_ref, w1_ref, b1_ref, w2_ref, b2_ref, o_ref,
                 *, H, W, TH, EXT, HALO, compute_dtype):
    # hh_ref: (R, 1) int32 window-local row index (R = EXT * W)
    # x_ref : (1, H_pad*W, C1p)  resident per-image input (H zero-padded by HALO)
    # w1_ref: (C1p, Cmp)   b1_ref: (1, Cmp)
    # w2_ref: (4, Cmp, C2p) (cv2 split into 4 level-blocks)   b2_ref: (1, C2p)
    # o_ref : (1, TH*W, C2p)
    R = EXT * W
    NEG = float("-inf")
    t_idx = pl.program_id(1)
    row0 = t_idx * TH                      # window start row (padded coordinates)

    # ---------------- cv1: 1x1 conv (+folded BN) + SiLU on the haloed window ---
    # The wrapper guarantees TH*W % 8 == 0 whenever there is more than one row
    # tile, so the dynamic sublane offset is always 8-aligned (no relayout).
    start = pl.multiple_of(row0 * W, 8)
    xw = x_ref[0, pl.ds(start, R), :]                       # (R, C1p)
    acc1 = jnp.dot(xw, w1_ref[...],
                   preferred_element_type=jnp.float32) + b1_ref[...]
    t0 = (acc1 * jax.nn.sigmoid(acc1)).astype(compute_dtype)  # SiLU, (R, Cmp)

    # ---------------- hoisted masks (built once, reused by all 3 pool levels) --
    hh = hh_ref[...]                                        # (R, 1)
    grow = hh + row0                                        # padded-global row
    in_img = (grow >= HALO) & (grow < HALO + H)             # (R, 1)
    # rows outside the real image contribute -inf to the pooling
    t0 = jnp.where(in_img, t0, NEG)

    w_shifts = tuple((-d) % R for d in (-2, -1, 1, 2))      # horizontal +-1, +-2
    h_shifts = tuple((-d * W) % R for d in (-2, -1, 1, 2))  # vertical   +-1, +-2
    # A horizontal neighbour is valid iff it comes from the same image row
    # (rolling the row-index array with the same shift makes this mask correct
    # independent of the roll direction convention).
    w_masks = tuple(pltpu.roll(hh, s, axis=0) == hh for s in w_shifts)

    # ---------------- 5x5 / stride-1 / pad-2 max pool (separable) --------------
    def pool(a):
        # vertical pass: no masks needed -- out-of-image rows are already -inf
        # and window-edge wraparound never reaches the tile's centre rows
        # (that is what the 6-row halo is for).
        r = a
        for s in h_shifts:
            r = jnp.maximum(r, pltpu.roll(a, s, axis=0))
        # horizontal pass: static same-row masks.
        c = r
        for s, m in zip(w_shifts, w_masks):
            c = jnp.maximum(c, jnp.where(m, pltpu.roll(r, s, axis=0), NEG))
        return c

    y1 = pool(t0)
    y2 = pool(y1)
    y3 = pool(y2)

    # ---------------- cv2: concat-free, four accumulating matmuls --------------
    lo, hi = HALO * W, HALO * W + TH * W                    # the tile's own rows
    z = jnp.dot(t0[lo:hi], w2_ref[0], preferred_element_type=jnp.float32)
    z = z + jnp.dot(y1[lo:hi], w2_ref[1], preferred_element_type=jnp.float32)
    z = z + jnp.dot(y2[lo:hi], w2_ref[2], preferred_element_type=jnp.float32)
    z = z + jnp.dot(y3[lo:hi], w2_ref[3], preferred_element_type=jnp.float32)
    z = z + b2_ref[...]
    z = z * jax.nn.sigmoid(z)                               # SiLU
    o_ref[0] = z.astype(o_ref.dtype)


# ------------------------------ VMEM budgeting --------------------------------

def _vmem_budget_bytes():
    """Generation-aware VMEM budget for the tile search / scoped limit."""
    kind = ""
    try:
        kind = jax.devices()[0].device_kind.lower()
    except Exception:
        pass
    if "v7" in kind:
        return 48 * 1024 * 1024       # 64 MiB physical per TensorCore
    if "v4" in kind or "v5" in kind or "v6" in kind:
        return 100 * 1024 * 1024      # 128 MiB physical
    return 48 * 1024 * 1024           # unknown: stay conservative


def _vmem_usage_bytes(th, W, H_pad, c1p, cmp_, c2p, itemsize):
    """Everything resident / live during one grid step (incl. double buffers)."""
    ext = th + 2 * HALO
    R = ext * W
    resident = (
        2 * H_pad * W * c1p * itemsize              # whole-image x block, x2 buf
        + 2 * (c1p * cmp_ + 4 * cmp_ * c2p) * itemsize   # w1 + w2, x2 buffered
        + 2 * (cmp_ + c2p) * 4                      # biases (f32), x2 buffered
        + 2 * R * 4                                 # hh row-index, x2 buffered
        + 2 * th * W * c2p * 4                      # f32 output block, x2 buffered
    )
    temps = (
        R * c1p * itemsize                          # xw window
        + R * cmp_ * 4                              # f32 cv1 accumulator
        + 4 * R * cmp_ * itemsize                   # t0, y1, y2, y3
        + 2 * R * cmp_ * itemsize                   # roll temporaries in pool()
        + th * W * c2p * 4                          # f32 cv2 accumulator
    )
    return resident + temps


def _tile_ok(th, H, W):
    """Divides H and keeps the out BlockSpec sublane-aligned when NT > 1."""
    if H % th:
        return False
    return th == H or (th * W) % 8 == 0


def _choose_tile_h(H, W, H_pad, c1p, cmp_, c2p, itemsize, budget):
    best = None
    for th in range(1, H + 1):
        if not _tile_ok(th, H, W):
            continue
        if _vmem_usage_bytes(th, W, H_pad, c1p, cmp_, c2p, itemsize) <= budget:
            best = th                           # monotone: keep the largest fit
    if best is None:
        # TH-independent residency alone exceeds the budget; fall back to the
        # smallest aligned tile and let the raised scoped limit absorb it.
        # TODO(synk): for very large feature maps, split x into per-window
        # blocks (or manual DMA from pl.ANY) instead of whole-image residency.
        for th in range(1, H + 1):
            if _tile_ok(th, H, W):
                best = th
                break
    return best


# ------------------------------- public wrappers -------------------------------

def sppf_pallas_nhwc(x_nhwc, w1, b1, w2, b2, *, compute_dtype=jnp.float32,
                     tile_h=None):
    """SPPF forward on NHWC input (no layout transposes).

    x_nhwc: (N, H, W, C1).  w1: (C1, Cm)  b1: (1, Cm)  w2: (4*Cm, C2)  b2: (1, C2)
    (w*/b* are the BN-folded 1x1 conv parameters).  Returns (N, H, W, C2) f32.

    compute_dtype: jnp.bfloat16 recommended on v6e/v7x (halves VMEM/HBM traffic,
    feeds the bf16 MXU; f32 accumulation is kept).  Keep f32 on v5e, whose
    VPU/EUP have no native bf16 for the pooling / sigmoid path.
    """
    N, H, W, C1 = x_nhwc.shape
    Cm = w1.shape[1]
    C2 = w2.shape[1]
    assert w1.shape[0] == C1 and w2.shape[0] == 4 * Cm
    assert b1.shape == (1, Cm) and b2.shape == (1, C2)

    C1p = _round_up(C1, 128)
    Cmp = _round_up(Cm, 128)
    C2p = _round_up(C2, 128)
    cdt = jnp.dtype(compute_dtype)
    H_pad = H + 2 * HALO

    budget = _vmem_budget_bytes()
    TH = tile_h if tile_h is not None else _choose_tile_h(
        H, W, H_pad, C1p, Cmp, C2p, cdt.itemsize, budget)
    assert H % TH == 0, f"tile_h={TH} must divide H={H}"
    NT = H // TH
    assert NT == 1 or (TH * W) % 8 == 0, (
        f"tile_h={TH}: TH*W={TH * W} must be a multiple of 8 when H is tiled "
        f"(out BlockSpec sublane alignment); pick another tile_h")
    EXT = TH + 2 * HALO
    R = EXT * W

    # Lane-pad channels, halo-pad rows, flatten spatial.  (Single XLA copy.)
    xp = x_nhwc
    if C1p != C1:
        xp = jnp.pad(xp, ((0, 0), (0, 0), (0, 0), (0, C1p - C1)))
    xp = jnp.pad(xp, ((0, 0), (HALO, HALO), (0, 0), (0, 0)))
    xp = xp.reshape(N, H_pad * W, C1p).astype(cdt)

    w1p = jnp.zeros((C1p, Cmp), cdt).at[:C1, :Cm].set(w1.astype(cdt))
    b1p = jnp.zeros((1, Cmp), jnp.float32).at[:, :Cm].set(b1.astype(jnp.float32))
    w2p = jnp.zeros((4, Cmp, C2p), cdt).at[:, :Cm, :C2].set(
        w2.astype(cdt).reshape(4, Cm, C2))
    b2p = jnp.zeros((1, C2p), jnp.float32).at[:, :C2].set(b2.astype(jnp.float32))

    hh = (jnp.arange(R, dtype=jnp.int32) // W)[:, None]      # (R, 1)

    # Advisory cost estimate so XLA overlaps the wrapper pads/reshapes with us.
    cost = pl.CostEstimate(
        flops=int(2 * N * H * W * (C1p * Cmp + 4 * Cmp * C2p)),
        transcendentals=int(N * H * W * (Cmp + C2p)),
        bytes_accessed=int(N * H_pad * W * C1p * cdt.itemsize
                           + (C1p * Cmp + 4 * Cmp * C2p) * cdt.itemsize
                           + N * H * W * C2p * 4),
    )

    kern = functools.partial(_sppf_kernel, H=H, W=W, TH=TH, EXT=EXT, HALO=HALO,
                             compute_dtype=cdt)
    out = pl.pallas_call(
        kern,
        out_shape=jax.ShapeDtypeStruct((N, H * W, C2p), jnp.float32),
        grid_spec=pltpu.PrefetchScalarGridSpec(
            num_scalar_prefetch=0,
            # Leading batch axis first: on v7x megacore the two TensorCores get
            # different images, so the resident x block is not duplicated.
            grid=(N, NT),
            in_specs=[
                pl.BlockSpec((R, 1), lambda n, t: (0, 0)),                 # hh
                pl.BlockSpec((1, H_pad * W, C1p), lambda n, t: (n, 0, 0)),  # x
                pl.BlockSpec((C1p, Cmp), lambda n, t: (0, 0)),             # w1
                pl.BlockSpec((1, Cmp), lambda n, t: (0, 0)),               # b1
                pl.BlockSpec((4, Cmp, C2p), lambda n, t: (0, 0, 0)),       # w2
                pl.BlockSpec((1, C2p), lambda n, t: (0, 0)),               # b2
            ],
            out_specs=pl.BlockSpec((1, TH * W, C2p), lambda n, t: (n, t, 0)),
        ),
        compiler_params=pltpu.CompilerParams(
            dimension_semantics=("parallel", "parallel"),
            vmem_limit_bytes=int(budget)),
        cost_estimate=cost,
    )(hh, xp, w1p, b1p, w2p, b2p)

    out = out.reshape(N, H, W, C2p)
    if C2p != C2:
        out = out[..., :C2]
    return out


def sppf_pallas(x_nchw, w1, b1, w2, b2, **kwargs):
    """Drop-in NCHW interface matching the PyTorch module.

    Prefer sppf_pallas_nhwc in NHWC pipelines: the two transposes here are two
    extra full HBM passes (they matter most on v5e's ~820 GB/s).
    """
    x_nhwc = jnp.transpose(x_nchw, (0, 2, 3, 1))
    out = sppf_pallas_nhwc(x_nhwc, w1, b1, w2, b2, **kwargs)
    return jnp.transpose(out, (0, 3, 1, 2))


# ----------------------------- parameters / reference -------------------------

def fold_bn(conv_w_oi, gamma, beta, mean, var, eps=1e-5):
    """Fold BatchNorm into a 1x1 conv.  conv_w_oi: (C_out, C_in).
    Returns (w (C_in, C_out), bias (1, C_out))."""
    scale = gamma / jnp.sqrt(var + eps)
    w = (conv_w_oi * scale[:, None]).T
    b = (beta - mean * scale)[None, :]
    return w.astype(jnp.float32), b.astype(jnp.float32)


def make_params(key, c1, c2):
    cm = c1 // 2
    ks = jax.random.split(key, 10)
    conv1_w = 0.2 * jax.random.normal(ks[0], (cm, c1), jnp.float32)
    g1 = 1.0 + 0.1 * jax.random.normal(ks[1], (cm,), jnp.float32)
    be1 = 0.1 * jax.random.normal(ks[2], (cm,), jnp.float32)
    m1 = 0.1 * jax.random.normal(ks[3], (cm,), jnp.float32)
    v1 = 0.5 + jnp.abs(jax.random.normal(ks[4], (cm,), jnp.float32))
    conv2_w = 0.2 * jax.random.normal(ks[5], (c2, 4 * cm), jnp.float32)
    g2 = 1.0 + 0.1 * jax.random.normal(ks[6], (c2,), jnp.float32)
    be2 = 0.1 * jax.random.normal(ks[7], (c2,), jnp.float32)
    m2 = 0.1 * jax.random.normal(ks[8], (c2,), jnp.float32)
    v2 = 0.5 + jnp.abs(jax.random.normal(ks[9], (c2,), jnp.float32))
    w1, b1 = fold_bn(conv1_w, g1, be1, m1, v1)
    w2, b2 = fold_bn(conv2_w, g2, be2, m2, v2)
    return w1, b1, w2, b2


def sppf_ref(x_nchw, w1, b1, w2, b2):
    """Pure-JAX reference (same BN-folded parameterization)."""
    x = jnp.transpose(x_nchw, (0, 2, 3, 1))                  # NHWC
    t = jnp.einsum("nhwc,cd->nhwd", x, w1) + b1[0]
    t = t * jax.nn.sigmoid(t)

    def pool(a):
        return lax.reduce_window(
            a, -jnp.inf, lax.max,
            window_dimensions=(1, 5, 5, 1), window_strides=(1, 1, 1, 1),
            padding=((0, 0), (2, 2), (2, 2), (0, 0)))

    y1 = pool(t); y2 = pool(y1); y3 = pool(y2)
    cat = jnp.concatenate([t, y1, y2, y3], axis=-1)
    z = jnp.einsum("nhwc,cd->nhwd", cat, w2) + b2[0]
    z = z * jax.nn.sigmoid(z)
    return jnp.transpose(z, (0, 3, 1, 2))


if __name__ == "__main__":
    N, C1, H, W = 2, 4, 16, 16
    C2 = 8

    key = jax.random.PRNGKey(0)
    kx, kp = jax.random.split(key)
    x = jax.random.normal(kx, (N, C1, H, W), jnp.float32)
    w1, b1, w2, b2 = make_params(kp, C1, C2)

    ref = sppf_ref(x, w1, b1, w2, b2)

    # Default (auto) tiling, f32 compute.
    out = jax.block_until_ready(sppf_pallas(x, w1, b1, w2, b2))
    assert out.shape == (N, C2, H, W), out.shape
    assert jnp.allclose(out, ref, atol=1e-4, rtol=1e-4), float(
        jnp.max(jnp.abs(out - ref)))

    # Forced multi-tile path (4 row tiles) - exercises the halo logic.
    out_t = jax.block_until_ready(sppf_pallas(x, w1, b1, w2, b2, tile_h=4))
    assert jnp.allclose(out_t, ref, atol=1e-4, rtol=1e-4), float(
        jnp.max(jnp.abs(out_t - ref)))

    # bf16 activations / matmul inputs (f32 accumulation), 2 row tiles.
    out_bf = jax.block_until_ready(
        sppf_pallas(x, w1, b1, w2, b2, compute_dtype=jnp.bfloat16, tile_h=8))
    assert jnp.allclose(out_bf, ref, atol=1e-1, rtol=1e-1), float(
        jnp.max(jnp.abs(out_bf - ref)))

    print("KERNEL_OK")
</pallas_src>

<mosaic_0001>
module attributes {stable_mosaic.version = 11 : i64} {
  func.func @_sppf_kernel(%arg0: i32, %arg1: i32, %arg2: memref<448x1xi32, #tpu.memory_space<vmem>>, %arg3: memref<1x448x128xf32, #tpu.memory_space<vmem>>, %arg4: memref<128x128xf32, #tpu.memory_space<vmem>>, %arg5: memref<1x128xf32, #tpu.memory_space<vmem>>, %arg6: memref<4x128x128xf32, #tpu.memory_space<vmem>>, %arg7: memref<1x128xf32, #tpu.memory_space<vmem>>, %arg8: memref<1x256x128xf32, #tpu.memory_space<vmem>>) attributes {dimension_semantics = [#tpu.dimension_semantics<parallel>, #tpu.dimension_semantics<parallel>], iteration_bounds = array<i64: 2, 1>, scalar_prefetch = 0 : i64, scratch_operands = 0 : i64, tpu.core_type = #tpu.core_type<tc>, window_params = [{pipeline_mode = #tpu.pipeline_mode<synchronous>, transform_indices = @transform_0, window_bounds = array<i64: 448, 1>}, {transform_indices = @transform_1, window_bounds = array<i64: 1, 448, 128>}, {pipeline_mode = #tpu.pipeline_mode<synchronous>, transform_indices = @transform_2, window_bounds = array<i64: 128, 128>}, {pipeline_mode = #tpu.pipeline_mode<synchronous>, transform_indices = @transform_3, window_bounds = array<i64: 1, 128>}, {pipeline_mode = #tpu.pipeline_mode<synchronous>, transform_indices = @transform_4, window_bounds = array<i64: 4, 128, 128>}, {pipeline_mode = #tpu.pipeline_mode<synchronous>, transform_indices = @transform_5, window_bounds = array<i64: 1, 128>}, {transform_indices = @transform_6, window_bounds = array<i64: 1, 256, 128>}]} {
    %c16_i32 = arith.constant 16 : i32
    %0 = arith.muli %arg1, %c16_i32 : i32
    %c16_i32_0 = arith.constant 16 : i32
    %1 = arith.muli %0, %c16_i32_0 : i32
    %2 = tpu.assume_multiple %1, 8 : i32
    %c0 = arith.constant 0 : index
    %3 = arith.index_cast %2 : i32 to index
    %c0_1 = arith.constant 0 : index
    %4 = vector.load %arg3[%c0, %3, %c0_1] : memref<1x448x128xf32, #tpu.memory_space<vmem>>, vector<1x448x128xf32>
    %5 = vector.shape_cast %4 : vector<1x448x128xf32> to vector<448x128xf32>
    %c0_2 = arith.constant 0 : index
    %c0_3 = arith.constant 0 : index
    %6 = vector.load %arg4[%c0_2, %c0_3] : memref<128x128xf32, #tpu.memory_space<vmem>>, vector<128x128xf32>
    %cst = arith.constant dense<0.000000e+00> : vector<448x128xf32>
    %7 = tpu.matmul %5, %6, %cst {dimension_numbers = #tpu.dot_dimension_numbers<[1], [0], [0], [1], [0, 0, 1, 1], [], []>} : vector<448x128xf32>, vector<128x128xf32>, vector<448x128xf32> -> vector<448x128xf32>
    %c0_4 = arith.constant 0 : index
    %c0_5 = arith.constant 0 : index
    %8 = vector.load %arg5[%c0_4, %c0_5] : memref<1x128xf32, #tpu.memory_space<vmem>>, vector<1x128xf32>
    %9 = vector.broadcast %8 : vector<1x128xf32> to vector<448x128xf32>
    %10 = arith.addf %7, %9 : vector<448x128xf32>
    %11 = arith.negf %10 : vector<448x128xf32>
    %12 = math.exp %11 : vector<448x128xf32>
    %cst_6 = arith.constant 1.000000e+00 : f32
    %13 = vector.broadcast %cst_6 : f32 to vector<448x128xf32>
    %14 = arith.addf %13, %12 : vector<448x128xf32>
    %15 = arith.divf %13, %14 : vector<448x128xf32>
    %16 = arith.mulf %10, %15 : vector<448x128xf32>
    %c0_7 = arith.constant 0 : index
    %c0_8 = arith.constant 0 : index
    %17 = vector.load %arg2[%c0_7, %c0_8] : memref<448x1xi32, #tpu.memory_space<vmem>>, vector<448x1xi32>
    %18 = vector.broadcast %0 : i32 to vector<448x1xi32>
    %19 = arith.addi %17, %18 : vector<448x1xi32>
    %c6_i32 = arith.constant 6 : i32
    %20 = vector.broadcast %c6_i32 : i32 to vector<448x1xi32>
    %21 = arith.cmpi sge, %19, %20 : vector<448x1xi32>
    %c22_i32 = arith.constant 22 : i32
    %22 = vector.broadcast %c22_i32 : i32 to vector<448x1xi32>
    %23 = arith.cmpi slt, %19, %22 : vector<448x1xi32>
    %24 = arith.andi %21, %23 : vector<448x1xi1>
    %cst_9 = arith.constant 0xFF800000 : f32
    %25 = vector.shape_cast %24 : vector<448x1xi1> to vector<448x1xi1>
    %26 = vector.broadcast %25 : vector<448x1xi1> to vector<448x128xi1>
    %27 = vector.broadcast %cst_9 : f32 to vector<448x128xf32>
    %28 = arith.select %26, %16, %27 : vector<448x128xi1>, vector<448x128xf32>
    %c2_i32 = arith.constant 2 : i32
    %29 = tpu.dynamic_rotate %17 by %c2_i32 dim 0 : vector<448x1xi32>, i32 -> vector<448x1xi32>
    %30 = arith.cmpi eq, %29, %17 : vector<448x1xi32>
    %c1_i32 = arith.constant 1 : i32
    %31 = tpu.dynamic_rotate %17 by %c1_i32 dim 0 : vector<448x1xi32>, i32 -> vector<448x1xi32>
    %32 = arith.cmpi eq, %31, %17 : vector<448x1xi32>
    %c447_i32 = arith.constant 447 : i32
    %33 = tpu.dynamic_rotate %17 by %c447_i32 dim 0 : vector<448x1xi32>, i32 -> vector<448x1xi32>
    %34 = arith.cmpi eq, %33, %17 : vector<448x1xi32>
    %c446_i32 = arith.constant 446 : i32
    %35 = tpu.dynamic_rotate %17 by %c446_i32 dim 0 : vector<448x1xi32>, i32 -> vector<448x1xi32>
    %36 = arith.cmpi eq, %35, %17 : vector<448x1xi32>
    %c32_i32 = arith.constant 32 : i32
    %37 = tpu.dynamic_rotate %28 by %c32_i32 dim 0 : vector<448x128xf32>, i32 -> vector<448x128xf32>
    %38 = arith.maximumf %28, %37 : vector<448x128xf32>
    %c16_i32_10 = arith.constant 16 : i32
    %39 = tpu.dynamic_rotate %28 by %c16_i32_10 dim 0 : vector<448x128xf32>, i32 -> vector<448x128xf32>
    %40 = arith.maximumf %38, %39 : vector<448x128xf32>
    %c432_i32 = arith.constant 432 : i32
    %41 = tpu.dynamic_rotate %28 by %c432_i32 dim 0 : vector<448x128xf32>, i32 -> vector<448x128xf32>
    %42 = arith.maximumf %40, %41 : vector<448x128xf32>
    %c416_i32 = arith.constant 416 : i32
    %43 = tpu.dynamic_rotate %28 by %c416_i32 dim 0 : vector<448x128xf32>, i32 -> vector<448x128xf32>
    %44 = arith.maximumf %42, %43 : vector<448x128xf32>
    %c2_i32_11 = arith.constant 2 : i32
    %45 = tpu.dynamic_rotate %44 by %c2_i32_11 dim 0 : vector<448x128xf32>, i32 -> vector<448x128xf32>
    %cst_12 = arith.constant 0xFF800000 : f32
    %46 = vector.shape_cast %30 : vector<448x1xi1> to vector<448x1xi1>
    %47 = vector.broadcast %46 : vector<448x1xi1> to vector<448x128xi1>
    %48 = vector.broadcast %cst_12 : f32 to vector<448x128xf32>
    %49 = arith.select %47, %45, %48 : vector<448x128xi1>, vector<448x128xf32>
    %50 = arith.maximumf %44, %49 : vector<448x128xf32>
    %c1_i32_13 = arith.constant 1 : i32
    %51 = tpu.dynamic_rotate %44 by %c1_i32_13 dim 0 : vector<448x128xf32>, i32 -> vector<448x128xf32>
    %cst_14 = arith.constant 0xFF800000 : f32
    %52 = vector.shape_cast %32 : vector<448x1xi1> to vector<448x1xi1>
    %53 = vector.broadcast %52 : vector<448x1xi1> to vector<448x128xi1>
    %54 = vector.broadcast %cst_14 : f32 to vector<448x128xf32>
    %55 = arith.select %53, %51, %54 : vector<448x128xi1>, vector<448x128xf32>
    %56 = arith.maximumf %50, %55 : vector<448x128xf32>
    %c447_i32_15 = arith.constant 447 : i32
    %57 = tpu.dynamic_rotate %44 by %c447_i32_15 dim 0 : vector<448x128xf32>, i32 -> vector<448x128xf32>
    %cst_16 = arith.constant 0xFF800000 : f32
    %58 = vector.shape_cast %34 : vector<448x1xi1> to vector<448x1xi1>
    %59 = vector.broadcast %58 : vector<448x1xi1> to vector<448x128xi1>
    %60 = vector.broadcast %cst_16 : f32 to vector<448x128xf32>
    %61 = arith.select %59, %57, %60 : vector<448x128xi1>, vector<448x128xf32>
    %62 = arith.maximumf %56, %61 : vector<448x128xf32>
    %c446_i32_17 = arith.constant 446 : i32
    %63 = tpu.dynamic_rotate %44 by %c446_i32_17 dim 0 : vector<448x128xf32>, i32 -> vector<448x128xf32>
    %cst_18 = arith.constant 0xFF800000 : f32
    %64 = vector.shape_cast %36 : vector<448x1xi1> to vector<448x1xi1>
    %65 = vector.broadcast %64 : vector<448x1xi1> to vector<448x128xi1>
    %66 = vector.broadcast %cst_18 : f32 to vector<448x128xf32>
    %67 = arith.select %65, %63, %66 : vector<448x128xi1>, vector<448x128xf32>
    %68 = arith.maximumf %62, %67 : vector<448x128xf32>
    %c32_i32_19 = arith.constant 32 : i32
    %69 = tpu.dynamic_rotate %68 by %c32_i32_19 dim 0 : vector<448x128xf32>, i32 -> vector<448x128xf32>
    %70 = arith.maximumf %68, %69 : vector<448x128xf32>
    %c16_i32_20 = arith.constant 16 : i32
    %71 = tpu.dynamic_rotate %68 by %c16_i32_20 dim 0 : vector<448x128xf32>, i32 -> vector<448x128xf32>
    %72 = arith.maximumf %70, %71 : vector<448x128xf32>
    %c432_i32_21 = arith.constant 432 : i32
    %73 = tpu.dynamic_rotate %68 by %c432_i32_21 dim 0 : vector<448x128xf32>, i32 -> vector<448x128xf32>
    %74 = arith.maximumf %72, %73 : vector<448x128xf32>
    %c416_i32_22 = arith.constant 416 : i32
    %75 = tpu.dynamic_rotate %68 by %c416_i32_22 dim 0 : vector<448x128xf32>, i32 -> vector<448x128xf32>
    %76 = arith.maximumf %74, %75 : vector<448x128xf32>
    %c2_i32_23 = arith.constant 2 : i32
    %77 = tpu.dynamic_rotate %76 by %c2_i32_23 dim 0 : vector<448x128xf32>, i32 -> vector<448x128xf32>
    %cst_24 = arith.constant 0xFF800000 : f32
    %78 = vector.shape_cast %30 : vector<448x1xi1> to vector<448x1xi1>
    %79 = vector.broadcast %78 : vector<448x1xi1> to vector<448x128xi1>
    %80 = vector.broadcast %cst_24 : f32 to vector<448x128xf32>
    %81 = arith.select %79, %77, %80 : vector<448x128xi1>, vector<448x128xf32>
    %82 = arith.maximumf %76, %81 : vector<448x128xf32>
    %c1_i32_25 = arith.constant 1 : i32
    %83 = tpu.dynamic_rotate %76 by %c1_i32_25 dim 0 : vector<448x128xf32>, i32 -> vector<448x128xf32>
    %cst_26 = arith.constant 0xFF800000 : f32
    %84 = vector.shape_cast %32 : vector<448x1xi1> to vector<448x1xi1>
    %85 = vector.broadcast %84 : vector<448x1xi1> to vector<448x128xi1>
    %86 = vector.broadcast %cst_26 : f32 to vector<448x128xf32>
    %87 = arith.select %85, %83, %86 : vector<448x128xi1>, vector<448x128xf32>
    %88 = arith.maximumf %82, %87 : vector<448x128xf32>
    %c447_i32_27 = arith.constant 447 : i32
    %89 = tpu.dynamic_rotate %76 by %c447_i32_27 dim 0 : vector<448x128xf32>, i32 -> vector<448x128xf32>
    %cst_28 = arith.constant 0xFF800000 : f32
    %90 = vector.shape_cast %34 : vector<448x1xi1> to vector<448x1xi1>
    %91 = vector.broadcast %90 : vector<448x1xi1> to vector<448x128xi1>
    %92 = vector.broadcast %cst_28 : f32 to vector<448x128xf32>
    %93 = arith.select %91, %89, %92 : vector<448x128xi1>, vector<448x128xf32>
    %94 = arith.maximumf %88, %93 : vector<448x128xf32>
    %c446_i32_29 = arith.constant 446 : i32
    %95 = tpu.dynamic_rotate %76 by %c446_i32_29 dim 0 : vector<448x128xf32>, i32 -> vector<448x128xf32>
    %cst_30 = arith.constant 0xFF800000 : f32
    %96 = vector.shape_cast %36 : vector<448x1xi1> to vector<448x1xi1>
    %97 = vector.broadcast %96 : vector<448x1xi1> to vector<448x128xi1>
    %98 = vector.broadcast %cst_30 : f32 to vector<448x128xf32>
    %99 = arith.select %97, %95, %98 : vector<448x128xi1>, vector<448x128xf32>
    %100 = arith.maximumf %94, %99 : vector<448x128xf32>
    %c32_i32_31 = arith.constant 32 : i32
    %101 = tpu.dynamic_rotate %100 by %c32_i32_31 dim 0 : vector<448x128xf32>, i32 -> vector<448x128xf32>
    %102 = arith.maximumf %100, %101 : vector<448x128xf32>
    %c16_i32_32 = arith.constant 16 : i32
    %103 = tpu.dynamic_rotate %100 by %c16_i32_32 dim 0 : vector<448x128xf32>, i32 -> vector<448x128xf32>
    %104 = arith.maximumf %102, %103 : vector<448x128xf32>
    %c432_i32_33 = arith.constant 432 : i32
    %105 = tpu.dynamic_rotate %100 by %c432_i32_33 dim 0 : vector<448x128xf32>, i32 -> vector<448x128xf32>
    %106 = arith.maximumf %104, %105 : vector<448x128xf32>
    %c416_i32_34 = arith.constant 416 : i32
    %107 = tpu.dynamic_rotate %100 by %c416_i32_34 dim 0 : vector<448x128xf32>, i32 -> vector<448x128xf32>
    %108 = arith.maximumf %106, %107 : vector<448x128xf32>
    %c2_i32_35 = arith.constant 2 : i32
    %109 = tpu.dynamic_rotate %108 by %c2_i32_35 dim 0 : vector<448x128xf32>, i32 -> vector<448x128xf32>
    %cst_36 = arith.constant 0xFF800000 : f32
    %110 = vector.shape_cast %30 : vector<448x1xi1> to vector<448x1xi1>
    %111 = vector.broadcast %110 : vector<448x1xi1> to vector<448x128xi1>
    %112 = vector.broadcast %cst_36 : f32 to vector<448x128xf32>
    %113 = arith.select %111, %109, %112 : vector<448x128xi1>, vector<448x128xf32>
    %114 = arith.maximumf %108, %113 : vector<448x128xf32>
    %c1_i32_37 = arith.constant 1 : i32
    %115 = tpu.dynamic_rotate %108 by %c1_i32_37 dim 0 : vector<448x128xf32>, i32 -> vector<448x128xf32>
    %cst_38 = arith.constant 0xFF800000 : f32
    %116 = vector.shape_cast %32 : vector<448x1xi1> to vector<448x1xi1>
    %117 = vector.broadcast %116 : vector<448x1xi1> to vector<448x128xi1>
    %118 = vector.broadcast %cst_38 : f32 to vector<448x128xf32>
    %119 = arith.select %117, %115, %118 : vector<448x128xi1>, vector<448x128xf32>
    %120 = arith.maximumf %114, %119 : vector<448x128xf32>
    %c447_i32_39 = arith.constant 447 : i32
    %121 = tpu.dynamic_rotate %108 by %c447_i32_39 dim 0 : vector<448x128xf32>, i32 -> vector<448x128xf32>
    %cst_40 = arith.constant 0xFF800000 : f32
    %122 = vector.shape_cast %34 : vector<448x1xi1> to vector<448x1xi1>
    %123 = vector.broadcast %122 : vector<448x1xi1> to vector<448x128xi1>
    %124 = vector.broadcast %cst_40 : f32 to vector<448x128xf32>
    %125 = arith.select %123, %121, %124 : vector<448x128xi1>, vector<448x128xf32>
    %126 = arith.maximumf %120, %125 : vector<448x128xf32>
    %c446_i32_41 = arith.constant 446 : i32
    %127 = tpu.dynamic_rotate %108 by %c446_i32_41 dim 0 : vector<448x128xf32>, i32 -> vector<448x128xf32>
    %cst_42 = arith.constant 0xFF800000 : f32
    %128 = vector.shape_cast %36 : vector<448x1xi1> to vector<448x1xi1>
    %129 = vector.broadcast %128 : vector<448x1xi1> to vector<448x128xi1>
    %130 = vector.broadcast %cst_42 : f32 to vector<448x128xf32>
    %131 = arith.select %129, %127, %130 : vector<448x128xi1>, vector<448x128xf32>
    %132 = arith.maximumf %126, %131 : vector<448x128xf32>
    %133 = vector.extract_strided_slice %28 {offsets = [96, 0], sizes = [256, 128], strides = [1, 1]} : vector<448x128xf32> to vector<256x128xf32>
    %c0_43 = arith.constant 0 : index
    %c0_44 = arith.constant 0 : index
    %c0_45 = arith.constant 0 : index
    %134 = vector.load %arg6[%c0_43, %c0_44, %c0_45] : memref<4x128x128xf32, #tpu.memory_space<vmem>>, vector<1x128x128xf32>
    %135 = vector.shape_cast %134 : vector<1x128x128xf32> to vector<128x128xf32>
    %cst_46 = arith.constant dense<0.000000e+00> : vector<256x128xf32>
    %136 = tpu.matmul %133, %135, %cst_46 {dimension_numbers = #tpu.dot_dimension_numbers<[1], [0], [0], [1], [0, 0, 1, 1], [], []>} : vector<256x128xf32>, vector<128x128xf32>, vector<256x128xf32> -> vector<256x128xf32>
    %137 = vector.extract_strided_slice %68 {offsets = [96, 0], sizes = [256, 128], strides = [1, 1]} : vector<448x128xf32> to vector<256x128xf32>
    %c1 = arith.constant 1 : index
    %c0_47 = arith.constant 0 : index
    %c0_48 = arith.constant 0 : index
    %138 = vector.load %arg6[%c1, %c0_47, %c0_48] : memref<4x128x128xf32, #tpu.memory_space<vmem>>, vector<1x128x128xf32>
    %139 = vector.shape_cast %138 : vector<1x128x128xf32> to vector<128x128xf32>
    %cst_49 = arith.constant dense<0.000000e+00> : vector<256x128xf32>
    %140 = tpu.matmul %137, %139, %cst_49 {dimension_numbers = #tpu.dot_dimension_numbers<[1], [0], [0], [1], [0, 0, 1, 1], [], []>} : vector<256x128xf32>, vector<128x128xf32>, vector<256x128xf32> -> vector<256x128xf32>
    %141 = arith.addf %136, %140 : vector<256x128xf32>
    %142 = vector.extract_strided_slice %100 {offsets = [96, 0], sizes = [256, 128], strides = [1, 1]} : vector<448x128xf32> to vector<256x128xf32>
    %c2 = arith.constant 2 : index
    %c0_50 = arith.constant 0 : index
    %c0_51 = arith.constant 0 : index
    %143 = vector.load %arg6[%c2, %c0_50, %c0_51] : memref<4x128x128xf32, #tpu.memory_space<vmem>>, vector<1x128x128xf32>
    %144 = vector.shape_cast %143 : vector<1x128x128xf32> to vector<128x128xf32>
    %cst_52 = arith.constant dense<0.000000e+00> : vector<256x128xf32>
    %145 = tpu.matmul %142, %144, %cst_52 {dimension_numbers = #tpu.dot_dimension_numbers<[1], [0], [0], [1], [0, 0, 1, 1], [], []>} : vector<256x128xf32>, vector<128x128xf32>, vector<256x128xf32> -> vector<256x128xf32>
    %146 = arith.addf %141, %145 : vector<256x128xf32>
    %147 = vector.extract_strided_slice %132 {offsets = [96, 0], sizes = [256, 128], strides = [1, 1]} : vector<448x128xf32> to vector<256x128xf32>
    %c3 = arith.constant 3 : index
    %c0_53 = arith.constant 0 : index
    %c0_54 = arith.constant 0 : index
    %148 = vector.load %arg6[%c3, %c0_53, %c0_54] : memref<4x128x128xf32, #tpu.memory_space<vmem>>, vector<1x128x128xf32>
    %149 = vector.shape_cast %148 : vector<1x128x128xf32> to vector<128x128xf32>
    %cst_55 = arith.constant dense<0.000000e+00> : vector<256x128xf32>
    %150 = tpu.matmul %147, %149, %cst_55 {dimension_numbers = #tpu.dot_dimension_numbers<[1], [0], [0], [1], [0, 0, 1, 1], [], []>} : vector<256x128xf32>, vector<128x128xf32>, vector<256x128xf32> -> vector<256x128xf32>
    %151 = arith.addf %146, %150 : vector<256x128xf32>
    %c0_56 = arith.constant 0 : index
    %c0_57 = arith.constant 0 : index
    %152 = vector.load %arg7[%c0_56, %c0_57] : memref<1x128xf32, #tpu.memory_space<vmem>>, vector<1x128xf32>
    %153 = vector.broadcast %152 : vector<1x128xf32> to vector<256x128xf32>
    %154 = arith.addf %151, %153 : vector<256x128xf32>
    %155 = arith.negf %154 : vector<256x128xf32>
    %156 = math.exp %155 : vector<256x128xf32>
    %cst_58 = arith.constant 1.000000e+00 : f32
    %157 = vector.broadcast %cst_58 : f32 to vector<256x128xf32>
    %158 = arith.addf %157, %156 : vector<256x128xf32>
    %159 = arith.divf %157, %158 : vector<256x128xf32>
    %160 = arith.mulf %154, %159 : vector<256x128xf32>
    %c0_59 = arith.constant 0 : index
    %c0_60 = arith.constant 0 : index
    %c0_61 = arith.constant 0 : index
    %161 = vector.load %arg8[%c0_59, %c0_60, %c0_61] : memref<1x256x128xf32, #tpu.memory_space<vmem>>, vector<1x256x128xf32>
    %162 = vector.shape_cast %161 : vector<1x256x128xf32> to vector<256x128xf32>
    %163 = vector.shape_cast %160 : vector<256x128xf32> to vector<1x256x128xf32>
    tpu.vector_store %arg8[%c0_59, %c0_60, %c0_61], %163 {strides = array<i32>} : memref<1x256x128xf32, #tpu.memory_space<vmem>>, vector<1x256x128xf32>,
    return
  }
  func.func @transform_0(%arg0: i32, %arg1: i32) -> (i32, i32) {
    %c0_i32 = arith.constant 0 : i32
    %c0_i32_0 = arith.constant 0 : i32
    %c0_i32_1 = arith.constant 0 : i32
    return %c0_i32, %c0_i32_0 : i32, i32
  }
  func.func @transform_1(%arg0: i32, %arg1: i32) -> (i32, i32, i32) {
    %c0_i32 = arith.constant 0 : i32
    %c0_i32_0 = arith.constant 0 : i32
    %c0_i32_1 = arith.constant 0 : i32
    return %arg0, %c0_i32, %c0_i32_0 : i32, i32, i32
  }
  func.func @transform_2(%arg0: i32, %arg1: i32) -> (i32, i32) {
    %c0_i32 = arith.constant 0 : i32
    %c0_i32_0 = arith.constant 0 : i32
    %c0_i32_1 = arith.constant 0 : i32
    return %c0_i32, %c0_i32_0 : i32, i32
  }
  func.func @transform_3(%arg0: i32, %arg1: i32) -> (i32, i32) {
    %c0_i32 = arith.constant 0 : i32
    %c0_i32_0 = arith.constant 0 : i32
    %c0_i32_1 = arith.constant 0 : i32
    return %c0_i32, %c0_i32_0 : i32, i32
  }
  func.func @transform_4(%arg0: i32, %arg1: i32) -> (i32, i32, i32) {
    %c0_i32 = arith.constant 0 : i32
    %c0_i32_0 = arith.constant 0 : i32
    %c0_i32_1 = arith.constant 0 : i32
    %c0_i32_2 = arith.constant 0 : i32
    return %c0_i32, %c0_i32_0, %c0_i32_1 : i32, i32, i32
  }
  func.func @transform_5(%arg0: i32, %arg1: i32) -> (i32, i32) {
    %c0_i32 = arith.constant 0 : i32
    %c0_i32_0 = arith.constant 0 : i32
    %c0_i32_1 = arith.constant 0 : i32
    return %c0_i32, %c0_i32_0 : i32, i32
  }
  func.func @transform_6(%arg0: i32, %arg1: i32) -> (i32, i32, i32) {
    %c0_i32 = arith.constant 0 : i32
    %c0_i32_0 = arith.constant 0 : i32
    return %arg0, %arg1, %c0_i32 : i32, i32, i32
  }
}

</mosaic_0001>

<bundles_post_ra>
// kernel: tpu_custom_call.1
= control target key start
LH: loop header
LB: loop body
LE: loop exit
PB: predicated region body
PF: predicated region fallthrough
CT: control target
= control target key end

     0   :  { %11 = vsyncpa [#allocation3], 0  ;;  %s18348_s0 = inlined_call_operand.vmem [shape: s32[448,1], index: 0, kind: input, shape index: {}]   ;;  %s18349_s1 = inlined_call_operand.hbm [shape: f32[2,448,128], index: 1, kind: input, shape index: {}]   ;;  %s18350_s2 = inlined_call_operand.vmem [shape: f32[128,128], index: 2, kind: input, shape index: {}]   ;;  %s18351_s3 = inlined_call_operand.vmem [shape: f32[1,128], index: 3, kind: input, shape index: {}]   ;;  %s18352_s4 = inlined_call_operand.hbm [shape: f32[4,128,128], index: 4, kind: input, shape index: {}]   ;;  %s18353_s5 = inlined_call_operand.vmem [shape: f32[1,128], index: 5, kind: input, shape index: {}]   ;;  %s18354_s6 = inlined_call_operand.hbm [shape: f32[2,256,128], index: 6, kind: output, shape index: {}]  }
   0x1   :  { %13 = vsyncpa [#allocation3 + $0x1], 0 }
   0x2   :  { %14 = vsyncpa [#allocation6], 0 }
   0x3   :  { %15 = vsyncpa [#allocation4], 0 }
   0x4   :  { %17 = vsyncpa [#allocation4 + $0x1], 0  ;;  %s9193_s21 = smov 0   ;;  %s9195_s22 = smov 0  }
   0x5   :  { %s9197_s23 = smov 0   ;;  %s9199_s24 = smov 0  }
   0x6   :  { %s9201_s25 = smov 0   ;;  %s9203_s26 = smov 0  }
   0x7 LB: > { %s7404_s27 = sadd.s32 4294967295, %s9148_s26   ;;  %s7405_s28 = sadd.s32 4294967294, %s9148_s26   ;;  %s9148_s26 = sphi %s9203_s26, %s23_s26   ;;  %s9144_s25 = sphi %s9201_s25, %s20707_s25   ;;  %s9140_s24 = sphi %s9199_s24, %s20706_s24   ;;  %s9136_s23 = sphi %s9197_s23, %s20705_s23   ;;  %s9132_s22 = sphi %s9195_s22, %s20704_s22   ;;  %s9128_s21 = sphi %s9193_s21, %s20703_s21  }
   0x8   : > { %p76_p0 = scmp.ne.s32.totalorder %s9132_s22, %s9128_s21  ;;  %p9227_p1 = scmp.eq.s32.totalorder %s7404_s27, 0 }
   0x9   : > { %p9231_p2 = scmp.eq.s32.totalorder %s7404_s27, 1  ;;  %p192_p3 = scmp.eq.s32.totalorder %s7405_s28, 1 }
   0xa   : > { %s19137_s29 = scalar_select %p9227_p1, 1, 0 }
   0xb   : > { %s19138_s30 = scalar_select %p9231_p2, 1, 0 }
   0xc   : > { %p9237_p4 = por %p9227_p1, %p76_p0  ;;  %p7406_p5 = scmp.ge.s32.totalorder %s9148_s26, 1 }
   0xd   : > { %p9242_p6 = por %p192_p3, %p76_p0  ;;  %p199_p7 = scmp.lt.s32.totalorder %s9148_s26, 3 }
   0xe   : > { %s19139_s7 = scalar_select %p9237_p4, 1, 0 }
   0xf   : > { %s19140_s8 = scalar_select %p9242_p6, 1, 0 }
  0x10   : > { %p9247_p8 = pnand %p7406_p5, %p199_p7  ;;  %s9150_s10 = smov [#allocation5]  }
  0x11   : > { %s220_s11 = sshll.u32 %s9150_s10, 4  ;;  %s35_s13 = sadd.s32 1, %s9144_s25  ;;  %s221_s11 = int_to_ptr.vmem [resolvable:$true] %s220_s11 }
  0x12   : > { %s19141_s9 = scalar_select %p9247_p8, 1, 0 }
  0x13   : > { %p8492_p9 = pneg %p9247_p8  ;;  %s9004_s16 = scalar_lea.hbm %s18352_s4, 8192 }
  0x14   : > { %p9005_p12 = scmp.ne.s32.totalorder %s18352_s4, %s9004_s16  ;;  %p9011_p5 = scmp.lt.u32.totalorder %s9004_s16, %s18352_s4 }
  0x15   : > { %p9256_p11 = pnand %p8492_p9, %p9227_p1 }
  0x17   : > { %p9006_p13 = pneg %p9256_p11 }
  0x19   : > { %p9007_p0 = pnand %p9006_p13, %p9005_p12 }
  0x1b   : > { %p9008_p3 = pneg %p9007_p0 }
  0x1d   : > { %p9013_p7 = pnand %p9011_p5, %p9008_p3 }
  0x1f   : > { %9016 = shalt.err (!%p9013_p7)
}
  0x20   : > { %s9017_s27 = scalar_lea.vmem %s221_s11, 8192  ;;  %p9025_p1 = scmp.lt.s32.totalorder %s221_s11, %s221_s11 }
  0x21   : > { %p9018_p9 = scmp.ne.s32.totalorder %s221_s11, %s9017_s27  ;;  %p9026_p4 = scmp.lt.s32.totalorder %s9017_s27, %s9017_s27 }
  0x23   : > { %p9020_p10 = pnand %p9018_p9, %p9006_p13  ;;  %p9027_p8 = por %p9026_p4, %p9025_p1 }
  0x25   : > { %p9021_p6 = pneg %p9020_p10 }
  0x27   : > { %p9028_p2 = pnand %p9027_p8, %p9021_p6 }
  0x29   : > { %9031 = shalt.err (!%p9028_p2)
}
  0x2a   : > { %s18359_s28 = smov 128   ;;  %s18360_s10 = smov 8  }
  0x2b   : > { %8495 = dma.hbm_to_vmem [thread:$0]  (!%p9256_p11), %s18352_s4, 8192, %s221_s11, [#allocation6], %s18359_s28, %s18359_s28, %s18360_s10  }
  0x2c   : > { %p37_p1 = scmp.ge.s32.totalorder %s35_s13, 2  ;;  %s63_s16 = sadd.s32 1, %s9136_s23 }
  0x2d   : > { %p70_p2 = scmp.ne.s32.totalorder %s9136_s23, %s9132_s22  ;;  %p71_p4 = scmp.eq.s32.totalorder %s9148_s26, 0 }
  0x2e   : > { %s20709_s13 = smov (%p37_p1, %s35_s13), 0  ;;  %p19143_p8 = scmp.ne.s32.totalorder %s19138_s30, 0 }
  0x2f   : > { %p72_p6 = por %p71_p4, %p70_p2  ;;  %s60_s12 = ssub.s32 %s9144_s25, %s20709_s13 }
  0x30   : > { %p9288_p10 = por %p19143_p8, %p70_p2  ;;  %p8505_p12 = scmp.lt.s32.totalorder %s9148_s26, 2 }
  0x31   : > { %p61_p13 = scmp.eq.s32.totalorder %s60_s12, 0  ;;  %s237_s18 = sand.u32 1, %s9136_s23  }
  0x32   : > { %s8481_s19 = smul.u32 448, %s237_s18  ;;  %p9300_p11 = pnand %p8505_p12, %p72_p6 }
  0x33   : > { %s9297_s20 = scalar_select %p61_p13, %s9136_s23, %s63_s16  }
  0x34   : > { %s8482_s11 = smul.u32 7168, %s9144_s25  ;;  %s241_s27 = scalar_lea.vmem [#allocation2], %s8481_s19 }
  0x35   : > { %s248_s14 = sshll.u32 %s241_s27, 4  ;;  %s9311_s16 = scalar_lea.sflag [#allocation3], %s237_s18  ;;  %s9309_s14 = int_to_ptr.vmem [resolvable:$true] %s248_s14 }
  0x36   : > { %s9307_s10 = scalar_lea.hbm %s18349_s1, %s8482_s11  ;;  %p9034_p3 = pneg %p9300_p11 }
  0x37   : > { %s9032_s12 = scalar_lea.hbm %s9307_s10, 7168  ;;  %s9037_s11 = scalar_lea.hbm %s18349_s1, 14336 }
  0x38   : > { %p9033_p0 = scmp.ne.s32.totalorder %s9307_s10, %s9032_s12  ;;  %p9038_p9 = scmp.lt.u32.totalorder %s9307_s10, %s18349_s1 }
  0x39   : > { %p9039_p1 = scmp.lt.u32.totalorder %s9037_s11, %s9032_s12  ;;  %p9041_p4 = scmp.lt.u32.totalorder %s9032_s12, %s9307_s10 }
  0x3a   : > { %p9035_p5 = pnand %p9034_p3, %p9033_p0 }
  0x3b   : > { %p9040_p2 = por %p9039_p1, %p9038_p9 }
  0x3c   : > { %p9036_p7 = pneg %p9035_p5 }
  0x3d   : > { %p9042_p6 = por %p9041_p4, %p9040_p2 }
  0x3f   : > { %p9043_p8 = pnand %p9042_p6, %p9036_p7 }
  0x41   : > { %9046 = shalt.err (!%p9043_p8)
}
  0x42   : > { %s9047_s18 = scalar_lea.vmem %s9309_s14, 7168  ;;  %s9153_s28 = smov [#allocation2]  }
  0x43   : > { %p9048_p12 = scmp.ne.s32.totalorder %s9309_s14, %s9047_s18  ;;  %s9052_s19 = sshll.u32 %s9153_s28, 4  ;;  %s9053_s19 = int_to_ptr.vmem [resolvable:$false] %s9052_s19 }
  0x44   : > { %s9054_s27 = scalar_lea.vmem %s9053_s19, 14336  ;;  %p9055_p5 = scmp.lt.s32.totalorder %s9309_s14, %s9053_s19 }
  0x45   : > { %p9050_p13 = pnand %p9048_p12, %p9034_p3  ;;  %p9056_p9 = scmp.lt.s32.totalorder %s9054_s27, %s9047_s18 }
  0x47   : > { %p9051_p0 = pneg %p9050_p13  ;;  %p9057_p1 = por %p9056_p9, %p9055_p5 }
  0x49   : > { %p9058_p2 = pnand %p9057_p1, %p9051_p0 }
  0x4b   : > { %9061 = shalt.err (!%p9058_p2)
}
  0x4c   : > { %s19146_s12 = smov 8   ;;  %s19147_s11 = smov 128  }
  0x4d   : > { %8499 = dma.hbm_to_vmem [thread:$0]  (!%p9300_p11), %s9307_s10, 7168, %s9309_s14, %s9311_s16, %s19147_s11, %s19147_s11, %s19146_s12  }
  0x4e   : > { %p19148_p3 = scmp.ne.s32.totalorder %s19141_s9, 0 }
  0x50   : > { %260 = sbr.rel (%p19148_p3) target bundleno = 1642 (0x66a), region = 44 }
  0x57   : > { %s9345_s30 = sand.u32 1, %s9132_s22   ;;  %p19149_p7 = scmp.ne.s32.totalorder %s19139_s7, 0 }
  0x58   : > { %s8483_s18 = smul.u32 448, %s9345_s30  ;;  %s263_s28 = scalar_lea.sflag [#allocation3], %s9345_s30 }
  0x5a   : > { %s9349_s19 = scalar_lea.vmem [#allocation2], %s8483_s18 }
  0x5b   : > { %9115 = dma.done.wait (%p19149_p7), %s263_s28, 7168  }
  0x5c   : > { %9117 = vsyncadd (%p19149_p7), %s263_s28, 4294960128  ;;  %p19150_p11 = scmp.ne.s32.totalorder %s19137_s29, 0 }
  0x5e   : > { %9119 = dma.done.wait (%p19150_p11), [#allocation6], 8192  }
  0x5f   : > { %9121 = vsyncadd (%p19150_p11), [#allocation6], 4294959104  ;;  %v18361_v0 = vmov 0   ;;  %v359_v1 = vld [vmem:[%s18350_s2] sm:$0xff]  ;;  %v360_v2 = vld [vmem:[%s18350_s2 + $0x8] sm:$0xff]  ;;  %s7412_s18 = sshll.u32 %s9345_s30, 8 }
  0x60   : > { %8563 = vset.pattern.permute.xlu1 %v18361_v0  ;;  %8562 = vset.pattern.permute.xlu0 %v18361_v0  ;;  %v9370_v3 = vld [vmem:[%s18348_s0 + $0x10] sm:$0xff]  ;;  %v8209_v4 = vpack.c.bf16 %v360_v2, %v359_v1  ;;  %v1119_v5 = vld [vmem:[%s18348_s0] sm:$0xff]  ;;  %v362_v7 = vld [vmem:[%s18350_s2 + $0x18] sm:$0xff]  ;;  %s18170_s28 = scalar_lea.vmem [#allocation7], %s7412_s18  ;;  %s7293_s7 = scalar_lea.sflag [#allocation4], %s9345_s30 }
  0x61   : > { %vm1234_vm0 = vcmp.ge.s32.totalorder %v9370_v3, 6  ;;  %vm1290_vm1 = vcmp.lt.s32.totalorder %v9370_v3, 22  ;;  %v361_v6 = vld [vmem:[%s18350_s2 + $0x10] sm:$0xff]  ;;  %vm1232_vm3 = vcmp.ge.s32.totalorder %v1119_v5, 6  ;;  %vm1288_vm4 = vcmp.lt.s32.totalorder %v1119_v5, 22  ;;  %v9386_v9 = vld [vmem:[%s18348_s0 + $0x18] sm:$0xff] }
  0x62   : > { %vm1346_vm2 = vmand %vm1234_vm0, %vm1290_vm1  ;;  %v8213_v8 = vpack.c.bf16 %v362_v7, %v361_v6  ;;  %v9391_v10 = vld [vmem:[%s18348_s0 + $0x8] sm:$0xff]  ;;  %8210 = vmatprep.subr.bf16.mxu0 %v8209_v4  ;;  %vm1235_vm6 = vcmp.ge.s32.totalorder %v9386_v9, 6  ;;  %vm1291_vm7 = vcmp.lt.s32.totalorder %v9386_v9, 22  ;;  %v363_v12 = vld [vmem:[%s18350_s2 + $0x20] sm:$0xff]  ;;  %s7308_s9 = sshll.u32 %s18170_s28, 4  ;;  %s18297_s9 = int_to_ptr.vmem [resolvable:$true] %s7308_s9 }
  0x63   : > { %v1402_v11 = vsel %vm1346_vm2, 1, %v18361_v0  ;;  %vm1344_vm5 = vmand %vm1232_vm3, %vm1288_vm4  ;;  %vm1233_vm8 = vcmp.ge.s32.totalorder %v9391_v10, 6  ;;  %v364_v13 = vld [vmem:[%s18350_s2 + $0x28] sm:$0xff]  ;;  %8212 = vmatpush3.bf16.msra.mxu0 %v8209_v4  ;;  %vm1289_vm10 = vcmp.lt.s32.totalorder %v9391_v10, 22  ;;  %v9413_v17 = vld [vmem:[%s18348_s0 + $0x20] sm:$0xff]  ;;  %s9062_s16 = scalar_lea.vmem %s18297_s9, 4096 }
  0x64   : > { %1463 = vperm.xlu1 %8563, %v1402_v11   ;;  %v1400_v14 = vsel %vm1344_vm5, 1, %v18361_v0  ;;  %vm1347_vm9 = vmand %vm1235_vm6, %vm1291_vm7  ;;  %v8217_v15 = vpack.c.bf16 %v364_v13, %v363_v12  ;;  %v9408_v16 = vld [vmem:[%s18348_s0 + $0x28] sm:$0xff]  ;;  %8214 = vmatprep.subr.bf16.mxu0 %v8213_v8  ;;  %vm1236_vm14 = vcmp.ge.s32.totalorder %v9413_v17, 6  ;;  %v365_v19 = vld [vmem:[%s18350_s2 + $0x30] sm:$0xff]  ;;  %vm1292_vm0 = vcmp.lt.s32.totalorder %v9413_v17, 22  ;;  %p9063_p4 = scmp.ne.s32.totalorder %s18297_s9, %s9062_s16 }
  0x65   : > { %1457 = vperm.xlu0 %8562, %v1400_v14   ;;  %v1403_v18 = vsel %vm1347_vm9, 1, %v18361_v0  ;;  %vm1345_vm11 = vmand %vm1233_vm8, %vm1289_vm10  ;;  %vm1237_vm12 = vcmp.ge.s32.totalorder %v9408_v16, 6  ;;  %vm1293_vm13 = vcmp.lt.s32.totalorder %v9408_v16, 22  ;;  %v366_v20 = vld [vmem:[%s18350_s2 + $0x38] sm:$0xff]  ;;  %v9435_v23 = vld [vmem:[%s18348_s0 + $0x30] sm:$0xff] }
  0x66   : > { %v1401_v21 = vsel %vm1345_vm11, 1, %v18361_v0  ;;  %vm1349_vm15 = vmand %vm1237_vm12, %vm1293_vm13  ;;  %v9430_v22 = vld [vmem:[%s18348_s0 + $0x38] sm:$0xff]  ;;  %vm1238_vm4 = vcmp.ge.s32.totalorder %v9435_v23, 6  ;;  %vm1294_vm5 = vcmp.lt.s32.totalorder %v9435_v23, 22  ;;  %v9444_v24 = vld [vmem:[%s18348_s0 + $0x48] sm:$0xff]  ;;  %v8221_v26 = vpack.c.bf16 %v366_v20, %v365_v19  ;;  %p9064_p6 = pnand %p9063_p4, %p9288_p10 }
  0x67   : > { %vm1348_vm1 = vmand %vm1236_vm14, %vm1292_vm0  ;;  %vm1239_vm2 = vcmp.ge.s32.totalorder %v9430_v22, 6  ;;  %vm1295_vm3 = vcmp.lt.s32.totalorder %v9430_v22, 22  ;;  %8216 = vmatpush3.bf16.msra.mxu0 %v8213_v8  ;;  %v1405_v25 = vsel %vm1349_vm15, 1, %v18361_v0  ;;  %v9450_v27 = vld [vmem:[%s18348_s0 + $0x40] sm:$0xff]  ;;  %v368_v30 = vld [vmem:[%s18350_s2 + $0x48] sm:$0xff]  ;;  %vm1241_vm8 = vcmp.ge.s32.totalorder %v9444_v24, 6 }
  0x68   : > { %1466 = vperm.xlu1 %8563, %v1403_v18   ;;  %8218 = vmatprep.subr.bf16.mxu0 %v8217_v15  ;;  %v1404_v28 = vsel %vm1348_vm1, 1, %v18361_v0  ;;  %vm1351_vm6 = vmand %vm1239_vm2, %vm1295_vm3  ;;  %v367_v29 = vld [vmem:[%s18350_s2 + $0x40] sm:$0xff]  ;;  %vm1297_vm9 = vcmp.lt.s32.totalorder %v9444_v24, 22  ;;  %vm1240_vm10 = vcmp.ge.s32.totalorder %v9450_v27, 6  ;;  %vm1296_vm11 = vcmp.lt.s32.totalorder %v9450_v27, 22  ;;  %v9466_v31 = vld [vmem:[%s18348_s0 + $0x58] sm:$0xff]  ;;  %p9065_p8 = pneg %p9064_p6 }
  0x69   : > { %1460 = vperm.xlu0 %8562, %v1401_v21   ;;  %vm1350_vm7 = vmand %vm1238_vm4, %vm1294_vm5  ;;  %v1407_v32 = vsel %vm1351_vm6, 1, %v18361_v0  ;;  %v8225_v33 = vpack.c.bf16 %v368_v30, %v367_v29  ;;  %v9472_v34 = vld [vmem:[%s18348_s0 + $0x50] sm:$0xff]  ;;  %v370_v37 = vld [vmem:[%s18350_s2 + $0x58] sm:$0xff]  ;;  %vm1243_vm14 = vcmp.ge.s32.totalorder %v9466_v31, 6  ;;  %vm1299_vm15 = vcmp.lt.s32.totalorder %v9466_v31, 22 }
  0x6a   : > { %v1406_v35 = vsel %vm1350_vm7, 1, %v18361_v0  ;;  %vm1353_vm12 = vmand %vm1241_vm8, %vm1297_vm9  ;;  %v369_v36 = vld [vmem:[%s18350_s2 + $0x50] sm:$0xff]  ;;  %v303_v38 = vld [vmem:[%s9349_s19] sm:$0xff]  ;;  %vm1242_vm0 = vcmp.ge.s32.totalorder %v9472_v34, 6  ;;  %vm1298_vm1 = vcmp.lt.s32.totalorder %v9472_v34, 22 }
  0x6b   : > { %8220 = vmatpush3.bf16.msra.mxu0 %v8217_v15  ;;  %vm1352_vm13 = vmand %vm1240_vm10, %vm1296_vm11  ;;  %v9489_v39 = vld [vmem:[%s18348_s0 + $0x68] sm:$0xff]  ;;  %v1409_v40 = vsel %vm1353_vm12, 1, %v18361_v0  ;;  %v8229_v41 = vpack.c.bf16 %v370_v37, %v369_v36  ;;  %v9495_v42 = vld [vmem:[%s18348_s0 + $0x60] sm:$0xff]  ;;  %7805 = vmatprep.mubr.f32.mxu0 %v303_v38 }
  0x6c   : > { %1472 = vperm.xlu1 %8563, %v1405_v25   ;;  %8222 = vmatprep.subr.bf16.mxu0 %v8221_v26  ;;  %v1408_v43 = vsel %vm1352_vm13, 1, %v18361_v0  ;;  %vm1355_vm2 = vmand %vm1243_vm14, %vm1299_vm15  ;;  %v371_v44 = vld [vmem:[%s18350_s2 + $0x60] sm:$0xff]  ;;  %v372_v45 = vld [vmem:[%s18350_s2 + $0x68] sm:$0xff]  ;;  %vm1245_vm4 = vcmp.ge.s32.totalorder %v9489_v39, 6  ;;  %vm1301_vm5 = vcmp.lt.s32.totalorder %v9489_v39, 22  ;;  %vm1244_vm6 = vcmp.ge.s32.totalorder %v9495_v42, 6 }
  0x6d   : > { %1469 = vperm.xlu0 %8562, %v1404_v28   ;;  %vm1354_vm3 = vmand %vm1242_vm0, %vm1298_vm1  ;;  %vm1300_vm7 = vcmp.lt.s32.totalorder %v9495_v42, 22  ;;  %v9511_v46 = vld [vmem:[%s18348_s0 + $0x78] sm:$0xff]  ;;  %v1411_v47 = vsel %vm1355_vm2, 1, %v18361_v0  ;;  %v8233_v48 = vpack.c.bf16 %v372_v45, %v371_v44  ;;  %v9517_v49 = vld [vmem:[%s18348_s0 + $0x70] sm:$0xff] }
  0x6e   : > { %v1410_v50 = vsel %vm1354_vm3, 1, %v18361_v0  ;;  %vm1357_vm8 = vmand %vm1245_vm4, %vm1301_vm5  ;;  %v373_v51 = vld [vmem:[%s18350_s2 + $0x70] sm:$0xff]  ;;  %v374_v52 = vld [vmem:[%s18350_s2 + $0x78] sm:$0xff]  ;;  %vm1247_vm10 = vcmp.ge.s32.totalorder %v9511_v46, 6  ;;  %vm1303_vm11 = vcmp.lt.s32.totalorder %v9511_v46, 22  ;;  %vm1246_vm12 = vcmp.ge.s32.totalorder %v9517_v49, 6 }
  0x6f   : > { %8224 = vmatpush3.bf16.msra.mxu0 %v8221_v26  ;;  %vm1356_vm9 = vmand %vm1244_vm6, %vm1300_vm7  ;;  %vm1302_vm13 = vcmp.lt.s32.totalorder %v9517_v49, 22  ;;  %v9533_v53 = vld [vmem:[%s18348_s0 + $0x88] sm:$0xff]  ;;  %v1413_v54 = vsel %vm1357_vm8, 1, %v18361_v0  ;;  %v8237_v55 = vpack.c.bf16 %v374_v52, %v373_v51  ;;  %v9539_v56 = vld [vmem:[%s18348_s0 + $0x80] sm:$0xff] }
  0x70   : > { %1478 = vperm.xlu1 %8563, %v1407_v32   ;;  %8226 = vmatprep.subr.bf16.mxu0 %v8225_v33  ;;  %v1412_v57 = vsel %vm1356_vm9, 1, %v18361_v0  ;;  %vm1359_vm14 = vmand %vm1247_vm10, %vm1303_vm11  ;;  %vm1249_vm0 = vcmp.ge.s32.totalorder %v9533_v53, 6  ;;  %vm1305_vm1 = vcmp.lt.s32.totalorder %v9533_v53, 22  ;;  %vm1248_vm2 = vcmp.ge.s32.totalorder %v9539_v56, 6  ;;  %v9549_v58 = vld [vmem:[%s18348_s0 + $0x98] sm:$0xff]  ;;  %v9555_v60 = vld [vmem:[%s18348_s0 + $0x90] sm:$0xff] }
  0x71   : > { %1475 = vperm.xlu0 %8562, %v1406_v35   ;;  %vm1358_vm15 = vmand %vm1246_vm12, %vm1302_vm13  ;;  %vm1304_vm3 = vcmp.lt.s32.totalorder %v9539_v56, 22  ;;  %v1415_v59 = vsel %vm1359_vm14, 1, %v18361_v0  ;;  %vm1251_vm6 = vcmp.ge.s32.totalorder %v9549_v58, 6  ;;  %vm1307_vm7 = vcmp.lt.s32.totalorder %v9549_v58, 22  ;;  %v304_v62 = vld [vmem:[%s9349_s19 + $0x8] sm:$0xff]  ;;  %v305_v2 = vld [vmem:[%s9349_s19 + $0x10] sm:$0xff] }
  0x72   : > { %v1414_v61 = vsel %vm1358_vm15, 1, %v18361_v0  ;;  %vm1361_vm4 = vmand %vm1249_vm0, %vm1305_vm1  ;;  %vm1250_vm8 = vcmp.ge.s32.totalorder %v9555_v60, 6  ;;  %vm1306_vm9 = vcmp.lt.s32.totalorder %v9555_v60, 22  ;;  %v9566_v63 = vld [vmem:[%s18348_s0 + $0xa8] sm:$0xff]  ;;  %v9573_v4 = vld [vmem:[%s18348_s0 + $0xa0] sm:$0xff] }
  0x73   : > { %8228 = vmatpush3.bf16.msra.mxu0 %v8225_v33  ;;  %vm1360_vm5 = vmand %vm1248_vm2, %vm1304_vm3  ;;  %v1417_v1 = vsel %vm1361_vm4, 1, %v18361_v0  ;;  %vm1253_vm12 = vcmp.ge.s32.totalorder %v9566_v63, 6  ;;  %vm1309_vm13 = vcmp.lt.s32.totalorder %v9566_v63, 22  ;;  %v306_v6 = vld [vmem:[%s9349_s19 + $0x18] sm:$0xff]  ;;  %vm1252_vm14 = vcmp.ge.s32.totalorder %v9573_v4, 6  ;;  %v307_v11 = vld [vmem:[%s9349_s19 + $0x20] sm:$0xff] }
  0x74   : > { %1484 = vperm.xlu1 %8563, %v1409_v40   ;;  %8230 = vmatprep.subr.bf16.mxu0 %v8229_v41  ;;  %v1416_v5 = vsel %vm1360_vm5, 1, %v18361_v0  ;;  %vm1363_vm10 = vmand %vm1251_vm6, %vm1307_vm7  ;;  %vm1308_vm15 = vcmp.lt.s32.totalorder %v9573_v4, 22  ;;  %v9584_v7 = vld [vmem:[%s18348_s0 + $0xb8] sm:$0xff]  ;;  %v9591_v12 = vld [vmem:[%s18348_s0 + $0xb0] sm:$0xff] }
  0x75   : > { %1481 = vperm.xlu0 %8562, %v1408_v43   ;;  %vm1362_vm11 = vmand %vm1250_vm8, %vm1306_vm9  ;;  %v1419_v8 = vsel %vm1363_vm10, 1, %v18361_v0  ;;  %vm1255_vm2 = vcmp.ge.s32.totalorder %v9584_v7, 6  ;;  %vm1311_vm3 = vcmp.lt.s32.totalorder %v9584_v7, 22  ;;  %v308_v14 = vld [vmem:[%s9349_s19 + $0x28] sm:$0xff]  ;;  %vm1254_vm4 = vcmp.ge.s32.totalorder %v9591_v12, 6  ;;  %v309_v19 = vld [vmem:[%s9349_s19 + $0x30] sm:$0xff] }
  0x76   : > { %v1418_v13 = vsel %vm1362_vm11, 1, %v18361_v0  ;;  %vm1365_vm0 = vmand %vm1253_vm12, %vm1309_vm13  ;;  %vm1310_vm5 = vcmp.lt.s32.totalorder %v9591_v12, 22  ;;  %v9602_v15 = vld [vmem:[%s18348_s0 + $0xc8] sm:$0xff]  ;;  %v9609_v20 = vld [vmem:[%s18348_s0 + $0xc0] sm:$0xff] }
  0x77   : > { %8232 = vmatpush3.bf16.msra.mxu0 %v8229_v41  ;;  %vm1364_vm1 = vmand %vm1252_vm14, %vm1308_vm15  ;;  %v1421_v18 = vsel %vm1365_vm0, 1, %v18361_v0  ;;  %vm1257_vm8 = vcmp.ge.s32.totalorder %v9602_v15, 6  ;;  %vm1313_vm9 = vcmp.lt.s32.totalorder %v9602_v15, 22  ;;  %v310_v25 = vld [vmem:[%s9349_s19 + $0x38] sm:$0xff]  ;;  %vm1256_vm10 = vcmp.ge.s32.totalorder %v9609_v20, 6  ;;  %v311_v29 = vld [vmem:[%s9349_s19 + $0x40] sm:$0xff] }
  0x78   : > { %1490 = vperm.xlu1 %8563, %v1411_v47   ;;  %8234 = vmatprep.subr.bf16.mxu0 %v8233_v48  ;;  %v1420_v21 = vsel %vm1364_vm1, 1, %v18361_v0  ;;  %vm1367_vm6 = vmand %vm1255_vm2, %vm1311_vm3  ;;  %vm1312_vm11 = vcmp.lt.s32.totalorder %v9609_v20, 22  ;;  %v9620_v26 = vld [vmem:[%s18348_s0 + $0xd8] sm:$0xff]  ;;  %v9627_v30 = vld [vmem:[%s18348_s0 + $0xd0] sm:$0xff] }
  0x79   : > { %1487 = vperm.xlu0 %8562, %v1410_v50   ;;  %vm1366_vm7 = vmand %vm1254_vm4, %vm1310_vm5  ;;  %v1423_v28 = vsel %vm1367_vm6, 1, %v18361_v0  ;;  %vm1259_vm14 = vcmp.ge.s32.totalorder %v9620_v26, 6  ;;  %vm1315_vm15 = vcmp.lt.s32.totalorder %v9620_v26, 22  ;;  %v312_v33 = vld [vmem:[%s9349_s19 + $0x48] sm:$0xff]  ;;  %vm1258_vm0 = vcmp.ge.s32.totalorder %v9627_v30, 6  ;;  %v313_v37 = vld [vmem:[%s9349_s19 + $0x50] sm:$0xff] }
  0x7a   : > { %v1422_v32 = vsel %vm1366_vm7, 1, %v18361_v0  ;;  %vm1369_vm12 = vmand %vm1257_vm8, %vm1313_vm9  ;;  %vm1314_vm1 = vcmp.lt.s32.totalorder %v9627_v30, 22  ;;  %v9638_v35 = vld [vmem:[%s18348_s0 + $0xe8] sm:$0xff]  ;;  %v9645_v38 = vld [vmem:[%s18348_s0 + $0xe0] sm:$0xff] }
  0x7b   : > { %8236 = vmatpush3.bf16.msra.mxu0 %v8233_v48  ;;  %vm1368_vm13 = vmand %vm1256_vm10, %vm1312_vm11  ;;  %v1425_v36 = vsel %vm1369_vm12, 1, %v18361_v0  ;;  %vm1261_vm4 = vcmp.ge.s32.totalorder %v9638_v35, 6  ;;  %vm1317_vm5 = vcmp.lt.s32.totalorder %v9638_v35, 22  ;;  %v314_v41 = vld [vmem:[%s9349_s19 + $0x58] sm:$0xff]  ;;  %vm1260_vm6 = vcmp.ge.s32.totalorder %v9645_v38, 6  ;;  %v315_v45 = vld [vmem:[%s9349_s19 + $0x60] sm:$0xff] }
  0x7c   : > { %1496 = vperm.xlu1 %8563, %v1413_v54   ;;  %8238 = vmatprep.subr.bf16.mxu0 %v8237_v55  ;;  %v1424_v40 = vsel %vm1368_vm13, 1, %v18361_v0  ;;  %vm1371_vm2 = vmand %vm1259_vm14, %vm1315_vm15  ;;  %vm1316_vm7 = vcmp.lt.s32.totalorder %v9645_v38, 22  ;;  %v9656_v43 = vld [vmem:[%s18348_s0 + $0xf8] sm:$0xff]  ;;  %v9663_v47 = vld [vmem:[%s18348_s0 + $0xf0] sm:$0xff] }
  0x7d   : > { %1493 = vperm.xlu0 %8562, %v1412_v57   ;;  %vm1370_vm3 = vmand %vm1258_vm0, %vm1314_vm1  ;;  %v1427_v44 = vsel %vm1371_vm2, 1, %v18361_v0  ;;  %vm1263_vm10 = vcmp.ge.s32.totalorder %v9656_v43, 6  ;;  %vm1319_vm11 = vcmp.lt.s32.totalorder %v9656_v43, 22  ;;  %v316_v50 = vld [vmem:[%s9349_s19 + $0x68] sm:$0xff]  ;;  %vm1262_vm12 = vcmp.ge.s32.totalorder %v9663_v47, 6  ;;  %v317_v54 = vld [vmem:[%s9349_s19 + $0x70] sm:$0xff] }
  0x7e   : > { %v1426_v48 = vsel %vm1370_vm3, 1, %v18361_v0  ;;  %vm1373_vm8 = vmand %vm1261_vm4, %vm1317_vm5  ;;  %vm1318_vm13 = vcmp.lt.s32.totalorder %v9663_v47, 22  ;;  %v9674_v51 = vld [vmem:[%s18348_s0 + $0x108] sm:$0xff] }
  0x7f   : > { %8240 = vmatpush3.bf16.msra.mxu0 %v8237_v55  ;;  %vm1372_vm9 = vmand %vm1260_vm6, %vm1316_vm7  ;;  %v1429_v52 = vsel %vm1373_vm8, 1, %v18361_v0  ;;  %v9681_v55 = vld [vmem:[%s18348_s0 + $0x100] sm:$0xff]  ;;  %vm1265_vm0 = vcmp.ge.s32.totalorder %v9674_v51, 6  ;;  %vm1321_vm1 = vcmp.lt.s32.totalorder %v9674_v51, 22 }
  0x80   : > { %1502 = vperm.xlu1 %8563, %v1415_v59   ;;  %v1428_v57 = vsel %vm1372_vm9, 1, %v18361_v0  ;;  %vm1375_vm14 = vmand %vm1263_vm10, %vm1319_vm11  ;;  %v318_v59 = vld [vmem:[%s9349_s19 + $0x78] sm:$0xff]  ;;  %vm1264_vm2 = vcmp.ge.s32.totalorder %v9681_v55, 6  ;;  %vm1320_vm3 = vcmp.lt.s32.totalorder %v9681_v55, 22 }
  0x81   : > { %1499 = vperm.xlu0 %8562, %v1414_v61   ;;  %vm1374_vm15 = vmand %vm1262_vm12, %vm1318_vm13  ;;  %v9692_v61 = vld [vmem:[%s18348_s0 + $0x118] sm:$0xff] }
  0x82   : > { %7806 = vmatmul.mubr.f32.vlgmr.msra.gmra.mrb[0].mxu0 %v304_v62  ;;  %v1431_v62 = vsel %vm1375_vm14, 1, %v18361_v0  ;;  %vm1377_vm4 = vmand %vm1265_vm0, %vm1321_vm1  ;;  %vm1267_vm6 = vcmp.ge.s32.totalorder %v9692_v61, 6  ;;  %vm1323_vm7 = vcmp.lt.s32.totalorder %v9692_v61, 22 }
  0x83   : > { %7808 = vmatprep.mubr.f32.mxu0 %v305_v2  ;;  %v9699_v2 = vld [vmem:[%s18348_s0 + $0x110] sm:$0xff]  ;;  %vm1376_vm5 = vmand %vm1264_vm2, %vm1320_vm3 }
  0x84   : > { %1508 = vperm.xlu1 %8563, %v1417_v1   ;;  %v319_v1 = vld [vmem:[%s9349_s19 + $0x80] sm:$0xff]  ;;  %vm1266_vm8 = vcmp.ge.s32.totalorder %v9699_v2, 6  ;;  %vm1322_vm9 = vcmp.lt.s32.totalorder %v9699_v2, 22  ;;  %vm1379_vm10 = vmand %vm1267_vm6, %vm1323_vm7 }
  0x85   : > { %1505 = vperm.xlu0 %8562, %v1416_v5   ;;  %v1430_v5 = vsel %vm1374_vm15, 1, %v18361_v0  ;;  %vm1378_vm11 = vmand %vm1266_vm8, %vm1322_vm9 }
  0x86   : > { %7809 = vmatmul.mubr.f32.gmra.mrb[2].mxu0 %v306_v6  ;;  %v320_v6 = vld [vmem:[%s9349_s19 + $0x88] sm:$0xff] }
  0x87   : > { %7811 = vmatprep.mubr.f32.mxu0 %v307_v11  ;;  %v1433_v11 = vsel %vm1377_vm4, 1, %v18361_v0 }
  0x88   : > { %1514 = vperm.xlu1 %8563, %v1419_v8   ;;  %v9710_v8 = vld [vmem:[%s18348_s0 + $0x128] sm:$0xff] }
  0x89   : > { %1511 = vperm.xlu0 %8562, %v1418_v13   ;;  %v321_v13 = vld [vmem:[%s9349_s19 + $0x90] sm:$0xff]  ;;  %vm1269_vm12 = vcmp.ge.s32.totalorder %v9710_v8, 6  ;;  %vm1325_vm13 = vcmp.lt.s32.totalorder %v9710_v8, 22 }
  0x8a   : > { %7812 = vmatmul.mubr.f32.gmra.mrb[4].mxu0 %v308_v14  ;;  %v9717_v14 = vld [vmem:[%s18348_s0 + $0x120] sm:$0xff]  ;;  %vm1381_vm0 = vmand %vm1269_vm12, %vm1325_vm13 }
  0x8b   : > { %7814 = vmatprep.mubr.f32.mxu0 %v309_v19  ;;  %v322_v19 = vld [vmem:[%s9349_s19 + $0x98] sm:$0xff]  ;;  %vm1268_vm14 = vcmp.ge.s32.totalorder %v9717_v14, 6  ;;  %vm1324_vm15 = vcmp.lt.s32.totalorder %v9717_v14, 22 }
  0x8c   : > { %1520 = vperm.xlu1 %8563, %v1421_v18   ;;  %v1432_v18 = vsel %vm1376_vm5, 1, %v18361_v0  ;;  %vm1380_vm1 = vmand %vm1268_vm14, %vm1324_vm15 }
  0x8d   : > { %1517 = vperm.xlu0 %8562, %v1420_v21   ;;  %v9728_v21 = vld [vmem:[%s18348_s0 + $0x138] sm:$0xff] }
  0x8e   : > { %7815 = vmatmul.mubr.f32.gmra.mrb[6].mxu0 %v310_v25  ;;  %v1435_v25 = vsel %vm1379_vm10, 1, %v18361_v0  ;;  %vm1271_vm2 = vcmp.ge.s32.totalorder %v9728_v21, 6  ;;  %vm1327_vm3 = vcmp.lt.s32.totalorder %v9728_v21, 22 }
  0x8f   : > { %7817 = vmatprep.mubr.f32.mxu0 %v311_v29  ;;  %v9735_v29 = vld [vmem:[%s18348_s0 + $0x130] sm:$0xff]  ;;  %vm1383_vm6 = vmand %vm1271_vm2, %vm1327_vm3 }
  0x90   : > { %1526 = vperm.xlu1 %8563, %v1423_v28   ;;  %v323_v28 = vld [vmem:[%s9349_s19 + $0xa0] sm:$0xff]  ;;  %vm1270_vm4 = vcmp.ge.s32.totalorder %v9735_v29, 6  ;;  %vm1326_vm5 = vcmp.lt.s32.totalorder %v9735_v29, 22 }
  0x91   : > { %1523 = vperm.xlu0 %8562, %v1422_v32   ;;  %v1434_v32 = vsel %vm1378_vm11, 1, %v18361_v0  ;;  %vm1382_vm7 = vmand %vm1270_vm4, %vm1326_vm5 }
  0x92   : > { %7818 = vmatmul.mubr.f32.gmra.mrb[8].mxu0 %v312_v33  ;;  %v324_v33 = vld [vmem:[%s9349_s19 + $0xa8] sm:$0xff] }
  0x93   : > { %7820 = vmatprep.mubr.f32.mxu0 %v313_v37  ;;  %v1437_v37 = vsel %vm1381_vm0, 1, %v18361_v0 }
  0x94   : > { %1532 = vperm.xlu1 %8563, %v1425_v36   ;;  %v9746_v36 = vld [vmem:[%s18348_s0 + $0x148] sm:$0xff] }
  0x95   : > { %1529 = vperm.xlu0 %8562, %v1424_v40   ;;  %v325_v40 = vld [vmem:[%s9349_s19 + $0xb0] sm:$0xff]  ;;  %vm1273_vm8 = vcmp.ge.s32.totalorder %v9746_v36, 6  ;;  %vm1329_vm9 = vcmp.lt.s32.totalorder %v9746_v36, 22 }
  0x96   : > { %7821 = vmatmul.mubr.f32.gmra.mrb[10].mxu0 %v314_v41  ;;  %v9753_v41 = vld [vmem:[%s18348_s0 + $0x140] sm:$0xff]  ;;  %vm1385_vm12 = vmand %vm1273_vm8, %vm1329_vm9 }
  0x97   : > { %7823 = vmatprep.mubr.f32.mxu0 %v315_v45  ;;  %v326_v45 = vld [vmem:[%s9349_s19 + $0xb8] sm:$0xff]  ;;  %vm1272_vm10 = vcmp.ge.s32.totalorder %v9753_v41, 6  ;;  %vm1328_vm11 = vcmp.lt.s32.totalorder %v9753_v41, 22 }
  0x98   : > { %1538 = vperm.xlu1 %8563, %v1427_v44   ;;  %v1436_v44 = vsel %vm1380_vm1, 1, %v18361_v0  ;;  %vm1384_vm13 = vmand %vm1272_vm10, %vm1328_vm11 }
  0x99   : > { %1535 = vperm.xlu0 %8562, %v1426_v48   ;;  %v9764_v48 = vld [vmem:[%s18348_s0 + $0x158] sm:$0xff] }
  0x9a   : > { %7824 = vmatmul.mubr.f32.gmra.mrb[12].mxu0 %v316_v50  ;;  %v1439_v50 = vsel %vm1383_vm6, 1, %v18361_v0  ;;  %vm1275_vm14 = vcmp.ge.s32.totalorder %v9764_v48, 6  ;;  %vm1331_vm15 = vcmp.lt.s32.totalorder %v9764_v48, 22 }
  0x9b   : > { %7826 = vmatprep.mubr.f32.mxu0 %v317_v54  ;;  %v9771_v54 = vld [vmem:[%s18348_s0 + $0x150] sm:$0xff]  ;;  %vm1387_vm2 = vmand %vm1275_vm14, %vm1331_vm15 }
  0x9c   : > { %1544 = vperm.xlu1 %8563, %v1429_v52   ;;  %v327_v52 = vld [vmem:[%s9349_s19 + $0xc0] sm:$0xff]  ;;  %vm1274_vm0 = vcmp.ge.s32.totalorder %v9771_v54, 6  ;;  %vm1330_vm1 = vcmp.lt.s32.totalorder %v9771_v54, 22 }
  0x9d   : > { %1541 = vperm.xlu0 %8562, %v1428_v57   ;;  %v1438_v57 = vsel %vm1382_vm7, 1, %v18361_v0  ;;  %vm1386_vm3 = vmand %vm1274_vm0, %vm1330_vm1 }
  0x9e   : > { %7827 = vmatmul.mubr.f32.gmra.mrb[14].mxu0 %v318_v59  ;;  %v328_v59 = vld [vmem:[%s9349_s19 + $0xc8] sm:$0xff] }
  0x9f   : > { %7829 = vmatprep.mubr.f32.mxu0 %v319_v1  ;;  %v1441_v1 = vsel %vm1385_vm12, 1, %v18361_v0 }
  0xa0   : > { %1550 = vperm.xlu1 %8563, %v1431_v62   ;;  %v9782_v62 = vld [vmem:[%s18348_s0 + $0x168] sm:$0xff] }
  0xa1   : > { %1547 = vperm.xlu0 %8562, %v1430_v5   ;;  %v329_v5 = vld [vmem:[%s9349_s19 + $0xd0] sm:$0xff]  ;;  %vm1277_vm4 = vcmp.ge.s32.totalorder %v9782_v62, 6  ;;  %vm1333_vm5 = vcmp.lt.s32.totalorder %v9782_v62, 22 }
  0xa2   : > { %7830 = vmatmul.mubr.f32.gmra.mrb[16].mxu0 %v320_v6  ;;  %v9789_v6 = vld [vmem:[%s18348_s0 + $0x160] sm:$0xff]  ;;  %vm1389_vm8 = vmand %vm1277_vm4, %vm1333_vm5 }
  0xa3   : > { %7832 = vmatprep.mubr.f32.mxu0 %v321_v13  ;;  %v330_v13 = vld [vmem:[%s9349_s19 + $0xd8] sm:$0xff]  ;;  %vm1276_vm6 = vcmp.ge.s32.totalorder %v9789_v6, 6  ;;  %vm1332_vm7 = vcmp.lt.s32.totalorder %v9789_v6, 22 }
  0xa4   : > { %1556 = vperm.xlu1 %8563, %v1433_v11   ;;  %v1440_v11 = vsel %vm1384_vm13, 1, %v18361_v0  ;;  %vm1388_vm9 = vmand %vm1276_vm6, %vm1332_vm7 }
  0xa5   : > { %1553 = vperm.xlu0 %8562, %v1432_v18   ;;  %v9800_v18 = vld [vmem:[%s18348_s0 + $0x178] sm:$0xff] }
  0xa6   : > { %7833 = vmatmul.mubr.f32.gmra.mrb[18].mxu0 %v322_v19  ;;  %v1443_v19 = vsel %vm1387_vm2, 1, %v18361_v0  ;;  %vm1279_vm10 = vcmp.ge.s32.totalorder %v9800_v18, 6  ;;  %vm1335_vm11 = vcmp.lt.s32.totalorder %v9800_v18, 22 }
  0xa7   : > { %7835 = vmatprep.mubr.f32.mxu0 %v323_v28  ;;  %v9807_v28 = vld [vmem:[%s18348_s0 + $0x170] sm:$0xff]  ;;  %vm1391_vm14 = vmand %vm1279_vm10, %vm1335_vm11 }
  0xa8   : > { %1562 = vperm.xlu1 %8563, %v1435_v25   ;;  %v331_v25 = vld [vmem:[%s9349_s19 + $0xe0] sm:$0xff]  ;;  %vm1278_vm12 = vcmp.ge.s32.totalorder %v9807_v28, 6  ;;  %vm1334_vm13 = vcmp.lt.s32.totalorder %v9807_v28, 22 }
  0xa9   : > { %1559 = vperm.xlu0 %8562, %v1434_v32   ;;  %v1442_v32 = vsel %vm1386_vm3, 1, %v18361_v0  ;;  %vm1390_vm15 = vmand %vm1278_vm12, %vm1334_vm13 }
  0xaa   : > { %7836 = vmatmul.mubr.f32.gmra.mrb[20].mxu0 %v324_v33  ;;  %v332_v33 = vld [vmem:[%s9349_s19 + $0xe8] sm:$0xff] }
  0xab   : > { %7838 = vmatprep.mubr.f32.mxu0 %v325_v40  ;;  %v1445_v40 = vsel %vm1389_vm8, 1, %v18361_v0 }
  0xac   : > { %1568 = vperm.xlu1 %8563, %v1437_v37   ;;  %v9818_v37 = vld [vmem:[%s18348_s0 + $0x188] sm:$0xff] }
  0xad   : > { %1565 = vperm.xlu0 %8562, %v1436_v44   ;;  %19151 = vst [vmem:[#allocation11_spill] sm:$0xff] %v9818_v37  ;;  %v333_v44 = vld [vmem:[%s9349_s19 + $0xf0] sm:$0xff]  ;;  %vm1281_vm0 = vcmp.ge.s32.totalorder %v9818_v37, 6  ;;  %vm1337_vm1 = vcmp.lt.s32.totalorder %v9818_v37, 22  ;;  %v1742_v37 = vrot.slane %v9430_v22, 6 }
  0xae   : > { %7839 = vmatmul.mubr.f32.gmra.mrb[22].mxu0 %v326_v45  ;;  %v9825_v45 = vld [vmem:[%s18348_s0 + $0x180] sm:$0xff]  ;;  %vm1393_vm4 = vmand %vm1281_vm0, %vm1337_vm1 }
  0xaf   : > { %7841 = vmatprep.mubr.f32.mxu0 %v327_v52  ;;  %v334_v52 = vld [vmem:[%s9349_s19 + $0xf8] sm:$0xff]  ;;  %vm1280_vm2 = vcmp.ge.s32.totalorder %v9825_v45, 6  ;;  %vm1336_vm3 = vcmp.lt.s32.totalorder %v9825_v45, 22 }
  0xb0   : > { %1574 = vperm.xlu1 %8563, %v1439_v50   ;;  %v1444_v50 = vsel %vm1388_vm9, 1, %v18361_v0  ;;  %vm1392_vm5 = vmand %vm1280_vm2, %vm1336_vm3 }
  0xb1   : > { %1571 = vperm.xlu0 %8562, %v1438_v57   ;;  %v9836_v57 = vld [vmem:[%s18348_s0 + $0x198] sm:$0xff] }
  0xb2   : > { %7842 = vmatmul.mubr.f32.gmra.mrb[24].mxu0 %v328_v59  ;;  %19152 = vst [vmem:[#allocation12_spill] sm:$0xff] %v9836_v57  ;;  %v1447_v59 = vsel %vm1391_vm14, 1, %v18361_v0  ;;  %vm1283_vm6 = vcmp.ge.s32.totalorder %v9836_v57, 6  ;;  %vm1339_vm7 = vcmp.lt.s32.totalorder %v9836_v57, 22 }
  0xb3   : > { %7844 = vmatprep.mubr.f32.mxu0 %v329_v5  ;;  %v9843_v5 = vld [vmem:[%s18348_s0 + $0x190] sm:$0xff]  ;;  %vm1395_vm10 = vmand %vm1283_vm6, %vm1339_vm7 }
  0xb4   : > { %1580 = vperm.xlu1 %8563, %v1441_v1   ;;  %v335_v1 = vld [vmem:[%s9349_s19 + $0x100] sm:$0xff]  ;;  %19153 = vst [vmem:[#allocation13_spill] sm:$0xff] %v9843_v5  ;;  %vm1282_vm8 = vcmp.ge.s32.totalorder %v9843_v5, 6  ;;  %vm1338_vm9 = vcmp.lt.s32.totalorder %v9843_v5, 22 }
  0xb5   : > { %1577 = vperm.xlu0 %8562, %v1440_v11   ;;  %v1446_v11 = vsel %vm1390_vm15, 1, %v18361_v0  ;;  %vm1394_vm11 = vmand %vm1282_vm8, %vm1338_vm9 }
  0xb6   : > { %7845 = vmatmul.mubr.f32.gmra.mrb[26].mxu0 %v330_v13  ;;  %v336_v13 = vld [vmem:[%s9349_s19 + $0x108] sm:$0xff] }
  0xb7   : > { %7847 = vmatprep.mubr.f32.mxu0 %v331_v25  ;;  %v1789_v25 = vlaneseq }
  0xb8   : > { %1586 = vperm.xlu1 %8563, %v1443_v19   ;;  %v9854_v19 = vld [vmem:[%s18348_s0 + $0x1a8] sm:$0xff] }
  0xb9   : > { %1583 = vperm.xlu0 %8562, %v1442_v32   ;;  %19154 = vst [vmem:[#allocation14_spill] sm:$0xff] %v9854_v19  ;;  %v1449_v32 = vsel %vm1393_vm4, 1, %v18361_v0  ;;  %vm1285_vm12 = vcmp.ge.s32.totalorder %v9854_v19, 6  ;;  %vm1341_vm13 = vcmp.lt.s32.totalorder %v9854_v19, 22  ;;  %v19157_v19 = vmov 0  }
  0xba   : > { %7848 = vmatmul.mubr.f32.gmra.mrb[28].mxu0 %v332_v33  ;;  %v337_v33 = vld [vmem:[%s9349_s19 + $0x110] sm:$0xff]  ;;  %vm1397_vm0 = vmand %vm1285_vm12, %vm1341_vm13 }
  0xbb   : > { %7850 = vmatprep.mubr.f32.mxu0 %v333_v44  ;;  %v1448_v44 = vsel %vm1392_vm5, 1, %v18361_v0 }
  0xbc   : > { %1592 = vperm.xlu1 %8563, %v1445_v40   ;;  %v9861_v40 = vld [vmem:[%s18348_s0 + $0x1a0] sm:$0xff] }
  0xbd   : > { %1589 = vperm.xlu0 %8562, %v1444_v50   ;;  %19155 = vst [vmem:[#allocation15_spill] sm:$0xff] %v9861_v40  ;;  %v338_v50 = vld [vmem:[%s9349_s19 + $0x118] sm:$0xff]  ;;  %vm1284_vm14 = vcmp.ge.s32.totalorder %v9861_v40, 6  ;;  %vm1340_vm15 = vcmp.lt.s32.totalorder %v9861_v40, 22  ;;  %v341_v40 = vld [vmem:[%s9349_s19 + $0x130] sm:$0xff] }
  0xbe   : > { %7851 = vmatmul.mubr.f32.gmra.mrb[30].mxu0 %v334_v52  ;;  %v1174_v52 = vld [vmem:[%s18348_s0 + $0x1b8] sm:$0xff]  ;;  %vm1396_vm1 = vmand %vm1284_vm14, %vm1340_vm15 }
  0xbf   : > { %7853 = vmatprep.mubr.f32.mxu0 %v335_v1  ;;  %v1451_v1 = vsel %vm1395_vm10, 1, %v18361_v0  ;;  %vm1287_vm2 = vcmp.ge.s32.totalorder %v1174_v52, 6  ;;  %vm1343_vm3 = vcmp.lt.s32.totalorder %v1174_v52, 22  ;;  %v1452_v57 = vsel %vm1396_vm1, 1, %v19157_v19 }
  0xc0   : > { %1598 = vperm.xlu1 %8563, %v1447_v59   ;;  %v9872_v59 = vshrl.u32 %v1789_v25, 7  ;;  %v1738_v25 = vrot.slane %v9386_v9, 6  ;;  %vm1399_vm7 = vmand %vm1287_vm2, %vm1343_vm3 }
  0xc1   : > { %1595 = vperm.xlu0 %8562, %v1446_v11   ;;  %v339_v11 = vld [vmem:[%s9349_s19 + $0x120] sm:$0xff]  ;;  %v1455_v52 = vsel %vm1399_vm7, 1, %v19157_v19 }
  0xc2   : > { %7854 = vmatmul.mubr.f32.gmra.mrb[32].mxu0 %v336_v13  ;;  %19156 = vst [vmem:[#allocation16_spill] sm:$0xff] %v9872_v59  ;;  %v1173_v13 = vld [vmem:[%s18348_s0 + $0x1b0] sm:$0xff]  ;;  %vm1791_vm6 = vcmp.lt.s32.totalorder %v9872_v59, 2 }
  0xc3   : > { %7856 = vmatprep.mubr.f32.mxu0 %v337_v33  ;;  %v1737_v33 = vrot.slane %v9370_v3, 6  ;;  %vm1286_vm4 = vcmp.ge.s32.totalorder %v1173_v13, 6  ;;  %vm1342_vm5 = vcmp.lt.s32.totalorder %v1173_v13, 22  ;;  %v1740_v13 = vrot.slane %v9408_v16, 6 }
  0xc4   : > { %1604 = vperm.xlu1 %8563, %v1449_v32   ;;  %v1450_v32 = vsel %vm1394_vm11, 1, %v18361_v0  ;;  %v1736_v0 = vrot.slane %v9391_v10, 6  ;;  %vm1398_vm8 = vmand %vm1286_vm4, %vm1342_vm5  ;;  %v342_v10 = vld [vmem:[%s9349_s19 + $0x138] sm:$0xff] }
  0xc5   : > { %1601 = vperm.xlu0 %8562, %v1448_v44   ;;  %v340_v44 = vld [vmem:[%s9349_s19 + $0x128] sm:$0xff]  ;;  %v1454_v5 = vsel %vm1398_vm8, 1, %v19157_v19 }
  0xc6   : > { %7857 = vmatmul.mubr.f32.gmra.mrb[34].mxu0 %v338_v50  ;;  %v1453_v50 = vsel %vm1397_vm0, 1, %v19157_v19 }
  0xc7   : > { %7859 = vmatprep.mubr.f32.mxu0 %v339_v11  ;;  %v1739_v11 = vrot.slane %v9413_v17, 6 }
  0xc8   : > { %1610 = vperm.xlu1 %8563, %v1451_v1   ;;  %v1842_v1 = vsel %vm1791_vm6, %v1737_v33, %v1738_v25 }
  0xc9   : > { %1607 = vperm.xlu0 %8562, %v1450_v32   ;;  %v1843_v32 = vsel %vm1791_vm6, %v1736_v0, %v1737_v33  ;;  %vm1845_vm9 = vcmp.eq.s32.totalorder %v1842_v1, %v9386_v9  ;;  %v344_v0 = vld [vmem:[%s9349_s19 + $0x148] sm:$0xff]  ;;  %v345_v33 = vld [vmem:[%s9349_s19 + $0x150] sm:$0xff] }
  0xca   : > { %7860 = vmatmul.mubr.f32.gmra.mrb[36].mxu0 %v340_v44  ;;  %v343_v44 = vld [vmem:[%s9349_s19 + $0x140] sm:$0xff]  ;;  %vm1844_vm10 = vcmp.eq.s32.totalorder %v1843_v32, %v9370_v3  ;;  %v2692_v9 = vsel %vm1845_vm9, 1, %v19157_v19  ;;  %v1744_v32 = vrot.slane %v9444_v24, 6 }
  0xcb   : > { %7862 = vmatprep.mubr.f32.mxu0 %v341_v40  ;;  %v1741_v40 = vrot.slane %v9435_v23, 6  ;;  %v2691_v3 = vsel %vm1844_vm10, 1, %v19157_v19 }
  0xcc   : > { %1616 = vperm.xlu1 %8563, %v1453_v50   ;;  %v1840_v50 = vsel %vm1791_vm6, %v1739_v11, %v1740_v13 }
  0xcd   : > { %1613 = vperm.xlu0 %8562, %v1452_v57   ;;  %v1841_v57 = vsel %vm1791_vm6, %v1738_v25, %v1739_v11  ;;  %vm1847_vm11 = vcmp.eq.s32.totalorder %v1840_v50, %v9408_v16  ;;  %v1838_v1 = vsel %vm1791_vm6, %v1741_v40, %v1742_v37  ;;  %v1839_v25 = vsel %vm1791_vm6, %v1740_v13, %v1741_v40  ;;  %v347_v11 = vld [vmem:[%s9349_s19 + $0x160] sm:$0xff]  ;;  %v348_v13 = vld [vmem:[%s9349_s19 + $0x168] sm:$0xff] }
  0xce   : > { %7863 = vmatmul.mubr.f32.gmra.mrb[38].mxu0 %v342_v10  ;;  %vm1846_vm12 = vcmp.eq.s32.totalorder %v1841_v57, %v9413_v17  ;;  %v1743_v10 = vrot.slane %v9450_v27, 6  ;;  %v2694_v16 = vsel %vm1847_vm11, 1, %v19157_v19  ;;  %vm1849_vm13 = vcmp.eq.s32.totalorder %v1838_v1, %v9430_v22  ;;  %v351_v1 = vld [vmem:[%s9349_s19 + $0x180] sm:$0xff] }
  0xcf   : > { %7865 = vmatprep.mubr.f32.mxu0 %v343_v44  ;;  %v2693_v17 = vsel %vm1846_vm12, 1, %v19157_v19  ;;  %vm1848_vm14 = vcmp.eq.s32.totalorder %v1839_v25, %v9435_v23  ;;  %v1745_v44 = vrot.slane %v9472_v34, 6  ;;  %v1746_v50 = vrot.slane %v9466_v31, 6 }
  0xd0   : > { %1622 = vperm.xlu1 %8563, %v1455_v52   ;;  %v1836_v52 = vsel %vm1791_vm6, %v1743_v10, %v1744_v32  ;;  %v1837_v40 = vsel %vm1791_vm6, %v1742_v37, %v1743_v10  ;;  %v2696_v22 = vsel %vm1849_vm13, 1, %v19157_v19  ;;  %v2695_v23 = vsel %vm1848_vm14, 1, %v19157_v19  ;;  %v350_v37 = vld [vmem:[%s9349_s19 + $0x178] sm:$0xff] }
  0xd1   : > { %1619 = vperm.xlu0 %8562, %v1454_v5   ;;  %v346_v5 = vld [vmem:[%s9349_s19 + $0x158] sm:$0xff]  ;;  %vm1851_vm15 = vcmp.eq.s32.totalorder %v1836_v52, %v9444_v24  ;;  %vm1850_vm0 = vcmp.eq.s32.totalorder %v1837_v40, %v9450_v27  ;;  %v1834_v57 = vsel %vm1791_vm6, %v1745_v44, %v1746_v50  ;;  %v1750_v25 = vrot.slane %v9511_v46, 6 }
  0xd2   : > { %7866 = vmatmul.mubr.f32.gmra.mrb[40].mxu0 %v344_v0  ;;  %v349_v0 = vld [vmem:[%s9349_s19 + $0x170] sm:$0xff]  ;;  %v2698_v24 = vsel %vm1851_vm15, 1, %v19157_v19  ;;  %v2697_v27 = vsel %vm1850_vm0, 1, %v19157_v19  ;;  %vm1853_vm1 = vcmp.eq.s32.totalorder %v1834_v57, %v9466_v31  ;;  %v354_v40 = vld [vmem:[%s9349_s19 + $0x198] sm:$0xff] }
  0xd3   : > { %7868 = vmatprep.mubr.f32.mxu0 %v345_v33  ;;  %v1748_v33 = vrot.slane %v9489_v39, 6  ;;  %v2700_v31 = vsel %vm1853_vm1, 1, %v19157_v19 }
  0xd4   : > { %2747 = vperm.xlu1 %8563, %v2692_v9   ;;  %v1747_v9 = vrot.slane %v9495_v42, 6 }
  0xd5   : > { %2744 = vperm.xlu0 %8562, %v2691_v3   ;;  %v1835_v3 = vsel %vm1791_vm6, %v1744_v32, %v1745_v44  ;;  %v352_v32 = vld [vmem:[%s9349_s19 + $0x188] sm:$0xff]  ;;  %v1751_v44 = vrot.slane %v9539_v56, 6 }
  0xd6   : > { %7869 = vmatmul.mubr.f32.gmra.mrb[42].mxu0 %v346_v5  ;;  %vm1852_vm2 = vcmp.eq.s32.totalorder %v1835_v3, %v9472_v34  ;;  %v1832_v10 = vsel %vm1791_vm6, %v1747_v9, %v1748_v33  ;;  %v1749_v5 = vrot.slane %v9517_v49, 6  ;;  %v356_v3 = vld [vmem:[%s9349_s19 + $0x1a8] sm:$0xff] }
  0xd7   : > { %7871 = vmatprep.mubr.f32.mxu0 %v347_v11  ;;  %v353_v11 = vld [vmem:[%s9349_s19 + $0x190] sm:$0xff]  ;;  %v2699_v34 = vsel %vm1852_vm2, 1, %v19157_v19  ;;  %vm1855_vm3 = vcmp.eq.s32.totalorder %v1832_v10, %v9489_v39 }
  0xd8   : > { %2753 = vperm.xlu1 %8563, %v2694_v16   ;;  %v1833_v16 = vsel %vm1791_vm6, %v1746_v50, %v1747_v9  ;;  %v1830_v52 = vsel %vm1791_vm6, %v1749_v5, %v1750_v25  ;;  %v1752_v50 = vrot.slane %v9533_v53, 6  ;;  %v1831_v39 = vsel %vm1791_vm6, %v1748_v33, %v1749_v5 }
  0xd9   : > { %2750 = vperm.xlu0 %8562, %v2693_v17   ;;  %vm1854_vm4 = vcmp.eq.s32.totalorder %v1833_v16, %v9495_v42  ;;  %v355_v42 = vld [vmem:[%s9349_s19 + $0x1a0] sm:$0xff]  ;;  %vm1857_vm5 = vcmp.eq.s32.totalorder %v1830_v52, %v9511_v46  ;;  %vm1856_vm7 = vcmp.eq.s32.totalorder %v1831_v39, %v9517_v49  ;;  %v1753_v9 = vrot.slane %v9555_v60, 6  ;;  %v357_v49 = vld [vmem:[%s9349_s19 + $0x1b0] sm:$0xff]  ;;  %v358_v16 = vld [vmem:[%s9349_s19 + $0x1b8] sm:$0xff]  ;;  %s7508_s19 = sshll.u32 %s9140_s24, 12  ;;  %s9155_s24 = smov [#allocation7]  }
  0xda   : > { %7872 = vmatmul.mubr.f32.gmra.mrb[44].mxu0 %v348_v13  ;;  %v1828_v57 = vsel %vm1791_vm6, %v1751_v44, %v1752_v50  ;;  %v1754_v33 = vrot.slane %v9549_v58, 6  ;;  %v1829_v46 = vsel %vm1791_vm6, %v1750_v25, %v1751_v44  ;;  %v1755_v5 = vrot.slane %v9573_v4, 6  ;;  %s18295_s15 = scalar_lea.hbm %s18354_s6, %s7508_s19  ;;  %s9066_s29 = sshll.u32 %s9155_s24, 4  ;;  %s9067_s29 = int_to_ptr.vmem [resolvable:$false] %s9066_s29 }
  0xdb   : > { %7874 = vmatprep.mubr.f32.mxu0 %v349_v0  ;;  %v2701_v0 = vsel %vm1854_vm4, 1, %v19157_v19  ;;  %vm1859_vm8 = vcmp.eq.s32.totalorder %v1828_v57, %v9533_v53  ;;  %vm1858_vm9 = vcmp.eq.s32.totalorder %v1829_v46, %v9539_v56  ;;  %v1756_v25 = vrot.slane %v9566_v63, 6  ;;  %s9068_s27 = scalar_lea.vmem %s9067_s29, 8192  ;;  %p9069_p12 = scmp.lt.s32.totalorder %s18297_s9, %s9067_s29 }
  0xdc   : > { %2759 = vperm.xlu1 %8563, %v2696_v22   ;;  %v2702_v22 = vsel %vm1855_vm3, 1, %v19157_v19  ;;  %v1826_v10 = vsel %vm1791_vm6, %v1753_v9, %v1754_v33  ;;  %v1827_v53 = vsel %vm1791_vm6, %v1752_v50, %v1753_v9  ;;  %v2705_v56 = vsel %vm1858_vm9, 1, %v19157_v19  ;;  %p9070_p13 = scmp.lt.s32.totalorder %s9068_s27, %s9062_s16 }
  0xdd   : > { %2756 = vperm.xlu0 %8562, %v2695_v23   ;;  %vm1861_vm10 = vcmp.eq.s32.totalorder %v1826_v10, %v9549_v58  ;;  %vm1860_vm11 = vcmp.eq.s32.totalorder %v1827_v53, %v9555_v60  ;;  %v1757_v52 = vrot.slane %v9591_v12, 6  ;;  %v1758_v44 = vrot.slane %v9584_v7, 6  ;;  %v5966_v53 = vld [vmem:[#allocation5] sm:$0xff] }
  0xde   : > { %7875 = vmatmul.mubr.f32.gmra.mrb[46].mxu0 %v350_v37  ;;  %v2708_v58 = vsel %vm1861_vm10, 1, %v19157_v19  ;;  %v2707_v39 = vsel %vm1860_vm11, 1, %v19157_v19  ;;  %v1761_v46 = vrot.slane %v9627_v30, 6  ;;  %p9071_p0 = por %p9070_p13, %p9069_p12 }
  0xdf   : > { %7877 = vmatprep.mubr.f32.mxu0 %v351_v1  ;;  %v2703_v1 = vsel %vm1856_vm7, 1, %v19157_v19  ;;  %v1823_v9 = vsel %vm1791_vm6, %v1756_v25, %v1757_v52 }
  0xe0   : > { %2765 = vperm.xlu1 %8563, %v2698_v24   ;;  %v2704_v24 = vsel %vm1857_vm5, 1, %v19157_v19  ;;  %vm1864_vm15 = vcmp.eq.s32.totalorder %v1823_v9, %v9591_v12  ;;  %p9072_p5 = pnand %p9071_p0, %p9065_p8 }
  0xe1   : > { %2762 = vperm.xlu0 %8562, %v2697_v27   ;;  %v2711_v10 = vsel %vm1864_vm15, 1, %v19157_v19 }
  0xe2   : > { %7878 = vmatmul.mubr.f32.gmra.mrb[48].mxu0 %v352_v32 }
  0xe3   : > { %v9960_v17 = vpop.permute.xlu1 %1463  ;;  %7880 = vmatprep.mubr.f32.mxu0 %v353_v11 }
  0xe4   : > { %19158 = vst [vmem:[#allocation17_spill] sm:$0xff] %v9960_v17  ;;  %v9967_v13 = vpop.permute.xlu0 %1457  ;;  %2771 = vperm.xlu1 %8563, %v2700_v31   ;;  %v2706_v31 = vsel %vm1859_vm8, 1, %v19157_v19 }
  0xe5   : > { %19159 = vst [vmem:[#allocation18_spill] sm:$0xff] %v9967_v13  ;;  %2768 = vperm.xlu0 %8562, %v2699_v34   ;;  %v1824_v34 = vsel %vm1791_vm6, %v1755_v5, %v1756_v25  ;;  %v1763_v25 = vrot.slane %v9645_v38, 6  ;;  %v10543_v13 = vld [vmem:[%s18348_s0 + $0xc8] sm:$0xff] }
  0xe6   : > { %7881 = vmatmul.mubr.f32.gmra.mrb[50].mxu0 %v354_v40  ;;  %v1825_v40 = vsel %vm1791_vm6, %v1754_v33, %v1755_v5  ;;  %vm1863_vm12 = vcmp.eq.s32.totalorder %v1824_v34, %v9566_v63 }
  0xe7   : > { %v9976_v23 = vpop.permute.xlu1 %1466  ;;  %7883 = vmatprep.mubr.f32.mxu0 %v355_v42  ;;  %vm1862_vm13 = vcmp.eq.s32.totalorder %v1825_v40, %v9573_v4  ;;  %v1759_v42 = vrot.slane %v9609_v20, 6  ;;  %v2710_v63 = vsel %vm1863_vm12, 1, %v19157_v19 }
  0xe8   : > { %v9983_v37 = vpop.permute.xlu0 %1460  ;;  %2777 = vperm.xlu1 %8563, %v2702_v22   ;;  %v1822_v22 = vsel %vm1791_vm6, %v1757_v52, %v1758_v44  ;;  %v2709_v33 = vsel %vm1862_vm13, 1, %v19157_v19 }
  0xe9   : > { %19160 = vst [vmem:[#allocation19_spill] sm:$0xff] %v9983_v37  ;;  %2774 = vperm.xlu0 %8562, %v2701_v0   ;;  %v1760_v0 = vrot.slane %v9602_v15, 6  ;;  %vm1865_vm14 = vcmp.eq.s32.totalorder %v1822_v22, %v9584_v7  ;;  %v5968_v22 = vld [vmem:[#allocation5 + $0x10] sm:$0xff] }
  0xea   : > { %7884 = vmatmul.mubr.f32.gmra.mrb[52].mxu0 %v356_v3  ;;  %v2712_v7 = vsel %vm1865_vm14, 1, %v19157_v19 }
  0xeb   : > { %v9992_v27 = vpop.permute.xlu1 %1472  ;;  %7886 = vmatprep.mubr.f32.mxu0 %v357_v49  ;;  %v1820_v3 = vsel %vm1791_vm6, %v1759_v42, %v1760_v0  ;;  %v1819_v34 = vsel %vm1791_vm6, %v1760_v0, %v1761_v46 }
  0xec   : > { %19161 = vst [vmem:[#allocation20_spill] sm:$0xff] %v9992_v27  ;;  %v9999_v32 = vpop.permute.xlu0 %1469  ;;  %2783 = vperm.xlu1 %8563, %v2704_v24   ;;  %v1762_v24 = vrot.slane %v9620_v26, 6  ;;  %vm1867_vm0 = vcmp.eq.s32.totalorder %v1820_v3, %v9602_v15  ;;  %vm1868_vm3 = vcmp.eq.s32.totalorder %v1819_v34, %v9627_v30  ;;  %v8955_v27 = vld [vmem:[%s18348_s0 + $0x140] sm:$0xff] }
  0xed   : > { %19162 = vst [vmem:[#allocation21_spill] sm:$0xff] %v9999_v32  ;;  %2780 = vperm.xlu0 %8562, %v2703_v1   ;;  %v1821_v1 = vsel %vm1791_vm6, %v1758_v44, %v1759_v42  ;;  %v5969_v42 = vld [vmem:[#allocation5 + $0x18] sm:$0xff] }
  0xee   : > { %7887 = vmatmul.mubr.f32.gmra.mrb[54].mxu0 %v358_v16  ;;  %vm1866_vm1 = vcmp.eq.s32.totalorder %v1821_v1, %v9609_v20  ;;  %v1818_v5 = vsel %vm1791_vm6, %v1761_v46, %v1762_v24  ;;  %v1764_v16 = vrot.slane %v9638_v35, 6  ;;  %v2714_v20 = vsel %vm1867_vm0, 1, %v19157_v19 }
  0xef   : > { %v10007_v11 = vpop.permute.xlu1 %1478  ;;  %v2713_v52 = vsel %vm1866_vm1, 1, %v19157_v19  ;;  %vm1869_vm2 = vcmp.eq.s32.totalorder %v1818_v5, %v9620_v26  ;;  %v1817_v26 = vsel %vm1791_vm6, %v1762_v24, %v1763_v25  ;;  %v10078_v9 = vpack.c.bf16 %v5969_v42, %v5968_v22  ;;  %v5970_v22 = vld [vmem:[#allocation5 + $0x20] sm:$0xff]  ;;  %v5971_v42 = vld [vmem:[#allocation5 + $0x28] sm:$0xff] }
  0xf0   : > { %v10014_v50 = vpop.permute.xlu0 %1475  ;;  %2789 = vperm.xlu1 %8563, %v2706_v31   ;;  %v5967_v31 = vld [vmem:[#allocation5 + $0x8] sm:$0xff]  ;;  %v1816_v40 = vsel %vm1791_vm6, %v1763_v25, %v1764_v16  ;;  %v2716_v30 = vsel %vm1869_vm2, 1, %v19157_v19  ;;  %vm1870_vm5 = vcmp.eq.s32.totalorder %v1817_v26, %v9645_v38  ;;  %v1767_v46 = vrot.slane %v9681_v55, 6 }
  0xf1   : > { %19163 = vst [vmem:[#allocation22_spill] sm:$0xff] %v10014_v50  ;;  %2786 = vperm.xlu0 %8562, %v2705_v56   ;;  %v10060_v15 = vpack.c.bf16 %v5967_v31, %v5966_v53  ;;  %19173 = vst [vmem:[#allocation32_spill] sm:$0xff] %v10078_v9  ;;  %vm1871_vm4 = vcmp.eq.s32.totalorder %v1816_v40, %v9638_v35  ;;  %v1768_v24 = vrot.slane %v9674_v51, 6  ;;  %v2717_v38 = vsel %vm1870_vm5, 1, %v19157_v19 }
  0xf2   : > { %v1769_v25 = vrot.slane %v9699_v2, 6  ;;  %v1770_v53 = vrot.slane %v9692_v61, 6  ;;  %v1772_v40 = vrot.slane %v9710_v8, 6  ;;  %v10127_v26 = vpack.c.bf16 %v5971_v42, %v5970_v22  ;;  %v5974_v22 = vld [vmem:[#allocation5 + $0x40] sm:$0xff]  ;;  %v5975_v42 = vld [vmem:[#allocation5 + $0x48] sm:$0xff] }
  0xf3   : > { %v10021_v60 = vpop.permute.xlu1 %1484  ;;  %19170 = vst [vmem:[#allocation29_spill] sm:$0xff] %v10060_v15  ;;  %8369 = vmatprep.subr.bf16.mxu1 %v10060_v15  ;;  %v1812_v5 = vsel %vm1791_vm6, %v1767_v46, %v1768_v24 }
  0xf4   : > { %19164 = vst [vmem:[#allocation23_spill] sm:$0xff] %v10021_v60  ;;  %v10028_v57 = vpop.permute.xlu0 %1481  ;;  %2795 = vperm.xlu1 %8563, %v2708_v58   ;;  %v1765_v58 = vrot.slane %v9663_v47, 6  ;;  %8377 = vmatpush3.bf16.msra.mxu1 %v10060_v15  ;;  %vm1875_vm9 = vcmp.eq.s32.totalorder %v1812_v5, %v9674_v51  ;;  %19180 = vst [vmem:[#allocation39_spill] sm:$0xff] %v10127_v26  ;;  %v1775_v5 = vrot.slane %v9753_v41, 6 }
  0xf5   : > { %19165 = vst [vmem:[#allocation24_spill] sm:$0xff] %v10028_v57  ;;  %2792 = vperm.xlu0 %8562, %v2707_v39   ;;  %v1766_v39 = vrot.slane %v9656_v43, 6  ;;  %8370 = vmatprep.subr.bf16.mxu1 %v10078_v9  ;;  %v2722_v51 = vsel %vm1875_vm9, 1, %v19157_v19 }
  0xf6   : > { %v1815_v35 = vsel %vm1791_vm6, %v1764_v16, %v1765_v58 }
  0xf7   : > { %v10035_v4 = vpop.permute.xlu1 %1490  ;;  %v1814_v3 = vsel %vm1791_vm6, %v1765_v58, %v1766_v39  ;;  %vm1872_vm8 = vcmp.eq.s32.totalorder %v1815_v35, %v9663_v47  ;;  %v1813_v16 = vsel %vm1791_vm6, %v1766_v39, %v1767_v46  ;;  %v1811_v39 = vsel %vm1791_vm6, %v1768_v24, %v1769_v25 }
  0xf8   : > { %19166 = vst [vmem:[#allocation25_spill] sm:$0xff] %v10035_v4  ;;  %v10042_v49 = vpop.permute.xlu0 %1487  ;;  %2801 = vperm.xlu1 %8563, %v2710_v63   ;;  %v2715_v63 = vsel %vm1868_vm3, 1, %v19157_v19  ;;  %8378 = vmatpush3.bf16.msra.mxu1 %v10078_v9  ;;  %vm1873_vm7 = vcmp.eq.s32.totalorder %v1814_v3, %v9656_v43  ;;  %v2719_v34 = vsel %vm1872_vm8, 1, %v19157_v19  ;;  %vm1874_vm10 = vcmp.eq.s32.totalorder %v1813_v16, %v9681_v55  ;;  %v5973_v16 = vld [vmem:[#allocation5 + $0x38] sm:$0xff] }
  0xf9   : > { %19167 = vst [vmem:[#allocation26_spill] sm:$0xff] %v10042_v49  ;;  %2798 = vperm.xlu0 %8562, %v2709_v33   ;;  %v2720_v43 = vsel %vm1873_vm7, 1, %v19157_v19  ;;  %v2721_v55 = vsel %vm1874_vm10, 1, %v19157_v19  ;;  %vm1876_vm12 = vcmp.eq.s32.totalorder %v1811_v39, %v9699_v2  ;;  %v1773_v3 = vrot.slane %v9735_v29, 6  ;;  %8371 = vmatprep.subr.bf16.mxu1 %v10127_v26 }
  0xfa   : > { %v1774_v46 = vrot.slane %v9728_v21, 6  ;;  %v2723_v2 = vsel %vm1876_vm12, 1, %v19157_v19  ;;  %vm1949_vm12 = vcmp.lt.s32.totalorder %v9872_v59, 1 }
  0xfb   : > { %v10049_v12 = vpop.permute.xlu1 %1496 }
  0xfc   : > { %19168 = vst [vmem:[#allocation27_spill] sm:$0xff] %v10049_v12  ;;  %v10056_v56 = vpop.permute.xlu0 %1493  ;;  %2807 = vperm.xlu1 %8563, %v2712_v7   ;;  %v2718_v7 = vsel %vm1871_vm4, 1, %v19157_v19  ;;  %8379 = vmatpush3.bf16.msra.mxu1 %v10127_v26 }
  0xfd   : > { %19169 = vst [vmem:[#allocation28_spill] sm:$0xff] %v10056_v56  ;;  %2804 = vperm.xlu0 %8562, %v2711_v10   ;;  %v10626_v56 = vld [vmem:[%s18348_s0 + $0xf8] sm:$0xff] }
  0xfe   : > { %v1926_v12 = vrot.slane %v10626_v56, 7 }
  0xff   : > { %v10066_v44 = vpop.permute.xlu1 %1502 }
 0x100   : > { %19171 = vst [vmem:[#allocation30_spill] sm:$0xff] %v10066_v44  ;;  %v10074_v0 = vpop.permute.xlu0 %1499  ;;  %2813 = vperm.xlu1 %8563, %v2714_v20   ;;  %v1810_v20 = vsel %vm1791_vm6, %v1769_v25, %v1770_v53  ;;  %v1776_v25 = vrot.slane %v9746_v36, 6  ;;  %v10620_v44 = vld [vmem:[%s18348_s0 + $0xf0] sm:$0xff] }
 0x101   : > { %19172 = vst [vmem:[#allocation31_spill] sm:$0xff] %v10074_v0  ;;  %2810 = vperm.xlu0 %8562, %v2713_v52   ;;  %v1771_v52 = vrot.slane %v9717_v14, 6  ;;  %vm1877_vm11 = vcmp.eq.s32.totalorder %v1810_v20, %v9692_v61 }
 0x102   : > { %v2724_v61 = vsel %vm1877_vm11, 1, %v19157_v19  ;;  %v1804_v39 = vsel %vm1791_vm6, %v1775_v5, %v1776_v25 }
 0x103   : > { %v10084_v33 = vpop.permute.xlu1 %1508  ;;  %v1809_v35 = vsel %vm1791_vm6, %v1770_v53, %v1771_v52  ;;  %v5972_v53 = vld [vmem:[#allocation5 + $0x30] sm:$0xff]  ;;  %vm1883_vm1 = vcmp.eq.s32.totalorder %v1804_v39, %v9746_v36 }
 0x104   : > { %19174 = vst [vmem:[#allocation33_spill] sm:$0xff] %v10084_v33  ;;  %v10092_v1 = vpop.permute.xlu0 %1505  ;;  %2819 = vperm.xlu1 %8563, %v2716_v30   ;;  %vm1878_vm14 = vcmp.eq.s32.totalorder %v1809_v35, %v9717_v14  ;;  %v10614_v33 = vld [vmem:[%s18348_s0 + $0xe8] sm:$0xff] }
 0x105   : > { %19175 = vst [vmem:[#allocation34_spill] sm:$0xff] %v10092_v1  ;;  %2816 = vperm.xlu0 %8562, %v2715_v63   ;;  %v1808_v63 = vsel %vm1791_vm6, %v1771_v52, %v1772_v40  ;;  %v2725_v20 = vsel %vm1878_vm14, 1, %v19157_v19  ;;  %v1924_v0 = vrot.slane %v10614_v33, 7 }
 0x106   : > { %vm1879_vm13 = vcmp.eq.s32.totalorder %v1808_v63, %v9710_v8  ;;  %v10156_v8 = vpack.c.bf16 %v5973_v16, %v5972_v53  ;;  %v10174_v63 = vpack.c.bf16 %v5975_v42, %v5974_v22  ;;  %v1782_v53 = vrot.slane %v9800_v18, 6 }
 0x107   : > { %v10099_v10 = vpop.permute.xlu1 %1514  ;;  %v2726_v14 = vsel %vm1879_vm13, 1, %v19157_v19 }
 0x108   : > { %19176 = vst [vmem:[#allocation35_spill] sm:$0xff] %v10099_v10  ;;  %v10106_v31 = vpop.permute.xlu0 %1511  ;;  %2825 = vperm.xlu1 %8563, %v2718_v7   ;;  %19185 = vst [vmem:[#allocation44_spill] sm:$0xff] %v10156_v8  ;;  %8372 = vmatprep.subr.bf16.mxu1 %v10156_v8 }
 0x109   : > { %19177 = vst [vmem:[#allocation36_spill] sm:$0xff] %v10106_v31  ;;  %2822 = vperm.xlu0 %8562, %v2717_v38   ;;  %v1806_v38 = vsel %vm1791_vm6, %v1773_v3, %v1774_v46  ;;  %8380 = vmatpush3.bf16.msra.mxu1 %v10156_v8  ;;  %19188 = vst [vmem:[#allocation47_spill] sm:$0xff] %v10174_v63 }
 0x10a   : > { %vm1881_vm15 = vcmp.eq.s32.totalorder %v1806_v38, %v9728_v21  ;;  %v1805_v21 = vsel %vm1791_vm6, %v1774_v46, %v1775_v5  ;;  %8373 = vmatprep.subr.bf16.mxu1 %v10174_v63  ;;  %v1779_v46 = vrot.slane %v9789_v6, 6  ;;  %v1781_v5 = vrot.slane %v9807_v28, 6 }
 0x10b   : > { %v10113_v47 = vpop.permute.xlu1 %1520  ;;  %vm1882_vm2 = vcmp.eq.s32.totalorder %v1805_v21, %v9753_v41  ;;  %v2730_v41 = vsel %vm1883_vm1, 1, %v19157_v19  ;;  %v1783_v21 = vrot.slane %v9825_v45, 6 }
 0x10c   : > { %19178 = vst [vmem:[#allocation37_spill] sm:$0xff] %v10113_v47  ;;  %v10120_v58 = vpop.permute.xlu0 %1517  ;;  %2831 = vperm.xlu1 %8563, %v2720_v43   ;;  %v2729_v16 = vsel %vm1882_vm2, 1, %v19157_v19  ;;  %v1920_v47 = vrot.slane %v10543_v13, 7 }
 0x10d   : > { %19179 = vst [vmem:[#allocation38_spill] sm:$0xff] %v10120_v58  ;;  %2828 = vperm.xlu0 %8562, %v2719_v34   ;;  %v1807_v34 = vsel %vm1791_vm6, %v1772_v40, %v1773_v3  ;;  %v1777_v40 = vrot.slane %v9771_v54, 6  ;;  %8381 = vmatpush3.bf16.msra.mxu1 %v10174_v63 }
 0x10e   : > { %vm1880_vm0 = vcmp.eq.s32.totalorder %v1807_v34, %v9735_v29  ;;  %v2728_v29 = vsel %vm1881_vm15, 1, %v19157_v19  ;;  %v5976_v34 = vld [vmem:[#allocation5 + $0x50] sm:$0xff] }
 0x10f   : > { %v10129_v30 = vpop.permute.xlu1 %1526  ;;  %v2727_v3 = vsel %vm1880_vm0, 1, %v19157_v19  ;;  %v1803_v36 = vsel %vm1791_vm6, %v1776_v25, %v1777_v40 }
 0x110   : > { %19181 = vst [vmem:[#allocation40_spill] sm:$0xff] %v10129_v30  ;;  %v10136_v24 = vpop.permute.xlu0 %1523  ;;  %2837 = vperm.xlu1 %8563, %v2722_v51   ;;  %v1778_v51 = vrot.slane %v9764_v48, 6  ;;  %vm1884_vm4 = vcmp.eq.s32.totalorder %v1803_v36, %v9771_v54  ;;  %v19194_v54 = vld [vmem:[#allocation11_spill] sm:$0xff] }
 0x111   : > { %19182 = vst [vmem:[#allocation41_spill] sm:$0xff] %v10136_v24  ;;  %2834 = vperm.xlu0 %8562, %v2721_v55  }
 0x112   : > { %v1801_v39 = vsel %vm1791_vm6, %v1778_v51, %v1779_v46 }
 0x113   : > { %v10145_v7 = vpop.permute.xlu1 %1532  ;;  %vm1886_vm7 = vcmp.eq.s32.totalorder %v1801_v39, %v9789_v6 }
 0x114   : > { %19183 = vst [vmem:[#allocation42_spill] sm:$0xff] %v10145_v7  ;;  %v10152_v43 = vpop.permute.xlu0 %1529  ;;  %2843 = vperm.xlu1 %8563, %v2724_v61   ;;  %v1802_v61 = vsel %vm1791_vm6, %v1777_v40, %v1778_v51  ;;  %v2731_v51 = vsel %vm1884_vm4, 1, %v19157_v19  ;;  %v2733_v39 = vsel %vm1886_vm7, 1, %v19157_v19 }
 0x115   : > { %19184 = vst [vmem:[#allocation43_spill] sm:$0xff] %v10152_v43  ;;  %2840 = vperm.xlu0 %8562, %v2723_v2   ;;  %v1780_v2 = vrot.slane %v9782_v62, 6  ;;  %vm1885_vm3 = vcmp.eq.s32.totalorder %v1802_v61, %v9764_v48  ;;  %v1798_v48 = vsel %vm1791_vm6, %v1781_v5, %v1782_v53  ;;  %v10427_v43 = vld [vmem:[%s18348_s0 + $0x88] sm:$0xff] }
 0x116   : > { %vm1889_vm8 = vcmp.eq.s32.totalorder %v1798_v48, %v9800_v18 }
 0x117   : > { %v10162_v52 = vpop.permute.xlu1 %1538  ;;  %v1800_v25 = vsel %vm1791_vm6, %v1779_v46, %v1780_v2  ;;  %v1799_v42 = vsel %vm1791_vm6, %v1780_v2, %v1781_v5  ;;  %v5978_v46 = vld [vmem:[#allocation5 + $0x60] sm:$0xff]  ;;  %v5979_v2 = vld [vmem:[#allocation5 + $0x68] sm:$0xff] }
 0x118   : > { %19186 = vst [vmem:[#allocation45_spill] sm:$0xff] %v10162_v52  ;;  %v10170_v55 = vpop.permute.xlu0 %1535  ;;  %2849 = vperm.xlu1 %8563, %v2726_v14   ;;  %v5977_v14 = vld [vmem:[#allocation5 + $0x58] sm:$0xff]  ;;  %vm1887_vm5 = vcmp.eq.s32.totalorder %v1800_v25, %v9782_v62  ;;  %vm1888_vm9 = vcmp.eq.s32.totalorder %v1799_v42, %v9807_v28  ;;  %v1797_v25 = vsel %vm1791_vm6, %v1782_v53, %v1783_v21  ;;  %v10259_v28 = vld [vmem:[%s18348_s0 + $0x10] sm:$0xff] }
 0x119   : > { %19187 = vst [vmem:[#allocation46_spill] sm:$0xff] %v10170_v55  ;;  %2846 = vperm.xlu0 %8562, %v2725_v20   ;;  %v10204_v40 = vpack.c.bf16 %v5977_v14, %v5976_v34  ;;  %v10230_v14 = vpack.c.bf16 %v5979_v2, %v5978_v46  ;;  %v2734_v6 = vsel %vm1887_vm5, 1, %v19157_v19  ;;  %v2736_v46 = vsel %vm1889_vm8, 1, %v19157_v19  ;;  %v5980_v42 = vld [vmem:[#allocation5 + $0x70] sm:$0xff]  ;;  %v5981_v2 = vld [vmem:[#allocation5 + $0x78] sm:$0xff] }
 0x11a   : > { %vm1890_vm11 = vcmp.eq.s32.totalorder %v1797_v25, %v9825_v45  ;;  %v1897_v48 = vrot.slane %v10259_v28, 7  ;;  %v10272_v9 = vpack.c.bf16 %v5981_v2, %v5980_v42  ;;  %v10329_v25 = vld [vmem:[%s18348_s0 + $0x40] sm:$0xff] }
 0x11b   : > { %v10180_v35 = vpop.permute.xlu1 %1544  ;;  %19192 = vst [vmem:[#allocation51_spill] sm:$0xff] %v10204_v40  ;;  %8374 = vmatprep.subr.bf16.mxu1 %v10204_v40 }
 0x11c   : > { %19189 = vst [vmem:[#allocation48_spill] sm:$0xff] %v10180_v35  ;;  %v10188_v38 = vpop.permute.xlu0 %1541  ;;  %2855 = vperm.xlu1 %8563, %v2728_v29   ;;  %v1784_v29 = vrot.slane %v19194_v54, 6  ;;  %8382 = vmatpush3.bf16.msra.mxu1 %v10204_v40  ;;  %v19200_v40 = vld [vmem:[#allocation15_spill] sm:$0xff] }
 0x11d   : > { %19190 = vst [vmem:[#allocation49_spill] sm:$0xff] %v10188_v38  ;;  %2852 = vperm.xlu0 %8562, %v2727_v3   ;;  %v2732_v3 = vsel %vm1885_vm3, 1, %v19157_v19  ;;  %v1787_v63 = vrot.slane %v19200_v40, 6  ;;  %8375 = vmatprep.subr.bf16.mxu1 %v10230_v14  ;;  %v10353_v38 = vld [vmem:[%s18348_s0 + $0x58] sm:$0xff] }
 0x11e   : > { %v1796_v5 = vsel %vm1791_vm6, %v1783_v21, %v1784_v29 }
 0x11f   : > { %v10197_v20 = vpop.permute.xlu1 %1550  ;;  %vm1891_vm10 = vcmp.eq.s32.totalorder %v1796_v5, %v19194_v54 }
 0x120   : > { %19191 = vst [vmem:[#allocation50_spill] sm:$0xff] %v10197_v20  ;;  %v10206_v22 = vpop.permute.xlu0 %1547  ;;  %2861 = vperm.xlu1 %8563, %v2730_v41   ;;  %v19197_v41 = vld [vmem:[#allocation13_spill] sm:$0xff]  ;;  %8383 = vmatpush3.bf16.msra.mxu1 %v10230_v14 }
 0x121   : > { %19193 = vst [vmem:[#allocation52_spill] sm:$0xff] %v10206_v22  ;;  %2858 = vperm.xlu0 %8562, %v2729_v16   ;;  %v1785_v62 = vrot.slane %v19197_v41, 6  ;;  %v19198_v16 = vld [vmem:[#allocation12_spill] sm:$0xff]  ;;  %19199 = vst [vmem:[#allocation13_spill] sm:$0xff] %v10230_v14  ;;  %8376 = vmatprep.subr.bf16.mxu1 %v10272_v9  ;;  %v2737_v22 = vsel %vm1890_vm11, 1, %v19157_v19 }
 0x122   : > { %v1786_v34 = vrot.slane %v19198_v16, 6 }
 0x123   : > { %v10219_v61 = vpop.permute.xlu1 %1556  ;;  %v1795_v18 = vsel %vm1791_vm6, %v1784_v29, %v1785_v62  ;;  %v8918_v29 = vld [vmem:[%s18348_s0 + $0x8] sm:$0xff] }
 0x124   : > { %19195 = vst [vmem:[#allocation11_spill] sm:$0xff] %v10219_v61  ;;  %v10224_v36 = vpop.permute.xlu0 %1553  ;;  %2867 = vperm.xlu1 %8563, %v2732_v3   ;;  %v19201_v3 = vld [vmem:[#allocation14_spill] sm:$0xff]  ;;  %v1794_v21 = vsel %vm1791_vm6, %v1785_v62, %v1786_v34  ;;  %v1896_v62 = vrot.slane %v8918_v29, 7  ;;  %vm1892_vm14 = vcmp.eq.s32.totalorder %v1795_v18, %v19197_v41  ;;  %8384 = vmatpush3.bf16.msra.mxu1 %v10272_v9 }
 0x125   : > { %19196 = vst [vmem:[#allocation53_spill] sm:$0xff] %v10224_v36  ;;  %2864 = vperm.xlu0 %8562, %v2731_v51   ;;  %v1788_v8 = vrot.slane %v19201_v3, 6  ;;  %v2735_v51 = vsel %vm1888_vm9, 1, %v19157_v19  ;;  %19204 = vst [vmem:[#allocation14_spill] sm:$0xff] %v10272_v9  ;;  %v10287_v36 = vld [vmem:[%s18348_s0 + $0x28] sm:$0xff]  ;;  %vm1893_vm13 = vcmp.eq.s32.totalorder %v1794_v21, %v19198_v16  ;;  %v10391_v21 = vld [vmem:[%s18348_s0 + $0x60] sm:$0xff] }
 0x126   : > { %v1900_v42 = vrot.slane %v10287_v36, 7  ;;  %v2001_v54 = vsel %vm1949_vm12, %v1896_v62, %v1897_v48  ;;  %v10335_v9 = vld [vmem:[%s18348_s0 + $0x48] sm:$0xff]  ;;  %v1907_v18 = vrot.slane %v10391_v21, 7 }
 0x127   : > { %v10239_v26 = vpop.permute.xlu1 %1562  ;;  %v1792_v15 = vsel %vm1791_vm6, %v1787_v63, %v1788_v8  ;;  %v10295_v8 = vld [vmem:[%s18348_s0 + $0x30] sm:$0xff]  ;;  %vm2002_vm2 = vcmp.eq.s32.totalorder %v2001_v54, %v10259_v28 }
 0x128   : > { %19202 = vst [vmem:[#allocation12_spill] sm:$0xff] %v10239_v26  ;;  %v10249_v53 = vpop.permute.xlu0 %1559  ;;  %2873 = vperm.xlu1 %8563, %v2734_v6   ;;  %v10265_v6 = vld [vmem:[%s18348_s0 + $0x18] sm:$0xff]  ;;  %vm1895_vm15 = vcmp.eq.s32.totalorder %v1792_v15, %v19201_v3 }
 0x129   : > { %19203 = vst [vmem:[#allocation15_spill] sm:$0xff] %v10249_v53  ;;  %2870 = vperm.xlu0 %8562, %v2733_v39   ;;  %v1898_v14 = vrot.slane %v10265_v6, 7  ;;  %v1793_v39 = vsel %vm1791_vm6, %v1786_v34, %v1787_v63  ;;  %v10281_v53 = vld [vmem:[%s18348_s0 + $0x20] sm:$0xff]  ;;  %v1901_v63 = vrot.slane %v10295_v8, 7  ;;  %v10301_v34 = vld [vmem:[%s18348_s0 + $0x38] sm:$0xff]  ;;  %v2742_v55 = vsel %vm1895_vm15, 1, %v19157_v19 }
 0x12a   : > { %v1899_v26 = vrot.slane %v10281_v53, 7  ;;  %19206 = vst [vmem:[#allocation55_spill] sm:$0xff] %v10301_v34  ;;  %v1902_v29 = vrot.slane %v10301_v34, 7  ;;  %vm1894_vm0 = vcmp.eq.s32.totalorder %v1793_v39, %v19200_v40  ;;  %v10397_v39 = vld [vmem:[%s18348_s0 + $0x68] sm:$0xff] }
 0x12b   : > { %v10290_v2 = vpop.permute.xlu1 %1568  ;;  %v2741_v52 = vsel %vm1894_vm0, 1, %v19157_v19 }
 0x12c   : > { %19205 = vst [vmem:[#allocation54_spill] sm:$0xff] %v10290_v2  ;;  %v10305_v61 = vpop.permute.xlu0 %1565  ;;  %2879 = vperm.xlu1 %8563, %v2736_v46   ;;  %v2738_v2 = vsel %vm1891_vm10, 1, %v19157_v19  ;;  %v2000_v46 = vsel %vm1949_vm12, %v1897_v48, %v1898_v14  ;;  %v1998_v45 = vsel %vm1949_vm12, %v1899_v26, %v1900_v42  ;;  %v1999_v5 = vsel %vm1949_vm12, %v1898_v14, %v1899_v26  ;;  %v10347_v14 = vld [vmem:[%s18348_s0 + $0x50] sm:$0xff] }
 0x12d   : > { %19207 = vst [vmem:[#allocation56_spill] sm:$0xff] %v10305_v61  ;;  %2876 = vperm.xlu0 %8562, %v2735_v51   ;;  %v1903_v51 = vrot.slane %v10329_v25, 7  ;;  %v1904_v48 = vrot.slane %v10335_v9, 7  ;;  %v1996_v61 = vsel %vm1949_vm12, %v1901_v63, %v1902_v29  ;;  %v1997_v26 = vsel %vm1949_vm12, %v1900_v42, %v1901_v63 }
 0x12e   : > { %v1905_v20 = vrot.slane %v10347_v14, 7  ;;  %v2740_v42 = vsel %vm1893_vm13, 1, %v19157_v19  ;;  %v2739_v63 = vsel %vm1892_vm14, 1, %v19157_v19  ;;  %vm2003_vm1 = vcmp.eq.s32.totalorder %v2000_v46, %v10265_v6 }
 0x12f   : > { %v10338_v62 = vpop.permute.xlu1 %1574  ;;  %vm2005_vm3 = vcmp.eq.s32.totalorder %v1998_v45, %v10287_v36  ;;  %vm2004_vm4 = vcmp.eq.s32.totalorder %v1999_v5, %v10281_v53  ;;  %vm2007_vm5 = vcmp.eq.s32.totalorder %v1996_v61, %v10301_v34  ;;  %vm2006_vm7 = vcmp.eq.s32.totalorder %v1997_v26, %v10295_v8 }
 0x130   : > { %19208 = vst [vmem:[#allocation57_spill] sm:$0xff] %v10338_v62  ;;  %v1906_v62 = vrot.slane %v10353_v38, 7  ;;  %v10356_v35 = vpop.permute.xlu0 %1571  ;;  %2885 = vperm.xlu1 %8563, %v2738_v2   ;;  %v1994_v15 = vsel %vm1949_vm12, %v1903_v51, %v1904_v48  ;;  %v1995_v40 = vsel %vm1949_vm12, %v1902_v29, %v1903_v51  ;;  %v1993_v16 = vsel %vm1949_vm12, %v1904_v48, %v1905_v20  ;;  %v10409_v51 = vld [vmem:[%s18348_s0 + $0x78] sm:$0xff] }
 0x131   : > { %19209 = vst [vmem:[#allocation58_spill] sm:$0xff] %v10356_v35  ;;  %2882 = vperm.xlu0 %8562, %v2737_v22   ;;  %v1908_v2 = vrot.slane %v10397_v39, 7  ;;  %v1910_v48 = vrot.slane %v10409_v51, 7  ;;  %v3163_v6 = vsel %vm2005_vm3, 1, %v19157_v19  ;;  %v3162_v28 = vsel %vm2004_vm4, 1, %v19157_v19 }
 0x132   : > { %v1992_v41 = vsel %vm1949_vm12, %v1905_v20, %v1906_v62  ;;  %v10403_v20 = vld [vmem:[%s18348_s0 + $0x70] sm:$0xff]  ;;  %v10439_v46 = vsel %vm2007_vm5, 1, %v19157_v19  ;;  %v10444_v54 = vsel %vm2006_vm7, 1, %v19157_v19  ;;  %vm2009_vm8 = vcmp.eq.s32.totalorder %v1994_v15, %v10335_v9 }
 0x133   : > { %v10376_v22 = vpop.permute.xlu1 %1580  ;;  %v1909_v29 = vrot.slane %v10403_v20, 7  ;;  %vm2008_vm9 = vcmp.eq.s32.totalorder %v1995_v40, %v10329_v25  ;;  %vm2011_vm10 = vcmp.eq.s32.totalorder %v1992_v41, %v10353_v38  ;;  %vm2010_vm11 = vcmp.eq.s32.totalorder %v1993_v16, %v10347_v14 }
 0x134   : > { %19210 = vst [vmem:[#allocation59_spill] sm:$0xff] %v10376_v22  ;;  %v10386_v3 = vpop.permute.xlu0 %1577  ;;  %2891 = vperm.xlu1 %8563, %v2740_v42   ;;  %v3161_v42 = vsel %vm2003_vm1, 1, %v19157_v19  ;;  %v10421_v22 = vld [vmem:[%s18348_s0 + $0x80] sm:$0xff]  ;;  %v1990_v61 = vsel %vm1949_vm12, %v1907_v18, %v1908_v2  ;;  %v1991_v53 = vsel %vm1949_vm12, %v1906_v62, %v1907_v18  ;;  %v10475_v18 = vld [vmem:[%s18348_s0 + $0x98] sm:$0xff]  ;;  %v10502_v40 = vsel %vm2011_vm10, 1, %v19157_v19 }
 0x135   : > { %19211 = vst [vmem:[#allocation60_spill] sm:$0xff] %v10386_v3  ;;  %2888 = vperm.xlu0 %8562, %v2739_v63   ;;  %v3160_v3 = vsel %vm2002_vm2, 1, %v19157_v19  ;;  %v1911_v35 = vrot.slane %v10421_v22, 7  ;;  %v1912_v63 = vrot.slane %v10427_v43, 7  ;;  %v1988_v8 = vsel %vm1949_vm12, %v1909_v29, %v1910_v48  ;;  %19214 = vst [vmem:[#allocation63_spill] sm:$0xff] %v10475_v18 }
 0x136   : > { %v1989_v45 = vsel %vm1949_vm12, %v1908_v2, %v1909_v29  ;;  %v10481_v2 = vsel %vm2009_vm8, 1, %v19157_v19  ;;  %v10491_v29 = vld [vmem:[%s18348_s0 + $0xa0] sm:$0xff]  ;;  %v10507_v24 = vsel %vm2010_vm11, 1, %v19157_v19  ;;  %vm2013_vm13 = vcmp.eq.s32.totalorder %v1990_v61, %v10397_v39 }
 0x137   : > { %v10446_v7 = vpop.permute.xlu1 %1586  ;;  %v1986_v5 = vsel %vm1949_vm12, %v1911_v35, %v1912_v63  ;;  %v1987_v26 = vsel %vm1949_vm12, %v1910_v48, %v1911_v35  ;;  %v10486_v35 = vsel %vm2008_vm9, 1, %v19157_v19  ;;  %v1915_v48 = vrot.slane %v10491_v29, 7 }
 0x138   : > { %19212 = vst [vmem:[#allocation61_spill] sm:$0xff] %v10446_v7  ;;  %v10452_v36 = vpop.permute.xlu0 %1583  ;;  %2897 = vperm.xlu1 %8563, %v2742_v55   ;;  %v10469_v55 = vld [vmem:[%s18348_s0 + $0x90] sm:$0xff]  ;;  %vm2012_vm14 = vcmp.eq.s32.totalorder %v1991_v53, %v10391_v21  ;;  %vm2015_vm15 = vcmp.eq.s32.totalorder %v1988_v8, %v10409_v51  ;;  %vm2014_vm0 = vcmp.eq.s32.totalorder %v1989_v45, %v10403_v20  ;;  %v10551_v10 = vsel %vm2013_vm13, 1, %v19157_v19 }
 0x139   : > { %19213 = vst [vmem:[#allocation62_spill] sm:$0xff] %v10452_v36  ;;  %2894 = vperm.xlu0 %8562, %v2741_v52   ;;  %v1913_v62 = vrot.slane %v10469_v55, 7  ;;  %v1914_v52 = vrot.slane %v10475_v18, 7  ;;  %v8936_v36 = vld [vmem:[%s18348_s0 + $0xa8] sm:$0xff]  ;;  %vm2017_vm1 = vcmp.eq.s32.totalorder %v1986_v5, %v10427_v43  ;;  %vm2016_vm2 = vcmp.eq.s32.totalorder %v1987_v26, %v10421_v22  ;;  %v10594_v26 = vld [vmem:[%s18348_s0 + $0xd0] sm:$0xff] }
 0x13a   : > { %v1916_v7 = vrot.slane %v8936_v36, 7  ;;  %v10566_v1 = vsel %vm2014_vm0, 1, %v19157_v19  ;;  %v10573_v61 = vsel %vm2017_vm1, 1, %v19157_v19  ;;  %v10578_v53 = vsel %vm2016_vm2, 1, %v19157_v19 }
 0x13b   : > { %v10497_v15 = vpop.permute.xlu1 %1592  ;;  %v1984_v41 = vsel %vm1949_vm12, %v1913_v62, %v1914_v52  ;;  %v1985_v16 = vsel %vm1949_vm12, %v1912_v63, %v1913_v62  ;;  %v1983_v63 = vsel %vm1949_vm12, %v1914_v52, %v1915_v48  ;;  %v8939_v62 = vld [vmem:[%s18348_s0 + $0xc0] sm:$0xff]  ;;  %v10556_v52 = vsel %vm2012_vm14, 1, %v19157_v19 }
 0x13c   : > { %19215 = vst [vmem:[#allocation64_spill] sm:$0xff] %v10497_v15  ;;  %v10511_v30 = vpop.permute.xlu0 %1589  ;;  %3216 = vperm.xlu1 %8563, %v3161_v42   ;;  %v10530_v15 = vld [vmem:[%s18348_s0 + $0xb8] sm:$0xff]  ;;  %v1982_v58 = vsel %vm1949_vm12, %v1915_v48, %v1916_v7  ;;  %v1919_v37 = vrot.slane %v8939_v62, 7  ;;  %v10561_v48 = vsel %vm2015_vm15, 1, %v19157_v19  ;;  %vm2019_vm3 = vcmp.eq.s32.totalorder %v1984_v41, %v10475_v18 }
 0x13d   : > { %19216 = vst [vmem:[#allocation65_spill] sm:$0xff] %v10511_v30  ;;  %3213 = vperm.xlu0 %8562, %v3160_v3   ;;  %v10524_v30 = vld [vmem:[%s18348_s0 + $0xb0] sm:$0xff]  ;;  %v1918_v3 = vrot.slane %v10530_v15, 7  ;;  %vm2018_vm4 = vcmp.eq.s32.totalorder %v1985_v16, %v10469_v55  ;;  %vm2021_vm5 = vcmp.eq.s32.totalorder %v1982_v58, %v8936_v36  ;;  %vm2020_vm7 = vcmp.eq.s32.totalorder %v1983_v63, %v10491_v29  ;;  %v8948_v58 = vld [vmem:[%s18348_s0 + $0x108] sm:$0xff] }
 0x13e   : > { %v1917_v42 = vrot.slane %v10524_v30, 7  ;;  %v1978_v45 = vsel %vm1949_vm12, %v1919_v37, %v1920_v47  ;;  %v10635_v4 = vsel %vm2019_vm3, 1, %v19157_v19  ;;  %v10640_v57 = vsel %vm2018_vm4, 1, %v19157_v19 }
 0x13f   : > { %v10546_v31 = vpop.permute.xlu1 %1598  ;;  %v1979_v5 = vsel %vm1949_vm12, %v1918_v3, %v1919_v37  ;;  %v10608_v37 = vld [vmem:[%s18348_s0 + $0xe0] sm:$0xff]  ;;  %v10644_v32 = vsel %vm2021_vm5, 1, %v19157_v19  ;;  %v1928_v36 = vrot.slane %v8948_v58, 7  ;;  %v10661_v16 = vsel %vm2020_vm7, 1, %v19157_v19 }
 0x140   : > { %19217 = vst [vmem:[#allocation66_spill] sm:$0xff] %v10546_v31  ;;  %v10568_v31 = vpop.permute.xlu0 %1595  ;;  %3222 = vperm.xlu1 %8563, %v3163_v6   ;;  %v1980_v6 = vsel %vm1949_vm12, %v1917_v42, %v1918_v3  ;;  %v1981_v8 = vsel %vm1949_vm12, %v1916_v7, %v1917_v42  ;;  %v1923_v3 = vrot.slane %v10608_v37, 7  ;;  %vm2024_vm10 = vcmp.eq.s32.totalorder %v1979_v5, %v8939_v62  ;;  %v10722_v62 = vld [vmem:[%s18348_s0 + $0x118] sm:$0xff]  ;;  %v10734_v5 = vld [vmem:[%s18348_s0 + $0x128] sm:$0xff] }
 0x141   : > { %19218 = vst [vmem:[#allocation67_spill] sm:$0xff] %v10568_v31  ;;  %3219 = vperm.xlu0 %8562, %v3162_v28   ;;  %v1921_v28 = vrot.slane %v10594_v26, 7  ;;  %v10600_v31 = vld [vmem:[%s18348_s0 + $0xd8] sm:$0xff]  ;;  %vm2023_vm8 = vcmp.eq.s32.totalorder %v1980_v6, %v10530_v15  ;;  %vm2022_vm9 = vcmp.eq.s32.totalorder %v1981_v8, %v10524_v30  ;;  %vm2025_vm11 = vcmp.eq.s32.totalorder %v1978_v45, %v10543_v13  ;;  %v10728_v8 = vld [vmem:[%s18348_s0 + $0x120] sm:$0xff] }
 0x142   : > { %v1922_v7 = vrot.slane %v10600_v31, 7  ;;  %v1974_v60 = vsel %vm1949_vm12, %v1923_v3, %v1924_v0  ;;  %v10705_v15 = vsel %vm2025_vm11, 1, %v19157_v19  ;;  %v1930_v6 = vrot.slane %v10722_v62, 7 }
 0x143   : > { %v10603_v42 = vpop.permute.xlu1 %1604  ;;  %vm2029_vm15 = vcmp.eq.s32.totalorder %v1974_v60, %v10614_v33  ;;  %v1931_v45 = vrot.slane %v10728_v8, 7  ;;  %vm2107_vm7 = vcmp.lt.s32.totalorder %v9872_v59, 7 }
 0x144   : > { %19219 = vst [vmem:[#allocation68_spill] sm:$0xff] %v10603_v42  ;;  %v1925_v42 = vrot.slane %v10620_v44, 7  ;;  %v10629_v49 = vpop.permute.xlu0 %1601  ;;  %3228 = vperm.xlu1 %8563, %v10439_v46   ;;  %v10652_v46 = vld [vmem:[%s18348_s0 + $0x100] sm:$0xff]  ;;  %v1975_v50 = vsel %vm1949_vm12, %v1922_v7, %v1923_v3 }
 0x145   : > { %19220 = vst [vmem:[#allocation69_spill] sm:$0xff] %v10629_v49  ;;  %3225 = vperm.xlu0 %8562, %v10444_v54   ;;  %v1927_v41 = vrot.slane %v10652_v46, 7  ;;  %v1976_v54 = vsel %vm1949_vm12, %v1921_v28, %v1922_v7  ;;  %v1977_v49 = vsel %vm1949_vm12, %v1920_v47, %v1921_v28  ;;  %v10684_v47 = vsel %vm2023_vm8, 1, %v19157_v19 }
 0x146   : > { %v1972_v29 = vsel %vm1949_vm12, %v1925_v42, %v1926_v12  ;;  %v1973_v63 = vsel %vm1949_vm12, %v1924_v0, %v1925_v42  ;;  %v10689_v28 = vsel %vm2022_vm9, 1, %v19157_v19  ;;  %v10693_v7 = vsel %vm2024_vm10, 1, %v19157_v19  ;;  %v10698_v0 = vld [vmem:[%s18348_s0 + $0x110] sm:$0xff] }
 0x147   : > { %v10668_v18 = vpop.permute.xlu1 %1610  ;;  %vm2027_vm13 = vcmp.eq.s32.totalorder %v1976_v54, %v10600_v31  ;;  %vm2026_vm14 = vcmp.eq.s32.totalorder %v1977_v49, %v10594_v26  ;;  %v1970_v30 = vsel %vm1949_vm12, %v1927_v41, %v1928_v36  ;;  %vm2028_vm0 = vcmp.eq.s32.totalorder %v1975_v50, %v10608_v37 }
 0x148   : > { %19221 = vst [vmem:[#allocation70_spill] sm:$0xff] %v10668_v18  ;;  %v10678_v17 = vpop.permute.xlu0 %1607  ;;  %3234 = vperm.xlu1 %8563, %v10481_v2   ;;  %v1929_v2 = vrot.slane %v10698_v0, 7  ;;  %vm2031_vm1 = vcmp.eq.s32.totalorder %v1972_v29, %v10626_v56  ;;  %vm2030_vm2 = vcmp.eq.s32.totalorder %v1973_v63, %v10620_v44  ;;  %v1971_v13 = vsel %vm1949_vm12, %v1926_v12, %v1927_v41  ;;  %v10745_v41 = vld [vmem:[%s18348_s0 + $0x130] sm:$0xff]  ;;  %v8956_v29 = vld [vmem:[%s18348_s0 + $0x148] sm:$0xff] }
 0x149   : > { %19222 = vst [vmem:[#allocation71_spill] sm:$0xff] %v10678_v17  ;;  %3231 = vperm.xlu0 %8562, %v10486_v35   ;;  %v1932_v12 = vrot.slane %v10734_v5, 7  ;;  %vm2033_vm3 = vcmp.eq.s32.totalorder %v1970_v30, %v8948_v58  ;;  %v8954_v17 = vld [vmem:[%s18348_s0 + $0x138] sm:$0xff]  ;;  %v10773_v31 = vsel %vm2029_vm15, 1, %v19157_v19  ;;  %v10778_v49 = vsel %vm2031_vm1, 1, %v19157_v19 }
 0x14a   : > { %v1969_v3 = vsel %vm1949_vm12, %v1928_v36, %v1929_v2  ;;  %v1934_v18 = vrot.slane %v8954_v17, 7  ;;  %v10760_v36 = vsel %vm2026_vm14, 1, %v19157_v19  ;;  %v10783_v50 = vsel %vm2030_vm2, 1, %v19157_v19 }
 0x14b   : > { %v10715_v35 = vpop.permute.xlu1 %1616  ;;  %vm2032_vm4 = vcmp.eq.s32.totalorder %v1971_v13, %v10652_v46  ;;  %v10790_v37 = vsel %vm2033_vm3, 1, %v19157_v19  ;;  %v1968_v60 = vsel %vm1949_vm12, %v1929_v2, %v1930_v6  ;;  %vm2034_vm5 = vcmp.eq.s32.totalorder %v1969_v3, %v10698_v0 }
 0x14c   : > { %19223 = vst [vmem:[#allocation72_spill] sm:$0xff] %v10715_v35  ;;  %v10737_v42 = vpop.permute.xlu0 %1613  ;;  %3240 = vperm.xlu1 %8563, %v10502_v40   ;;  %v1933_v35 = vrot.slane %v10745_v41, 7  ;;  %v10755_v40 = vsel %vm2027_vm13, 1, %v19157_v19  ;;  %v1966_v56 = vsel %vm1949_vm12, %v1931_v45, %v1932_v12  ;;  %v1967_v44 = vsel %vm1949_vm12, %v1930_v6, %v1931_v45  ;;  %v10817_v6 = vld [vmem:[%s18348_s0 + $0x150] sm:$0xff] }
 0x14d   : > { %19224 = vst [vmem:[#allocation73_spill] sm:$0xff] %v10737_v42  ;;  %3237 = vperm.xlu0 %8562, %v10507_v24   ;;  %v10765_v42 = vsel %vm2028_vm0, 1, %v19157_v19  ;;  %v1935_v24 = vrot.slane %v8955_v27, 7  ;;  %v1936_v63 = vrot.slane %v8956_v29, 7  ;;  %v2060_v30 = vrot.slane %v10329_v25, 1  ;;  %19227 = vst [vmem:[#allocation76_spill] sm:$0xff] %v10817_v6 }
 0x14e   : > { %v1964_v58 = vsel %vm1949_vm12, %v1933_v35, %v1934_v18  ;;  %v1965_v54 = vsel %vm1949_vm12, %v1932_v12, %v1933_v35  ;;  %v2063_v45 = vrot.slane %v10353_v38, 1  ;;  %v2061_v12 = vrot.slane %v10335_v9, 1 }
 0x14f   : > { %v10786_v26 = vpop.permute.xlu1 %1622  ;;  %v1963_v2 = vsel %vm1949_vm12, %v1934_v18, %v1935_v24  ;;  %vm2035_vm8 = vcmp.eq.s32.totalorder %v1968_v60, %v10722_v62  ;;  %v10835_v35 = vsel %vm2034_vm5, 1, %v19157_v19  ;;  %vm2037_vm9 = vcmp.eq.s32.totalorder %v1966_v56, %v10734_v5 }
 0x150   : > { %19225 = vst [vmem:[#allocation74_spill] sm:$0xff] %v10786_v26  ;;  %v10797_v33 = vpop.permute.xlu0 %1619  ;;  %3246 = vperm.xlu1 %8563, %v10551_v10   ;;  %v10829_v10 = vsel %vm2032_vm4, 1, %v19157_v19  ;;  %19229 = vst [vmem:[#allocation78_spill] sm:$0xff] %v10835_v35  ;;  %vm2036_vm10 = vcmp.eq.s32.totalorder %v1967_v44, %v10728_v8  ;;  %vm2039_vm11 = vcmp.eq.s32.totalorder %v1964_v58, %v8954_v17  ;;  %v19230_v13 = vrot.slane %v10301_v34, 1 }
 0x151   : > { %19226 = vst [vmem:[#allocation75_spill] sm:$0xff] %v10797_v33  ;;  %3243 = vperm.xlu0 %8562, %v10556_v52   ;;  %v2064_v52 = vrot.slane %v10391_v21, 1  ;;  %vm2038_vm13 = vcmp.eq.s32.totalorder %v1965_v54, %v10745_v41  ;;  %v1962_v46 = vsel %vm1949_vm12, %v1935_v24, %v1936_v63  ;;  %vm2040_vm14 = vcmp.eq.s32.totalorder %v1963_v2, %v8955_v27  ;;  %v10902_v27 = vld [vmem:[%s18351_s3] ss:$0 sm:$0xff] }
 0x152   : > { %v2154_v0 = vsel %vm2107_vm7, %v19230_v13, %v2060_v30  ;;  %v19231_v62 = vrot.slane %v10817_v6, 7  ;;  %v2062_v3 = vrot.slane %v10347_v14, 1  ;;  %v10856_v24 = vsel %vm2035_vm8, 1, %v19157_v19 }
 0x153   : > { %v10824_v18 = vpop.permute.xlu1 %2747  ;;  %v2153_v33 = vsel %vm2107_vm7, %v2060_v30, %v2061_v12  ;;  %v2065_v13 = vrot.slane %v10397_v39, 1  ;;  %vm2041_vm15 = vcmp.eq.s32.totalorder %v1962_v46, %v8956_v29  ;;  %v10885_v30 = vsel %vm2038_vm13, 1, %v19157_v19 }
 0x154   : > { %19228 = vst [vmem:[#allocation77_spill] sm:$0xff] %v10824_v18  ;;  %3252 = vperm.xlu1 %8563, %v10561_v48   ;;  %v1961_v48 = vsel %vm1949_vm12, %v1936_v63, %v19231_v62  ;;  %v10853_v60 = vpop.permute.xlu0 %2744  ;;  %v10870_v63 = vsel %vm2037_vm9, 1, %v19157_v19  ;;  %v10875_v62 = vsel %vm2036_vm10, 1, %v19157_v19  ;;  %v10889_v5 = vsel %vm2040_vm14, 1, %v19157_v19 }
 0x155   : > { %3249 = vperm.xlu0 %8562, %v10566_v1   ;;  %19232 = vst [vmem:[#allocation79_spill] sm:$0xff] %v10853_v60  ;;  %v7807_v18 = vpop.f32.mrb[0].mxu0  ;;  %v2150_v1 = vsel %vm2107_vm7, %v2063_v45, %v2064_v52  ;;  %v10879_v60 = vsel %vm2039_vm11, 1, %v19157_v19  ;;  %vm2165_vm0 = vcmp.eq.s32.totalorder %v2154_v0, %v10301_v34  ;;  %vm2042_vm1 = vcmp.eq.s32.totalorder %v1961_v48, %v10817_v6 }
 0x156   : > { %v10865_v35 = vpop.f32.mrb[1].mxu0  ;;  %vm2169_vm2 = vcmp.eq.s32.totalorder %v2150_v1, %v10353_v38  ;;  %vm2166_vm3 = vcmp.eq.s32.totalorder %v2153_v33, %v10329_v25  ;;  %v2152_v17 = vsel %vm2107_vm7, %v2061_v12, %v2062_v3  ;;  %v10905_v41 = vsel %vm2041_vm15, 1, %v19157_v19 }
 0x157   : > { %v10863_v26 = vpop.permute.xlu1 %2753  ;;  %v2218_v56 = vrot.slane %v10329_v25, 2  ;;  %v18452_v44 = vrot.slane %v10335_v9, 2  ;;  %v10919_v2 = vsel %vm2165_vm0, 1, %v19157_v19  ;;  %v10924_v12 = vsel %vm2042_vm1, 1, %v19157_v19 }
 0x158   : > { %19233 = vst [vmem:[#allocation80_spill] sm:$0xff] %v10863_v26  ;;  %3258 = vperm.xlu1 %8563, %v10573_v61   ;;  %v18450_v61 = vrot.slane %v10403_v20, 1  ;;  %vm2265_vm4 = vcmp.lt.s32.totalorder %v9872_v59, 6  ;;  %v10936_v0 = vsel %vm2169_vm2, 1, %v19157_v19  ;;  %v10941_v48 = vsel %vm2166_vm3, 1, %v19157_v19 }
 0x159   : > { %3255 = vperm.xlu0 %8562, %v10578_v53   ;;  %v7810_v8 = vpop.f32.mrb[2].mxu0  ;;  %v2149_v53 = vsel %vm2107_vm7, %v2064_v52, %v2065_v13  ;;  %v10927_v52 = vpop.permute.xlu0 %2750  ;;  %vm2167_vm5 = vcmp.eq.s32.totalorder %v2152_v17, %v10335_v9  ;;  %v2222_v6 = vrot.slane %v10391_v21, 2 }
 0x15a   : > { %v10912_v58 = vadd.f32 %v7810_v8, %v10902_v27  ;;  %v458_v29 = vpop.f32.mrb[3].mxu0  ;;  %19235 = vst [vmem:[#allocation82_spill] sm:$0xff] %v10927_v52  ;;  %vm2170_vm8 = vcmp.eq.s32.totalorder %v2149_v53, %v10391_v21  ;;  %v2148_v1 = vsel %vm2107_vm7, %v2065_v13, %v18450_v61  ;;  %v2311_v52 = vsel %vm2265_vm4, %v2218_v56, %v18452_v44 }
 0x15b   : > { %v10914_v54 = vpop.permute.xlu1 %2759  ;;  %v10930_v46 = vadd.f32 %v10902_v27, %v458_v29  ;;  %v2223_v13 = vrot.slane %v10397_v39, 2  ;;  %v10978_v44 = vadd.f32 %v7807_v18, %v10902_v27  ;;  %vm2171_vm10 = vcmp.eq.s32.totalorder %v2148_v1, %v10397_v39 }
 0x15c   : > { %19234 = vst [vmem:[#allocation81_spill] sm:$0xff] %v10914_v54  ;;  %3264 = vperm.xlu1 %8563, %v10635_v4   ;;  %v7417_v8 = vmul.f32 -1.442695, %v10912_v58  ;;  %v2151_v4 = vsel %vm2107_vm7, %v2062_v3, %v2063_v45  ;;  %vm2324_vm11 = vcmp.eq.s32.totalorder %v2311_v52, %v10329_v25  ;;  %v19241_v18 = vrot.slane %v10301_v34, 2 }
 0x15d   : > { %3261 = vperm.xlu0 %8562, %v10640_v57   ;;  %v7416_v33 = vmul.f32 -1.442695, %v10930_v46  ;;  %v7813_v29 = vpop.f32.mrb[4].mxu0  ;;  %19238 = vst [vmem:[#allocation85_spill] sm:$0xff] %v10978_v44  ;;  %vm2168_vm9 = vcmp.eq.s32.totalorder %v2151_v4, %v10347_v14 }
 0x15e   : > { %8564 = vpow2.f32 %v7417_v8  ;;  %v10961_v45 = vadd.f32 %v7813_v29, %v10902_v27  ;;  %v468_v54 = vpop.f32.mrb[5].mxu0  ;;  %v10974_v8 = vsel %vm2167_vm5, 1, %v19157_v19 }
 0x15f   : > { %v10963_v3 = vpop.permute.xlu1 %2765  ;;  %8566 = vpow2.f32 %v7416_v33  ;;  %v10968_v26 = vadd.f32 %v10902_v27, %v468_v54  ;;  %19237 = vst [vmem:[#allocation84_spill] sm:$0xff] %v10974_v8  ;;  %v10985_v54 = vsel %vm2170_vm8, 1, %v19157_v19 }
 0x160   : > { %19236 = vst [vmem:[#allocation83_spill] sm:$0xff] %v10963_v3  ;;  %3270 = vperm.xlu1 %8563, %v10644_v32   ;;  %v7419_v57 = vmul.f32 -1.442695, %v10961_v45  ;;  %19239 = vst [vmem:[#allocation86_spill] sm:$0xff] %v10985_v54  ;;  %v10988_v32 = vpop.permute.xlu0 %2756  ;;  %v2307_v3 = vsel %vm2265_vm4, %v2222_v6, %v2223_v13 }
 0x161   : > { %3267 = vperm.xlu0 %8562, %v10661_v16   ;;  %19240 = vst [vmem:[#allocation87_spill] sm:$0xff] %v10988_v32  ;;  %v7418_v17 = vmul.f32 -1.442695, %v10968_v26  ;;  %v7816_v33 = vpop.f32.mrb[6].mxu0  ;;  %v2312_v16 = vsel %vm2265_vm4, %v19241_v18, %v2218_v56  ;;  %v19243_v32 = vrot.slane %v10353_v38, 2  ;;  %v19244_v56 = vrot.slane %v10403_v20, 2 }
 0x162   : > { %8568 = vpow2.f32 %v7419_v57  ;;  %v10998_v53 = vadd.f32 %v7816_v33, %v10902_v27  ;;  %v478_v61 = vpop.f32.mrb[7].mxu0  ;;  %v2220_v33 = vrot.slane %v10347_v14, 2  ;;  %v7415_v18 = vmul.f32 -1.442695, %v10978_v44 }
 0x163   : > { %v11000_v29 = vpop.permute.xlu1 %2771  ;;  %v2308_v54 = vsel %vm2265_vm4, %v19243_v32, %v2222_v6  ;;  %8570 = vpow2.f32 %v7418_v17  ;;  %v11009_v8 = vadd.f32 %v10902_v27, %v478_v61  ;;  %v2306_v57 = vsel %vm2265_vm4, %v2223_v13, %v19244_v56 }
 0x164   : > { %19242 = vst [vmem:[#allocation88_spill] sm:$0xff] %v11000_v29  ;;  %3276 = vperm.xlu1 %8563, %v10684_v47   ;;  %v7421_v29 = vmul.f32 -1.442695, %v10998_v53  ;;  %v11023_v6 = vsel %vm2168_vm9, 1, %v19157_v19  ;;  %vm2323_vm13 = vcmp.eq.s32.totalorder %v2312_v16, %v10301_v34  ;;  %v11030_v13 = vsel %vm2171_vm10, 1, %v19157_v19  ;;  %v11057_v52 = vpop.permute.xlu0 %2762 }
 0x165   : > { %3273 = vperm.xlu0 %8562, %v10689_v28   ;;  %v7420_v47 = vmul.f32 -1.442695, %v11009_v8  ;;  %v7819_v61 = vpop.f32.mrb[8].mxu0  ;;  %19245 = vst [vmem:[#allocation89_spill] sm:$0xff] %v11030_v13  ;;  %vm2328_vm14 = vcmp.eq.s32.totalorder %v2307_v3, %v10391_v21  ;;  %vm2327_vm15 = vcmp.eq.s32.totalorder %v2308_v54, %v10353_v38  ;;  %v11042_v17 = vsel %vm2324_vm11, 1, %v19157_v19  ;;  %19250 = vst [vmem:[#allocation93_spill] sm:$0xff] %v11057_v52 }
 0x166   : > { %8572 = vpow2.f32 %v7421_v29  ;;  %v11035_v28 = vadd.f32 %v7819_v61, %v10902_v27  ;;  %v488_v32 = vpop.f32.mrb[9].mxu0  ;;  %19247 = vst [vmem:[#allocation91_spill] sm:$0xff] %v11042_v17  ;;  %vm2329_vm0 = vcmp.eq.s32.totalorder %v2306_v57, %v10397_v39  ;;  %v11050_v29 = vsel %vm2323_vm13, 1, %v19157_v19  ;;  %v19279_v17 = vld [vmem:[#allocation21_spill] sm:$0xff] }
 0x167   : > { %v11037_v4 = vpop.permute.xlu1 %2777  ;;  %v11046_v1 = vadd.f32 %v10902_v27, %v488_v32  ;;  %19248 = vst [vmem:[#allocation92_spill] sm:$0xff] %v11050_v29  ;;  %v19249_v16 = vrot.slane %v10335_v9, 2  ;;  %8574 = vpow2.f32 %v7415_v18  ;;  %v11069_v32 = vsel %vm2327_vm15, 1, %v19157_v19 }
 0x168   : > { %19246 = vst [vmem:[#allocation90_spill] sm:$0xff] %v11037_v4  ;;  %3282 = vperm.xlu1 %8563, %v10705_v15   ;;  %v8565_v25 = vpop.eup %8564  ;;  %v7423_v34 = vmul.f32 -1.442695, %v11035_v28  ;;  %v11064_v15 = vsel %vm2328_vm14, 1, %v19157_v19  ;;  %19252 = vst [vmem:[#allocation95_spill] sm:$0xff] %v11069_v32  ;;  %8576 = vpow2.f32 %v7420_v47  ;;  %v19255_v39 = vrot.slane %v10353_v38, 2 }
 0x169   : > { %v2310_v56 = vsel %vm2265_vm4, %v19249_v16, %v2220_v33  ;;  %3279 = vperm.xlu0 %8562, %v10693_v7   ;;  %19251 = vst [vmem:[#allocation94_spill] sm:$0xff] %v11064_v15  ;;  %v8567_v16 = vpop.eup %8566  ;;  %v898_v61 = vadd.f32 1.0, %v8565_v25  ;;  %v7422_v18 = vmul.f32 -1.442695, %v11046_v1  ;;  %v7822_v4 = vpop.f32.mrb[10].mxu0  ;;  %v11075_v7 = vsel %vm2329_vm0, 1, %v19157_v19 }
 0x16a   : > { %19253 = vst [vmem:[#allocation96_spill] sm:$0xff] %v11075_v7  ;;  %v897_v52 = vadd.f32 1.0, %v8567_v16  ;;  %8578 = vpow2.f32 %v7423_v34  ;;  %v11078_v21 = vadd.f32 %v7822_v4, %v10902_v27  ;;  %v498_v54 = vpop.f32.mrb[11].mxu0  ;;  %vm2325_vm1 = vcmp.eq.s32.totalorder %v2310_v56, %v10335_v9  ;;  %v19274_v32 = vld [vmem:[#allocation22_spill] sm:$0xff] }
 0x16b   : > { %v11080_v3 = vpop.permute.xlu1 %2783  ;;  %8580 = vrcp.f32 %v898_v61  ;;  %v11084_v47 = vadd.f32 %v10902_v27, %v498_v54  ;;  %v2309_v57 = vsel %vm2265_vm4, %v2220_v33, %v19255_v39  ;;  %v19256_v34 = vrot.slane %v10409_v51, 1 }
 0x16c   : > { %19254 = vst [vmem:[#allocation97_spill] sm:$0xff] %v11080_v3  ;;  %3288 = vperm.xlu1 %8563, %v10755_v40   ;;  %v19257_v4 = vrot.slane %v10403_v20, 1  ;;  %v8569_v16 = vpop.eup %8568  ;;  %8582 = vrcp.f32 %v897_v52  ;;  %v7425_v61 = vmul.f32 -1.442695, %v11078_v21  ;;  %v2068_v40 = vrot.slane %v10421_v22, 1  ;;  %v11106_v52 = vpop.permute.xlu0 %2768 }
 0x16d   : > { %3285 = vperm.xlu0 %8562, %v10760_v36   ;;  %v2069_v38 = vrot.slane %v10427_v43, 1  ;;  %v8571_v54 = vpop.eup %8570  ;;  %v11103_v33 = vadd.f32 %v10902_v27, %v10865_v35  ;;  %v900_v39 = vadd.f32 1.0, %v8569_v16  ;;  %8584 = vpow2.f32 %v7422_v18  ;;  %19259 = vst [vmem:[#allocation99_spill] sm:$0xff] %v11106_v52 }
 0x16e   : > { %v2147_v25 = vsel %vm2107_vm7, %v19257_v4, %v19256_v34  ;;  %v7424_v3 = vmul.f32 -1.442695, %v11084_v47  ;;  %v7825_v34 = vpop.f32.mrb[12].mxu0  ;;  %v899_v4 = vadd.f32 1.0, %v8571_v54  ;;  %8586 = vpow2.f32 %v7425_v61 }
 0x16f   : > { %19258 = vst [vmem:[#allocation98_spill] sm:$0xff] %v11103_v33  ;;  %v11109_v36 = vadd.f32 %v7825_v34, %v10902_v27  ;;  %v508_v7 = vpop.f32.mrb[13].mxu0  ;;  %v11114_v44 = vsel %vm2325_vm1, 1, %v19157_v19  ;;  %8588 = vrcp.f32 %v900_v39  ;;  %v11116_v35 = vpop.permute.xlu1 %2789  ;;  %vm2326_vm2 = vcmp.eq.s32.totalorder %v2309_v57, %v10347_v14 }
 0x170   : > { %19260 = vst [vmem:[#allocation100_spill] sm:$0xff] %v11114_v44  ;;  %19261 = vst [vmem:[#allocation101_spill] sm:$0xff] %v11116_v35  ;;  %v11119_v18 = vadd.f32 %v10902_v27, %v508_v7  ;;  %3294 = vperm.xlu1 %8563, %v10773_v31   ;;  %vm2172_vm3 = vcmp.eq.s32.totalorder %v2147_v25, %v10403_v20  ;;  %v8573_v16 = vpop.eup %8572  ;;  %8590 = vrcp.f32 %v899_v4  ;;  %v7414_v7 = vmul.f32 -1.442695, %v11103_v33  ;;  %v11151_v57 = vpop.permute.xlu0 %2774  ;;  %v19273_v33 = vld [vmem:[#allocation17_spill] sm:$0xff] }
 0x171   : > { %v7427_v61 = vmul.f32 -1.442695, %v11109_v36  ;;  %3291 = vperm.xlu0 %8562, %v10765_v42   ;;  %v2145_v9 = vsel %vm2107_vm7, %v2068_v40, %v2069_v38  ;;  %v902_v54 = vadd.f32 1.0, %v8573_v16  ;;  %8592 = vpow2.f32 %v7424_v3  ;;  %v7828_v39 = vpop.f32.mrb[14].mxu0  ;;  %v11131_v34 = vpop.eup %8574  ;;  %19264 = vst [vmem:[#allocation103_spill] sm:$0xff] %v11151_v57 }
 0x172   : > { %v7426_v31 = vmul.f32 -1.442695, %v11119_v18  ;;  %v11134_v4 = vadd.f32 %v7828_v39, %v10902_v27  ;;  %v518_v35 = vpop.f32.mrb[15].mxu0  ;;  %v11139_v42 = vsel %vm2326_vm2, 1, %v19157_v19  ;;  %v19263_v56 = vrot.slane %v10409_v51, 1  ;;  %v8577_v16 = vpop.eup %8576 }
 0x173   : > { %8594 = vpow2.f32 %v7427_v61  ;;  %19262 = vst [vmem:[#allocation102_spill] sm:$0xff] %v11139_v42  ;;  %v11146_v52 = vadd.f32 %v10902_v27, %v518_v35  ;;  %vm2174_vm5 = vcmp.eq.s32.totalorder %v2145_v9, %v10421_v22  ;;  %v2225_v61 = vrot.slane %v10409_v51, 2 }
 0x174   : > { %v2146_v3 = vsel %vm2107_vm7, %v19263_v56, %v2068_v40  ;;  %8596 = vrcp.f32 %v902_v54  ;;  %3300 = vperm.xlu1 %8563, %v10778_v49   ;;  %v8579_v39 = vpop.eup %8578  ;;  %v901_v14 = vadd.f32 1.0, %v8577_v16  ;;  %v7429_v42 = vmul.f32 -1.442695, %v11134_v4  ;;  %v11160_v56 = vpop.permute.xlu1 %2795 }
 0x175   : > { %8598 = vpow2.f32 %v7426_v31  ;;  %3297 = vperm.xlu0 %8562, %v10783_v50   ;;  %v11158_v40 = vsel %vm2172_vm3, 1, %v19157_v19  ;;  %v8581_v35 = vpop.eup %8580  ;;  %v904_v49 = vadd.f32 1.0, %v8579_v39  ;;  %19266 = vst [vmem:[#allocation105_spill] sm:$0xff] %v11160_v56  ;;  %v7428_v54 = vmul.f32 -1.442695, %v11146_v52  ;;  %v7831_v16 = vpop.f32.mrb[16].mxu0 }
 0x176   : > { %19265 = vst [vmem:[#allocation104_spill] sm:$0xff] %v11158_v40  ;;  %8600 = vpow2.f32 %v7414_v7  ;;  %v19267_v57 = vrot.slane %v10469_v55, 1  ;;  %v11167_v44 = vpop.eup %8582  ;;  %v11170_v50 = vadd.f32 %v7831_v16, %v10902_v27  ;;  %v528_v25 = vpop.f32.mrb[17].mxu0  ;;  %v11175_v7 = vsel %vm2174_vm5, 1, %v19157_v19 }
 0x177   : > { %8602 = vrcp.f32 %v901_v14  ;;  %19268 = vst [vmem:[#allocation106_spill] sm:$0xff] %v11175_v7  ;;  %vm2173_vm8 = vcmp.eq.s32.totalorder %v2146_v3, %v10409_v51  ;;  %v8585_v39 = vpop.eup %8584  ;;  %vm1627_vm9 = vcmp.eq.s32.totalorder %v9976_v23, 1  ;;  %vm1631_vm10 = vcmp.eq.s32.totalorder %v10007_v11, 1 }
 0x178   : > { %v2144_v31 = vsel %vm2107_vm7, %v2069_v38, %v19267_v57  ;;  %8604 = vrcp.f32 %v904_v49  ;;  %v11181_v38 = vadd.f32 %v10902_v27, %v528_v25  ;;  %3306 = vperm.xlu1 %8563, %v10790_v37   ;;  %v19270_v14 = vrot.slane %v10403_v20, 2  ;;  %v8587_v16 = vpop.eup %8586  ;;  %v19271_v25 = vld [vmem:[#allocation20_spill] sm:$0xff] }
 0x179   : > { %v2226_v57 = vrot.slane %v10421_v22, 2  ;;  %v903_v56 = vadd.f32 1.0, %v8585_v39  ;;  %8606 = vpow2.f32 %v7429_v42  ;;  %v7431_v7 = vmul.f32 -1.442695, %v11170_v50  ;;  %3303 = vperm.xlu0 %8562, %v10829_v10   ;;  %v8589_v49 = vpop.eup %8588  ;;  %v7834_v40 = vpop.f32.mrb[18].mxu0 }
 0x17a   : > { %19269 = vst [vmem:[#allocation107_spill] sm:$0xff] %v11181_v38  ;;  %v2305_v9 = vsel %vm2265_vm4, %v19270_v14, %v2225_v61  ;;  %vm2175_vm11 = vcmp.eq.s32.totalorder %v2144_v31, %v10427_v43  ;;  %vm1629_vm13 = vcmp.eq.s32.totalorder %v19271_v25, 1  ;;  %v906_v37 = vadd.f32 1.0, %v8587_v16  ;;  %v8591_v42 = vpop.eup %8590  ;;  %v11201_v10 = vpop.permute.xlu0 %2780 }
 0x17b   : > { %8608 = vpow2.f32 %v7428_v54  ;;  %v11196_v14 = vsel %vm2173_vm8, 1, %v19157_v19  ;;  %vm1626_vm14 = vcmp.eq.s32.totalorder %v19273_v33, 1  ;;  %vm1630_vm15 = vcmp.eq.s32.totalorder %v19274_v32, 1  ;;  %19275 = vst [vmem:[#allocation17_spill] sm:$0xff] %v11201_v10  ;;  %v538_v16 = vpop.f32.mrb[19].mxu0  ;;  %v8593_v3 = vpop.eup %8592 }
 0x17c   : > { %19272 = vst [vmem:[#allocation20_spill] sm:$0xff] %v11196_v14  ;;  %8610 = vrcp.f32 %v903_v56  ;;  %v7430_v15 = vmul.f32 -1.442695, %v11181_v38  ;;  %v11205_v54 = vadd.f32 %v7834_v40, %v10902_v27  ;;  %vm2330_vm0 = vcmp.eq.s32.totalorder %v2305_v9, %v10403_v20  ;;  %v19276_v14 = vld [vmem:[#allocation23_spill] sm:$0xff]  ;;  %v11209_v39 = vpop.permute.xlu1 %2801  ;;  %3312 = vperm.xlu1 %8563, %v10856_v24   ;;  %v19283_v9 = vld [vmem:[#allocation25_spill] sm:$0xff] }
 0x17d   : > { %vm1633_vm1 = vcmp.eq.s32.totalorder %v19276_v14, 1  ;;  %8612 = vrcp.f32 %v906_v37  ;;  %19277 = vst [vmem:[#allocation22_spill] sm:$0xff] %v11209_v39  ;;  %v11212_v29 = vadd.f32 %v10902_v27, %v538_v16  ;;  %v11218_v56 = vsel %vm2175_vm11, 1, %v19157_v19  ;;  %v8595_v10 = vpop.eup %8594  ;;  %v19280_v39 = vld [vmem:[#allocation78_spill] sm:$0xff]  ;;  %v7837_v31 = vpop.f32.mrb[20].mxu0 }
 0x17e   : > { %19278 = vst [vmem:[#allocation23_spill] sm:$0xff] %v11218_v56  ;;  %v2304_v40 = vsel %vm2265_vm4, %v2225_v61, %v2226_v57  ;;  %vm1628_vm2 = vcmp.eq.s32.totalorder %v19279_v17, 1  ;;  %v1066_v37 = vmul.f32 %v8581_v35, %v10912_v58  ;;  %v905_v38 = vadd.f32 1.0, %v8593_v3  ;;  %3309 = vperm.xlu0 %8562, %v19280_v39   ;;  %v8597_v24 = vpop.eup %8596 }
 0x17f   : > { %8614 = vpow2.f32 %v7431_v7  ;;  %v7433_v16 = vmul.f32 -1.442695, %v11205_v54  ;;  %v908_v13 = vadd.f32 1.0, %v8595_v10  ;;  %v11229_v56 = vsel %vm2330_vm0, 1, %v19157_v19  ;;  %v8599_v35 = vpop.eup %8598  ;;  %v19282_v7 = vld [vmem:[#allocation24_spill] sm:$0xff] }
 0x180   : > { %8616 = vpow2.f32 %v7430_v15  ;;  %v19281_v61 = vrot.slane %v10427_v43, 2  ;;  %vm1632_vm3 = vcmp.eq.s32.totalorder %v19282_v7, 1  ;;  %v1068_v39 = vmul.f32 %v8589_v49, %v10961_v45  ;;  %v11240_v15 = vpop.f32.mrb[21].mxu0  ;;  %v11243_v20 = vpop.eup %8600  ;;  %3318 = vperm.xlu1 %8563, %v10870_v63  }
 0x181   : > { %v1070_v10 = vmul.f32 %v8597_v24, %v10998_v53  ;;  %8618 = vrcp.f32 %v905_v38  ;;  %vm2331_vm5 = vcmp.eq.s32.totalorder %v2304_v40, %v10409_v51  ;;  %vm1635_vm8 = vcmp.eq.s32.totalorder %v19283_v9, 1  ;;  %v8603_v45 = vpop.eup %8602  ;;  %v11259_v24 = vpop.permute.xlu0 %2786 }
 0x182   : > { %v11235_v58 = vsel %vm2265_vm4, %v2226_v57, %v19281_v61  ;;  %v1065_v57 = vmul.f32 %v11167_v44, %v10930_v46  ;;  %8620 = vrcp.f32 %v908_v13  ;;  %v907_v3 = vadd.f32 1.0, %v8599_v35  ;;  %19285 = vst [vmem:[#allocation78_spill] sm:$0xff] %v11259_v24  ;;  %3315 = vperm.xlu0 %8562, %v10875_v62   ;;  %v8605_v44 = vpop.eup %8604  ;;  %v11265_v23 = vpop.permute.xlu1 %2807  ;;  %v19288_v35 = vld [vmem:[#allocation27_spill] sm:$0xff] }
 0x183   : > { %v7432_v61 = vmul.f32 -1.442695, %v11212_v29  ;;  %v11252_v53 = vsel %vm1627_vm9, %v1066_v37, -inf  ;;  %v1067_v38 = vmul.f32 %v8591_v42, %v10968_v26  ;;  %v11257_v49 = vsel %vm1631_vm10, %v1070_v10, -inf  ;;  %19286 = vst [vmem:[#allocation24_spill] sm:$0xff] %v11265_v23  ;;  %v11270_v11 = vpop.f32.mrb[22].mxu0  ;;  %v8607_v13 = vpop.eup %8606 }
 0x184   : > { %19284 = vst [vmem:[#allocation21_spill] sm:$0xff] %v11257_v49  ;;  %8622 = vpow2.f32 %v7433_v16  ;;  %v2376_v63 = vmax.f32 %v11257_v49, %v11252_v53  ;;  %v1069_v46 = vmul.f32 %v8603_v45, %v11009_v8  ;;  %v11268_v26 = vadd.f32 %v7837_v31, %v10902_v27  ;;  %v19287_v42 = vld [vmem:[#allocation26_spill] sm:$0xff]  ;;  %v11278_v16 = vpop.f32.mrb[23].mxu0  ;;  %3324 = vperm.xlu1 %8563, %v10879_v60   ;;  %v19302_v24 = vld [vmem:[#allocation31_spill] sm:$0xff] }
 0x185   : > { %8624 = vrcp.f32 %v907_v3  ;;  %vm1634_vm9 = vcmp.eq.s32.totalorder %v19287_v42, 1  ;;  %v11275_v62 = vsel %vm1629_vm13, %v1068_v39, -inf  ;;  %v1072_v37 = vmul.f32 %v8605_v44, %v11035_v28  ;;  %v8609_v31 = vpop.eup %8608  ;;  %v11314_v14 = vpop.f32.mrb[24].mxu0 }
 0x186   : > { %8626 = vpow2.f32 %v7432_v61  ;;  %vm2332_vm10 = vcmp.eq.s32.totalorder %v11235_v58, %v10421_v22  ;;  %v11285_v8 = vsel %vm2331_vm5, 1, %v19157_v19  ;;  %vm1637_vm11 = vcmp.eq.s32.totalorder %v19288_v35, 1  ;;  %v8611_v3 = vpop.eup %8610  ;;  %3321 = vperm.xlu0 %8562, %v10885_v30  }
 0x187   : > { %v11290_v25 = vsel %vm1626_vm14, %v1065_v57, -inf  ;;  %v11294_v28 = vsel %vm1630_vm15, %v1069_v46, -inf  ;;  %v2430_v39 = vmax.f32 %v2376_v63, %v11275_v62  ;;  %v910_v10 = vadd.f32 1.0, %v8607_v13  ;;  %v19292_v57 = vld [vmem:[#allocation63_spill] sm:$0xff]  ;;  %v8613_v61 = vpop.eup %8612  ;;  %v19293_v13 = vld [vmem:[#allocation28_spill] sm:$0xff] }
 0x188   : > { %19289 = vst [vmem:[#allocation25_spill] sm:$0xff] %v11290_v25  ;;  %19290 = vst [vmem:[#allocation26_spill] sm:$0xff] %v11294_v28  ;;  %v2375_v51 = vmax.f32 %v11294_v28, %v11290_v25  ;;  %v11302_v40 = vsel %vm1633_vm1, %v1072_v37, -inf  ;;  %v909_v33 = vadd.f32 1.0, %v8609_v31  ;;  %v11308_v45 = vsel %vm1628_vm2, %v1067_v38, -inf  ;;  %v11320_v38 = vpop.permute.xlu0 %2792  ;;  %v11322_v31 = vpop.f32.mrb[25].mxu0  ;;  %3330 = vperm.xlu1 %8563, %v10905_v41  }
 0x189   : > { %19291 = vst [vmem:[#allocation27_spill] sm:$0xff] %v11302_v40  ;;  %v2378_v60 = vmax.f32 %v11302_v40, %v11275_v62  ;;  %v1071_v44 = vmul.f32 %v8611_v3, %v11046_v1  ;;  %v7435_v63 = vmul.f32 -1.442695, %v11268_v26  ;;  %v8615_v46 = vpop.eup %8614  ;;  %vm1636_vm13 = vcmp.eq.s32.totalorder %v19293_v13, 1  ;;  %19294 = vst [vmem:[#allocation63_spill] sm:$0xff] %v11320_v38 }
 0x18a   : > { %v2484_v30 = vmax.f32 %v2430_v39, %v11302_v40  ;;  %v2429_v37 = vmax.f32 %v2375_v51, %v11308_v45  ;;  %v1074_v17 = vmul.f32 %v8613_v61, %v11078_v21  ;;  %8628 = vrcp.f32 %v910_v10  ;;  %v8617_v32 = vpop.eup %8616  ;;  %v11331_v39 = vpop.permute.xlu1 %2813  ;;  %3327 = vperm.xlu0 %8562, %v10889_v5  }
 0x18b   : > { %v11326_v1 = vsel %vm1632_vm3, %v1071_v44, -inf  ;;  %v11329_v3 = vmax.f32 %v2378_v60, %v11257_v49  ;;  %8630 = vrcp.f32 %v909_v33  ;;  %v912_v23 = vadd.f32 1.0, %v8615_v46  ;;  %19297 = vst [vmem:[#allocation109_spill] sm:$0xff] %v11331_v39  ;;  %v8619_v21 = vpop.eup %8618  ;;  %v11354_v46 = vpop.f32.mrb[26].mxu0 }
 0x18c   : > { %19295 = vst [vmem:[#allocation28_spill] sm:$0xff] %v11326_v1  ;;  %v2377_v10 = vmax.f32 %v11326_v1, %v11308_v45  ;;  %v2483_v51 = vmax.f32 %v2429_v37, %v11326_v1  ;;  %v11339_v7 = vsel %vm1635_vm8, %v1074_v17, -inf  ;;  %v11343_v61 = vadd.f32 %v10902_v27, %v11240_v15  ;;  %v8621_v33 = vpop.eup %8620  ;;  %v19300_v17 = vld [vmem:[#allocation30_spill] sm:$0xff]  ;;  %v11361_v38 = vpop.f32.mrb[27].mxu0  ;;  %3697 = vperm.xlu1 %8563, %v10919_v2  }
 0x18d   : > { %19296 = vst [vmem:[#allocation108_spill] sm:$0xff] %v11329_v3  ;;  %19298 = vst [vmem:[#allocation110_spill] sm:$0xff] %v11339_v7  ;;  %v2380_v41 = vmax.f32 %v11339_v7, %v11257_v49  ;;  %v11351_v44 = vmax.f32 %v2484_v30, %v11339_v7  ;;  %v1073_v9 = vmul.f32 %v8619_v21, %v11084_v47  ;;  %vm1639_vm14 = vcmp.eq.s32.totalorder %v19300_v17, 1  ;;  %v11383_v42 = vpop.permute.xlu0 %2798  ;;  %v19322_v17 = vld [vmem:[#allocation36_spill] sm:$0xff] }
 0x18e   : > { %v8623_v37 = vpop.eup %8622  ;;  %v11358_v15 = vmax.f32 %v2377_v10, %v11294_v28  ;;  %v1076_v5 = vmul.f32 %v8621_v33, %v11109_v36  ;;  %8632 = vrcp.f32 %v912_v23  ;;  %v911_v39 = vadd.f32 1.0, %v8617_v32  ;;  %19307 = vst [vmem:[#allocation115_spill] sm:$0xff] %v11383_v42  ;;  %3333 = vperm.xlu0 %8562, %v10924_v12  }
 0x18f   : > { %19299 = vst [vmem:[#allocation111_spill] sm:$0xff] %v11351_v44  ;;  %v8625_v60 = vpop.eup %8624  ;;  %vm1638_vm15 = vcmp.eq.s32.totalorder %v19302_v24, 1  ;;  %v11365_v30 = vmax.f32 %v2380_v41, %v11302_v40  ;;  %v11369_v47 = vsel %vm1634_vm9, %v1073_v9, -inf  ;;  %v914_v21 = vadd.f32 1.0, %v8623_v37  ;;  %v11389_v41 = vpop.permute.xlu1 %2819  ;;  %v19309_v37 = vld [vmem:[#allocation33_spill] sm:$0xff] }
 0x190   : > { %19301 = vst [vmem:[#allocation30_spill] sm:$0xff] %v11358_v15  ;;  %19304 = vst [vmem:[#allocation112_spill] sm:$0xff] %v11369_v47  ;;  %8634 = vpow2.f32 %v7435_v63  ;;  %v8627_v10 = vpop.eup %8626  ;;  %v2379_v36 = vmax.f32 %v11369_v47, %v11294_v28  ;;  %v11377_v32 = vmax.f32 %v2483_v51, %v11369_v47  ;;  %v11381_v33 = vsel %vm1637_vm11, %v1076_v5, -inf  ;;  %v11391_v9 = vpop.f32.mrb[28].mxu0  ;;  %3709 = vperm.xlu1 %8563, %v10936_v0  }
 0x191   : > { %19303 = vst [vmem:[#allocation31_spill] sm:$0xff] %v11365_v30  ;;  %19306 = vst [vmem:[#allocation114_spill] sm:$0xff] %v11381_v33  ;;  %v2382_v2 = vmax.f32 %v11381_v33, %v11302_v40  ;;  %v1075_v63 = vmul.f32 %v8625_v60, %v11119_v18  ;;  %v11397_v35 = vsel %vm2332_vm10, 1, %v19157_v19  ;;  %vm1641_vm0 = vcmp.eq.s32.totalorder %v19309_v37, 1  ;;  %v11405_v60 = vpop.f32.mrb[29].mxu0  ;;  %v11439_v42 = vpop.permute.xlu0 %2804  ;;  %v19348_v30 = vld [vmem:[#allocation96_spill] sm:$0xff] }
 0x192   : > { %19305 = vst [vmem:[#allocation113_spill] sm:$0xff] %v11377_v32  ;;  %19308 = vst [vmem:[#allocation116_spill] sm:$0xff] %v11389_v41  ;;  %v11402_v12 = vmax.f32 %v2379_v36, %v11326_v1  ;;  %8636 = vrcp.f32 %v911_v39  ;;  %v913_v5 = vadd.f32 1.0, %v8627_v10  ;;  %v7434_v18 = vmul.f32 -1.442695, %v11343_v61  ;;  %3700 = vperm.xlu0 %8562, %v10941_v48   ;;  %v11432_v51 = vpop.f32.mrb[30].mxu0 }
 0x193   : > { %v11409_v23 = vsel %vm1636_vm13, %v1075_v63, -inf  ;;  %v2436_v22 = vmax.f32 %v2382_v2, %v11339_v7  ;;  %8638 = vrcp.f32 %v914_v21  ;;  %v11414_v58 = vadd.f32 %v11270_v11, %v10902_v27 }
 0x194   : > { %19310 = vst [vmem:[#allocation33_spill] sm:$0xff] %v11402_v12  ;;  %19311 = vst [vmem:[#allocation117_spill] sm:$0xff] %v11409_v23  ;;  %v8629_v36 = vpop.eup %8628  ;;  %v896_v39 = vadd.f32 1.0, %v11131_v34  ;;  %v2381_v10 = vmax.f32 %v11409_v23, %v11326_v1  ;;  %8640 = vrcp.f32 %v913_v5  ;;  %v19312_v13 = vrot.slane %v19292_v57, 1  ;;  %v19314_v5 = vld [vmem:[#allocation34_spill] sm:$0xff] }
 0x195   : > { %v19313_v2 = vrot.slane %v10469_v55, 1  ;;  %v8631_v11 = vpop.eup %8630  ;;  %v895_v0 = vadd.f32 1.0, %v11243_v20  ;;  %v1078_v63 = vmul.f32 %v8629_v36, %v11134_v4  ;;  %8642 = vpow2.f32 %v7434_v18  ;;  %19315 = vst [vmem:[#allocation34_spill] sm:$0xff] %v11439_v42  ;;  %v11445_v20 = vpop.f32.mrb[31].mxu0  ;;  %v19350_v1 = vld [vmem:[#allocation98_spill] sm:$0xff] }
 0x196   : > { %v7437_v34 = vmul.f32 -1.442695, %v11414_v58  ;;  %vm1640_vm1 = vcmp.eq.s32.totalorder %v19314_v5, 1  ;;  %v1077_v48 = vmul.f32 %v8631_v11, %v11146_v52  ;;  %v11437_v41 = vmax.f32 %v2381_v10, %v11369_v47  ;;  %v19318_v52 = vld [vmem:[#allocation35_spill] sm:$0xff]  ;;  %v19321_v11 = vld [vmem:[#allocation84_spill] sm:$0xff] }
 0x197   : > { %v11427_v21 = vsel %vm2107_vm7, %v19313_v2, %v19312_v13  ;;  %v11443_v13 = vadd.f32 %v10902_v27, %v11278_v16  ;;  %v19316_v4 = vrot.slane %v10469_v55, 2  ;;  %v19317_v18 = vrot.slane %v10427_v43, 2  ;;  %v11464_v2 = vpop.permute.xlu1 %2825  ;;  %3703 = vperm.xlu1 %8563, %v19321_v11   ;;  %v11470_v43 = vld [vmem:[%s18348_s0 + $0x98] sm:$0xff]  ;;  %v11484_v11 = vld [vmem:[%s18348_s0 + $0xa0] sm:$0xff] }
 0x198   : > { %vm1643_vm2 = vcmp.eq.s32.totalorder %v19318_v52, 1  ;;  %v11458_v10 = vsel %vm1639_vm14, %v1078_v63, -inf  ;;  %8644 = vpow2.f32 %v7437_v34  ;;  %v11462_v16 = vadd.f32 %v11314_v14, %v10902_v27  ;;  %19320 = vst [vmem:[#allocation118_spill] sm:$0xff] %v11464_v2  ;;  %v19324_v34 = vld [vmem:[#allocation86_spill] sm:$0xff]  ;;  %19325 = vst [vmem:[#allocation36_spill] sm:$0xff] %v11484_v11  ;;  %v19331_v55 = vld [vmem:[#allocation107_spill] sm:$0xff] }
 0x199   : > { %v11453_v36 = vsel %vm2265_vm4, %v19317_v18, %v19316_v4  ;;  %19319 = vst [vmem:[#allocation35_spill] sm:$0xff] %v11458_v10  ;;  %v8633_v18 = vpop.eup %8632  ;;  %vm1642_vm3 = vcmp.eq.s32.totalorder %v19322_v17, 1  ;;  %8646 = vrcp.f32 %v896_v39  ;;  %v2384_v63 = vmax.f32 %v11458_v10, %v11339_v7  ;;  %3712 = vperm.xlu0 %8562, %v19324_v34  }
 0x19a   : > { %v11478_v14 = vsel %vm1638_vm15, %v1077_v48, -inf  ;;  %v8635_v2 = vpop.eup %8634  ;;  %8648 = vrcp.f32 %v895_v0  ;;  %v2490_v39 = vmax.f32 %v2436_v22, %v11458_v10  ;;  %v1080_v24 = vmul.f32 %v8633_v18, %v11170_v50  ;;  %v11491_v48 = vpop.f32.mrb[32].mxu0 }
 0x19b   : > { %19323 = vst [vmem:[#allocation84_spill] sm:$0xff] %v11478_v14  ;;  %v2383_v42 = vmax.f32 %v11478_v14, %v11369_v47  ;;  %v2438_v34 = vmax.f32 %v2384_v63, %v11381_v33  ;;  %v916_v44 = vadd.f32 1.0, %v8635_v2  ;;  %v7436_v32 = vmul.f32 -1.442695, %v11443_v13  ;;  %v11496_v12 = vpop.f32.mrb[33].mxu0  ;;  %3706 = vperm.xlu1 %8563, %v11023_v6   ;;  %v19330_v6 = vld [vmem:[#allocation89_spill] sm:$0xff]  ;;  %v11531_v3 = vpop.permute.xlu1 %2831 }
 0x19c   : > { %v7439_v15 = vmul.f32 -1.442695, %v11462_v16  ;;  %v11500_v0 = vsel %vm1641_vm0, %v1080_v24, -inf  ;;  %v11505_v50 = vadd.f32 %v10902_v27, %v11322_v31  ;;  %v19326_v2 = vrot.slane %v11470_v43, 2  ;;  %v11522_v31 = vpop.permute.xlu0 %2810  ;;  %19332 = vst [vmem:[#allocation89_spill] sm:$0xff] %v11531_v3 }
 0x19d   : > { %v2437_v22 = vmax.f32 %v2383_v42, %v11409_v23  ;;  %v19327_v18 = vmov %v19316_v4  ;;  %v8637_v4 = vpop.eup %8636  ;;  %v2386_v37 = vmax.f32 %v11500_v0, %v11381_v33  ;;  %v2492_v42 = vmax.f32 %v2438_v34, %v11500_v0  ;;  %19329 = vst [vmem:[#allocation119_spill] sm:$0xff] %v11522_v31  ;;  %3715 = vperm.xlu0 %8562, %v19330_v6   ;;  %v11533_v34 = vpop.f32.mrb[34].mxu0  ;;  %v19349_v33 = vld [vmem:[#allocation38_spill] sm:$0xff] }
 0x19e   : > { %v11514_v63 = vsel %vm2265_vm4, %v19327_v18, %v19326_v2  ;;  %v11520_v24 = vmax.f32 %v2490_v39, %v11500_v0  ;;  %8650 = vrcp.f32 %v916_v44  ;;  %v8639_v47 = vpop.eup %8638  ;;  %v1079_v7 = vmul.f32 %v8637_v4, %v19331_v55 }
 0x19f   : > { %8652 = vpow2.f32 %v7436_v32  ;;  %v7438_v2 = vmul.f32 -1.442695, %v11505_v50  ;;  %v11529_v18 = vadd.f32 %v11354_v46, %v10902_v27  ;;  %v8641_v39 = vpop.eup %8640  ;;  %v2489_v44 = vmax.f32 %v11437_v41, %v11478_v14  ;;  %v11541_v32 = vpop.f32.mrb[35].mxu0  ;;  %v19334_v41 = vld [vmem:[#allocation37_spill] sm:$0xff] }
 0x1a0   : > { %19328 = vst [vmem:[#allocation86_spill] sm:$0xff] %v11520_v24  ;;  %v1082_v6 = vmul.f32 %v8639_v47, %v11205_v54  ;;  %v11539_v31 = vmax.f32 %v2386_v37, %v11458_v10  ;;  %8654 = vpow2.f32 %v7439_v15  ;;  %v8643_v4 = vpop.eup %8642  ;;  %v11545_v46 = vsel %vm1640_vm1, %v1079_v7, -inf  ;;  %v19333_v24 = vld [vmem:[#allocation91_spill] sm:$0xff]  ;;  %v11575_v52 = vpop.f32.mrb[36].mxu0 }
 0x1a1   : > { %v1081_v55 = vmul.f32 %v8641_v39, %v11212_v29  ;;  %8656 = vpow2.f32 %v7438_v2  ;;  %v7441_v3 = vmul.f32 -1.442695, %v11529_v18  ;;  %4169 = vperm.xlu1 %8563, %v19333_v24   ;;  %vm1645_vm5 = vcmp.eq.s32.totalorder %v19334_v41, 1  ;;  %8007 = vmatprep.mubr.f32.mxu1 %v11545_v46  ;;  %v19336_v29 = vld [vmem:[#allocation92_spill] sm:$0xff]  ;;  %v11580_v39 = vld [vmem:[%s18348_s0 + $0x90] sm:$0xff]  ;;  %v11595_v24 = vpop.f32.mrb[37].mxu0 }
 0x1a2   : > { %v2385_v54 = vmax.f32 %v11545_v46, %v11409_v23  ;;  %v2491_v15 = vmax.f32 %v2437_v22, %v11545_v46  ;;  %v11555_v47 = vmax.f32 %v2489_v44, %v11545_v46  ;;  %v11559_v7 = vsel %vm1643_vm2, %v1082_v6, -inf  ;;  %4166 = vperm.xlu0 %8562, %v19336_v29   ;;  %v8645_v5 = vpop.eup %8644  ;;  %8008 = vmatmul.mubr.f32.vlgmr.msra.gmra.mrb[0].mxu1 %v11500_v0  ;;  %v11592_v29 = vpop.permute.xlu0 %2816 }
 0x1a3   : > { %v2388_v37 = vmax.f32 %v11559_v7, %v11458_v10  ;;  %v11568_v22 = vmax.f32 %v2492_v42, %v11559_v7  ;;  %v11572_v2 = vsel %vm1642_vm3, %v1081_v55, -inf  ;;  %vm2176_vm8 = vcmp.eq.s32.totalorder %v11427_v21, %v11580_v39  ;;  %v8647_v44 = vpop.eup %8646  ;;  %19339 = vst [vmem:[#allocation92_spill] sm:$0xff] %v11592_v29  ;;  %v11600_v23 = vpop.permute.xlu1 %2837 }
 0x1a4   : > { %19335 = vst [vmem:[#allocation107_spill] sm:$0xff] %v11555_v47  ;;  %v2387_v42 = vmax.f32 %v11572_v2, %v11478_v14  ;;  %v11587_v17 = vmax.f32 %v2385_v54, %v11478_v14  ;;  %v11590_v6 = vmax.f32 %v2491_v15, %v11572_v2  ;;  %v915_v55 = vadd.f32 1.0, %v8643_v4  ;;  %8010 = vmatprep.mubr.f32.mxu1 %v11572_v2  ;;  %v19341_v54 = vld [vmem:[#allocation94_spill] sm:$0xff] }
 0x1a5   : > { %19337 = vst [vmem:[#allocation91_spill] sm:$0xff] %v11568_v22  ;;  %v8649_v22 = vpop.eup %8648  ;;  %v11598_v47 = vmax.f32 %v2388_v37, %v11500_v0  ;;  %v918_v10 = vadd.f32 1.0, %v8645_v5  ;;  %8658 = vpow2.f32 %v7441_v3  ;;  %19340 = vst [vmem:[#allocation120_spill] sm:$0xff] %v11600_v23  ;;  %4181 = vperm.xlu1 %8563, %v19341_v54   ;;  %v19342_v15 = vrot.slane %v11484_v11, 1  ;;  %v19344_v5 = vld [vmem:[#allocation95_spill] sm:$0xff]  ;;  %v11626_v54 = vpop.f32.mrb[38].mxu0 }
 0x1a6   : > { %19338 = vst [vmem:[#allocation37_spill] sm:$0xff] %v11590_v6  ;;  %v19343_v4 = vrot.slane %v19292_v57, 1  ;;  %8660 = vrcp.f32 %v915_v55  ;;  %v11614_v37 = vmax.f32 %v2387_v42, %v11545_v46  ;;  %v11618_v3 = vadd.f32 %v10902_v27, %v11361_v38  ;;  %4178 = vperm.xlu0 %8562, %v19344_v5   ;;  %8011 = vmatmul.mubr.f32.gmra.mrb[2].mxu1 %v11559_v7  ;;  %v8961_v42 = vld [vmem:[%s18348_s0 + $0x88] sm:$0xff]  ;;  %v19345_v55 = vld [vmem:[#allocation18_spill] sm:$0xff]  ;;  %v11645_v5 = vpop.f32.mrb[39].mxu0  ;;  %v19347_v23 = vld [vmem:[#allocation85_spill] sm:$0xff]  ;;  %v11659_v49 = vpop.permute.xlu0 %2822 }
 0x1a7   : > { %8662 = vrcp.f32 %v918_v10  ;;  %v11623_v57 = vadd.f32 %v11391_v9, %v10902_v27  ;;  %vm2333_vm9 = vcmp.eq.s32.totalorder %v11453_v36, %v8961_v42  ;;  %vm2334_vm10 = vcmp.eq.s32.totalorder %v11514_v63, %v11580_v39  ;;  %v19346_v10 = vld [vmem:[#allocation19_spill] sm:$0xff]  ;;  %19351 = vst [vmem:[#allocation94_spill] sm:$0xff] %v11659_v49  ;;  %v19361_v42 = vld [vmem:[#allocation42_spill] sm:$0xff] }
 0x1a8   : > { %v11609_v29 = vsel %vm2107_vm7, %v19343_v4, %v19342_v15  ;;  %v8651_v38 = vpop.eup %8650  ;;  %vm1624_vm11 = vcmp.eq.s32.totalorder %v19345_v55, 1  ;;  %vm1625_vm13 = vcmp.eq.s32.totalorder %v19346_v10, 1  ;;  %v7440_v9 = vmul.f32 -1.442695, %v11618_v3 }
 0x1a9   : > { %v11639_v15 = vadd.f32 %v10902_v27, %v11405_v60  ;;  %v11643_v4 = vadd.f32 %v11432_v51, %v10902_v27  ;;  %vm2177_vm14 = vcmp.eq.s32.totalorder %v11609_v29, %v11470_v43  ;;  %v8653_v6 = vpop.eup %8652  ;;  %v1064_v11 = vmul.f32 %v8647_v44, %v19347_v23  ;;  %4184 = vperm.xlu1 %8563, %v19348_v30  }
 0x1aa   : > { %v1084_v14 = vmul.f32 %v8651_v38, %v11268_v26  ;;  %v7443_v59 = vmul.f32 -1.442695, %v11623_v57  ;;  %v11654_v60 = vadd.f32 %v10902_v27, %v11445_v20  ;;  %v8655_v51 = vpop.eup %8654  ;;  %vm1644_vm15 = vcmp.eq.s32.totalorder %v19349_v33, 1  ;;  %v19352_v26 = vld [vmem:[#allocation100_spill] sm:$0xff]  ;;  %v19366_v33 = vld [vmem:[#allocation43_spill] sm:$0xff] }
 0x1ab   : > { %v1063_v40 = vmul.f32 %v8649_v22, %v19350_v1  ;;  %v917_v28 = vadd.f32 1.0, %v8653_v6  ;;  %8664 = vpow2.f32 %v7440_v9  ;;  %v7442_v23 = vmul.f32 -1.442695, %v11639_v15  ;;  %4172 = vperm.xlu0 %8562, %v19352_v26   ;;  %v8657_v44 = vpop.eup %8656  ;;  %v19353_v38 = vld [vmem:[#allocation40_spill] sm:$0xff]  ;;  %v11669_v1 = vpop.permute.xlu1 %2843 }
 0x1ac   : > { %vm1647_vm0 = vcmp.eq.s32.totalorder %v19353_v38, 1  ;;  %v11666_v20 = vsel %vm1645_vm5, %v1084_v14, -inf  ;;  %v920_v30 = vadd.f32 1.0, %v8655_v51  ;;  %8666 = vpow2.f32 %v7443_v59  ;;  %19354 = vst [vmem:[#allocation95_spill] sm:$0xff] %v11669_v1  ;;  %v11671_v22 = vpop.f32.mrb[40].mxu0  ;;  %v19370_v38 = vld [vmem:[#allocation23_spill] sm:$0xff] }
 0x1ad   : > { %v7445_v25 = vmul.f32 -1.442695, %v11643_v4  ;;  %v2390_v6 = vmax.f32 %v11666_v20, %v11500_v0  ;;  %v2496_v9 = vmax.f32 %v11598_v47, %v11666_v20  ;;  %v19355_v41 = vmax.f32 %v11539_v31, %v11559_v7  ;;  %v11683_v59 = vpop.f32.mrb[41].mxu0  ;;  %v19357_v0 = vld [vmem:[#allocation102_spill] sm:$0xff] }
 0x1ae   : > { %8668 = vrcp.f32 %v917_v28  ;;  %v919_v51 = vadd.f32 1.0, %v8657_v44  ;;  %v7444_v26 = vmul.f32 -1.442695, %v11654_v60  ;;  %v11688_v1 = vadd.f32 %v11491_v48, %v10902_v27  ;;  %4175 = vperm.xlu1 %8563, %v19357_v0   ;;  %v19358_v28 = vld [vmem:[#allocation104_spill] sm:$0xff]  ;;  %v19359_v0 = vld [vmem:[#allocation41_spill] sm:$0xff] }
 0x1af   : > { %v11681_v14 = vmax.f32 %v19355_v41, %v11666_v20  ;;  %8670 = vrcp.f32 %v920_v30  ;;  %v11692_v47 = vmax.f32 %v2390_v6, %v11559_v7  ;;  %v11696_v31 = vadd.f32 %v10902_v27, %v11496_v12  ;;  %3718 = vperm.xlu0 %8562, %v19358_v28   ;;  %v8659_v48 = vpop.eup %8658  ;;  %v11718_v28 = vpop.permute.xlu0 %2828 }
 0x1b0   : > { %8672 = vpow2.f32 %v7442_v23  ;;  %v11703_v44 = vsel %vm2176_vm8, 1, %v19157_v19  ;;  %v7447_v30 = vmul.f32 -1.442695, %v11688_v1  ;;  %v11708_v6 = vadd.f32 %v11533_v34, %v10902_v27  ;;  %v11710_v23 = vpop.f32.mrb[42].mxu0  ;;  %v8661_v41 = vpop.eup %8660  ;;  %19360 = vst [vmem:[#allocation19_spill] sm:$0xff] %v11718_v28  ;;  %v19364_v28 = vld [vmem:[#allocation106_spill] sm:$0xff] }
 0x1b1   : > { %19356 = vst [vmem:[#allocation18_spill] sm:$0xff] %v11681_v14  ;;  %8674 = vrcp.f32 %v919_v51  ;;  %v11715_v12 = vsel %vm2333_vm9, 1, %v19157_v19  ;;  %vm1646_vm1 = vcmp.eq.s32.totalorder %v19359_v0, 1  ;;  %v922_v21 = vadd.f32 1.0, %v8659_v48  ;;  %v11720_v51 = vpop.f32.mrb[43].mxu0  ;;  %v8663_v34 = vpop.eup %8662 }
 0x1b2   : > { %8676 = vpow2.f32 %v7445_v25  ;;  %v11726_v27 = vsel %vm2334_vm10, 1, %v19157_v19  ;;  %v11732_v36 = vsel %vm2177_vm14, 1, %v19157_v19  ;;  %vm1649_vm2 = vcmp.eq.s32.totalorder %v19361_v42, 1  ;;  %v11744_v39 = vpop.permute.xlu1 %2849  ;;  %3724 = vperm.xlu1 %8563, %v19364_v28  }
 0x1b3   : > { %v11737_v25 = vsel %vm1625_vm13, %v1064_v11, -inf  ;;  %v11741_v48 = vsel %vm1624_vm11, %v1063_v40, -inf  ;;  %v1083_v63 = vmul.f32 %v8661_v41, %v11343_v61  ;;  %8678 = vpow2.f32 %v7444_v26  ;;  %19363 = vst [vmem:[#allocation96_spill] sm:$0xff] %v11744_v39  ;;  %v19365_v11 = vld [vmem:[#allocation20_spill] sm:$0xff]  ;;  %v11758_v61 = vld [vmem:[%s18351_s3] ss:$0 sm:$0xff] }
 0x1b4   : > { %19362 = vst [vmem:[#allocation85_spill] sm:$0xff] %v11741_v48  ;;  %v1086_v29 = vmul.f32 %v8663_v34, %v11414_v58  ;;  %8680 = vrcp.f32 %v922_v21  ;;  %v7446_v49 = vmul.f32 -1.442695, %v11696_v31  ;;  %v7449_v10 = vmul.f32 -1.442695, %v11708_v6  ;;  %3721 = vperm.xlu0 %8562, %v19365_v11   ;;  %v11768_v26 = vpop.f32.mrb[44].mxu0 }
 0x1b5   : > { %v11753_v40 = vsel %vm1644_vm15, %v1083_v63, -inf  ;;  %8682 = vpow2.f32 %v7447_v30  ;;  %v11762_v58 = vadd.f32 %v11758_v61, %v11541_v32  ;;  %v11766_v55 = vadd.f32 %v11758_v61, %v11575_v52  ;;  %v8665_v41 = vpop.eup %8664  ;;  %v11786_v34 = vpop.f32.mrb[45].mxu0 }
 0x1b6   : > { %vm1648_vm3 = vcmp.eq.s32.totalorder %v19366_v33, 1  ;;  %v2389_v30 = vmax.f32 %v11753_v40, %v11545_v46  ;;  %v2495_v21 = vmax.f32 %v11614_v37, %v11753_v40  ;;  %v19367_v32 = vmax.f32 %v11587_v17, %v11572_v2  ;;  %8013 = vmatprep.mubr.f32.mxu1 %v11753_v40  ;;  %v8667_v63 = vpop.eup %8666  ;;  %3727 = vperm.xlu1 %8563, %v19370_v38   ;;  %v11808_v38 = vpop.permute.xlu1 %2855 }
 0x1b7   : > { %v11783_v52 = vsel %vm1647_vm0, %v1086_v29, -inf  ;;  %v921_v17 = vadd.f32 1.0, %v8665_v41  ;;  %8014 = vmatmul.mubr.f32.gmra.mrb[4].mxu1 %v11666_v20  ;;  %8684 = vpow2.f32 %v7446_v49  ;;  %19373 = vst [vmem:[#allocation40_spill] sm:$0xff] %v11808_v38  ;;  %v11811_v39 = vpop.f32.mrb[46].mxu0  ;;  %v11815_v49 = vmul.f32 -1.442695, %v11766_v55 }
 0x1b8   : > { %v11779_v28 = vmax.f32 %v19367_v32, %v11753_v40  ;;  %v2392_v46 = vmax.f32 %v11783_v52, %v11559_v7  ;;  %v2498_v37 = vmax.f32 %v11692_v47, %v11783_v52  ;;  %v11793_v11 = vmax.f32 %v2496_v9, %v11783_v52  ;;  %v8669_v29 = vpop.eup %8668  ;;  %v19371_v32 = vld [vmem:[#allocation45_spill] sm:$0xff]  ;;  %4187 = vperm.xlu0 %8562, %v11229_v56  }
 0x1b9   : > { %vm1651_vm5 = vcmp.eq.s32.totalorder %v19371_v32, 1  ;;  %v2443_v14 = vmax.f32 %v2389_v30, %v11572_v2  ;;  %v924_v7 = vadd.f32 1.0, %v8667_v63  ;;  %v8671_v9 = vpop.eup %8670  ;;  %v1085_v47 = vmul.f32 %v8669_v29, %v11443_v13  ;;  %v11821_v13 = vpop.f32.mrb[47].mxu0 }
 0x1ba   : > { %19368 = vst [vmem:[#allocation38_spill] sm:$0xff] %v11779_v28  ;;  %19369 = vst [vmem:[#allocation98_spill] sm:$0xff] %v11793_v11  ;;  %v11801_v28 = vpop.permute.xlu0 %2834  ;;  %v11806_v41 = vmax.f32 %v2392_v46, %v11666_v20  ;;  %8686 = vrcp.f32 %v921_v17  ;;  %v7448_v11 = vmul.f32 -1.442695, %v11762_v58  ;;  %v8673_v30 = vpop.eup %8672  ;;  %v1088_v63 = vmul.f32 %v8671_v9, %v11462_v16  ;;  %4193 = vperm.xlu1 %8563, %v11397_v35  }
 0x1bb   : > { %19372 = vst [vmem:[#allocation100_spill] sm:$0xff] %v11801_v28  ;;  %8688 = vrcp.f32 %v924_v7  ;;  %v11819_v56 = vadd.f32 %v11758_v61, %v11595_v24  ;;  %v8675_v46 = vpop.eup %8674  ;;  %v11825_v17 = vsel %vm1646_vm1, %v1085_v47, -inf  ;;  %v923_v29 = vadd.f32 1.0, %v8673_v30 }
 0x1bc   : > { %8690 = vpow2.f32 %v7449_v10  ;;  %v11829_v16 = vadd.f32 %v11758_v61, %v11626_v54  ;;  %v8677_v7 = vpop.eup %8676  ;;  %v2391_v24 = vmax.f32 %v11825_v17, %v11572_v2  ;;  %v2497_v9 = vmax.f32 %v2443_v14, %v11825_v17  ;;  %8016 = vmatprep.mubr.f32.mxu1 %v11825_v17  ;;  %4190 = vperm.xlu0 %8562, %v11285_v8   ;;  %v19375_v10 = vld [vmem:[#allocation46_spill] sm:$0xff]  ;;  %v19377_v8 = vld [vmem:[#allocation48_spill] sm:$0xff] }
 0x1bd   : > { %v11836_v38 = vmax.f32 %v2495_v21, %v11825_v17  ;;  %v11840_v0 = vsel %vm1649_vm2, %v1088_v63, -inf  ;;  %v8679_v54 = vpop.eup %8678  ;;  %vm1650_vm8 = vcmp.eq.s32.totalorder %v19375_v10, 1  ;;  %v1087_v42 = vmul.f32 %v8675_v46, %v11505_v50  ;;  %8017 = vmatmul.mubr.f32.gmra.mrb[6].mxu1 %v11783_v52  ;;  %v11854_v21 = vpop.f32.mrb[48].mxu0 }
 0x1be   : > { %v2394_v35 = vmax.f32 %v11840_v0, %v11666_v20  ;;  %v2500_v2 = vmax.f32 %v11806_v41, %v11840_v0  ;;  %v11850_v14 = vmax.f32 %v2498_v37, %v11840_v0  ;;  %v8681_v47 = vpop.eup %8680  ;;  %vm1653_vm9 = vcmp.eq.s32.totalorder %v19377_v8, 1  ;;  %v11858_v20 = vpop.permute.xlu0 %2840  ;;  %3730 = vperm.xlu1 %8563, %v11703_v44  }
 0x1bf   : > { %19374 = vst [vmem:[#allocation102_spill] sm:$0xff] %v11836_v38  ;;  %v2445_v30 = vmax.f32 %v2391_v24, %v11753_v40  ;;  %8692 = vrcp.f32 %v923_v29  ;;  %v926_v63 = vadd.f32 1.0, %v8677_v7  ;;  %19378 = vst [vmem:[#allocation41_spill] sm:$0xff] %v11858_v20  ;;  %v925_v28 = vadd.f32 1.0, %v8679_v54  ;;  %v11860_v41 = vpop.f32.mrb[49].mxu0  ;;  %v8683_v37 = vpop.eup %8682 }
 0x1c0   : > { %19376 = vst [vmem:[#allocation104_spill] sm:$0xff] %v11850_v14  ;;  %v11864_v50 = vsel %vm1648_vm3, %v1087_v42, -inf  ;;  %v1090_v46 = vmul.f32 %v8681_v47, %v11529_v18  ;;  %v2448_v14 = vmax.f32 %v2394_v35, %v11783_v52  ;;  %8694 = vpow2.f32 %v7448_v11  ;;  %v11868_v38 = vpop.permute.xlu1 %2861  ;;  %4196 = vperm.xlu0 %8562, %v11715_v12  }
 0x1c1   : > { %19379 = vst [vmem:[#allocation42_spill] sm:$0xff] %v11868_v38  ;;  %v2393_v29 = vmax.f32 %v11864_v50, %v11753_v40  ;;  %v2499_v7 = vmax.f32 %v2445_v30, %v11864_v50  ;;  %v11875_v24 = vmax.f32 %v2497_v9, %v11864_v50  ;;  %8696 = vrcp.f32 %v926_v63  ;;  %8019 = vmatprep.mubr.f32.mxu1 %v11864_v50  ;;  %v11885_v40 = vpop.f32.mrb[50].mxu0  ;;  %v8685_v11 = vpop.eup %8684  ;;  %v19381_v9 = vld [vmem:[#allocation49_spill] sm:$0xff] }
 0x1c2   : > { %v11881_v18 = vsel %vm1651_vm5, %v1090_v46, -inf  ;;  %8698 = vrcp.f32 %v925_v28  ;;  %v928_v33 = vadd.f32 1.0, %v8683_v37  ;;  %v7450_v44 = vmul.f32 -1.442695, %v11819_v56  ;;  %8020 = vmatmul.mubr.f32.gmra.mrb[8].mxu1 %v11840_v0  ;;  %v11897_v35 = vpop.f32.mrb[51].mxu0  ;;  %4199 = vperm.xlu1 %8563, %v11726_v27   ;;  %v11911_v46 = vpop.permute.xlu0 %2846  ;;  %v19385_v27 = vld [vmem:[#allocation52_spill] sm:$0xff] }
 0x1c3   : > { %19380 = vst [vmem:[#allocation106_spill] sm:$0xff] %v11875_v24  ;;  %vm1652_vm10 = vcmp.eq.s32.totalorder %v19381_v9, 1  ;;  %v2396_v54 = vmax.f32 %v11881_v18, %v11783_v52  ;;  %v2502_v12 = vmax.f32 %v2448_v14, %v11881_v18  ;;  %v11892_v32 = vmax.f32 %v2500_v2, %v11881_v18  ;;  %v19383_v2 = vld [vmem:[#allocation50_spill] sm:$0xff]  ;;  %19384 = vst [vmem:[#allocation43_spill] sm:$0xff] %v11911_v46 }
 0x1c4   : > { %v11895_v28 = vmax.f32 %v2393_v29, %v11825_v17  ;;  %v8687_v42 = vpop.eup %8686  ;;  %v2373_v47 = vmax.f32 %v11308_v45, %v11741_v48  ;;  %8700 = vrcp.f32 %v928_v33  ;;  %v927_v30 = vadd.f32 1.0, %v8685_v11  ;;  %3733 = vperm.xlu0 %8562, %v11732_v36   ;;  %v11922_v11 = vpop.permute.xlu1 %2867 }
 0x1c5   : > { %19382 = vst [vmem:[#allocation20_spill] sm:$0xff] %v11892_v32  ;;  %v11903_v63 = vadd.f32 %v11758_v61, %v11645_v5  ;;  %v8689_v52 = vpop.eup %8688  ;;  %vm1655_vm11 = vcmp.eq.s32.totalorder %v19383_v2, 1  ;;  %v1089_v14 = vmul.f32 %v8687_v42, %v11618_v3  ;;  %v11909_v37 = vmax.f32 %v2396_v54, %v11840_v0  ;;  %19386 = vst [vmem:[#allocation23_spill] sm:$0xff] %v11922_v11  ;;  %v11925_v42 = vpop.f32.mrb[52].mxu0 }
 0x1c6   : > { %8702 = vpow2.f32 %v11815_v49  ;;  %v11916_v29 = vadd.f32 %v11758_v61, %v11671_v22  ;;  %v8691_v5 = vpop.eup %8690  ;;  %vm1654_vm13 = vcmp.eq.s32.totalorder %v19385_v27, 1  ;;  %v1092_v33 = vmul.f32 %v8689_v52, %v11623_v57  ;;  %v11932_v38 = vpop.f32.mrb[53].mxu0 }
 0x1c7   : > { %8704 = vrcp.f32 %v927_v30  ;;  %v7453_v3 = vmul.f32 -1.442695, %v11829_v16  ;;  %v7452_v54 = vmul.f32 -1.442695, %v11903_v63  ;;  %v11929_v22 = vsel %vm1650_vm8, %v1089_v14, -inf  ;;  %v19388_v14 = vld [vmem:[#allocation11_spill] sm:$0xff]  ;;  %v11967_v20 = vpop.permute.xlu0 %2852 }
 0x1c8   : > { %v930_v49 = vadd.f32 1.0, %v8691_v5  ;;  %8706 = vpow2.f32 %v7450_v44  ;;  %v7455_v36 = vmul.f32 -1.442695, %v11916_v29  ;;  %v2395_v57 = vmax.f32 %v11929_v22, %v11825_v17  ;;  %8022 = vmatprep.mubr.f32.mxu1 %v11929_v22  ;;  %19392 = vst [vmem:[#allocation48_spill] sm:$0xff] %v11967_v20 }
 0x1c9   : > { %v2501_v30 = vmax.f32 %v11895_v28, %v11929_v22  ;;  %v11939_v52 = vmax.f32 %v2499_v7, %v11929_v22  ;;  %v11943_v10 = vsel %vm1653_vm9, %v1092_v33, -inf  ;;  %v8693_v44 = vpop.eup %8692  ;;  %vm1657_vm14 = vcmp.eq.s32.totalorder %v19388_v14, 1  ;;  %8023 = vmatmul.mubr.f32.gmra.mrb[10].mxu1 %v11881_v18  ;;  %v19390_v7 = vld [vmem:[#allocation53_spill] sm:$0xff] }
 0x1ca   : > { %v2398_v5 = vmax.f32 %v11943_v10, %v11840_v0  ;;  %v2504_v17 = vmax.f32 %v11909_v37, %v11943_v10  ;;  %v11952_v28 = vmax.f32 %v2502_v12, %v11943_v10  ;;  %8708 = vrcp.f32 %v930_v49  ;;  %v8695_v8 = vpop.eup %8694  ;;  %v11964_v37 = vpop.f32.mrb[54].mxu0 }
 0x1cb   : > { %19387 = vst [vmem:[#allocation45_spill] sm:$0xff] %v11939_v52  ;;  %vm1656_vm15 = vcmp.eq.s32.totalorder %v19390_v7, 1  ;;  %v19391_v33 = vmax.f32 %v11275_v62, %v11737_v25  ;;  %v1091_v0 = vmul.f32 %v8693_v44, %v11639_v15  ;;  %v2449_v46 = vmax.f32 %v2395_v57, %v11864_v50  ;;  %v8697_v12 = vpop.eup %8696  ;;  %v19393_v15 = vld [vmem:[#allocation25_spill] sm:$0xff] }
 0x1cc   : > { %19389 = vst [vmem:[#allocation46_spill] sm:$0xff] %v11952_v28  ;;  %8710 = vpow2.f32 %v7453_v3  ;;  %v2452_v49 = vmax.f32 %v2398_v5, %v11881_v18  ;;  %v929_v28 = vadd.f32 1.0, %v8695_v8  ;;  %v11971_v32 = vadd.f32 %v11758_v61, %v11683_v59  ;;  %v8699_v52 = vpop.eup %8698  ;;  %v11981_v5 = vpop.permute.xlu1 %2873  ;;  %v19395_v8 = vld [vmem:[#allocation12_spill] sm:$0xff] }
 0x1cd   : > { %v11960_v11 = vmax.f32 %v19391_v33, %v11252_v53  ;;  %8712 = vpow2.f32 %v7452_v54  ;;  %v11973_v33 = vpop.f32.mrb[55].mxu0  ;;  %v11976_v44 = vmax.f32 %v2373_v47, %v19393_v15  ;;  %v1708_v3 = vsel %vm1652_vm10, %v1091_v0, -inf  ;;  %19394 = vst [vmem:[#allocation49_spill] sm:$0xff] %v11981_v5 }
 0x1ce   : > { %v1094_v57 = vmul.f32 %v8697_v12, %v11643_v4  ;;  %8714 = vpow2.f32 %v7455_v36  ;;  %vm1659_vm0 = vcmp.eq.s32.totalorder %v19395_v8, 1  ;;  %v2397_v54 = vmax.f32 %v1708_v3, %v11864_v50  ;;  %8025 = vmatprep.mubr.f32.mxu1 %v1708_v3  ;;  %v8701_v47 = vpop.eup %8700 }
 0x1cf   : > { %v2503_v59 = vmax.f32 %v2449_v46, %v1708_v3  ;;  %v11985_v20 = vmax.f32 %v2501_v30, %v1708_v3  ;;  %v1093_v24 = vmul.f32 %v8699_v52, %v11654_v60  ;;  %8716 = vrcp.f32 %v929_v28  ;;  %8026 = vmatmul.mubr.f32.gmra.mrb[12].mxu1 %v11943_v10 }
 0x1d0   : > { %v11990_v9 = vsel %vm1655_vm11, %v1094_v57, -inf  ;;  %v7454_v4 = vmul.f32 -1.442695, %v11971_v32  ;;  %v11995_v36 = vadd.f32 %v11758_v61, %v11710_v23  ;;  %v8703_v50 = vpop.eup %8702  ;;  %v2451_v28 = vmax.f32 %v2397_v54, %v11929_v22  ;;  %v19400_v57 = vld [vmem:[#allocation15_spill] sm:$0xff] }
 0x1d1   : > { %19396 = vst [vmem:[#allocation50_spill] sm:$0xff] %v11985_v20  ;;  %v2400_v46 = vmax.f32 %v11990_v9, %v11881_v18  ;;  %v2506_v60 = vmax.f32 %v2452_v49, %v11990_v9  ;;  %v12002_v30 = vmax.f32 %v2504_v17, %v11990_v9  ;;  %v12006_v2 = vsel %vm1654_vm13, %v1093_v24, -inf  ;;  %v8705_v52 = vpop.eup %8704  ;;  %v12018_v49 = vpop.permute.xlu0 %2858 }
 0x1d2   : > { %v2399_v23 = vmax.f32 %v12006_v2, %v11929_v22  ;;  %v12012_v0 = vmax.f32 %v2503_v59, %v12006_v2  ;;  %v1096_v18 = vmul.f32 %v8701_v47, %v11688_v1  ;;  %8028 = vmatprep.mubr.f32.mxu1 %v12006_v2  ;;  %v8707_v12 = vpop.eup %8706  ;;  %v1095_v27 = vmul.f32 %v8705_v52, %v11696_v31  ;;  %v12026_v47 = vpop.permute.xlu1 %2879 }
 0x1d3   : > { %19397 = vst [vmem:[#allocation52_spill] sm:$0xff] %v12002_v30  ;;  %v2454_v17 = vmax.f32 %v2400_v46, %v11943_v10  ;;  %v932_v24 = vadd.f32 1.0, %v8703_v50  ;;  %19399 = vst [vmem:[#allocation53_spill] sm:$0xff] %v12018_v49  ;;  %8718 = vpow2.f32 %v7454_v4  ;;  %vm1658_vm1 = vcmp.eq.s32.totalorder %v19400_v57, 1  ;;  %8029 = vmatmul.mubr.f32.gmra.mrb[14].mxu1 %v11990_v9  ;;  %v19426_v30 = vld [vmem:[#allocation117_spill] sm:$0xff] }
 0x1d4   : > { %19398 = vst [vmem:[#allocation11_spill] sm:$0xff] %v12012_v0  ;;  %v2505_v22 = vmax.f32 %v2451_v28, %v12006_v2  ;;  %v12024_v54 = vsel %vm1657_vm14, %v1096_v18, -inf  ;;  %v2453_v1 = vmax.f32 %v2399_v23, %v1708_v3  ;;  %v931_v59 = vadd.f32 1.0, %v8707_v12  ;;  %19401 = vst [vmem:[#allocation12_spill] sm:$0xff] %v12026_v47  ;;  %v8709_v46 = vpop.eup %8708  ;;  %v19427_v49 = vld [vmem:[#allocation33_spill] sm:$0xff]  ;;  %v19428_v0 = vld [vmem:[#allocation60_spill] sm:$0xff] }
 0x1d5   : > { %v2402_v31 = vmax.f32 %v12024_v54, %v11943_v10  ;;  %v2508_v4 = vmax.f32 %v2454_v17, %v12024_v54  ;;  %v12033_v50 = vmax.f32 %v2506_v60, %v12024_v54  ;;  %v12037_v14 = vsel %vm1656_vm15, %v1095_v27, -inf  ;;  %v12065_v8 = vpop.permute.xlu0 %2864 }
 0x1d6   : > { %v8711_v52 = vpop.eup %8710  ;;  %v2401_v23 = vmax.f32 %v12037_v14, %v1708_v3  ;;  %v2507_v28 = vmax.f32 %v2453_v1, %v12037_v14  ;;  %v12042_v18 = vmax.f32 %v2505_v22, %v12037_v14  ;;  %v1098_v12 = vmul.f32 %v8709_v46, %v11708_v6  ;;  %8031 = vmatprep.mubr.f32.mxu1 %v12037_v14 }
 0x1d7   : > { %19402 = vst [vmem:[#allocation15_spill] sm:$0xff] %v12033_v50  ;;  %v8713_v10 = vpop.eup %8712  ;;  %v12047_v60 = vmax.f32 %v2402_v31, %v11990_v9  ;;  %8720 = vrcp.f32 %v932_v24  ;;  %v934_v7 = vadd.f32 1.0, %v8711_v52  ;;  %v7457_v17 = vmul.f32 -1.442695, %v11995_v36  ;;  %8032 = vmatmul.mubr.f32.gmra.mrb[16].mxu1 %v12024_v54  ;;  %19405 = vst [vmem:[#allocation123_spill] sm:$0xff] %v12065_v8  ;;  %v19406_v52 = vld [vmem:[#allocation21_spill] sm:$0xff] }
 0x1d8   : > { %19403 = vst [vmem:[#allocation121_spill] sm:$0xff] %v12042_v18  ;;  %v8715_v27 = vpop.eup %8714  ;;  %v12052_v3 = vsel %vm1659_vm0, %v1098_v12, -inf  ;;  %v12055_v22 = vmax.f32 %v2401_v23, %v12006_v2  ;;  %8722 = vrcp.f32 %v931_v59  ;;  %v933_v6 = vadd.f32 1.0, %v8713_v10  ;;  %v19408_v10 = vld [vmem:[#allocation54_spill] sm:$0xff] }
 0x1d9   : > { %v2404_v1 = vmax.f32 %v12052_v3, %v11990_v9  ;;  %v12063_v46 = vmax.f32 %v2508_v4, %v12052_v3  ;;  %8724 = vrcp.f32 %v934_v7  ;;  %v8717_v31 = vpop.eup %8716  ;;  %v2482_v23 = vmax.f32 %v11960_v11, %v19406_v52  ;;  %v12073_v9 = vpop.permute.xlu1 %2885  ;;  %v19409_v11 = vld [vmem:[#allocation56_spill] sm:$0xff] }
 0x1da   : > { %8726 = vrcp.f32 %v933_v6  ;;  %v936_v59 = vadd.f32 1.0, %v8715_v27  ;;  %v12071_v12 = vadd.f32 %v11758_v61, %v11720_v51  ;;  %19407 = vst [vmem:[#allocation21_spill] sm:$0xff] %v12073_v9  ;;  %vm1661_vm2 = vcmp.eq.s32.totalorder %v19408_v10, 1  ;;  %v19410_v27 = vld [vmem:[#allocation26_spill] sm:$0xff]  ;;  %v19411_v6 = vld [vmem:[#allocation27_spill] sm:$0xff] }
 0x1db   : > { %19404 = vst [vmem:[#allocation122_spill] sm:$0xff] %v12063_v46  ;;  %v1097_v4 = vmul.f32 %v8717_v31, %v11762_v58  ;;  %v12078_v7 = vmax.f32 %v2404_v1, %v12024_v54  ;;  %8728 = vpow2.f32 %v7457_v17  ;;  %v12082_v24 = vadd.f32 %v11758_v61, %v11768_v26  ;;  %v19413_v31 = vld [vmem:[#allocation57_spill] sm:$0xff] }
 0x1dc   : > { %vm1660_vm3 = vcmp.eq.s32.totalorder %v19409_v11, 1  ;;  %v2481_v51 = vmax.f32 %v11976_v44, %v19410_v27  ;;  %v12088_v47 = vmax.f32 %v2482_v23, %v19411_v6  ;;  %8730 = vrcp.f32 %v936_v59  ;;  %v19415_v6 = vld [vmem:[#allocation28_spill] sm:$0xff] }
 0x1dd   : > { %v7456_v9 = vmul.f32 -1.442695, %v12071_v12  ;;  %v8719_v58 = vpop.eup %8718  ;;  %vm1663_vm5 = vcmp.eq.s32.totalorder %v19413_v31, 1  ;;  %v12094_v17 = vsel %vm1658_vm1, %v1097_v4, -inf  ;;  %v7459_v26 = vmul.f32 -1.442695, %v12082_v24  ;;  %v12125_v46 = vpop.permute.xlu1 %2891 }
 0x1de   : > { %19412 = vst [vmem:[#allocation54_spill] sm:$0xff] %v12088_v47  ;;  %v12099_v1 = vadd.f32 %v11758_v61, %v11786_v34  ;;  %v12103_v44 = vadd.f32 %v11758_v61, %v11811_v39  ;;  %v2403_v23 = vmax.f32 %v12094_v17, %v12006_v2  ;;  %v2509_v59 = vmax.f32 %v12055_v22, %v12094_v17  ;;  %v12116_v34 = vpop.permute.xlu0 %2870  ;;  %v19418_v2 = vld [vmem:[#allocation58_spill] sm:$0xff] }
 0x1df   : > { %v12110_v57 = vmax.f32 %v2507_v28, %v12094_v17  ;;  %v935_v4 = vadd.f32 1.0, %v8719_v58  ;;  %8034 = vmatprep.mubr.f32.mxu1 %v12094_v17  ;;  %v12114_v5 = vmax.f32 %v2481_v51, %v19415_v6  ;;  %19417 = vst [vmem:[#allocation57_spill] sm:$0xff] %v12116_v34  ;;  %8732 = vpow2.f32 %v7456_v9  ;;  %v19419_v22 = vld [vmem:[#allocation114_spill] sm:$0xff]  ;;  %v19420_v28 = vld [vmem:[#allocation31_spill] sm:$0xff]  ;;  %19421 = vst [vmem:[#allocation28_spill] sm:$0xff] %v12125_v46 }
 0x1e0   : > { %v7458_v39 = vmul.f32 -1.442695, %v12099_v1  ;;  %v7461_v8 = vmul.f32 -1.442695, %v12103_v44  ;;  %8035 = vmatmul.mubr.f32.gmra.mrb[18].mxu1 %v12052_v3  ;;  %vm1662_vm8 = vcmp.eq.s32.totalorder %v19418_v2, 1  ;;  %v2457_v58 = vmax.f32 %v2403_v23, %v12037_v14  ;;  %v19422_v6 = vld [vmem:[#allocation59_spill] sm:$0xff] }
 0x1e1   : > { %19414 = vst [vmem:[#allocation56_spill] sm:$0xff] %v12110_v57  ;;  %19416 = vst [vmem:[#allocation27_spill] sm:$0xff] %v12114_v5  ;;  %8734 = vrcp.f32 %v935_v4  ;;  %v12129_v51 = vadd.f32 %v11758_v61, %v11821_v13  ;;  %v8721_v9 = vpop.eup %8720  ;;  %vm1665_vm9 = vcmp.eq.s32.totalorder %v19422_v6, 1  ;;  %v19423_v34 = vld [vmem:[#allocation108_spill] sm:$0xff]  ;;  %v19424_v57 = vld [vmem:[#allocation110_spill] sm:$0xff]  ;;  %v12142_v23 = vadd.f32 %v11758_v61, %v11854_v21 }
 0x1e2   : > { %v19425_v50 = vmax.f32 %v19423_v34, %v19424_v57  ;;  %8736 = vpow2.f32 %v7459_v26  ;;  %v8723_v4 = vpop.eup %8722  ;;  %v1100_v13 = vmul.f32 %v8721_v9, %v11766_v55  ;;  %v12148_v20 = vadd.f32 %v11758_v61, %v11860_v41  ;;  %v12172_v10 = vpop.permute.xlu0 %2876 }
 0x1e3   : > { %8738 = vpow2.f32 %v7458_v39  ;;  %v7460_v46 = vmul.f32 -1.442695, %v12129_v51  ;;  %v1099_v57 = vmul.f32 %v8723_v4, %v11819_v56  ;;  %v7463_v26 = vmul.f32 -1.442695, %v12142_v23  ;;  %19431 = vst [vmem:[#allocation31_spill] sm:$0xff] %v12172_v10  ;;  %v19452_v10 = vld [vmem:[#allocation65_spill] sm:$0xff] }
 0x1e4   : > { %v12136_v18 = vmax.f32 %v19425_v50, %v19419_v22  ;;  %v8725_v50 = vpop.eup %8724  ;;  %8740 = vpow2.f32 %v7461_v8  ;;  %v12154_v21 = vadd.f32 %v11758_v61, %v11885_v40  ;;  %vm1664_vm10 = vcmp.eq.s32.totalorder %v19428_v0, 1 }
 0x1e5   : > { %v8727_v34 = vpop.eup %8726  ;;  %v1717_v55 = vsel %vm1661_vm2, %v1100_v13, -inf  ;;  %v1102_v39 = vmul.f32 %v8725_v50, %v11829_v16  ;;  %8742 = vpow2.f32 %v7460_v46  ;;  %v7462_v41 = vmul.f32 -1.442695, %v12148_v20 }
 0x1e6   : > { %v8729_v9 = vpop.eup %8728  ;;  %v2406_v56 = vmax.f32 %v1717_v55, %v12024_v54  ;;  %v2512_v8 = vmax.f32 %v12078_v7, %v1717_v55  ;;  %v19429_v40 = vmax.f32 %v12047_v60, %v12052_v3  ;;  %v12170_v27 = vsel %vm1660_vm3, %v1099_v57, -inf  ;;  %v12184_v7 = vpop.permute.xlu1 %2897 }
 0x1e7   : > { %v8731_v16 = vpop.eup %8730  ;;  %v2405_v46 = vmax.f32 %v12170_v27, %v12037_v14  ;;  %v2511_v13 = vmax.f32 %v2457_v58, %v12170_v27  ;;  %v12178_v54 = vmax.f32 %v2509_v59, %v12170_v27  ;;  %v12182_v60 = vsel %vm1663_vm5, %v1102_v39, -inf  ;;  %19433 = vst [vmem:[#allocation108_spill] sm:$0xff] %v12184_v7  ;;  %8037 = vmatprep.mubr.f32.mxu1 %v12170_v27 }
 0x1e8   : > { %v12166_v4 = vmax.f32 %v19429_v40, %v1717_v55  ;;  %v2408_v11 = vmax.f32 %v12182_v60, %v12052_v3  ;;  %v2460_v50 = vmax.f32 %v2406_v56, %v12052_v3  ;;  %v12191_v14 = vmax.f32 %v2512_v8, %v12182_v60  ;;  %8038 = vmatmul.mubr.f32.gmra.mrb[20].mxu1 %v1717_v55 }
 0x1e9   : > { %19432 = vst [vmem:[#allocation59_spill] sm:$0xff] %v12178_v54  ;;  %v1101_v58 = vmul.f32 %v8727_v34, %v11903_v63  ;;  %v2459_v59 = vmax.f32 %v2405_v46, %v12094_v17  ;;  %v1104_v31 = vmul.f32 %v8731_v16, %v11916_v29  ;;  %v938_v57 = vadd.f32 1.0, %v8729_v9  ;;  %v8733_v39 = vpop.eup %8732  ;;  %v19436_v9 = vld [vmem:[#allocation80_spill] sm:$0xff]  ;;  %v12222_v46 = vpop.permute.xlu0 %2882 }
 0x1ea   : > { %19430 = vst [vmem:[#allocation58_spill] sm:$0xff] %v12166_v4  ;;  %19434 = vst [vmem:[#allocation110_spill] sm:$0xff] %v12191_v14  ;;  %8744 = vpow2.f32 %v7463_v26  ;;  %v2514_v40 = vmax.f32 %v2460_v50, %v12182_v60  ;;  %v12201_v3 = vmax.f32 %v2408_v11, %v1717_v55  ;;  %vm2902_vm11 = vcmp.eq.s32.totalorder %v19436_v9, 1 }
 0x1eb   : > { %v12199_v7 = vsel %vm1662_vm8, %v1101_v58, -inf  ;;  %8746 = vpow2.f32 %v7462_v41  ;;  %v8735_v56 = vpop.eup %8734  ;;  %v12211_v26 = vsel %vm1665_vm9, %v1104_v31, -inf  ;;  %19438 = vst [vmem:[#allocation80_spill] sm:$0xff] %v12222_v46  ;;  %v937_v11 = vadd.f32 1.0, %v8733_v39  ;;  %v19441_v31 = vld [vmem:[#allocation112_spill] sm:$0xff] }
 0x1ec   : > { %v2407_v63 = vmax.f32 %v12199_v7, %v12094_v17  ;;  %v2513_v34 = vmax.f32 %v2459_v59, %v12199_v7  ;;  %v12207_v29 = vmax.f32 %v2511_v13, %v12199_v7  ;;  %8040 = vmatprep.mubr.f32.mxu1 %v12199_v7  ;;  %v8737_v2 = vpop.eup %8736  ;;  %v2410_v41 = vmax.f32 %v12211_v26, %v1717_v55  ;;  %v12228_v55 = vpop.permute.xlu1 %3216  ;;  %v19440_v59 = vld [vmem:[#allocation30_spill] sm:$0xff] }
 0x1ed   : > { %v12219_v17 = vmax.f32 %v2514_v40, %v12211_v26  ;;  %v1103_v16 = vmul.f32 %v8735_v56, %v11971_v32  ;;  %8041 = vmatmul.mubr.f32.gmra.mrb[22].mxu1 %v12182_v60  ;;  %v8739_v6 = vpop.eup %8738  ;;  %8748 = vrcp.f32 %v938_v57  ;;  %v940_v50 = vadd.f32 1.0, %v8737_v2  ;;  %19439 = vst [vmem:[#allocation124_spill] sm:$0xff] %v12228_v55 }
 0x1ee   : > { %19435 = vst [vmem:[#allocation33_spill] sm:$0xff] %v12207_v29  ;;  %v12226_v13 = vmax.f32 %v2407_v63, %v12170_v27  ;;  %v8741_v58 = vpop.eup %8740  ;;  %v19442_v40 = vmax.f32 %v19440_v59, %v19441_v31  ;;  %v12241_v56 = vmax.f32 %v2410_v41, %v12182_v60  ;;  %v939_v63 = vadd.f32 1.0, %v8739_v6  ;;  %v19444_v6 = vld [vmem:[#allocation61_spill] sm:$0xff]  ;;  %v19445_v59 = vld [vmem:[#allocation35_spill] sm:$0xff] }
 0x1ef   : > { %19437 = vst [vmem:[#allocation60_spill] sm:$0xff] %v12219_v17  ;;  %v12238_v32 = vsel %vm1664_vm10, %v1103_v16, -inf  ;;  %v8743_v57 = vpop.eup %8742  ;;  %8750 = vrcp.f32 %v937_v11  ;;  %v942_v0 = vadd.f32 1.0, %v8741_v58  ;;  %v7465_v41 = vmul.f32 -1.442695, %v12154_v21  ;;  %v19454_v17 = vld [vmem:[#allocation84_spill] sm:$0xff] }
 0x1f0   : > { %v12234_v8 = vmax.f32 %v19442_v40, %v19426_v30  ;;  %v2409_v39 = vmax.f32 %v12238_v32, %v12170_v27  ;;  %v12248_v46 = vmax.f32 %v2513_v34, %v12238_v32  ;;  %8043 = vmatprep.mubr.f32.mxu1 %v12238_v32  ;;  %8752 = vrcp.f32 %v940_v50  ;;  %v12267_v50 = vpop.permute.xlu0 %2888 }
 0x1f1   : > { %v941_v16 = vadd.f32 1.0, %v8743_v57  ;;  %8044 = vmatmul.mubr.f32.gmra.mrb[24].mxu1 %v12211_v26  ;;  %vm1667_vm13 = vcmp.eq.s32.totalorder %v19444_v6, 1  ;;  %v19446_v27 = vmax.f32 %v19420_v28, %v19419_v22  ;;  %8754 = vrcp.f32 %v939_v63  ;;  %19447 = vst [vmem:[#allocation112_spill] sm:$0xff] %v12267_v50  ;;  %v19448_v63 = vld [vmem:[#allocation62_spill] sm:$0xff]  ;;  %v19449_v50 = vld [vmem:[#allocation64_spill] sm:$0xff] }
 0x1f2   : > { %19443 = vst [vmem:[#allocation30_spill] sm:$0xff] %v12248_v46  ;;  %v12261_v34 = vmax.f32 %v2409_v39, %v12199_v7  ;;  %v12265_v11 = vadd.f32 %v11758_v61, %v11897_v35  ;;  %8756 = vrcp.f32 %v942_v0  ;;  %v12271_v58 = vadd.f32 %v11758_v61, %v11925_v42 }
 0x1f3   : > { %v12258_v31 = vmax.f32 %v19446_v27, %v19445_v59  ;;  %v18557_v28 = vrot.slane %v12088_v47, 6  ;;  %vm1666_vm14 = vcmp.eq.s32.totalorder %v19448_v63, 1  ;;  %8758 = vrcp.f32 %v941_v16  ;;  %v3223_v27 = vpop.permute.xlu1 %3222 }
 0x1f4   : > { %v8745_v57 = vpop.eup %8744  ;;  %v7464_v39 = vmul.f32 -1.442695, %v12265_v11  ;;  %v18556_v0 = vrot.slane %v12088_v47, 7  ;;  %vm1669_vm15 = vcmp.eq.s32.totalorder %v19449_v50, 1  ;;  %8760 = vpow2.f32 %v7465_v41 }
 0x1f5   : > { %v8747_v2 = vpop.eup %8746  ;;  %v944_v42 = vadd.f32 1.0, %v8745_v57  ;;  %v7467_v40 = vmul.f32 -1.442695, %v12271_v58  ;;  %v19450_v59 = vrot.slane %v12114_v5, 6  ;;  %vm1668_vm0 = vcmp.eq.s32.totalorder %v19452_v10, 1 }
 0x1f6   : > { %v943_v55 = vadd.f32 1.0, %v8747_v2  ;;  %8762 = vpow2.f32 %v7464_v39  ;;  %v19453_v41 = vrot.slane %v12114_v5, 7  ;;  %v19455_v46 = vmax.f32 %v19427_v49, %v19426_v30 }
 0x1f7   : > { %v2687_v16 = vsel %vm1791_vm6, %v19450_v59, %v18557_v28  ;;  %8764 = vrcp.f32 %v944_v42  ;;  %vm3371_vm1 = vcmp.eq.s32.totalorder %v3223_v27, 1  ;;  %v8749_v59 = vpop.eup %8748  ;;  %v12305_v39 = vadd.f32 %v11758_v61, %v11932_v38  ;;  %v12322_v38 = vld [vmem:[%s18348_s0 + $0xa0] sm:$0xff]  ;;  %v19463_v27 = vld [vmem:[#allocation68_spill] sm:$0xff] }
 0x1f8   : > { %v2954_v35 = vsel %vm2902_vm11, %v2687_v16, -inf  ;;  %v3156_v57 = vsel %vm1949_vm12, %v19453_v41, %v18556_v0  ;;  %v12300_v14 = vmax.f32 %v19455_v46, %v19454_v17  ;;  %8766 = vrcp.f32 %v943_v55  ;;  %v12310_v16 = vld [vmem:[%s18348_s0 + $0xa8] sm:$0xff]  ;;  %v19456_v46 = vld [vmem:[#allocation66_spill] sm:$0xff] }
 0x1f9   : > { %v3006_v2 = vmax.f32 %v12088_v47, %v2954_v35  ;;  %v3423_v9 = vsel %vm3371_vm1, %v3156_v57, -inf  ;;  %v18560_v49 = vrot.slane %v12310_v16, 1  ;;  %vm1671_vm2 = vcmp.eq.s32.totalorder %v19456_v46, 1  ;;  %v12315_v35 = vpop.permute.xlu0 %2894  ;;  %v8751_v41 = vpop.eup %8750  ;;  %v19459_v57 = vld [vmem:[#allocation67_spill] sm:$0xff] }
 0x1fa   : > { %v1106_v42 = vmul.f32 %v8749_v59, %v11995_v36  ;;  %19457 = vst [vmem:[#allocation61_spill] sm:$0xff] %v12315_v35  ;;  %8768 = vpow2.f32 %v7467_v40  ;;  %vm1670_vm3 = vcmp.eq.s32.totalorder %v19459_v57, 1  ;;  %v7466_v0 = vmul.f32 -1.442695, %v12305_v39  ;;  %v19460_v36 = vld [vmem:[#allocation36_spill] sm:$0xff]  ;;  %v8753_v35 = vpop.eup %8752 }
 0x1fb   : > { %v12317_v55 = vmax.f32 %v3006_v2, %v3423_v9  ;;  %v19461_v59 = vrot.slane %v19460_v36, 1  ;;  %v12335_v2 = vadd.f32 %v11758_v61, %v11964_v37  ;;  %v19462_v9 = vld [vmem:[#allocation113_spill] sm:$0xff]  ;;  %vm1673_vm5 = vcmp.eq.s32.totalorder %v19463_v27, 1 }
 0x1fc   : > { %v1723_v17 = vsel %vm1667_vm13, %v1106_v42, -inf  ;;  %v1105_v30 = vmul.f32 %v8751_v41, %v12071_v12  ;;  %v19464_v36 = vrot.slane %v12322_v38, 2  ;;  %v1108_v12 = vmul.f32 %v8753_v35, %v12082_v24 }
 0x1fd   : > { %19458 = vst [vmem:[#allocation62_spill] sm:$0xff] %v12317_v55  ;;  %v2141_v40 = vsel %vm2107_vm7, %v19461_v59, %v18560_v49  ;;  %v19465_v59 = vrot.slane %v11470_v43, 2  ;;  %v8755_v49 = vpop.eup %8754  ;;  %v2412_v28 = vmax.f32 %v1723_v17, %v12182_v60  ;;  %v19466_v55 = vmax.f32 %v12201_v3, %v12211_v26  ;;  %v19468_v60 = vld [vmem:[#allocation69_spill] sm:$0xff] }
 0x1fe   : > { %vm2178_vm8 = vcmp.eq.s32.totalorder %v2141_v40, %v12322_v38  ;;  %v2518_v42 = vmax.f32 %v12241_v56, %v1723_v17  ;;  %v8757_v41 = vpop.eup %8756  ;;  %v1722_v43 = vsel %vm1666_vm14, %v1105_v30, -inf  ;;  %v1107_v40 = vmul.f32 %v8755_v49, %v12099_v1 }
 0x1ff   : > { %v12349_v37 = vsel %vm2265_vm4, %v19465_v59, %v19464_v36  ;;  %v12355_v6 = vmax.f32 %v19466_v55, %v1723_v17  ;;  %8770 = vpow2.f32 %v7466_v0  ;;  %v3647_v36 = vsel %vm2178_vm8, 1, %v19157_v19  ;;  %v8759_v59 = vpop.eup %8758  ;;  %8046 = vmatprep.mubr.f32.mxu1 %v1722_v43 }
 0x200   : > { %vm1672_vm9 = vcmp.eq.s32.totalorder %v19468_v60, 1  ;;  %v2411_v3 = vmax.f32 %v1722_v43, %v12199_v7  ;;  %v19469_v55 = vmax.f32 %v12226_v13, %v12238_v32  ;;  %v1725_v56 = vsel %vm1669_vm15, %v1108_v12, -inf  ;;  %3736 = vperm.xlu1 %8563, %v3647_v36   ;;  %v8761_v1 = vpop.eup %8760  ;;  %v12379_v13 = vpop.permute.xlu0 %3213  ;;  %8047 = vmatmul.mubr.f32.gmra.mrb[26].mxu1 %v1723_v17 }
 0x201   : > { %19467 = vst [vmem:[#allocation64_spill] sm:$0xff] %v12355_v6  ;;  %v2466_v30 = vmax.f32 %v2412_v28, %v12211_v26  ;;  %v2414_v63 = vmax.f32 %v1725_v56, %v12211_v26  ;;  %v12374_v0 = vmax.f32 %v2518_v42, %v1725_v56  ;;  %v1724_v7 = vsel %vm1668_vm0, %v1107_v40, -inf  ;;  %19472 = vst [vmem:[#allocation66_spill] sm:$0xff] %v12379_v13  ;;  %v8763_v35 = vpop.eup %8762 }
 0x202   : > { %v12368_v24 = vmax.f32 %v19469_v55, %v1722_v43  ;;  %v2517_v49 = vmax.f32 %v12261_v34, %v1722_v43  ;;  %v2413_v12 = vmax.f32 %v1724_v7, %v12238_v32  ;;  %v2465_v28 = vmax.f32 %v2411_v3, %v12238_v32  ;;  %v8765_v55 = vpop.eup %8764  ;;  %v19474_v32 = vld [vmem:[#allocation81_spill] sm:$0xff] }
 0x203   : > { %19471 = vst [vmem:[#allocation65_spill] sm:$0xff] %v12374_v0  ;;  %v2520_v50 = vmax.f32 %v2466_v30, %v1725_v56  ;;  %v1110_v36 = vmul.f32 %v8757_v41, %v12103_v44  ;;  %v2468_v42 = vmax.f32 %v2414_v63, %v1723_v17  ;;  %v1109_v10 = vmul.f32 %v8759_v59, %v12129_v51  ;;  %v8767_v5 = vpop.eup %8766  ;;  %v19475_v44 = vld [vmem:[#allocation87_spill] sm:$0xff] }
 0x204   : > { %19470 = vst [vmem:[#allocation16_spill] sm:$0xff] %v12368_v24  ;;  %v12384_v26 = vmax.f32 %v2517_v49, %v1724_v7  ;;  %v946_v40 = vadd.f32 1.0, %v8761_v1  ;;  %v2519_v34 = vmax.f32 %v2465_v28, %v1724_v7  ;;  %v2467_v30 = vmax.f32 %v2413_v12, %v1722_v43  ;;  %v8769_v6 = vpop.eup %8768 }
 0x205   : > { %v12389_v13 = vsel %vm1671_vm2, %v1110_v36, -inf  ;;  %v1112_v0 = vmul.f32 %v8765_v55, %v12142_v23  ;;  %vm18597_vm10 = vcmp.eq.s32.totalorder %v19474_v32, 1  ;;  %vm2903_vm11 = vcmp.eq.s32.totalorder %v19475_v44, 1 }
 0x206   : > { %19473 = vst [vmem:[#allocation67_spill] sm:$0xff] %v12384_v26  ;;  %v2416_v41 = vmax.f32 %v12389_v13, %v1723_v17  ;;  %v2522_v3 = vmax.f32 %v2468_v42, %v12389_v13  ;;  %v12397_v51 = vmax.f32 %v2520_v50, %v12389_v13  ;;  %v12401_v46 = vsel %vm1670_vm3, %v1109_v10, -inf  ;;  %v12417_v50 = vpop.permute.xlu0 %3219  ;;  %v12443_v42 = vpop.permute.xlu1 %3228  ;;  %v19482_v10 = vld [vmem:[#allocation70_spill] sm:$0xff] }
 0x207   : > { %v2415_v59 = vmax.f32 %v12401_v46, %v1722_v43  ;;  %v2521_v23 = vmax.f32 %v2467_v30, %v12401_v46  ;;  %v12406_v1 = vmax.f32 %v2519_v34, %v12401_v46  ;;  %v12410_v63 = vsel %vm1673_vm5, %v1112_v0, -inf  ;;  %19479 = vst [vmem:[#allocation87_spill] sm:$0xff] %v12417_v50  ;;  %19481 = vst [vmem:[#allocation126_spill] sm:$0xff] %v12443_v42  ;;  %v19483_v34 = vld [vmem:[#allocation111_spill] sm:$0xff] }
 0x208   : > { %19476 = vst [vmem:[#allocation36_spill] sm:$0xff] %v12397_v51  ;;  %v2418_v17 = vmax.f32 %v12410_v63, %v1725_v56  ;;  %v12414_v49 = vmax.f32 %v2522_v3, %v12410_v63  ;;  %v1111_v57 = vmul.f32 %v8767_v5, %v12148_v20  ;;  %8772 = vrcp.f32 %v946_v40  ;;  %v8965_v20 = vld [vmem:[%s18348_s0 + $0x98] sm:$0xff] }
 0x209   : > { %19477 = vst [vmem:[#allocation68_spill] sm:$0xff] %v12406_v1  ;;  %v12419_v43 = vmax.f32 %v2415_v59, %v1724_v7  ;;  %v12421_v12 = vmax.f32 %v2416_v41, %v1725_v56  ;;  %v945_v28 = vadd.f32 1.0, %v8763_v35  ;;  %v948_v36 = vadd.f32 1.0, %v8769_v6  ;;  %v8771_v55 = vpop.eup %8770  ;;  %v19484_v59 = vld [vmem:[#allocation83_spill] sm:$0xff] }
 0x20a   : > { %19478 = vst [vmem:[#allocation69_spill] sm:$0xff] %v12414_v49  ;;  %v12425_v27 = vsel %vm1672_vm9, %v1111_v57, -inf  ;;  %v12428_v0 = vmax.f32 %v2418_v17, %v12389_v13  ;;  %vm2335_vm13 = vcmp.eq.s32.totalorder %v12349_v37, %v8965_v20  ;;  %v7469_v5 = vmul.f32 -1.442695, %v12335_v2  ;;  %v3226_v57 = vpop.permute.xlu0 %3225 }
 0x20b   : > { %v2417_v56 = vmax.f32 %v12425_v27, %v1724_v7  ;;  %v12439_v60 = vmax.f32 %v2521_v23, %v12425_v27  ;;  %v2524_v35 = vmax.f32 %v12421_v12, %v12410_v63  ;;  %vm1675_vm14 = vcmp.eq.s32.totalorder %v19482_v10, 1 }
 0x20c   : > { %8774 = vrcp.f32 %v945_v28  ;;  %v947_v40 = vadd.f32 1.0, %v8771_v55  ;;  %v4115_v37 = vsel %vm2335_vm13, 1, %v19157_v19  ;;  %v18568_v30 = vrot.slane %v19483_v34, 6 }
 0x20d   : > { %19480 = vst [vmem:[#allocation125_spill] sm:$0xff] %v12439_v60  ;;  %8776 = vrcp.f32 %v948_v36  ;;  %v12449_v7 = vmax.f32 %v2417_v56, %v12401_v46  ;;  %4202 = vperm.xlu0 %8562, %v4115_v37   ;;  %v3060_v41 = vrot.slane %v19462_v9, 7  ;;  %v18567_v3 = vrot.slane %v19483_v34, 7  ;;  %v19489_v37 = vld [vmem:[#allocation93_spill] sm:$0xff] }
 0x20e   : > { %vm18595_vm15 = vcmp.eq.s32.totalorder %v19484_v59, 1  ;;  %8778 = vrcp.f32 %v947_v40  ;;  %v19485_v23 = vrot.slane %v19462_v9, 6  ;;  %vm18590_vm0 = vcmp.eq.s32.totalorder %v12443_v42, 1  ;;  %v19488_v40 = vld [vmem:[#allocation71_spill] sm:$0xff] }
 0x20f   : > { %v19487_v28 = vrot.slane %v12088_v47, 6  ;;  %8780 = vpow2.f32 %v7469_v5  ;;  %v3154_v20 = vsel %vm1949_vm12, %v3060_v41, %v18567_v3  ;;  %vm1674_vm1 = vcmp.eq.s32.totalorder %v19488_v40, 1  ;;  %v19491_v3 = vld [vmem:[#allocation72_spill] sm:$0xff] }
 0x210   : > { %v2685_v17 = vsel %vm1791_vm6, %v19485_v23, %v18568_v30  ;;  %v19486_v12 = vmov %v19485_v23  ;;  %vm18596_vm2 = vcmp.eq.s32.totalorder %v19489_v37, 1  ;;  %v3425_v5 = vsel %vm18590_vm0, %v3154_v20, -inf  ;;  %v19492_v30 = vld [vmem:[#allocation73_spill] sm:$0xff] }
 0x211   : > { %v2686_v36 = vsel %vm1791_vm6, %v19487_v28, %v19486_v12  ;;  %v2956_v55 = vsel %vm18597_vm10, %v2685_v17, -inf  ;;  %v19490_v17 = vrot.slane %v12088_v47, 7  ;;  %vm1677_vm3 = vcmp.eq.s32.totalorder %v19491_v3, 1 }
 0x212   : > { %v2955_v56 = vsel %vm2903_vm11, %v2686_v36, -inf  ;;  %v3008_v23 = vmax.f32 %v19483_v34, %v2956_v55  ;;  %vm3372_vm5 = vcmp.eq.s32.totalorder %v3226_v57, 1  ;;  %v12488_v44 = vadd.f32 %v11758_v61, %v11973_v33  ;;  %v12494_v55 = vld [vmem:[%s18348_s0 + $0xb0] sm:$0xff] }
 0x213   : > { %v3007_v12 = vmax.f32 %v19462_v9, %v2955_v56  ;;  %v3155_v28 = vsel %vm1949_vm12, %v19490_v17, %v3060_v41  ;;  %v8773_v56 = vpop.eup %8772  ;;  %v2593_v17 = vrot.slane %v12234_v8, 6  ;;  %v18570_v57 = vrot.slane %v12136_v18, 6 }
 0x214   : > { %v12497_v6 = vmax.f32 %v3008_v23, %v3425_v5  ;;  %v3424_v41 = vsel %vm3372_vm5, %v3155_v28, -inf  ;;  %vm1676_vm8 = vcmp.eq.s32.totalorder %v19492_v30, 1  ;;  %v1114_v61 = vmul.f32 %v8773_v56, %v12154_v21 }
 0x215   : > { %v12503_v33 = vmax.f32 %v3007_v12, %v3424_v41  ;;  %v7468_v36 = vmul.f32 -1.442695, %v12488_v44  ;;  %v19494_v49 = vrot.slane %v12310_v16, 2  ;;  %v19495_v20 = vrot.slane %v12322_v38, 2  ;;  %v12519_v12 = vpop.permute.xlu1 %3234 }
 0x216   : > { %v19496_v5 = vrot.slane %v12494_v55, 1  ;;  %v19497_v28 = vrot.slane %v12310_v16, 1  ;;  %19498 = vst [vmem:[#allocation111_spill] sm:$0xff] %v12519_v12  ;;  %v2683_v56 = vsel %vm1791_vm6, %v2593_v17, %v18570_v57  ;;  %v3062_v41 = vrot.slane %v12234_v8, 7 }
 0x217   : > { %19493 = vst [vmem:[#allocation70_spill] sm:$0xff] %v12503_v33  ;;  %v2299_v23 = vsel %vm2265_vm4, %v19495_v20, %v19494_v49  ;;  %v1731_v49 = vsel %vm1675_vm14, %v1114_v61, -inf  ;;  %8782 = vpow2.f32 %v7468_v36  ;;  %v8775_v20 = vpop.eup %8774  ;;  %v2958_v10 = vsel %vm18595_vm15, %v2683_v56, -inf }
 0x218   : > { %vm2336_vm9 = vcmp.eq.s32.totalorder %v2299_v23, %v12322_v38  ;;  %v2140_v21 = vsel %vm2107_vm7, %v19497_v28, %v19496_v5  ;;  %v2420_v23 = vmax.f32 %v1731_v49, %v12389_v13  ;;  %v2526_v5 = vmax.f32 %v12428_v0, %v1731_v49  ;;  %v8777_v60 = vpop.eup %8776 }
 0x219   : > { %v4116_v38 = vsel %vm2336_vm9, 1, %v19157_v19  ;;  %vm2179_vm11 = vcmp.eq.s32.totalorder %v2140_v21, %v12310_v16  ;;  %v12532_v28 = vmax.f32 %v2524_v35, %v1731_v49  ;;  %v1113_v51 = vmul.f32 %v8775_v20, %v12265_v11  ;;  %v8779_v61 = vpop.eup %8778  ;;  %v19501_v20 = vld [vmem:[#allocation88_spill] sm:$0xff] }
 0x21a   : > { %4205 = vperm.xlu1 %8563, %v4116_v38   ;;  %v3648_v57 = vsel %vm2179_vm11, 1, %v19157_v19  ;;  %v18573_v36 = vrot.slane %v12136_v18, 7  ;;  %vm18579_vm13 = vcmp.eq.s32.totalorder %v12519_v12, 1  ;;  %v1116_v13 = vmul.f32 %v8777_v60, %v12271_v58  ;;  %v19515_v12 = vld [vmem:[#allocation103_spill] sm:$0xff] }
 0x21b   : > { %19499 = vst [vmem:[#allocation71_spill] sm:$0xff] %v12532_v28  ;;  %3739 = vperm.xlu0 %8562, %v3648_v57   ;;  %v12542_v0 = vmax.f32 %v2420_v23, %v12410_v63  ;;  %v3010_v35 = vmax.f32 %v12136_v18, %v2958_v10  ;;  %v19500_v21 = vrot.slane %v19483_v34, 6  ;;  %v8781_v57 = vpop.eup %8780  ;;  %v12551_v56 = vsel %vm1674_vm1, %v1113_v51, -inf }
 0x21c   : > { %v1115_v38 = vmul.f32 %v8779_v61, %v12305_v39  ;;  %v3152_v58 = vsel %vm1949_vm12, %v3062_v41, %v18573_v36  ;;  %vm18605_vm14 = vcmp.eq.s32.totalorder %v19501_v20, 1  ;;  %v19502_v51 = vmax.f32 %v12419_v43, %v12425_v27 }
 0x21d   : > { %v2684_v11 = vsel %vm1791_vm6, %v19500_v21, %v2593_v17  ;;  %v2419_v17 = vmax.f32 %v12551_v56, %v12401_v46  ;;  %v12571_v39 = vsel %vm1677_vm3, %v1116_v13, -inf  ;;  %v2525_v23 = vmax.f32 %v12449_v7, %v12551_v56  ;;  %v19505_v21 = vld [vmem:[#allocation99_spill] sm:$0xff] }
 0x21e   : > { %v2957_v60 = vsel %vm18596_vm2, %v2684_v11, -inf  ;;  %v12567_v40 = vmax.f32 %v19502_v51, %v12551_v56  ;;  %v2422_v61 = vmax.f32 %v12571_v39, %v12410_v63  ;;  %v12582_v43 = vmax.f32 %v2526_v5, %v12571_v39  ;;  %v12594_v63 = vpop.permute.xlu0 %3231 }
 0x21f   : > { %vm18592_vm1 = vcmp.eq.s32.totalorder %v19505_v21, 1  ;;  %v12587_v3 = vsel %vm1676_vm8, %v1115_v38, -inf  ;;  %v12590_v7 = vmax.f32 %v2419_v17, %v12425_v27  ;;  %v950_v13 = vadd.f32 1.0, %v8781_v57  ;;  %19506 = vst [vmem:[#allocation127_spill] sm:$0xff] %v12594_v63 }
 0x220   : > { %19503 = vst [vmem:[#allocation72_spill] sm:$0xff] %v12567_v40  ;;  %19504 = vst [vmem:[#allocation73_spill] sm:$0xff] %v12582_v43  ;;  %v3427_v11 = vsel %vm18579_vm13, %v3152_v58, -inf  ;;  %v2421_v51 = vmax.f32 %v12587_v3, %v12425_v27  ;;  %v12599_v5 = vmax.f32 %v2525_v23, %v12587_v3  ;;  %v12601_v46 = vmax.f32 %v2422_v61, %v1731_v49  ;;  %v12619_v49 = vld [vmem:[%s18348_s0 + $0xb8] sm:$0xff]  ;;  %v12638_v43 = vpop.permute.xlu1 %3240 }
 0x221   : > { %v12603_v30 = vmax.f32 %v3010_v35, %v3427_v11  ;;  %8784 = vrcp.f32 %v950_v13  ;;  %v3009_v57 = vmax.f32 %v12234_v8, %v2957_v60  ;;  %v19508_v58 = vrot.slane %v19483_v34, 7  ;;  %v8783_v10 = vpop.eup %8782  ;;  %v19509_v11 = vld [vmem:[#allocation90_spill] sm:$0xff]  ;;  %19512 = vst [vmem:[#allocation129_spill] sm:$0xff] %v12638_v43 }
 0x222   : > { %19507 = vst [vmem:[#allocation128_spill] sm:$0xff] %v12599_v5  ;;  %v12613_v27 = vmax.f32 %v2421_v51, %v12551_v56  ;;  %vm18580_vm3 = vcmp.eq.s32.totalorder %v12594_v63, 1  ;;  %v2075_v35 = vrot.slane %v12619_v49, 1  ;;  %v2232_v60 = vrot.slane %v12494_v55, 2  ;;  %v19513_v5 = vld [vmem:[#allocation74_spill] sm:$0xff] }
 0x223   : > { %v3153_v17 = vsel %vm1949_vm12, %v19508_v58, %v3062_v41  ;;  %v949_v23 = vadd.f32 1.0, %v8783_v10  ;;  %v2595_v41 = vrot.slane %v12300_v14, 6  ;;  %v2596_v13 = vrot.slane %v12258_v31, 6 }
 0x224   : > { %v3426_v61 = vsel %vm18580_vm3, %v3153_v17, -inf  ;;  %vm18867_vm5 = vcmp.eq.s32.totalorder %v19509_v11, 1  ;;  %v19510_v58 = vrot.slane %v12494_v55, 1  ;;  %v19511_v36 = vrot.slane %v12310_v16, 2 }
 0x225   : > { %v12628_v51 = vmax.f32 %v3009_v57, %v3426_v61  ;;  %v3064_v17 = vrot.slane %v12300_v14, 7  ;;  %vm1679_vm8 = vcmp.eq.s32.totalorder %v19513_v5, 1  ;;  %8786 = vrcp.f32 %v949_v23  ;;  %v12646_v61 = vpop.permute.xlu0 %3237 }
 0x226   : > { %v2139_v38 = vsel %vm2107_vm7, %v19510_v58, %v2075_v35  ;;  %v2298_v10 = vsel %vm2265_vm4, %v19511_v36, %v2232_v60  ;;  %v2681_v57 = vsel %vm1791_vm6, %v2595_v41, %v2596_v13  ;;  %19514 = vst [vmem:[#allocation74_spill] sm:$0xff] %v12646_v61  ;;  %v3065_v40 = vrot.slane %v12258_v31, 7 }
 0x227   : > { %vm2180_vm9 = vcmp.eq.s32.totalorder %v2139_v38, %v12494_v55  ;;  %vm2337_vm11 = vcmp.eq.s32.totalorder %v2298_v10, %v12310_v16  ;;  %v2960_v28 = vsel %vm18605_vm14, %v2681_v57, -inf  ;;  %vm18880_vm13 = vcmp.eq.s32.totalorder %v19515_v12, 1 }
 0x228   : > { %v3649_v58 = vsel %vm2180_vm9, 1, %v19157_v19  ;;  %v4117_v36 = vsel %vm2337_vm11, 1, %v19157_v19  ;;  %v3012_v16 = vmax.f32 %v12258_v31, %v2960_v28  ;;  %vm18602_vm3 = vcmp.eq.s32.totalorder %v12638_v43, 1 }
 0x229   : > { %3742 = vperm.xlu1 %8563, %v3649_v58   ;;  %4208 = vperm.xlu0 %8562, %v4117_v36   ;;  %v19516_v38 = vrot.slane %v12136_v18, 6  ;;  %v19517_v10 = vrot.slane %v12136_v18, 7  ;;  %v3150_v63 = vsel %vm1949_vm12, %v3064_v17, %v3065_v40  ;;  %vm18588_vm9 = vcmp.eq.s32.totalorder %v12646_v61, 1  ;;  %v19518_v36 = vld [vmem:[#allocation75_spill] sm:$0xff]  ;;  %v19521_v61 = vld [vmem:[#allocation86_spill] sm:$0xff] }
 0x22a   : > { %v18591_v28 = vrot.slane %v12619_v49, 2  ;;  %vm1678_vm11 = vcmp.eq.s32.totalorder %v19518_v36, 1 }
 0x22b   : > { %v2682_v23 = vsel %vm1791_vm6, %v19516_v38, %v2595_v41  ;;  %v3151_v57 = vsel %vm1949_vm12, %v19517_v10, %v3064_v17  ;;  %v3429_v41 = vsel %vm18602_vm3, %v3150_v63, -inf  ;;  %v12679_v17 = vld [vmem:[%s18348_s0 + $0xc0] sm:$0xff]  ;;  %v12688_v63 = vpop.permute.xlu1 %3246  ;;  %v8785_v37 = vpop.eup %8784 }
 0x22c   : > { %v2959_v58 = vsel %vm18592_vm1, %v2682_v23, -inf  ;;  %v3428_v10 = vsel %vm18588_vm9, %v3151_v57, -inf  ;;  %v2076_v23 = vrot.slane %v12679_v17, 1  ;;  %v12682_v42 = vmax.f32 %v3012_v16, %v3429_v41  ;;  %19519 = vst [vmem:[#allocation75_spill] sm:$0xff] %v12688_v63 }
 0x22d   : > { %v3011_v38 = vmax.f32 %v12300_v14, %v2959_v58  ;;  %v2297_v21 = vsel %vm2265_vm4, %v2232_v60, %v18591_v28  ;;  %v19520_v58 = vld [vmem:[#allocation107_spill] sm:$0xff]  ;;  %v18593_v57 = vrot.slane %v19521_v61, 6  ;;  %v1118_v43 = vmul.f32 %v8785_v37, %v12335_v2 }
 0x22e   : > { %v2597_v59 = vrot.slane %v19520_v58, 6  ;;  %vm2338_vm9 = vcmp.eq.s32.totalorder %v2297_v21, %v12494_v55  ;;  %v2138_v16 = vsel %vm2107_vm7, %v2075_v35, %v2076_v23  ;;  %v3066_v41 = vrot.slane %v19520_v58, 7 }
 0x22f   : > { %v12692_v32 = vmax.f32 %v3011_v38, %v3428_v10  ;;  %v4118_v60 = vsel %vm2338_vm9, 1, %v19157_v19  ;;  %vm2181_vm0 = vcmp.eq.s32.totalorder %v2138_v16, %v12619_v49  ;;  %v12705_v38 = vpop.permute.xlu0 %3243  ;;  %vm18866_vm1 = vcmp.eq.s32.totalorder %v12688_v63, 1  ;;  %v19568_v63 = vld [vmem:[#allocation34_spill] sm:$0xff] }
 0x230   : > { %v2679_v28 = vsel %vm1791_vm6, %v2597_v59, %v18593_v57  ;;  %19522 = vst [vmem:[#allocation107_spill] sm:$0xff] %v12705_v38  ;;  %4211 = vperm.xlu1 %8563, %v4118_v60   ;;  %v3650_v55 = vsel %vm2181_vm0, 1, %v19157_v19  ;;  %v1735_v2 = vsel %vm1679_vm8, %v1118_v43, -inf  ;;  %v2680_v10 = vsel %vm1791_vm6, %v2596_v13, %v2597_v59  ;;  %v8787_v60 = vpop.eup %8786 }
 0x231   : > { %v2962_v21 = vsel %vm18867_vm5, %v2679_v28, -inf  ;;  %3745 = vperm.xlu0 %8562, %v3650_v55   ;;  %v3149_v16 = vsel %vm1949_vm12, %v3065_v40, %v3066_v41  ;;  %v2372_v57 = vmax.f32 %v11252_v53, %v1735_v2  ;;  %v19523_v28 = vmax.f32 %v11737_v25, %v12571_v39  ;;  %v19526_v55 = vld [vmem:[#allocation97_spill] sm:$0xff] }
 0x232   : > { %v3014_v37 = vmax.f32 %v19521_v61, %v2962_v21  ;;  %v2530_v20 = vmax.f32 %v12601_v46, %v1735_v2  ;;  %v19524_v43 = vmax.f32 %v12542_v0, %v12571_v39  ;;  %vm18612_vm0 = vcmp.eq.s32.totalorder %v19526_v55, 1 }
 0x233   : > { %v2424_v35 = vmax.f32 %v19523_v28, %v1735_v2  ;;  %v1117_v59 = vmul.f32 %v8787_v60, %v12488_v44  ;;  %v19527_v40 = vrot.slane %v19521_v61, 7  ;;  %v2961_v21 = vsel %vm18880_vm13, %v2680_v10, -inf  ;;  %v19530_v60 = vld [vmem:[#allocation17_spill] sm:$0xff] }
 0x234   : > { %v12727_v5 = vmax.f32 %v19524_v43, %v1735_v2  ;;  %vm18879_vm8 = vcmp.eq.s32.totalorder %v12705_v38, 1  ;;  %v2426_v46 = vmax.f32 %v2372_v57, %v11737_v25  ;;  %v12741_v39 = vmax.f32 %v2530_v20, %v11737_v25  ;;  %v12745_v2 = vpop.permute.xlu1 %3252  ;;  %v12755_v57 = vpop.permute.xlu0 %3249 }
 0x235   : > { %v3148_v13 = vsel %vm1949_vm12, %v3066_v41, %v19527_v40  ;;  %v2478_v0 = vmax.f32 %v2424_v35, %v11252_v53  ;;  %19529 = vst [vmem:[#allocation131_spill] sm:$0xff] %v12745_v2  ;;  %vm18629_vm9 = vcmp.eq.s32.totalorder %v19530_v60, 1  ;;  %v1734_v41 = vsel %vm1678_vm11, %v1117_v59, -inf  ;;  %19531 = vst [vmem:[#allocation132_spill] sm:$0xff] %v12755_v57 }
 0x236   : > { %19525 = vst [vmem:[#allocation86_spill] sm:$0xff] %v12727_v5  ;;  %19528 = vst [vmem:[#allocation130_spill] sm:$0xff] %v12741_v39  ;;  %v3431_v44 = vsel %vm18866_vm1, %v3148_v13, -inf  ;;  %v3013_v28 = vmax.f32 %v19520_v58, %v2961_v21  ;;  %v3430_v53 = vsel %vm18879_vm8, %v3149_v16, -inf  ;;  %v2480_v25 = vmax.f32 %v2426_v46, %v11275_v62  ;;  %v12774_v16 = vld [vmem:[%s18348_s0 + $0xc8] sm:$0xff] }
 0x237   : > { %v12750_v10 = vmax.f32 %v3014_v37, %v3431_v44  ;;  %v12759_v20 = vmax.f32 %v2478_v0, %v11275_v62  ;;  %v2371_v35 = vmax.f32 %v19393_v15, %v1734_v41  ;;  %v2423_v43 = vmax.f32 %v1734_v41, %v12551_v56  ;;  %v19538_v0 = vld [vmem:[#allocation37_spill] sm:$0xff] }
 0x238   : > { %v2529_v36 = vmax.f32 %v12613_v27, %v1734_v41  ;;  %v19533_v37 = vmax.f32 %v12590_v7, %v12587_v3  ;;  %v12769_v40 = vmax.f32 %v3013_v28, %v3430_v53  ;;  %v2077_v62 = vrot.slane %v12774_v16, 1  ;;  %v19540_v53 = vld [vmem:[#allocation101_spill] sm:$0xff] }
 0x239   : > { %19532 = vst [vmem:[#allocation133_spill] sm:$0xff] %v12759_v20  ;;  %v12778_v13 = vmax.f32 %v2480_v25, %v19406_v52  ;;  %v2425_v56 = vmax.f32 %v2371_v35, %v11741_v48  ;;  %v12782_v27 = vmax.f32 %v2423_v43, %v12587_v3  ;;  %v2234_v7 = vrot.slane %v12679_v17, 2  ;;  %v12800_v43 = vpop.permute.xlu1 %3258 }
 0x23a   : > { %v12767_v59 = vmax.f32 %v19533_v37, %v1734_v41  ;;  %v12786_v21 = vmax.f32 %v2529_v36, %v11741_v48  ;;  %v2137_v46 = vsel %vm2107_vm7, %v2076_v23, %v2077_v62  ;;  %v2599_v44 = vrot.slane %v19538_v0, 6  ;;  %v19539_v41 = vld [vmem:[#allocation91_spill] sm:$0xff]  ;;  %19542 = vst [vmem:[#allocation37_spill] sm:$0xff] %v12800_v43  ;;  %v19543_v23 = vld [vmem:[#allocation78_spill] sm:$0xff] }
 0x23b   : > { %19535 = vst [vmem:[#allocation135_spill] sm:$0xff] %v12778_v13  ;;  %19536 = vst [vmem:[#allocation136_spill] sm:$0xff] %v12782_v27  ;;  %v2600_v28 = vrot.slane %v19539_v41, 6  ;;  %vm18624_vm11 = vcmp.eq.s32.totalorder %v19540_v53, 1  ;;  %v2479_v52 = vmax.f32 %v2425_v56, %v11308_v45  ;;  %vm2182_vm15 = vcmp.eq.s32.totalorder %v2137_v46, %v12679_v17  ;;  %v12808_v56 = vpop.permute.xlu0 %3255  ;;  %v19545_v46 = vld [vmem:[#allocation26_spill] sm:$0xff] }
 0x23c   : > { %19534 = vst [vmem:[#allocation134_spill] sm:$0xff] %v12767_v59  ;;  %19537 = vst [vmem:[#allocation137_spill] sm:$0xff] %v12786_v21  ;;  %v19541_v3 = vrot.slane %v12619_v49, 2  ;;  %v3068_v35 = vrot.slane %v19538_v0, 7  ;;  %vm18628_vm2 = vcmp.eq.s32.totalorder %v19543_v23, 1  ;;  %v3651_v36 = vsel %vm2182_vm15, 1, %v19157_v19 }
 0x23d   : > { %v2677_v45 = vsel %vm1791_vm6, %v2599_v44, %v2600_v28  ;;  %v3069_v37 = vrot.slane %v19539_v41, 7  ;;  %19544 = vst [vmem:[#allocation91_spill] sm:$0xff] %v12808_v56  ;;  %v12811_v15 = vmax.f32 %v2479_v52, %v19545_v46  ;;  %3748 = vperm.xlu1 %8563, %v3651_v36   ;;  %vm18610_vm15 = vcmp.eq.s32.totalorder %v12745_v2, 1  ;;  %v12851_v59 = vpop.permute.xlu1 %3264 }
 0x23e   : > { %v2296_v25 = vsel %vm2265_vm4, %v19541_v3, %v2234_v7  ;;  %v2964_v27 = vsel %vm18612_vm0, %v2677_v45, -inf  ;;  %v19547_v48 = vrot.slane %v19521_v61, 6  ;;  %v19548_v36 = vrot.slane %v19521_v61, 7 }
 0x23f   : > { %vm2339_vm10 = vcmp.eq.s32.totalorder %v2296_v25, %v12619_v49  ;;  %19546 = vst [vmem:[#allocation26_spill] sm:$0xff] %v12811_v15  ;;  %v3016_v49 = vmax.f32 %v19539_v41, %v2964_v27  ;;  %v3146_v25 = vsel %vm1949_vm12, %v3068_v35, %v3069_v37  ;;  %v2235_v27 = vrot.slane %v12774_v16, 2  ;;  %v12859_v47 = vpop.permute.xlu0 %3261 }
 0x240   : > { %v4119_v3 = vsel %vm2339_vm10, 1, %v19157_v19  ;;  %v2678_v52 = vsel %vm1791_vm6, %v19547_v48, %v2599_v44  ;;  %v3147_v46 = vsel %vm1949_vm12, %v19548_v36, %v3068_v35  ;;  %v3433_v45 = vsel %vm18610_vm15, %v3146_v25, -inf  ;;  %v12842_v44 = vld [vmem:[%s18348_s0 + $0xd0] sm:$0xff]  ;;  %v19550_v36 = vld [vmem:[#allocation38_spill] sm:$0xff] }
 0x241   : > { %4214 = vperm.xlu0 %8562, %v4119_v3   ;;  %v2963_v3 = vsel %vm18629_vm9, %v2678_v52, -inf  ;;  %vm18614_vm10 = vcmp.eq.s32.totalorder %v12755_v57, 1  ;;  %v12834_v39 = vmax.f32 %v3016_v49, %v3433_v45  ;;  %v2078_v35 = vrot.slane %v12842_v44, 1  ;;  %v19549_v25 = vld [vmem:[#allocation105_spill] sm:$0xff]  ;;  %v19551_v45 = vld [vmem:[#allocation18_spill] sm:$0xff]  ;;  %19552 = vst [vmem:[#allocation38_spill] sm:$0xff] %v12851_v59  ;;  %v12896_v20 = vpop.permute.xlu1 %3270 }
 0x242   : > { %v3015_v21 = vmax.f32 %v19538_v0, %v2963_v3  ;;  %v3432_v48 = vsel %vm18614_vm10, %v3147_v46, -inf  ;;  %vm18643_vm3 = vcmp.eq.s32.totalorder %v19549_v25, 1  ;;  %v2295_v52 = vsel %vm2265_vm4, %v2234_v7, %v2235_v27  ;;  %19553 = vst [vmem:[#allocation18_spill] sm:$0xff] %v12859_v47  ;;  %v19554_v7 = vld [vmem:[#allocation63_spill] sm:$0xff] }
 0x243   : > { %v2601_v49 = vrot.slane %v19550_v36, 6  ;;  %v2602_v5 = vrot.slane %v19551_v45, 6  ;;  %v3070_v3 = vrot.slane %v19550_v36, 7  ;;  %vm2340_vm14 = vcmp.eq.s32.totalorder %v2295_v52, %v12679_v17 }
 0x244   : > { %v12853_v46 = vmax.f32 %v3015_v21, %v3432_v48  ;;  %v2136_v33 = vsel %vm2107_vm7, %v2077_v62, %v2078_v35  ;;  %v3071_v9 = vrot.slane %v19551_v45, 7  ;;  %vm18660_vm15 = vcmp.eq.s32.totalorder %v19554_v7, 1 }
 0x245   : > { %v4120_v50 = vsel %vm2340_vm14, 1, %v19157_v19  ;;  %vm2183_vm0 = vcmp.eq.s32.totalorder %v2136_v33, %v12774_v16  ;;  %v2675_v13 = vsel %vm1791_vm6, %v2601_v49, %v2602_v5  ;;  %vm18623_vm10 = vcmp.eq.s32.totalorder %v12800_v43, 1  ;;  %v19558_v43 = vld [vmem:[#allocation22_spill] sm:$0xff] }
 0x246   : > { %4217 = vperm.xlu1 %8563, %v4120_v50   ;;  %v3652_v17 = vsel %vm2183_vm0, 1, %v19157_v19  ;;  %v2966_v62 = vsel %vm18624_vm11, %v2675_v13, -inf  ;;  %v3144_v21 = vsel %vm1949_vm12, %v3070_v3, %v3071_v9  ;;  %v2676_v48 = vsel %vm1791_vm6, %v2600_v28, %v2601_v49  ;;  %v12886_v28 = vld [vmem:[%s18348_s0 + $0xd8] sm:$0xff] }
 0x247   : > { %3751 = vperm.xlu0 %8562, %v3652_v17   ;;  %v3018_v33 = vmax.f32 %v19551_v45, %v2966_v62  ;;  %v3435_v52 = vsel %vm18623_vm10, %v3144_v21, -inf  ;;  %v2965_v50 = vsel %vm18628_vm2, %v2676_v48, -inf  ;;  %v3145_v15 = vsel %vm1949_vm12, %v3069_v37, %v3070_v3  ;;  %v19555_v48 = vld [vmem:[#allocation102_spill] sm:$0xff] }
 0x248   : > { %v3017_v13 = vmax.f32 %v19550_v36, %v2965_v50  ;;  %vm18625_vm14 = vcmp.eq.s32.totalorder %v12808_v56, 1  ;;  %v2079_v49 = vrot.slane %v12886_v28, 1  ;;  %v2236_v17 = vrot.slane %v12842_v44, 2  ;;  %v19556_v3 = vld [vmem:[#allocation98_spill] sm:$0xff]  ;;  %19557 = vst [vmem:[#allocation102_spill] sm:$0xff] %v12896_v20  ;;  %v12906_v56 = vpop.permute.xlu0 %3267 }
 0x249   : > { %v12890_v62 = vmax.f32 %v3018_v33, %v3435_v52  ;;  %v3434_v21 = vsel %vm18625_vm14, %v3145_v15, -inf  ;;  %v2603_v37 = vrot.slane %v19555_v48, 6  ;;  %v2604_v50 = vrot.slane %v19556_v3, 6  ;;  %19559 = vst [vmem:[#allocation138_spill] sm:$0xff] %v12906_v56  ;;  %v19560_v15 = vld [vmem:[#allocation115_spill] sm:$0xff] }
 0x24a   : > { %vm18657_vm0 = vcmp.eq.s32.totalorder %v19558_v43, 1  ;;  %v12899_v53 = vmax.f32 %v3017_v13, %v3434_v21  ;;  %v2135_v23 = vsel %vm2107_vm7, %v2078_v35, %v2079_v49  ;;  %v2294_v33 = vsel %vm2265_vm4, %v2235_v27, %v2236_v17 }
 0x24b   : > { %v3072_v52 = vrot.slane %v19555_v48, 7  ;;  %vm18659_vm10 = vcmp.eq.s32.totalorder %v19560_v15, 1  ;;  %vm2184_vm11 = vcmp.eq.s32.totalorder %v2135_v23, %v12842_v44  ;;  %vm2341_vm14 = vcmp.eq.s32.totalorder %v2294_v33, %v12774_v16  ;;  %v19574_v15 = vld [vmem:[#allocation109_spill] sm:$0xff] }
 0x24c   : > { %v2673_v13 = vsel %vm1791_vm6, %v2603_v37, %v2604_v50  ;;  %v3073_v21 = vrot.slane %v19556_v3, 7  ;;  %v3653_v35 = vsel %vm2184_vm11, 1, %v19157_v19  ;;  %v4121_v2 = vsel %vm2341_vm14, 1, %v19157_v19 }
 0x24d   : > { %v2968_v27 = vsel %vm18643_vm3, %v2673_v13, -inf  ;;  %vm18642_vm2 = vcmp.eq.s32.totalorder %v12851_v59, 1  ;;  %3754 = vperm.xlu1 %8563, %v3653_v35   ;;  %4220 = vperm.xlu0 %8562, %v4121_v2   ;;  %v2674_v33 = vsel %vm1791_vm6, %v2602_v5, %v2603_v37  ;;  %vm18645_vm9 = vcmp.eq.s32.totalorder %v12859_v47, 1  ;;  %v12940_v37 = vld [vmem:[%s18348_s0 + $0xe0] sm:$0xff]  ;;  %v19563_v59 = vld [vmem:[#allocation24_spill] sm:$0xff]  ;;  %v12951_v47 = vpop.permute.xlu0 %3273 }
 0x24e   : > { %v3020_v23 = vmax.f32 %v19556_v3, %v2968_v27  ;;  %v3142_v16 = vsel %vm1949_vm12, %v3072_v52, %v3073_v21  ;;  %v2967_v13 = vsel %vm18660_vm15, %v2674_v33, -inf  ;;  %v3143_v35 = vsel %vm1949_vm12, %v3071_v9, %v3072_v52  ;;  %v12943_v33 = vpop.permute.xlu1 %3276  ;;  %19566 = vst [vmem:[#allocation141_spill] sm:$0xff] %v12951_v47  ;;  %v5984_v3 = vld [vmem:[#allocation5 + $0x88] sm:$0xff] }
 0x24f   : > { %v3437_v55 = vsel %vm18642_vm2, %v3142_v16, -inf  ;;  %v2237_v2 = vrot.slane %v12886_v28, 2  ;;  %v3019_v25 = vmax.f32 %v19555_v48, %v2967_v13  ;;  %v3436_v5 = vsel %vm18645_vm9, %v3143_v35, -inf  ;;  %19562 = vst [vmem:[#allocation140_spill] sm:$0xff] %v12943_v33 }
 0x250   : > { %v12932_v27 = vmax.f32 %v3020_v23, %v3437_v55  ;;  %v2080_v16 = vrot.slane %v12940_v37, 1  ;;  %vm18670_vm11 = vcmp.eq.s32.totalorder %v19563_v59, 1  ;;  %v19564_v55 = vld [vmem:[#allocation106_spill] sm:$0xff]  ;;  %v19565_v23 = vld [vmem:[#allocation104_spill] sm:$0xff]  ;;  %vm18682_vm2 = vcmp.eq.s32.totalorder %v19568_v63, 1 }
 0x251   : > { %v2293_v9 = vsel %vm2265_vm4, %v2236_v17, %v2237_v2  ;;  %v2605_v52 = vrot.slane %v19564_v55, 6  ;;  %v2606_v13 = vrot.slane %v19565_v23, 6  ;;  %v3074_v35 = vrot.slane %v19564_v55, 7  ;;  %v12996_v43 = vpop.permute.xlu0 %3279 }
 0x252   : > { %19561 = vst [vmem:[#allocation139_spill] sm:$0xff] %v12932_v27  ;;  %v12953_v7 = vmax.f32 %v3019_v25, %v3436_v5  ;;  %vm2342_vm14 = vcmp.eq.s32.totalorder %v2293_v9, %v12842_v44  ;;  %v2134_v57 = vsel %vm2107_vm7, %v2079_v49, %v2080_v16  ;;  %v3075_v60 = vrot.slane %v19565_v23, 7  ;;  %19573 = vst [vmem:[#allocation145_spill] sm:$0xff] %v12996_v43 }
 0x253   : > { %v4122_v17 = vsel %vm2342_vm14, 1, %v19157_v19  ;;  %vm2185_vm3 = vcmp.eq.s32.totalorder %v2134_v57, %v12886_v28  ;;  %v2671_v11 = vsel %vm1791_vm6, %v2605_v52, %v2606_v13  ;;  %vm18656_vm9 = vcmp.eq.s32.totalorder %v12896_v20, 1 }
 0x254   : > { %19567 = vst [vmem:[#allocation142_spill] sm:$0xff] %v12953_v7  ;;  %4223 = vperm.xlu1 %8563, %v4122_v17   ;;  %v3654_v25 = vsel %vm2185_vm3, 1, %v19157_v19  ;;  %v2970_v44 = vsel %vm18657_vm0, %v2671_v11, -inf  ;;  %v3140_v49 = vsel %vm1949_vm12, %v3074_v35, %v3075_v60  ;;  %v2672_v5 = vsel %vm1791_vm6, %v2604_v50, %v2605_v52  ;;  %v12984_v50 = vld [vmem:[%s18348_s0 + $0xe8] sm:$0xff]  ;;  %v5983_v7 = vld [vmem:[#allocation5 + $0x80] sm:$0xff] }
 0x255   : > { %3757 = vperm.xlu0 %8562, %v3654_v25   ;;  %v3022_v57 = vmax.f32 %v19565_v23, %v2970_v44  ;;  %v3439_v9 = vsel %vm18656_vm9, %v3140_v49, -inf  ;;  %v2969_v17 = vsel %vm18659_vm10, %v2672_v5, -inf  ;;  %v3141_v38 = vsel %vm1949_vm12, %v3073_v21, %v3074_v35  ;;  %v12988_v44 = vpop.permute.xlu1 %3282  ;;  %v19571_v35 = vld [vmem:[#allocation45_spill] sm:$0xff] }
 0x256   : > { %v3021_v11 = vmax.f32 %v19564_v55, %v2969_v17  ;;  %vm18658_vm3 = vcmp.eq.s32.totalorder %v12906_v56, 1  ;;  %v2081_v52 = vrot.slane %v12984_v50, 1  ;;  %v2238_v25 = vrot.slane %v12940_v37, 2  ;;  %19569 = vst [vmem:[#allocation143_spill] sm:$0xff] %v12988_v44  ;;  %v19572_v17 = vld [vmem:[#allocation20_spill] sm:$0xff]  ;;  %v19576_v56 = vld [vmem:[#allocation119_spill] sm:$0xff] }
 0x257   : > { %v12990_v49 = vmax.f32 %v3022_v57, %v3439_v9  ;;  %v3438_v21 = vsel %vm18658_vm3, %v3141_v38, -inf  ;;  %v2607_v5 = vrot.slane %v19571_v35, 6  ;;  %v2608_v20 = vrot.slane %v19572_v17, 6 }
 0x258   : > { %vm18679_vm14 = vcmp.eq.s32.totalorder %v19574_v15, 1  ;;  %v12999_v12 = vmax.f32 %v3021_v11, %v3438_v21  ;;  %v2133_v23 = vsel %vm2107_vm7, %v2080_v16, %v2081_v52  ;;  %v2292_v57 = vsel %vm2265_vm4, %v2237_v2, %v2238_v25 }
 0x259   : > { %19570 = vst [vmem:[#allocation144_spill] sm:$0xff] %v12990_v49  ;;  %v3076_v9 = vrot.slane %v19571_v35, 7  ;;  %vm18681_vm9 = vcmp.eq.s32.totalorder %v19576_v56, 1  ;;  %vm2186_vm0 = vcmp.eq.s32.totalorder %v2133_v23, %v12940_v37  ;;  %vm2343_vm3 = vcmp.eq.s32.totalorder %v2292_v57, %v12886_v28  ;;  %v19590_v56 = vld [vmem:[#allocation118_spill] sm:$0xff] }
 0x25a   : > { %19575 = vst [vmem:[#allocation146_spill] sm:$0xff] %v12999_v12  ;;  %v2669_v38 = vsel %vm1791_vm6, %v2607_v5, %v2608_v20  ;;  %v3077_v11 = vrot.slane %v19572_v17, 7  ;;  %v3655_v21 = vsel %vm2186_vm0, 1, %v19157_v19  ;;  %v4123_v16 = vsel %vm2343_vm3, 1, %v19157_v19 }
 0x25b   : > { %v2972_v2 = vsel %vm18670_vm11, %v2669_v38, -inf  ;;  %vm18669_vm10 = vcmp.eq.s32.totalorder %v12943_v33, 1  ;;  %3760 = vperm.xlu1 %8563, %v3655_v21   ;;  %4226 = vperm.xlu0 %8562, %v4123_v16   ;;  %v2670_v57 = vsel %vm1791_vm6, %v2606_v13, %v2607_v5  ;;  %vm18671_vm15 = vcmp.eq.s32.totalorder %v12951_v47, 1  ;;  %v13040_v5 = vld [vmem:[%s18348_s0 + $0xf0] sm:$0xff] }
 0x25c   : > { %v3024_v23 = vmax.f32 %v19572_v17, %v2972_v2  ;;  %v3138_v28 = vsel %vm1949_vm12, %v3076_v9, %v3077_v11  ;;  %v2971_v38 = vsel %vm18682_vm2, %v2670_v57, -inf  ;;  %v3139_v21 = vsel %vm1949_vm12, %v3075_v60, %v3076_v9  ;;  %v13030_v2 = vpop.permute.xlu1 %3288  ;;  %v13043_v57 = vpop.permute.xlu0 %3285  ;;  %v19580_v60 = vld [vmem:[#allocation116_spill] sm:$0xff]  ;;  %v19581_v9 = vld [vmem:[#allocation50_spill] sm:$0xff] }
 0x25d   : > { %v3441_v49 = vsel %vm18669_vm10, %v3138_v28, -inf  ;;  %v2239_v16 = vrot.slane %v12984_v50, 2  ;;  %19577 = vst [vmem:[#allocation147_spill] sm:$0xff] %v13030_v2  ;;  %v3023_v17 = vmax.f32 %v19571_v35, %v2971_v38  ;;  %v3440_v13 = vsel %vm18671_vm15, %v3139_v21, -inf  ;;  %19579 = vst [vmem:[#allocation149_spill] sm:$0xff] %v13043_v57  ;;  %v19582_v38 = vld [vmem:[#allocation46_spill] sm:$0xff] }
 0x25e   : > { %v13032_v59 = vmax.f32 %v3024_v23, %v3441_v49  ;;  %v2082_v28 = vrot.slane %v13040_v5, 1  ;;  %vm18694_vm0 = vcmp.eq.s32.totalorder %v19580_v60, 1  ;;  %v2609_v23 = vrot.slane %v19581_v9, 6  ;;  %v19584_v35 = vld [vmem:[#allocation92_spill] sm:$0xff] }
 0x25f   : > { %v2291_v49 = vsel %vm2265_vm4, %v2238_v25, %v2239_v16  ;;  %v2610_v33 = vrot.slane %v19582_v38, 6  ;;  %v3078_v21 = vrot.slane %v19581_v9, 7  ;;  %v13051_v47 = vmax.f32 %v3023_v17, %v3440_v13 }
 0x260   : > { %19578 = vst [vmem:[#allocation148_spill] sm:$0xff] %v13032_v59  ;;  %vm2344_vm3 = vcmp.eq.s32.totalorder %v2291_v49, %v12940_v37  ;;  %v2132_v63 = vsel %vm2107_vm7, %v2081_v52, %v2082_v28  ;;  %v3079_v59 = vrot.slane %v19582_v38, 7  ;;  %vm18812_vm10 = vcmp.eq.s32.totalorder %v19584_v35, 1  ;;  %v13077_v15 = vpop.permute.xlu1 %3294 }
 0x261   : > { %19583 = vst [vmem:[#allocation150_spill] sm:$0xff] %v13051_v47  ;;  %v4124_v12 = vsel %vm2344_vm3, 1, %v19157_v19  ;;  %vm2187_vm11 = vcmp.eq.s32.totalorder %v2132_v63, %v12984_v50  ;;  %v2667_v25 = vsel %vm1791_vm6, %v2609_v23, %v2610_v33  ;;  %vm18678_vm15 = vcmp.eq.s32.totalorder %v12988_v44, 1  ;;  %19585 = vst [vmem:[#allocation151_spill] sm:$0xff] %v13077_v15 }
 0x262   : > { %4229 = vperm.xlu1 %8563, %v4124_v12   ;;  %v3656_v17 = vsel %vm2187_vm11, 1, %v19157_v19  ;;  %v2974_v37 = vsel %vm18679_vm14, %v2667_v25, -inf  ;;  %v3136_v52 = vsel %vm1949_vm12, %v3078_v21, %v3079_v59  ;;  %v2668_v13 = vsel %vm1791_vm6, %v2608_v20, %v2609_v23  ;;  %v13084_v20 = vld [vmem:[%s18348_s0 + $0xf8] sm:$0xff] }
 0x263   : > { %3763 = vperm.xlu0 %8562, %v3656_v17   ;;  %v3026_v63 = vmax.f32 %v19582_v38, %v2974_v37  ;;  %v3443_v49 = vsel %vm18678_vm15, %v3136_v52, -inf  ;;  %v2973_v12 = vsel %vm18681_vm9, %v2668_v13, -inf  ;;  %v3137_v47 = vsel %vm1949_vm12, %v3077_v11, %v3078_v21  ;;  %v13088_v37 = vpop.permute.xlu0 %3291  ;;  %v19588_v21 = vld [vmem:[#allocation11_spill] sm:$0xff] }
 0x264   : > { %v3025_v25 = vmax.f32 %v19581_v9, %v2973_v12  ;;  %vm18680_vm11 = vcmp.eq.s32.totalorder %v12996_v43, 1  ;;  %v2083_v23 = vrot.slane %v13084_v20, 1  ;;  %v2240_v17 = vrot.slane %v13040_v5, 2  ;;  %19586 = vst [vmem:[#allocation152_spill] sm:$0xff] %v13088_v37  ;;  %v19589_v12 = vld [vmem:[#allocation52_spill] sm:$0xff]  ;;  %v13121_v43 = vpop.permute.xlu1 %3300 }
 0x265   : > { %v13090_v52 = vmax.f32 %v3026_v63, %v3443_v49  ;;  %v3442_v11 = vsel %vm18680_vm11, %v3137_v47, -inf  ;;  %v2611_v13 = vrot.slane %v19588_v21, 6  ;;  %v2612_v44 = vrot.slane %v19589_v12, 6  ;;  %v19592_v49 = vld [vmem:[#allocation94_spill] sm:$0xff]  ;;  %19593 = vst [vmem:[#allocation155_spill] sm:$0xff] %v13121_v43 }
 0x266   : > { %vm18703_vm3 = vcmp.eq.s32.totalorder %v19590_v56, 1  ;;  %v13097_v38 = vmax.f32 %v3025_v25, %v3442_v11  ;;  %v2131_v9 = vsel %vm2107_vm7, %v2082_v28, %v2083_v23  ;;  %v2290_v27 = vsel %vm2265_vm4, %v2239_v16, %v2240_v17 }
 0x267   : > { %19587 = vst [vmem:[#allocation153_spill] sm:$0xff] %v13090_v52  ;;  %v3080_v63 = vrot.slane %v19588_v21, 7  ;;  %vm18705_vm15 = vcmp.eq.s32.totalorder %v19592_v49, 1  ;;  %vm2188_vm14 = vcmp.eq.s32.totalorder %v2131_v9, %v13040_v5  ;;  %vm2345_vm11 = vcmp.eq.s32.totalorder %v2290_v27, %v12984_v50  ;;  %v19600_v52 = vld [vmem:[#allocation19_spill] sm:$0xff] }
 0x268   : > { %19591 = vst [vmem:[#allocation154_spill] sm:$0xff] %v13097_v38  ;;  %v2665_v47 = vsel %vm1791_vm6, %v2611_v13, %v2612_v44  ;;  %v3081_v25 = vrot.slane %v19589_v12, 7  ;;  %v3657_v11 = vsel %vm2188_vm14, 1, %v19157_v19  ;;  %v4125_v28 = vsel %vm2345_vm11, 1, %v19157_v19 }
 0x269   : > { %v2976_v16 = vsel %vm18694_vm0, %v2665_v47, -inf  ;;  %vm18692_vm9 = vcmp.eq.s32.totalorder %v13030_v2, 1  ;;  %3766 = vperm.xlu1 %8563, %v3657_v11   ;;  %4232 = vperm.xlu0 %8562, %v4125_v28   ;;  %v2666_v50 = vsel %vm1791_vm6, %v2610_v33, %v2611_v13  ;;  %vm18695_vm2 = vcmp.eq.s32.totalorder %v13043_v57, 1  ;;  %v19596_v2 = vld [vmem:[#allocation89_spill] sm:$0xff] }
 0x26a   : > { %v3028_v9 = vmax.f32 %v19589_v12, %v2976_v16  ;;  %v3134_v27 = vsel %vm1949_vm12, %v3080_v63, %v3081_v25  ;;  %v2975_v47 = vsel %vm18812_vm10, %v2666_v50, -inf  ;;  %v3135_v11 = vsel %vm1949_vm12, %v3079_v59, %v3080_v63  ;;  %v13130_v16 = vpop.permute.xlu0 %3297  ;;  %v19597_v63 = vld [vmem:[#allocation121_spill] sm:$0xff] }
 0x26b   : > { %v3445_v60 = vsel %vm18692_vm9, %v3134_v27, -inf  ;;  %v2241_v28 = vrot.slane %v13084_v20, 2  ;;  %19594 = vst [vmem:[#allocation156_spill] sm:$0xff] %v13130_v16  ;;  %v3027_v33 = vmax.f32 %v19588_v21, %v2975_v47  ;;  %v3444_v13 = vsel %vm18695_vm2, %v3135_v11, -inf  ;;  %v13140_v27 = vld [vmem:[%s18348_s0 + $0x100] sm:$0xff] }
 0x26c   : > { %v13132_v12 = vmax.f32 %v3028_v9, %v3445_v60  ;;  %v2084_v50 = vrot.slane %v13140_v27, 1  ;;  %vm18715_vm14 = vcmp.eq.s32.totalorder %v19596_v2, 1  ;;  %v2613_v60 = vrot.slane %v19597_v63, 6  ;;  %v19598_v9 = vld [vmem:[#allocation15_spill] sm:$0xff] }
 0x26d   : > { %v2289_v59 = vsel %vm2265_vm4, %v2240_v17, %v2241_v28  ;;  %v2614_v35 = vrot.slane %v19598_v9, 6  ;;  %v3082_v47 = vrot.slane %v19597_v63, 7  ;;  %v13149_v57 = vmax.f32 %v3027_v33, %v3444_v13 }
 0x26e   : > { %19595 = vst [vmem:[#allocation157_spill] sm:$0xff] %v13132_v12  ;;  %vm2346_vm11 = vcmp.eq.s32.totalorder %v2289_v59, %v13040_v5  ;;  %v2130_v11 = vsel %vm2107_vm7, %v2083_v23, %v2084_v50  ;;  %v3083_v12 = vrot.slane %v19598_v9, 7  ;;  %vm18718_vm9 = vcmp.eq.s32.totalorder %v19600_v52, 1  ;;  %v13168_v59 = vpop.permute.xlu1 %3306  ;;  %v13177_v56 = vpop.permute.xlu0 %3303 }
 0x26f   : > { %19599 = vst [vmem:[#allocation158_spill] sm:$0xff] %v13149_v57  ;;  %v4126_v21 = vsel %vm2346_vm11, 1, %v19157_v19  ;;  %vm2189_vm0 = vcmp.eq.s32.totalorder %v2130_v11, %v13084_v20  ;;  %v2663_v17 = vsel %vm1791_vm6, %v2613_v60, %v2614_v35  ;;  %vm18702_vm2 = vcmp.eq.s32.totalorder %v13077_v15, 1  ;;  %19601 = vst [vmem:[#allocation159_spill] sm:$0xff] %v13168_v59  ;;  %v19606_v15 = vld [vmem:[#allocation120_spill] sm:$0xff] }
 0x270   : > { %4235 = vperm.xlu1 %8563, %v4126_v21   ;;  %v3658_v33 = vsel %vm2189_vm0, 1, %v19157_v19  ;;  %v2978_v5 = vsel %vm18703_vm3, %v2663_v17, -inf  ;;  %v3132_v23 = vsel %vm1949_vm12, %v3082_v47, %v3083_v12  ;;  %v2664_v13 = vsel %vm1791_vm6, %v2612_v44, %v2613_v60  ;;  %19602 = vst [vmem:[#allocation160_spill] sm:$0xff] %v13177_v56  ;;  %v13184_v44 = vld [vmem:[%s18348_s0 + $0x108] sm:$0xff] }
 0x271   : > { %3769 = vperm.xlu0 %8562, %v3658_v33   ;;  %v3030_v11 = vmax.f32 %v19598_v9, %v2978_v5  ;;  %v3447_v57 = vsel %vm18702_vm2, %v3132_v23, -inf  ;;  %v2977_v21 = vsel %vm18705_vm15, %v2664_v13, -inf  ;;  %v3133_v17 = vsel %vm1949_vm12, %v3081_v25, %v3082_v47  ;;  %v19604_v47 = vld [vmem:[#allocation56_spill] sm:$0xff]  ;;  %v19605_v13 = vld [vmem:[#allocation122_spill] sm:$0xff] }
 0x272   : > { %v3029_v38 = vmax.f32 %v19597_v63, %v2977_v21  ;;  %vm18704_vm0 = vcmp.eq.s32.totalorder %v13088_v37, 1  ;;  %v2085_v60 = vrot.slane %v13184_v44, 1  ;;  %v2242_v33 = vrot.slane %v13140_v27, 2  ;;  %v13213_v37 = vpop.permute.xlu1 %3312 }
 0x273   : > { %v13188_v5 = vmax.f32 %v3030_v11, %v3447_v57  ;;  %v3446_v25 = vsel %vm18704_vm0, %v3133_v17, -inf  ;;  %v2615_v23 = vrot.slane %v19604_v47, 6  ;;  %v2616_v21 = vrot.slane %v19605_v13, 6  ;;  %v19608_v11 = vld [vmem:[#allocation100_spill] sm:$0xff]  ;;  %19609 = vst [vmem:[#allocation163_spill] sm:$0xff] %v13213_v37 }
 0x274   : > { %vm18726_vm11 = vcmp.eq.s32.totalorder %v19606_v15, 1  ;;  %v13195_v49 = vmax.f32 %v3029_v38, %v3446_v25  ;;  %v2129_v9 = vsel %vm2107_vm7, %v2084_v50, %v2085_v60  ;;  %v2288_v63 = vsel %vm2265_vm4, %v2241_v28, %v2242_v33 }
 0x275   : > { %19603 = vst [vmem:[#allocation161_spill] sm:$0xff] %v13188_v5  ;;  %v3084_v57 = vrot.slane %v19604_v47, 7  ;;  %vm18728_vm2 = vcmp.eq.s32.totalorder %v19608_v11, 1  ;;  %vm2190_vm3 = vcmp.eq.s32.totalorder %v2129_v9, %v13140_v27  ;;  %vm2347_vm0 = vcmp.eq.s32.totalorder %v2288_v63, %v13084_v20  ;;  %v13221_v5 = vpop.permute.xlu0 %3309 }
 0x276   : > { %19607 = vst [vmem:[#allocation162_spill] sm:$0xff] %v13195_v49  ;;  %v2661_v17 = vsel %vm1791_vm6, %v2615_v23, %v2616_v21  ;;  %v3085_v38 = vrot.slane %v19605_v13, 7  ;;  %v3659_v25 = vsel %vm2190_vm3, 1, %v19157_v19  ;;  %v4127_v50 = vsel %vm2347_vm0, 1, %v19157_v19  ;;  %19610 = vst [vmem:[#allocation164_spill] sm:$0xff] %v13221_v5 }
 0x277   : > { %v2980_v28 = vsel %vm18715_vm14, %v2661_v17, -inf  ;;  %vm18710_vm15 = vcmp.eq.s32.totalorder %v13121_v43, 1  ;;  %3772 = vperm.xlu1 %8563, %v3659_v25   ;;  %4238 = vperm.xlu0 %8562, %v4127_v50   ;;  %v2662_v9 = vsel %vm1791_vm6, %v2614_v35, %v2615_v23  ;;  %vm18717_vm3 = vcmp.eq.s32.totalorder %v13130_v16, 1  ;;  %v13238_v23 = vld [vmem:[%s18348_s0 + $0x110] sm:$0xff] }
 0x278   : > { %v3032_v20 = vmax.f32 %v19605_v13, %v2980_v28  ;;  %v3130_v63 = vsel %vm1949_vm12, %v3084_v57, %v3085_v38  ;;  %v2979_v2 = vsel %vm18718_vm9, %v2662_v9, -inf  ;;  %v3131_v25 = vsel %vm1949_vm12, %v3083_v12, %v3084_v57  ;;  %v19612_v9 = vld [vmem:[#allocation95_spill] sm:$0xff]  ;;  %v19614_v16 = vld [vmem:[#allocation41_spill] sm:$0xff] }
 0x279   : > { %v3449_v17 = vsel %vm18710_vm15, %v3130_v63, -inf  ;;  %v2243_v50 = vrot.slane %v13184_v44, 2  ;;  %v3031_v13 = vmax.f32 %v19604_v47, %v2979_v2  ;;  %v3448_v35 = vsel %vm18717_vm3, %v3131_v25, -inf }
 0x27a   : > { %v13230_v28 = vmax.f32 %v3032_v20, %v3449_v17  ;;  %v2086_v63 = vrot.slane %v13238_v23, 1  ;;  %vm18741_vm0 = vcmp.eq.s32.totalorder %v19612_v9, 1  ;;  %v2617_v57 = vrot.slane %v12178_v54, 6 }
 0x27b   : > { %v2287_v12 = vsel %vm2265_vm4, %v2242_v33, %v2243_v50  ;;  %v2618_v20 = vrot.slane %v12166_v4, 6  ;;  %v3086_v2 = vrot.slane %v12178_v54, 7  ;;  %v13247_v17 = vmax.f32 %v3031_v13, %v3448_v35  ;;  %v13259_v13 = vpop.permute.xlu1 %3318 }
 0x27c   : > { %19611 = vst [vmem:[#allocation165_spill] sm:$0xff] %v13230_v28  ;;  %vm2348_vm15 = vcmp.eq.s32.totalorder %v2287_v12, %v13140_v27  ;;  %v2128_v25 = vsel %vm2107_vm7, %v2085_v60, %v2086_v63  ;;  %v3087_v43 = vrot.slane %v12166_v4, 7  ;;  %vm18748_vm14 = vcmp.eq.s32.totalorder %v19614_v16, 1  ;;  %19615 = vst [vmem:[#allocation167_spill] sm:$0xff] %v13259_v13  ;;  %v19628_v16 = vld [vmem:[#allocation48_spill] sm:$0xff] }
 0x27d   : > { %19613 = vst [vmem:[#allocation166_spill] sm:$0xff] %v13247_v17  ;;  %v4128_v52 = vsel %vm2348_vm15, 1, %v19157_v19  ;;  %vm2191_vm3 = vcmp.eq.s32.totalorder %v2128_v25, %v13184_v44  ;;  %v2659_v33 = vsel %vm1791_vm6, %v2617_v57, %v2618_v20  ;;  %vm18725_vm9 = vcmp.eq.s32.totalorder %v13168_v59, 1  ;;  %v13268_v25 = vpop.permute.xlu0 %3315 }
 0x27e   : > { %4241 = vperm.xlu1 %8563, %v4128_v52   ;;  %v3660_v27 = vsel %vm2191_vm3, 1, %v19157_v19  ;;  %v2982_v60 = vsel %vm18726_vm11, %v2659_v33, -inf  ;;  %v3128_v35 = vsel %vm1949_vm12, %v3086_v2, %v3087_v43  ;;  %v2660_v12 = vsel %vm1791_vm6, %v2616_v21, %v2617_v57  ;;  %19616 = vst [vmem:[#allocation168_spill] sm:$0xff] %v13268_v25  ;;  %v13282_v21 = vld [vmem:[%s18348_s0 + $0x118] sm:$0xff] }
 0x27f   : > { %3775 = vperm.xlu0 %8562, %v3660_v27   ;;  %v3034_v28 = vmax.f32 %v12166_v4, %v2982_v60  ;;  %v3451_v17 = vsel %vm18725_vm9, %v3128_v35, -inf  ;;  %v2981_v52 = vsel %vm18728_vm2, %v2660_v12, -inf  ;;  %v3129_v33 = vsel %vm1949_vm12, %v3085_v38, %v3086_v2  ;;  %v19618_v2 = vld [vmem:[#allocation110_spill] sm:$0xff] }
 0x280   : > { %v3033_v15 = vmax.f32 %v12178_v54, %v2981_v52  ;;  %vm18727_vm15 = vcmp.eq.s32.totalorder %v13177_v56, 1  ;;  %v2087_v57 = vrot.slane %v13282_v21, 1  ;;  %v18729_v27 = vrot.slane %v13238_v23, 2  ;;  %v19619_v52 = vld [vmem:[#allocation96_spill] sm:$0xff]  ;;  %v19621_v56 = vld [vmem:[#allocation43_spill] sm:$0xff] }
 0x281   : > { %v13286_v60 = vmax.f32 %v3034_v28, %v3451_v17  ;;  %v3450_v35 = vsel %vm18727_vm15, %v3129_v33, -inf  ;;  %v2619_v38 = vrot.slane %v12207_v29, 6  ;;  %v2620_v12 = vrot.slane %v19618_v2, 6 }
 0x282   : > { %vm18758_vm3 = vcmp.eq.s32.totalorder %v19619_v52, 1  ;;  %v13293_v59 = vmax.f32 %v3033_v15, %v3450_v35  ;;  %v2127_v11 = vsel %vm2107_vm7, %v2086_v63, %v2087_v57  ;;  %v2286_v28 = vsel %vm2265_vm4, %v2243_v50, %v18729_v27  ;;  %v13308_v35 = vpop.permute.xlu1 %3324  ;;  %v13315_v27 = vpop.permute.xlu0 %3321 }
 0x283   : > { %19617 = vst [vmem:[#allocation169_spill] sm:$0xff] %v13286_v60  ;;  %v3088_v17 = vrot.slane %v12207_v29, 7  ;;  %vm18760_vm9 = vcmp.eq.s32.totalorder %v19621_v56, 1  ;;  %vm2192_vm11 = vcmp.eq.s32.totalorder %v2127_v11, %v13238_v23  ;;  %vm2349_vm15 = vcmp.eq.s32.totalorder %v2286_v28, %v13184_v44  ;;  %19622 = vst [vmem:[#allocation171_spill] sm:$0xff] %v13308_v35 }
 0x284   : > { %19620 = vst [vmem:[#allocation170_spill] sm:$0xff] %v13293_v59  ;;  %v2657_v15 = vsel %vm1791_vm6, %v2619_v38, %v2620_v12  ;;  %v3089_v33 = vrot.slane %v19618_v2, 7  ;;  %v3661_v63 = vsel %vm2192_vm11, 1, %v19157_v19  ;;  %v4129_v60 = vsel %vm2349_vm15, 1, %v19157_v19  ;;  %19623 = vst [vmem:[#allocation172_spill] sm:$0xff] %v13315_v27 }
 0x285   : > { %v2984_v50 = vsel %vm18741_vm0, %v2657_v15, -inf  ;;  %vm18737_vm2 = vcmp.eq.s32.totalorder %v13213_v37, 1  ;;  %3778 = vperm.xlu1 %8563, %v3661_v63   ;;  %4244 = vperm.xlu0 %8562, %v4129_v60   ;;  %v2658_v28 = vsel %vm1791_vm6, %v2618_v20, %v2619_v38  ;;  %vm18742_vm11 = vcmp.eq.s32.totalorder %v13221_v5, 1  ;;  %v13332_v60 = vld [vmem:[%s18348_s0 + $0x10] sm:$0xff]  ;;  %v19627_v5 = vld [vmem:[#allocation40_spill] sm:$0xff] }
 0x286   : > { %v3036_v44 = vmax.f32 %v19618_v2, %v2984_v50  ;;  %v3126_v11 = vsel %vm1949_vm12, %v3088_v17, %v3089_v33  ;;  %v2983_v15 = vsel %vm18748_vm14, %v2658_v28, -inf  ;;  %v3127_v63 = vsel %vm1949_vm12, %v3087_v43, %v3088_v17  ;;  %v13349_v17 = vld [vmem:[%s18348_s0 + $0x120] sm:$0xff] }
 0x287   : > { %v3453_v9 = vsel %vm18737_vm2, %v3126_v11, -inf  ;;  %v2054_v50 = vrot.slane %v13332_v60, 1  ;;  %v3035_v20 = vmax.f32 %v12207_v29, %v2983_v15  ;;  %v3452_v38 = vsel %vm18742_vm11, %v3127_v63, -inf  ;;  %v13343_v11 = vld [vmem:[%s18348_s0 + $0x18] sm:$0xff]  ;;  %v19626_v15 = vld [vmem:[#allocation60_spill] sm:$0xff] }
 0x288   : > { %v13335_v2 = vmax.f32 %v3036_v44, %v3453_v9  ;;  %v2055_v43 = vrot.slane %v13343_v11, 1  ;;  %v19625_v44 = vld [vmem:[#allocation30_spill] sm:$0xff]  ;;  %v2622_v37 = vrot.slane %v19626_v15, 6  ;;  %vm18774_vm15 = vcmp.eq.s32.totalorder %v19627_v5, 1  ;;  %v13363_v9 = vpop.permute.xlu1 %3330 }
 0x289   : > { %v2621_v28 = vrot.slane %v19625_v44, 6  ;;  %v3090_v63 = vrot.slane %v19625_v44, 7  ;;  %vm18799_vm2 = vcmp.eq.s32.totalorder %v19628_v16, 1  ;;  %v3091_v59 = vrot.slane %v19626_v15, 7  ;;  %19630 = vst [vmem:[#allocation175_spill] sm:$0xff] %v13363_v9 }
 0x28a   : > { %19624 = vst [vmem:[#allocation173_spill] sm:$0xff] %v13335_v2  ;;  %v13357_v2 = vmax.f32 %v3035_v20, %v3452_v38  ;;  %v2159_v29 = vsel %vm2107_vm7, %v2054_v50, %v2055_v43  ;;  %vm18756_vm0 = vcmp.eq.s32.totalorder %v13259_v13, 1  ;;  %v19631_v4 = vrot.slane %v13349_v17, 1  ;;  %v13374_v50 = vpop.permute.xlu0 %3327 }
 0x28b   : > { %vm2160_vm11 = vcmp.eq.s32.totalorder %v2159_v29, %v13332_v60  ;;  %v2655_v20 = vsel %vm1791_vm6, %v2621_v28, %v2622_v37  ;;  %v2656_v38 = vsel %vm1791_vm6, %v2620_v12, %v2621_v28  ;;  %19632 = vst [vmem:[#allocation176_spill] sm:$0xff] %v13374_v50  ;;  %v3124_v47 = vsel %vm1949_vm12, %v3090_v63, %v3091_v59 }
 0x28c   : > { %19629 = vst [vmem:[#allocation174_spill] sm:$0xff] %v13357_v2  ;;  %v2126_v54 = vsel %vm2107_vm7, %v2087_v57, %v19631_v4  ;;  %v3629_v2 = vsel %vm2160_vm11, 1, %v19157_v19  ;;  %v2986_v29 = vsel %vm18758_vm3, %v2655_v20, -inf  ;;  %v3455_v12 = vsel %vm18756_vm0, %v3124_v47, -inf }
 0x28d   : > { %vm2193_vm14 = vcmp.eq.s32.totalorder %v2126_v54, %v13282_v21  ;;  %3682 = vperm.xlu1 %8563, %v3629_v2   ;;  %v3038_v57 = vmax.f32 %v19626_v15, %v2986_v29  ;;  %v2985_v28 = vsel %vm18760_vm9, %v2656_v38, -inf  ;;  %v3125_v20 = vsel %vm1949_vm12, %v3089_v33, %v3090_v63  ;;  %v13395_v2 = vld [vmem:[%s18348_s0 + $0x20] sm:$0xff]  ;;  %v13405_v38 = vld [vmem:[%s18348_s0 + $0x28] sm:$0xff] }
 0x28e   : > { %v3662_v4 = vsel %vm2193_vm14, 1, %v19157_v19  ;;  %v3037_v54 = vmax.f32 %v19625_v44, %v2985_v28  ;;  %vm18759_vm11 = vcmp.eq.s32.totalorder %v13268_v25, 1  ;;  %v2056_v29 = vrot.slane %v13395_v2, 1  ;;  %v13416_v25 = vpop.permute.xlu1 %3697 }
 0x28f   : > { %3781 = vperm.xlu0 %8562, %v3662_v4   ;;  %v13398_v13 = vmax.f32 %v3038_v57, %v3455_v12  ;;  %v3454_v47 = vsel %vm18759_vm11, %v3125_v20, -inf  ;;  %v18762_v33 = vrot.slane %v13405_v38, 1  ;;  %v2623_v63 = vrot.slane %v12368_v24, 6  ;;  %v19634_v4 = vld [vmem:[#allocation42_spill] sm:$0xff]  ;;  %v19636_v12 = vld [vmem:[#allocation64_spill] sm:$0xff]  ;;  %19637 = vst [vmem:[#allocation179_spill] sm:$0xff] %v13416_v25 }
 0x290   : > { %vm18783_vm14 = vcmp.eq.s32.totalorder %v19634_v4, 1  ;;  %v13410_v28 = vmax.f32 %v3037_v54, %v3454_v47  ;;  %v2158_v57 = vsel %vm2107_vm7, %v2055_v43, %v2056_v29  ;;  %v2624_v52 = vrot.slane %v19636_v12, 6  ;;  %v13425_v54 = vpop.permute.xlu0 %3333  ;;  %v19639_v43 = vld [vmem:[#allocation53_spill] sm:$0xff] }
 0x291   : > { %19633 = vst [vmem:[#allocation177_spill] sm:$0xff] %v13398_v13  ;;  %v3092_v20 = vrot.slane %v12368_v24, 7  ;;  %v2157_v56 = vsel %vm2107_vm7, %v2056_v29, %v18762_v33  ;;  %vm2161_vm0 = vcmp.eq.s32.totalorder %v2158_v57, %v13343_v11  ;;  %v3093_v13 = vrot.slane %v19636_v12, 7  ;;  %19638 = vst [vmem:[#allocation180_spill] sm:$0xff] %v13425_v54 }
 0x292   : > { %19635 = vst [vmem:[#allocation178_spill] sm:$0xff] %v13410_v28  ;;  %vm18773_vm3 = vcmp.eq.s32.totalorder %v13308_v35, 1  ;;  %vm18796_vm11 = vcmp.eq.s32.totalorder %v19639_v43, 1  ;;  %vm2162_vm9 = vcmp.eq.s32.totalorder %v2157_v56, %v13395_v2  ;;  %v3630_v47 = vsel %vm2161_vm0, 1, %v19157_v19  ;;  %v13462_v35 = vpop.permute.xlu1 %3709 }
 0x293   : > { %v2653_v28 = vsel %vm1791_vm6, %v2623_v63, %v2624_v52  ;;  %v2654_v29 = vsel %vm1791_vm6, %v2622_v37, %v2623_v63  ;;  %v3631_v57 = vsel %vm2162_vm9, 1, %v19157_v19  ;;  %3685 = vperm.xlu0 %8562, %v3630_v47   ;;  %v3122_v15 = vsel %vm1949_vm12, %v3092_v20, %v3093_v13  ;;  %v13452_v47 = vld [vmem:[%s18348_s0 + $0x30] sm:$0xff] }
 0x294   : > { %v2988_v33 = vsel %vm18774_vm15, %v2653_v28, -inf  ;;  %v2987_v56 = vsel %vm18799_vm2, %v2654_v29, -inf  ;;  %3688 = vperm.xlu1 %8563, %v3631_v57   ;;  %v3457_v49 = vsel %vm18773_vm3, %v3122_v15, -inf  ;;  %v3123_v63 = vsel %vm1949_vm12, %v3091_v59, %v3092_v20 }
 0x295   : > { %v3040_v44 = vmax.f32 %v19636_v12, %v2988_v33  ;;  %v3039_v37 = vmax.f32 %v12368_v24, %v2987_v56  ;;  %vm18775_vm9 = vcmp.eq.s32.totalorder %v13315_v27, 1  ;;  %v2245_v28 = vrot.slane %v13282_v21, 2  ;;  %v19641_v56 = vld [vmem:[#allocation65_spill] sm:$0xff]  ;;  %v19644_v24 = vld [vmem:[#allocation55_spill] sm:$0xff] }
 0x296   : > { %v2058_v29 = vrot.slane %v13452_v47, 1  ;;  %v2625_v33 = vrot.slane %v12384_v26, 6  ;;  %v3456_v15 = vsel %vm18775_vm9, %v3123_v63, -inf  ;;  %v2626_v59 = vrot.slane %v19641_v56, 6  ;;  %v13475_v63 = vpop.permute.xlu0 %3700 }
 0x297   : > { %v13456_v57 = vmax.f32 %v3040_v44, %v3457_v49  ;;  %v3094_v20 = vrot.slane %v12384_v26, 7  ;;  %v13464_v5 = vmax.f32 %v3039_v37, %v3456_v15  ;;  %v19643_v16 = vrot.slane %v13238_v23, 2  ;;  %19646 = vst [vmem:[#allocation55_spill] sm:$0xff] %v13475_v63  ;;  %v19647_v15 = vld [vmem:[#allocation123_spill] sm:$0xff] }
 0x298   : > { %v19645_v55 = vrot.slane %v19644_v24, 1  ;;  %v3095_v44 = vrot.slane %v19641_v56, 7  ;;  %v2651_v37 = vsel %vm1791_vm6, %v2625_v33, %v2626_v59  ;;  %vm18782_vm15 = vcmp.eq.s32.totalorder %v13363_v9, 1 }
 0x299   : > { %19640 = vst [vmem:[#allocation181_spill] sm:$0xff] %v13456_v57  ;;  %19642 = vst [vmem:[#allocation182_spill] sm:$0xff] %v13464_v5  ;;  %v2285_v12 = vsel %vm2265_vm4, %v19643_v16, %v2245_v28  ;;  %vm18792_vm9 = vcmp.eq.s32.totalorder %v19647_v15, 1  ;;  %v3121_v5 = vsel %vm1949_vm12, %v3093_v13, %v3094_v20  ;;  %v8241_v9 = vpack.c.bf16 %v5984_v3, %v5983_v7  ;;  %v5990_v15 = vld [vmem:[#allocation5 + $0xb8] sm:$0xff] }
 0x29a   : > { %v2155_v49 = vsel %vm2107_vm7, %v2058_v29, %v19645_v55  ;;  %vm2350_vm0 = vcmp.eq.s32.totalorder %v2285_v12, %v13238_v23  ;;  %v2990_v55 = vsel %vm18783_vm14, %v2651_v37, -inf  ;;  %v3120_v57 = vsel %vm1949_vm12, %v3094_v20, %v3095_v44 }
 0x29b   : > { %vm2164_vm3 = vcmp.eq.s32.totalorder %v2155_v49, %v13452_v47  ;;  %v4130_v16 = vsel %vm2350_vm0, 1, %v19157_v19  ;;  %v3042_v23 = vmax.f32 %v19641_v56, %v2990_v55  ;;  %v3459_v12 = vsel %vm18782_vm15, %v3120_v57, -inf  ;;  %8242 = vmatprep.subr.bf16.mxu0 %v8241_v9 }
 0x29c   : > { %v3633_v27 = vsel %vm2164_vm3, 1, %v19157_v19  ;;  %4247 = vperm.xlu1 %8563, %v4130_v16   ;;  %v2652_v49 = vsel %vm1791_vm6, %v2624_v52, %v2625_v33  ;;  %vm18793_vm3 = vcmp.eq.s32.totalorder %v13374_v50, 1  ;;  %v19648_v16 = vrot.slane %v13405_v38, 1  ;;  %v13510_v33 = vpop.permute.xlu1 %3703  ;;  %8244 = vmatpush3.bf16.msra.mxu0 %v8241_v9 }
 0x29d   : > { %3694 = vperm.xlu0 %8562, %v3633_v27   ;;  %v2989_v37 = vsel %vm18796_vm11, %v2652_v49, -inf  ;;  %v18785_v27 = vrot.slane %v13349_v17, 2  ;;  %v13504_v55 = vmax.f32 %v3042_v23, %v3459_v12  ;;  %v3458_v13 = vsel %vm18793_vm3, %v3121_v5, -inf  ;;  %19650 = vst [vmem:[#allocation184_spill] sm:$0xff] %v13510_v33  ;;  %v13518_v23 = vpop.permute.xlu0 %3712 }
 0x29e   : > { %v2156_v57 = vsel %vm2107_vm7, %v19648_v16, %v2058_v29  ;;  %v3041_v52 = vmax.f32 %v12384_v26, %v2989_v37  ;;  %v18784_v29 = vrot.slane %v19483_v34, 1  ;;  %19651 = vst [vmem:[#allocation185_spill] sm:$0xff] %v13518_v23  ;;  %v3530_v5 = vrot.slane %v12234_v8, 1  ;;  %v5985_v37 = vld [vmem:[#allocation5 + $0x90] sm:$0xff]  ;;  %v5986_v16 = vld [vmem:[#allocation5 + $0x98] sm:$0xff] }
 0x29f   : > { %19649 = vst [vmem:[#allocation183_spill] sm:$0xff] %v13504_v55  ;;  %vm2163_vm0 = vcmp.eq.s32.totalorder %v2156_v57, %v13405_v38  ;;  %v2284_v20 = vsel %vm2265_vm4, %v2245_v28, %v18785_v27  ;;  %vm18803_vm14 = vcmp.eq.s32.totalorder %v13416_v25, 1  ;;  %v18790_v7 = vrot.slane %v12406_v1, 6  ;;  %v19712_v25 = vld [vmem:[#allocation104_spill] sm:$0xff] }
 0x2a0   : > { %v3632_v49 = vsel %vm2163_vm0, 1, %v19157_v19  ;;  %v13520_v12 = vmax.f32 %v3041_v52, %v3458_v13  ;;  %vm2351_vm15 = vcmp.eq.s32.totalorder %v2284_v20, %v13282_v21  ;;  %v18789_v3 = vrot.slane %v12406_v1, 7  ;;  %v13538_v13 = vld [vmem:[%s18348_s0 + $0x128] sm:$0xff]  ;;  %v13561_v50 = vpop.permute.xlu1 %3706 }
 0x2a1   : > { %3691 = vperm.xlu0 %8562, %v3632_v49   ;;  %v4131_v28 = vsel %vm2351_vm15, 1, %v19157_v19  ;;  %vm18791_vm0 = vcmp.eq.s32.totalorder %v13425_v54, 1  ;;  %v3623_v21 = vsel %vm2107_vm7, %v18784_v29, %v3530_v5  ;;  %v2212_v57 = vrot.slane %v13332_v60, 2  ;;  %19653 = vst [vmem:[#allocation187_spill] sm:$0xff] %v13561_v50 }
 0x2a2   : > { %19652 = vst [vmem:[#allocation186_spill] sm:$0xff] %v13520_v12  ;;  %4250 = vperm.xlu1 %8563, %v4131_v28   ;;  %v2213_v52 = vrot.slane %v13343_v11, 2  ;;  %v13543_v49 = vsel %vm18803_vm14, %v3623_v21, -inf  ;;  %v2650_v9 = vsel %vm1791_vm6, %v2626_v59, %v18790_v7  ;;  %v3119_v28 = vsel %vm1949_vm12, %v3095_v44, %v18789_v3  ;;  %v5988_v3 = vld [vmem:[#allocation5 + $0xa8] sm:$0xff]  ;;  %v13572_v7 = vpop.permute.xlu0 %3715 }
 0x2a3   : > { %v8245_v29 = vpack.c.bf16 %v5986_v16, %v5985_v37  ;;  %v2991_v20 = vsel %vm18792_vm9, %v2650_v9, -inf  ;;  %v3460_v21 = vsel %vm18791_vm0, %v3119_v28, -inf  ;;  %v19654_v44 = vrot.slane %v13538_v13, 1  ;;  %v5987_v28 = vld [vmem:[#allocation5 + $0xa0] sm:$0xff]  ;;  %19656 = vst [vmem:[#allocation188_spill] sm:$0xff] %v13572_v7 }
 0x2a4   : > { %v2317_v4 = vsel %vm2265_vm4, %v2212_v57, %v2213_v52  ;;  %v3043_v59 = vmax.f32 %v12406_v1, %v2991_v20  ;;  %v19655_v37 = vrot.slane %v13349_v17, 1  ;;  %v3533_v9 = vrot.slane %v12258_v31, 1 }
 0x2a5   : > { %vm2318_vm15 = vcmp.eq.s32.totalorder %v2317_v4, %v13332_v60  ;;  %8246 = vmatprep.subr.bf16.mxu0 %v8245_v29  ;;  %v3534_v60 = vrot.slane %v19520_v58, 1  ;;  %vm3846_vm9 = vcmp.eq.s32.totalorder %v13462_v35, 1  ;;  %vm18802_vm3 = vcmp.eq.s32.totalorder %v13475_v63, 1 }
 0x2a6   : > { %v2125_v16 = vsel %vm2107_vm7, %v19655_v37, %v19654_v44  ;;  %v4098_v57 = vsel %vm2318_vm15, 1, %v19157_v19  ;;  %8248 = vmatpush3.bf16.msra.mxu0 %v8245_v29  ;;  %v13578_v4 = vmax.f32 %v3043_v59, %v3460_v21  ;;  %v3531_v44 = vrot.slane %v12136_v18, 1  ;;  %v13613_v43 = vpop.permute.xlu0 %4166 }
 0x2a7   : > { %vm2194_vm0 = vcmp.eq.s32.totalorder %v2125_v16, %v13349_v17  ;;  %4151 = vperm.xlu1 %8563, %v4098_v57   ;;  %v3619_v37 = vsel %vm2107_vm7, %v3533_v9, %v3534_v60  ;;  %v2214_v16 = vrot.slane %v13395_v2, 2  ;;  %v2215_v29 = vrot.slane %v13405_v38, 2  ;;  %19659 = vst [vmem:[#allocation191_spill] sm:$0xff] %v13613_v43 }
 0x2a8   : > { %19657 = vst [vmem:[#allocation189_spill] sm:$0xff] %v13578_v4  ;;  %v3663_v20 = vsel %vm2194_vm0, 1, %v19157_v19  ;;  %v8249_v27 = vpack.c.bf16 %v5988_v3, %v5987_v28  ;;  %v13589_v21 = vsel %vm3846_vm9, %v3619_v37, -inf  ;;  %v3622_v59 = vsel %vm2107_vm7, %v3530_v5, %v3531_v44  ;;  %v13605_v37 = vpop.permute.xlu1 %4169 }
 0x2a9   : > { %3784 = vperm.xlu0 %8562, %v3663_v20   ;;  %v3532_v57 = vrot.slane %v12300_v14, 1  ;;  %vm18801_vm0 = vcmp.eq.s32.totalorder %v13510_v33, 1  ;;  %v13599_v54 = vsel %vm18802_vm3, %v3622_v59, -inf  ;;  %v2315_v3 = vsel %vm2265_vm4, %v2214_v16, %v2215_v29  ;;  %19658 = vst [vmem:[#allocation190_spill] sm:$0xff] %v13605_v37  ;;  %v5989_v20 = vld [vmem:[#allocation5 + $0xb0] sm:$0xff] }
 0x2aa   : > { %v2316_v28 = vsel %vm2265_vm4, %v2213_v52, %v2214_v16  ;;  %8250 = vmatprep.subr.bf16.mxu0 %v8249_v27  ;;  %vm2320_vm15 = vcmp.eq.s32.totalorder %v2315_v3, %v13395_v2  ;;  %v3535_v2 = vrot.slane %v19521_v61, 1  ;;  %vm18872_vm2 = vcmp.eq.s32.totalorder %v13518_v23, 1 }
 0x2ab   : > { %vm2319_vm11 = vcmp.eq.s32.totalorder %v2316_v28, %v13343_v11  ;;  %8252 = vmatpush3.bf16.msra.mxu0 %v8249_v27  ;;  %v3621_v59 = vsel %vm2107_vm7, %v3531_v44, %v3532_v57  ;;  %v4100_v52 = vsel %vm2320_vm15, 1, %v19157_v19  ;;  %v13628_v27 = vld [vmem:[%s18348_s0 + $0x130] sm:$0xff]  ;;  %v2216_v3 = vrot.slane %v13452_v47, 2 }
 0x2ac   : > { %v4099_v16 = vsel %vm2319_vm11, 1, %v19157_v19  ;;  %v13619_v4 = vsel %vm18801_vm0, %v3621_v59, -inf  ;;  %4157 = vperm.xlu1 %8563, %v4100_v52   ;;  %v2090_v44 = vrot.slane %v13628_v27, 1  ;;  %v3618_v28 = vsel %vm2107_vm7, %v3534_v60, %v3535_v2 }
 0x2ad   : > { %4154 = vperm.xlu0 %8562, %v4099_v16   ;;  %v8253_v59 = vpack.c.bf16 %v5990_v15, %v5989_v20  ;;  %v3620_v52 = vsel %vm2107_vm7, %v3532_v57, %v3533_v9  ;;  %vm18804_vm11 = vcmp.eq.s32.totalorder %v13561_v50, 1  ;;  %v13639_v16 = vsel %vm18872_vm2, %v3618_v28, -inf  ;;  %v5991_v9 = vld [vmem:[#allocation5 + $0xc0] sm:$0xff]  ;;  %v5992_v57 = vld [vmem:[#allocation5 + $0xc8] sm:$0xff]  ;;  %v13665_v20 = vpop.permute.xlu0 %4178 }
 0x2ae   : > { %v19660_v11 = vrot.slane %v13538_v13, 1  ;;  %v19661_v33 = vrot.slane %v19644_v24, 2  ;;  %v13651_v15 = vsel %vm18804_vm11, %v3620_v52, -inf  ;;  %v18805_v52 = vrot.slane %v19538_v0, 1 }
 0x2af   : > { %8254 = vmatprep.subr.bf16.mxu0 %v8253_v59  ;;  %vm18813_vm3 = vcmp.eq.s32.totalorder %v13572_v7, 1  ;;  %v3999_v24 = vrot.slane %v12234_v8, 2  ;;  %v18807_v55 = vrot.slane %v12136_v18, 2  ;;  %vm18810_vm11 = vcmp.eq.s32.totalorder %v13613_v43, 1 }
 0x2b0   : > { %v2124_v5 = vsel %vm2107_vm7, %v19660_v11, %v2090_v44  ;;  %v2313_v60 = vsel %vm2265_vm4, %v2216_v3, %v19661_v33  ;;  %v13659_v11 = vpop.permute.xlu1 %4181  ;;  %8256 = vmatpush3.bf16.msra.mxu0 %v8253_v59  ;;  %v3617_v59 = vsel %vm2107_vm7, %v3535_v2, %v18805_v52  ;;  %v18806_v2 = vrot.slane %v19483_v34, 2 }
 0x2b1   : > { %vm2195_vm15 = vcmp.eq.s32.totalorder %v2124_v5, %v13538_v13  ;;  %vm2322_vm0 = vcmp.eq.s32.totalorder %v2313_v60, %v13452_v47  ;;  %19662 = vst [vmem:[#allocation192_spill] sm:$0xff] %v13659_v11  ;;  %v2247_v47 = vrot.slane %v13538_v13, 2  ;;  %v2314_v5 = vsel %vm2265_vm4, %v2215_v29, %v2216_v3 }
 0x2b2   : > { %v3664_v33 = vsel %vm2195_vm15, 1, %v19157_v19  ;;  %v4102_v28 = vsel %vm2322_vm0, 1, %v19157_v19  ;;  %v8257_v60 = vpack.c.bf16 %v5992_v57, %v5991_v9  ;;  %vm2321_vm0 = vcmp.eq.s32.totalorder %v2314_v5, %v13405_v38  ;;  %v5993_v9 = vld [vmem:[#allocation5 + $0xd0] sm:$0xff]  ;;  %v5994_v38 = vld [vmem:[#allocation5 + $0xd8] sm:$0xff]  ;;  %v13719_v57 = vpop.permute.xlu0 %4172 }
 0x2b3   : > { %3787 = vperm.xlu1 %8563, %v3664_v33   ;;  %4163 = vperm.xlu0 %8562, %v4102_v28   ;;  %vm18811_vm15 = vcmp.eq.s32.totalorder %v13605_v37, 1  ;;  %v13680_v33 = vsel %vm18813_vm3, %v3617_v59, -inf  ;;  %v19663_v29 = vrot.slane %v13349_v17, 2  ;;  %v4101_v3 = vsel %vm2321_vm0, 1, %v19157_v19  ;;  %19666 = vst [vmem:[#allocation194_spill] sm:$0xff] %v13719_v57  ;;  %v19705_v37 = vld [vmem:[#allocation51_spill] sm:$0xff] }
 0x2b4   : > { %8258 = vmatprep.subr.bf16.mxu0 %v8257_v60  ;;  %v4091_v28 = vsel %vm2265_vm4, %v3999_v24, %v18807_v55  ;;  %v19667_v55 = vmax.f32 %v12497_v6, %v13543_v49  ;;  %vm18870_vm0 = vcmp.eq.s32.totalorder %v13659_v11, 1  ;;  %v5995_v6 = vld [vmem:[#allocation5 + $0xe0] sm:$0xff]  ;;  %vm18814_vm10 = vcmp.eq.s32.totalorder %v13719_v57, 1 }
 0x2b5   : > { %v2283_v8 = vsel %vm2265_vm4, %v19663_v29, %v2247_v47  ;;  %8260 = vmatpush3.bf16.msra.mxu0 %v8257_v60  ;;  %v4364_v59 = vsel %vm18811_vm15, %v4091_v28, -inf  ;;  %v4092_v29 = vsel %vm2265_vm4, %v18806_v2, %v3999_v24  ;;  %v2248_v24 = vrot.slane %v13628_v27, 2 }
 0x2b6   : > { %vm2352_vm14 = vcmp.eq.s32.totalorder %v2283_v8, %v13349_v17  ;;  %v13706_v17 = vld [vmem:[%s18348_s0 + $0x138] sm:$0xff]  ;;  %v13709_v8 = vpop.permute.xlu1 %4184  ;;  %v4363_v28 = vsel %vm18810_vm11, %v4092_v29, -inf  ;;  %v8261_v2 = vpack.c.bf16 %v5994_v38, %v5993_v9  ;;  %v4002_v9 = vrot.slane %v12258_v31, 2  ;;  %v13756_v29 = vld [vmem:[%s18348_s0 + $0x140] sm:$0xff] }
 0x2b7   : > { %v4132_v5 = vsel %vm2352_vm14, 1, %v19157_v19  ;;  %4160 = vperm.xlu0 %8562, %v4101_v3   ;;  %v2091_v60 = vrot.slane %v13706_v17, 1  ;;  %19664 = vst [vmem:[#allocation193_spill] sm:$0xff] %v13709_v8  ;;  %v19665_v3 = vmax.f32 %v12628_v51, %v13599_v54  ;;  %v13724_v1 = vmax.f32 %v19667_v55, %v4363_v28  ;;  %v5996_v55 = vld [vmem:[#allocation5 + $0xe8] sm:$0xff] }
 0x2b8   : > { %4253 = vperm.xlu1 %8563, %v4132_v5   ;;  %v4003_v51 = vrot.slane %v19520_v58, 2  ;;  %v4004_v54 = vrot.slane %v19521_v61, 2  ;;  %8262 = vmatprep.subr.bf16.mxu0 %v8261_v2  ;;  %vm4315_vm15 = vcmp.eq.s32.totalorder %v13665_v20, 1  ;;  %v8265_v28 = vpack.c.bf16 %v5996_v55, %v5995_v6 }
 0x2b9   : > { %v13714_v52 = vmax.f32 %v19665_v3, %v4364_v59  ;;  %v2123_v5 = vsel %vm2107_vm7, %v2090_v44, %v2091_v60  ;;  %v2282_v59 = vsel %vm2265_vm4, %v2247_v47, %v2248_v24  ;;  %8264 = vmatpush3.bf16.msra.mxu0 %v8261_v2  ;;  %v2249_v47 = vrot.slane %v13706_v17, 2 }
 0x2ba   : > { %vm2196_vm14 = vcmp.eq.s32.totalorder %v2123_v5, %v13628_v27  ;;  %vm2353_vm11 = vcmp.eq.s32.totalorder %v2282_v59, %v13538_v13  ;;  %v4087_v61 = vsel %vm2265_vm4, %v4003_v51, %v4004_v54  ;;  %v4088_v31 = vsel %vm2265_vm4, %v4002_v9, %v4003_v51  ;;  %v13759_v5 = vpop.permute.xlu1 %4175  ;;  %8266 = vmatprep.subr.bf16.mxu0 %v8265_v28 }
 0x2bb   : > { %v3665_v49 = vsel %vm2196_vm14, 1, %v19157_v19  ;;  %v4133_v58 = vsel %vm2353_vm11, 1, %v19157_v19  ;;  %v4368_v44 = vsel %vm18870_vm0, %v4087_v61, -inf  ;;  %v19668_v13 = vmax.f32 %v12769_v40, %v13639_v16  ;;  %19670 = vst [vmem:[#allocation196_spill] sm:$0xff] %v13759_v5 }
 0x2bc   : > { %3790 = vperm.xlu1 %8563, %v3665_v49   ;;  %4256 = vperm.xlu0 %8562, %v4133_v58   ;;  %v4367_v38 = vsel %vm4315_vm15, %v4088_v31, -inf  ;;  %v2092_v3 = vrot.slane %v13756_v29, 1  ;;  %v19671_v51 = vmax.f32 %v12682_v42, %v13589_v21  ;;  %v2281_v40 = vsel %vm2265_vm4, %v2248_v24, %v2249_v47  ;;  %v13770_v49 = vpop.permute.xlu0 %3718  ;;  %v5997_v42 = vld [vmem:[#allocation5 + $0xf0] sm:$0xff]  ;;  %v5998_v21 = vld [vmem:[#allocation5 + $0xf8] sm:$0xff]  ;;  %v13796_v31 = vld [vmem:[%s18348_s0 + $0x148] sm:$0xff] }
 0x2bd   : > { %v13749_v2 = vmax.f32 %v19668_v13, %v4368_v44  ;;  %v4005_v16 = vrot.slane %v19538_v0, 2  ;;  %vm18817_vm11 = vcmp.eq.s32.totalorder %v13709_v8, 1  ;;  %19673 = vst [vmem:[#allocation198_spill] sm:$0xff] %v13770_v49  ;;  %vm2354_vm14 = vcmp.eq.s32.totalorder %v2281_v40, %v13628_v27  ;;  %8268 = vmatpush3.bf16.msra.mxu0 %v8265_v28 }
 0x2be   : > { %v13764_v59 = vmax.f32 %v19671_v51, %v4367_v38  ;;  %v2122_v6 = vsel %vm2107_vm7, %v2091_v60, %v2092_v3  ;;  %v4001_v55 = vrot.slane %v12300_v14, 2  ;;  %v4134_v24 = vsel %vm2354_vm14, 1, %v19157_v19 }
 0x2bf   : > { %19669 = vst [vmem:[#allocation195_spill] sm:$0xff] %v13749_v2  ;;  %7921 = vmatprep.mubr.f32.mxu0 %v13749_v2  ;;  %vm2197_vm3 = vcmp.eq.s32.totalorder %v2122_v6, %v13706_v17  ;;  %v4086_v27 = vsel %vm2265_vm4, %v4004_v54, %v4005_v16  ;;  %v19674_v58 = vrot.slane %v12136_v18, 2  ;;  %v2093_v54 = vrot.slane %v13796_v31, 1 }
 0x2c0   : > { %19672 = vst [vmem:[#allocation197_spill] sm:$0xff] %v13764_v59  ;;  %v4467_v60 = vmax.f32 %v13764_v59, %v13724_v1  ;;  %4259 = vperm.xlu1 %8563, %v4134_v24   ;;  %v3666_v14 = vsel %vm2197_vm3, 1, %v19157_v19  ;;  %v4369_v61 = vsel %vm18817_vm11, %v4086_v27, -inf  ;;  %v19675_v13 = vmax.f32 %v12750_v10, %v13680_v33  ;;  %v13817_v10 = vpop.permute.xlu1 %3724 }
 0x2c1   : > { %v4090_v44 = vsel %vm2265_vm4, %v19674_v58, %v4001_v55  ;;  %3793 = vperm.xlu0 %8562, %v3666_v14   ;;  %v2250_v18 = vrot.slane %v13756_v29, 2  ;;  %v8269_v51 = vpack.c.bf16 %v5998_v21, %v5997_v42  ;;  %v19677_v40 = vmax.f32 %v12603_v30, %v13619_v4  ;;  %19679 = vst [vmem:[#allocation201_spill] sm:$0xff] %v13817_v10  ;;  %v6451_v21 = vld [vmem:[#allocation5 + $0x108] sm:$0xff] }
 0x2c2   : > { %v13802_v38 = vmax.f32 %v19675_v13, %v4369_v61  ;;  %v4365_v28 = vsel %vm18814_vm10, %v4090_v44, -inf  ;;  %v2121_v24 = vsel %vm2107_vm7, %v2092_v3, %v2093_v54  ;;  %v4089_v27 = vsel %vm2265_vm4, %v4001_v55, %v4002_v9  ;;  %v13826_v3 = vpop.permute.xlu0 %3721 }
 0x2c3   : > { %v13810_v6 = vmax.f32 %v19677_v40, %v4365_v28  ;;  %vm18815_vm3 = vcmp.eq.s32.totalorder %v13759_v5, 1  ;;  %vm2198_vm14 = vcmp.eq.s32.totalorder %v2121_v24, %v13756_v29  ;;  %v2280_v33 = vsel %vm2265_vm4, %v2249_v47, %v2250_v18  ;;  %8270 = vmatprep.subr.bf16.mxu0 %v8269_v51  ;;  %19680 = vst [vmem:[#allocation202_spill] sm:$0xff] %v13826_v3  ;;  %v6450_v47 = vld [vmem:[#allocation5 + $0x100] sm:$0xff] }
 0x2c4   : > { %19676 = vst [vmem:[#allocation199_spill] sm:$0xff] %v13802_v38  ;;  %v4366_v30 = vsel %vm18815_vm3, %v4089_v27, -inf  ;;  %v4468_v4 = vmax.f32 %v13749_v2, %v13714_v52  ;;  %v3667_v42 = vsel %vm2198_vm14, 1, %v19157_v19  ;;  %vm2355_vm10 = vcmp.eq.s32.totalorder %v2280_v33, %v13706_v17  ;;  %8272 = vmatpush3.bf16.msra.mxu0 %v8269_v51  ;;  %v19697_v5 = vld [vmem:[#allocation47_spill] sm:$0xff] }
 0x2c5   : > { %19678 = vst [vmem:[#allocation200_spill] sm:$0xff] %v13810_v6  ;;  %v4469_v9 = vmax.f32 %v13802_v38, %v13810_v6  ;;  %v13831_v55 = vmax.f32 %v4467_v60, %v13810_v6  ;;  %3796 = vperm.xlu1 %8563, %v3667_v42   ;;  %v4135_v14 = vsel %vm2355_vm10, 1, %v19157_v19  ;;  %v19681_v61 = vmax.f32 %v12692_v32, %v13651_v15  ;;  %v19682_v60 = vld [vmem:[#allocation29_spill] sm:$0xff] }
 0x2c6   : > { %v3537_v44 = vrot.slane %v19539_v41, 1  ;;  %vm18816_vm3 = vcmp.eq.s32.totalorder %v13770_v49, 1  ;;  %8274 = vmatprep.subr.bf16.mxu0 %v19682_v60  ;;  %4262 = vperm.xlu0 %8562, %v4135_v14   ;;  %v2251_v28 = vrot.slane %v13796_v31, 2  ;;  %v13853_v32 = vld [vmem:[%s18348_s0 + $0x150] sm:$0xff]  ;;  %v19683_v40 = vrot.slane %v19538_v0, 1  ;;  %v13876_v14 = vpop.permute.xlu1 %3727 }
 0x2c7   : > { %v13839_v58 = vmax.f32 %v19681_v61, %v4366_v30  ;;  %v13845_v13 = vmax.f32 %v4469_v9, %v13764_v59  ;;  %v2094_v15 = vrot.slane %v13853_v32, 1  ;;  %7922 = vmatmul.mubr.f32.vlgmr.msra.gmra.mrb[56].mxu0 %v13802_v38  ;;  %v8305_v27 = vpack.c.bf16 %v6451_v21, %v6450_v47  ;;  %19684 = vst [vmem:[#allocation29_spill] sm:$0xff] %v13876_v14  ;;  %v6453_v21 = vld [vmem:[#allocation5 + $0x118] sm:$0xff]  ;;  %v13884_v61 = vpop.permute.xlu0 %4187 }
 0x2c8   : > { %v3616_v24 = vsel %vm2107_vm7, %v19683_v40, %v3537_v44  ;;  %v3538_v33 = vrot.slane %v19550_v36, 1  ;;  %v2279_v9 = vsel %vm2265_vm4, %v2250_v18, %v2251_v28  ;;  %v3539_v42 = vrot.slane %v19551_v45, 1  ;;  %8276 = vmatpush3.bf16.msra.mxu0 %v19682_v60  ;;  %v6452_v18 = vld [vmem:[#allocation5 + $0x110] sm:$0xff]  ;;  %19685 = vst [vmem:[#allocation203_spill] sm:$0xff] %v13884_v61 }
 0x2c9   : > { %v13857_v51 = vmax.f32 %v4468_v4, %v13839_v58  ;;  %v13867_v30 = vsel %vm18816_vm3, %v3616_v24, -inf  ;;  %v2120_v4 = vsel %vm2107_vm7, %v2093_v54, %v2094_v15  ;;  %vm2356_vm10 = vcmp.eq.s32.totalorder %v2279_v9, %v13756_v29  ;;  %8306 = vmatprep.subr.bf16.mxu1 %v8305_v27  ;;  %v19686_v54 = vld [vmem:[#allocation32_spill] sm:$0xff]  ;;  %v13902_v9 = vld [vmem:[%s18348_s0 + $0x158] sm:$0xff] }
 0x2ca   : > { %v3953_v47 = vmax.f32 %v12853_v46, %v13867_v30  ;;  %vm2199_vm14 = vcmp.eq.s32.totalorder %v2120_v4, %v13796_v31  ;;  %vm18818_vm3 = vcmp.eq.s32.totalorder %v13817_v10, 1  ;;  %8278 = vmatprep.subr.bf16.mxu0 %v19686_v54  ;;  %v4136_v40 = vsel %vm2356_vm10, 1, %v19157_v19  ;;  %8308 = vmatpush3.bf16.msra.mxu1 %v8305_v27 }
 0x2cb   : > { %v3668_v60 = vsel %vm2199_vm14, 1, %v19157_v19  ;;  %v3614_v46 = vsel %vm2107_vm7, %v3538_v33, %v3539_v42  ;;  %v3615_v29 = vsel %vm2107_vm7, %v3537_v44, %v3538_v33  ;;  %4265 = vperm.xlu1 %8563, %v4136_v40   ;;  %vm18819_vm11 = vcmp.eq.s32.totalorder %v13826_v3, 1 }
 0x2cc   : > { %3799 = vperm.xlu0 %8562, %v3668_v60   ;;  %v13895_v24 = vsel %vm18818_vm3, %v3614_v46, -inf  ;;  %v2252_v30 = vrot.slane %v13853_v32, 2  ;;  %v1938_v4 = vrot.slane %v13902_v9, 7  ;;  %v13909_v27 = vsel %vm18819_vm11, %v3615_v29, -inf  ;;  %8280 = vmatpush3.bf16.msra.mxu0 %v19686_v54  ;;  %v6455_v54 = vld [vmem:[#allocation5 + $0x128] sm:$0xff] }
 0x2cd   : > { %v3955_v44 = vmax.f32 %v12899_v53, %v13895_v24  ;;  %v8309_v33 = vpack.c.bf16 %v6453_v21, %v6452_v18  ;;  %v18820_v40 = vrot.slane %v19555_v48, 1  ;;  %v3954_v60 = vmax.f32 %v12834_v39, %v13909_v27  ;;  %v19687_v53 = vld [vmem:[#allocation76_spill] sm:$0xff]  ;;  %v19689_v18 = vld [vmem:[#allocation39_spill] sm:$0xff]  ;;  %v13934_v27 = vpop.permute.xlu1 %4193 }
 0x2ce   : > { %v2278_v46 = vsel %vm2265_vm4, %v2251_v28, %v2252_v30  ;;  %v19688_v24 = vrot.slane %v19687_v53, 7  ;;  %vm18821_vm10 = vcmp.eq.s32.totalorder %v13876_v14, 1  ;;  %8282 = vmatprep.subr.bf16.mxu0 %v19689_v18  ;;  %v4006_v28 = vrot.slane %v19539_v41, 2  ;;  %v6454_v21 = vld [vmem:[#allocation5 + $0x120] sm:$0xff]  ;;  %19690 = vst [vmem:[#allocation32_spill] sm:$0xff] %v13934_v27 }
 0x2cf   : > { %vm2357_vm14 = vcmp.eq.s32.totalorder %v2278_v46, %v13796_v31  ;;  %8310 = vmatprep.subr.bf16.mxu1 %v8309_v33  ;;  %v3613_v39 = vsel %vm2107_vm7, %v3539_v42, %v18820_v40  ;;  %vm18822_vm11 = vcmp.eq.s32.totalorder %v13884_v61, 1  ;;  %v13943_v46 = vpop.permute.xlu0 %4190  ;;  %v4007_v41 = vrot.slane %v19550_v36, 2 }
 0x2d0   : > { %v1960_v29 = vsel %vm1949_vm12, %v19688_v24, %v1938_v4  ;;  %v4137_v53 = vsel %vm2357_vm14, 1, %v19157_v19  ;;  %v13940_v31 = vsel %vm18821_vm10, %v3613_v39, -inf  ;;  %8312 = vmatpush3.bf16.msra.mxu1 %v8309_v33  ;;  %19691 = vst [vmem:[#allocation76_spill] sm:$0xff] %v13943_v46  ;;  %v4085_v42 = vsel %vm2265_vm4, %v4005_v16, %v4006_v28  ;;  %v13955_v39 = vld [vmem:[%s18348_s0 + $0x160] sm:$0xff]  ;;  %8284 = vmatpush3.bf16.msra.mxu0 %v19689_v18  ;;  %v6456_v18 = vld [vmem:[#allocation5 + $0x130] sm:$0xff] }
 0x2d1   : > { %vm2043_vm3 = vcmp.eq.s32.totalorder %v1960_v29, %v13902_v9  ;;  %4268 = vperm.xlu1 %8563, %v4137_v53   ;;  %v2095_v29 = vrot.slane %v13902_v9, 1  ;;  %v18823_v33 = vrot.slane %v13955_v39, 1  ;;  %v4370_v53 = vsel %vm18822_vm11, %v4085_v42, -inf }
 0x2d2   : > { %v3201_v24 = vsel %vm2043_vm3, 1, %v19157_v19  ;;  %v18824_v0 = vrot.slane %v19551_v45, 2  ;;  %v13963_v16 = vmax.f32 %v3953_v47, %v4370_v53  ;;  %vm18826_vm3 = vcmp.eq.s32.totalorder %v13934_v27, 1 }
 0x2d3   : > { %3336 = vperm.xlu0 %8562, %v3201_v24   ;;  %v8313_v24 = vpack.c.bf16 %v6455_v54, %v6454_v21  ;;  %v2118_v40 = vsel %vm2107_vm7, %v2095_v29, %v18823_v33  ;;  %v2119_v17 = vsel %vm2107_vm7, %v2094_v15, %v2095_v29  ;;  %v19693_v21 = vld [vmem:[#allocation44_spill] sm:$0xff]  ;;  %v4084_v47 = vsel %vm2265_vm4, %v4006_v28, %v4007_v41  ;;  %v6457_v54 = vld [vmem:[#allocation5 + $0x138] sm:$0xff]  ;;  %v13990_v29 = vpop.permute.xlu1 %3730  ;;  %v13997_v53 = vpop.permute.xlu0 %4196 }
 0x2d4   : > { %19692 = vst [vmem:[#allocation39_spill] sm:$0xff] %v13963_v16  ;;  %8286 = vmatprep.subr.bf16.mxu0 %v19693_v21  ;;  %vm2201_vm14 = vcmp.eq.s32.totalorder %v2118_v40, %v13902_v9  ;;  %vm2200_vm10 = vcmp.eq.s32.totalorder %v2119_v17, %v13853_v32  ;;  %v4083_v36 = vsel %vm2265_vm4, %v4007_v41, %v18824_v0  ;;  %19694 = vst [vmem:[#allocation44_spill] sm:$0xff] %v13990_v29 }
 0x2d5   : > { %8314 = vmatprep.subr.bf16.mxu1 %v8313_v24  ;;  %v4470_v15 = vmax.f32 %v13963_v16, %v13839_v58  ;;  %v4556_v42 = vmax.f32 %v13857_v51, %v13963_v16  ;;  %v3670_v40 = vsel %vm2201_vm14, 1, %v19157_v19  ;;  %v3669_v17 = vsel %vm2200_vm10, 1, %v19157_v19  ;;  %7924 = vmatprep.mubr.f32.mxu0 %v13963_v16  ;;  %19695 = vst [vmem:[#allocation204_spill] sm:$0xff] %v13997_v53 }
 0x2d6   : > { %8316 = vmatpush3.bf16.msra.mxu1 %v8313_v24  ;;  %3805 = vperm.xlu1 %8563, %v3670_v40   ;;  %v4372_v28 = vsel %vm18826_vm3, %v4083_v36, -inf  ;;  %vm18832_vm11 = vcmp.eq.s32.totalorder %v13943_v46, 1  ;;  %v2253_v41 = vrot.slane %v13902_v9, 2  ;;  %v1939_v51 = vrot.slane %v13955_v39, 7 }
 0x2d7   : > { %3802 = vperm.xlu0 %8562, %v3669_v17   ;;  %v13999_v33 = vmax.f32 %v3955_v44, %v4372_v28  ;;  %v14002_v24 = vmax.f32 %v4470_v15, %v13749_v2  ;;  %v4371_v40 = vsel %vm18832_vm11, %v4084_v47, -inf  ;;  %v8317_v17 = vpack.c.bf16 %v6457_v54, %v6456_v18  ;;  %8288 = vmatpush3.bf16.msra.mxu0 %v19693_v21  ;;  %v19696_v15 = vld [vmem:[#allocation98_spill] sm:$0xff] }
 0x2d8   : > { %v14007_v36 = vmax.f32 %v3954_v60, %v4371_v40  ;;  %v2277_v0 = vsel %vm2265_vm4, %v2252_v30, %v2253_v41  ;;  %v1959_v44 = vsel %vm1949_vm12, %v1938_v4, %v1939_v51  ;;  %v3541_v28 = vrot.slane %v19696_v15, 1  ;;  %8290 = vmatprep.subr.bf16.mxu0 %v19697_v5 }
 0x2d9   : > { %v4472_v47 = vmax.f32 %v13999_v33, %v13749_v2  ;;  %v14024_v21 = vmax.f32 %v4556_v42, %v13999_v33  ;;  %vm2358_vm10 = vcmp.eq.s32.totalorder %v2277_v0, %v13853_v32  ;;  %8318 = vmatprep.subr.bf16.mxu1 %v8317_v17  ;;  %v19698_v18 = vmax.f32 %v13831_v55, %v13802_v38  ;;  %v6458_v55 = vld [vmem:[#allocation5 + $0x140] sm:$0xff]  ;;  %v6459_v42 = vld [vmem:[#allocation5 + $0x148] sm:$0xff] }
 0x2da   : > { %v4471_v30 = vmax.f32 %v14007_v36, %v13764_v59  ;;  %v4557_v4 = vmax.f32 %v13845_v13, %v14007_v36  ;;  %v4138_v40 = vsel %vm2358_vm10, 1, %v19157_v19  ;;  %8320 = vmatpush3.bf16.msra.mxu1 %v8317_v17  ;;  %7925 = vmatmul.mubr.f32.gmra.mrb[58].mxu0 %v14007_v36  ;;  %vm2044_vm14 = vcmp.eq.s32.totalorder %v1959_v44, %v13955_v39 }
 0x2db   : > { %v14035_v54 = vmax.f32 %v19698_v18, %v14007_v36  ;;  %4271 = vperm.xlu1 %8563, %v4138_v40   ;;  %v19700_v32 = vrot.slane %v19555_v48, 1  ;;  %vm18830_vm3 = vcmp.eq.s32.totalorder %v13990_v29, 1  ;;  %v4009_v13 = vrot.slane %v19555_v48, 2  ;;  %7927 = vmatprep.mubr.f32.mxu0 %v13999_v33  ;;  %v14047_v18 = vpop.permute.xlu1 %4199  ;;  %v19703_v48 = vld [vmem:[#allocation142_spill] sm:$0xff] }
 0x2dc   : > { %19701 = vst [vmem:[#allocation47_spill] sm:$0xff] %v14047_v18  ;;  %v3202_v17 = vsel %vm2044_vm14, 1, %v19157_v19  ;;  %vm18831_vm10 = vcmp.eq.s32.totalorder %v13997_v53, 1  ;;  %v14054_v40 = vmax.f32 %v4471_v30, %v13802_v38  ;;  %8292 = vmatpush3.bf16.msra.mxu0 %v19697_v5  ;;  %v19704_v57 = vrot.slane %v19551_v45, 2 }
 0x2dd   : > { %19699 = vst [vmem:[#allocation98_spill] sm:$0xff] %v14035_v54  ;;  %v3612_v0 = vsel %vm2107_vm7, %v19700_v32, %v3541_v28  ;;  %v14056_v32 = vpop.permute.xlu0 %3733  ;;  %3339 = vperm.xlu0 %8562, %v3202_v17   ;;  %v18834_v12 = vrot.slane %v13955_v39, 2  ;;  %8294 = vmatprep.subr.bf16.mxu0 %v19705_v37  ;;  %v8321_v17 = vpack.c.bf16 %v6459_v42, %v6458_v55  ;;  %v4010_v45 = vrot.slane %v19696_v15, 2  ;;  %v6460_v42 = vld [vmem:[#allocation5 + $0x150] sm:$0xff] }
 0x2de   : > { %v3905_v44 = vsel %vm18830_vm3, %v3612_v0, -inf  ;;  %19702 = vst [vmem:[#allocation205_spill] sm:$0xff] %v14056_v32  ;;  %v4082_v43 = vsel %vm2265_vm4, %v19704_v57, %v4009_v13  ;;  %v14068_v0 = vld [vmem:[%s18348_s0 + $0x168] sm:$0xff]  ;;  %vm18840_vm14 = vcmp.eq.s32.totalorder %v14047_v18, 1  ;;  %v19706_v57 = vmax.f32 %v12890_v62, %v13940_v31  ;;  %v19707_v31 = vld [vmem:[#allocation106_spill] sm:$0xff] }
 0x2df   : > { %v3957_v60 = vmax.f32 %v19703_v48, %v3905_v44  ;;  %v18833_v30 = vrot.slane %v14068_v0, 7  ;;  %v4373_v5 = vsel %vm18831_vm10, %v4082_v43, -inf  ;;  %v2276_v48 = vsel %vm2265_vm4, %v2253_v41, %v18834_v12  ;;  %8322 = vmatprep.subr.bf16.mxu1 %v8321_v17 }
 0x2e0   : > { %v14079_v44 = vmax.f32 %v19706_v57, %v4373_v5  ;;  %v14090_v55 = vmax.f32 %v4472_v47, %v13963_v16  ;;  %vm2359_vm3 = vcmp.eq.s32.totalorder %v2276_v48, %v13902_v9  ;;  %v4081_v62 = vsel %vm2265_vm4, %v4009_v13, %v4010_v45  ;;  %8296 = vmatpush3.bf16.msra.mxu0 %v19705_v37  ;;  %v6461_v13 = vld [vmem:[#allocation5 + $0x158] sm:$0xff]  ;;  %v14107_v5 = vpop.permute.xlu1 %3736 }
 0x2e1   : > { %v1958_v43 = vsel %vm1949_vm12, %v1939_v51, %v18833_v30  ;;  %v3542_v15 = vrot.slane %v19707_v31, 1  ;;  %v4139_v9 = vsel %vm2359_vm3, 1, %v19157_v19  ;;  %8324 = vmatpush3.bf16.msra.mxu1 %v8321_v17  ;;  %19708 = vst [vmem:[#allocation142_spill] sm:$0xff] %v14107_v5  ;;  %v4374_v57 = vsel %vm18840_vm14, %v4081_v62, -inf  ;;  %v19710_v17 = vld [vmem:[#allocation13_spill] sm:$0xff]  ;;  %v19711_v30 = vld [vmem:[#allocation139_spill] sm:$0xff] }
 0x2e2   : > { %vm2045_vm10 = vcmp.eq.s32.totalorder %v1958_v43, %v14068_v0  ;;  %v4473_v41 = vmax.f32 %v14079_v44, %v13802_v38  ;;  %v14103_v47 = vmax.f32 %v4557_v4, %v14079_v44  ;;  %7928 = vmatmul.mubr.f32.gmra.mrb[60].mxu0 %v14079_v44  ;;  %4274 = vperm.xlu1 %8563, %v4139_v9   ;;  %vm18839_vm11 = vcmp.eq.s32.totalorder %v14056_v32, 1  ;;  %v14115_v4 = vpop.permute.xlu0 %4202  ;;  %v14126_v62 = vld [vmem:[%s18348_s0 + $0x170] sm:$0xff] }
 0x2e3   : > { %v3203_v37 = vsel %vm2045_vm10, 1, %v19157_v19  ;;  %v3611_v48 = vsel %vm2107_vm7, %v3541_v28, %v3542_v15  ;;  %19709 = vst [vmem:[#allocation51_spill] sm:$0xff] %v14115_v4  ;;  %8298 = vmatprep.subr.bf16.mxu0 %v19710_v17  ;;  %v14118_v43 = vmax.f32 %v3957_v60, %v4374_v57  ;;  %v2097_v51 = vrot.slane %v14068_v0, 1 }
 0x2e4   : > { %3342 = vperm.xlu0 %8562, %v3203_v37   ;;  %v3906_v9 = vsel %vm18839_vm11, %v3611_v48, -inf  ;;  %v18838_v28 = vrot.slane %v14126_v62, 1  ;;  %v8325_v63 = vpack.c.bf16 %v6461_v13, %v6460_v42  ;;  %v3543_v38 = vrot.slane %v19712_v25, 1  ;;  %8300 = vmatpush3.bf16.msra.mxu0 %v19710_v17  ;;  %v19715_v37 = vld [vmem:[#allocation14_spill] sm:$0xff] }
 0x2e5   : > { %v3958_v12 = vmax.f32 %v19711_v30, %v3906_v9  ;;  %vm18846_vm3 = vcmp.eq.s32.totalorder %v14107_v5, 1  ;;  %v4474_v60 = vmax.f32 %v14118_v43, %v13963_v16  ;;  %v19713_v57 = vmax.f32 %v14002_v24, %v13999_v33  ;;  %7930 = vmatprep.mubr.f32.mxu0 %v14118_v43  ;;  %v6462_v9 = vld [vmem:[#allocation5 + $0x160] sm:$0xff]  ;;  %8302 = vmatprep.subr.bf16.mxu0 %v19715_v37 }
 0x2e6   : > { %v2116_v30 = vsel %vm2107_vm7, %v2097_v51, %v18838_v28  ;;  %v19714_v42 = vrot.slane %v13955_v39, 1  ;;  %8326 = vmatprep.subr.bf16.mxu1 %v8325_v63  ;;  %v3610_v24 = vsel %vm2107_vm7, %v3542_v15, %v3543_v38  ;;  %v4011_v17 = vrot.slane %v19707_v31, 2  ;;  %v19717_v31 = vld [vmem:[#allocation146_spill] sm:$0xff] }
 0x2e7   : > { %v14141_v48 = vmax.f32 %v19713_v57, %v14118_v43  ;;  %vm2203_vm10 = vcmp.eq.s32.totalorder %v2116_v30, %v14068_v0  ;;  %v6463_v57 = vld [vmem:[#allocation5 + $0x168] sm:$0xff]  ;;  %v3907_v30 = vsel %vm18846_vm3, %v3610_v24, -inf  ;;  %vm18847_vm14 = vcmp.eq.s32.totalorder %v14115_v4, 1  ;;  %8328 = vmatpush3.bf16.msra.mxu1 %v8325_v63 }
 0x2e8   : > { %v2117_v13 = vsel %vm2107_vm7, %v19714_v42, %v2097_v51  ;;  %v3672_v28 = vsel %vm2203_vm10, 1, %v19157_v19  ;;  %v14162_v51 = vpop.permute.xlu1 %4205  ;;  %v3959_v42 = vmax.f32 %v19717_v31, %v3907_v30  ;;  %v4080_v59 = vsel %vm2265_vm4, %v4010_v45, %v4011_v17  ;;  %8304 = vmatpush3.bf16.msra.mxu0 %v19715_v37  ;;  %v6465_v45 = vld [vmem:[#allocation5 + $0x178] sm:$0xff] }
 0x2e9   : > { %vm2202_vm11 = vcmp.eq.s32.totalorder %v2117_v13, %v13955_v39  ;;  %19716 = vst [vmem:[#allocation106_spill] sm:$0xff] %v14162_v51  ;;  %3811 = vperm.xlu1 %8563, %v3672_v28   ;;  %v14169_v56 = vmax.f32 %v4473_v41, %v14007_v36  ;;  %v14171_v13 = vpop.permute.xlu0 %3739  ;;  %v4375_v63 = vsel %vm18847_vm14, %v4080_v59, -inf  ;;  %v2255_v28 = vrot.slane %v14068_v0, 2 }
 0x2ea   : > { %v3671_v15 = vsel %vm2202_vm11, 1, %v19157_v19  ;;  %19718 = vst [vmem:[#allocation13_spill] sm:$0xff] %v14171_v13  ;;  %v1941_v24 = vrot.slane %v14126_v62, 7  ;;  %v8329_v26 = vpack.c.bf16 %v6463_v57, %v6462_v9  ;;  %v14178_v30 = vmax.f32 %v3958_v12, %v4375_v63  ;;  %v19721_v12 = vld [vmem:[#allocation45_spill] sm:$0xff] }
 0x2eb   : > { %3808 = vperm.xlu0 %8562, %v3671_v15   ;;  %vm18924_vm11 = vcmp.eq.s32.totalorder %v14162_v51, 1  ;;  %v14183_v41 = vmax.f32 %v4474_v60, %v13999_v33  ;;  %v19719_v37 = vrot.slane %v13955_v39, 2  ;;  %v19720_v59 = vrot.slane %v14068_v0, 7 }
 0x2ec   : > { %8330 = vmatprep.subr.bf16.mxu1 %v8329_v26  ;;  %vm18940_vm10 = vcmp.eq.s32.totalorder %v14171_v13, 1  ;;  %v19722_v63 = vmax.f32 %v14054_v40, %v14079_v44  ;;  %v19723_v57 = vrot.slane %v19712_v25, 2  ;;  %v19724_v6 = vrot.slane %v19721_v12, 1  ;;  %7931 = vmatmul.mubr.f32.gmra.mrb[62].mxu0 %v14178_v30 }
 0x2ed   : > { %v2275_v15 = vsel %vm2265_vm4, %v19719_v37, %v2255_v28  ;;  %v1957_v31 = vsel %vm1949_vm12, %v19720_v59, %v1941_v24  ;;  %8332 = vmatpush3.bf16.msra.mxu1 %v8329_v26  ;;  %v6464_v59 = vld [vmem:[#allocation5 + $0x170] sm:$0xff]  ;;  %v4013_v23 = vrot.slane %v19721_v12, 2  ;;  %v19746_v16 = vrot.slane %v14141_v48, 1 }
 0x2ee   : > { %v14203_v37 = vmax.f32 %v19722_v63, %v14178_v30  ;;  %vm2360_vm3 = vcmp.eq.s32.totalorder %v2275_v15, %v13955_v39  ;;  %vm2046_vm14 = vcmp.eq.s32.totalorder %v1957_v31, %v14126_v62  ;;  %v4079_v60 = vsel %vm2265_vm4, %v4011_v17, %v19723_v57  ;;  %v19725_v57 = vld [vmem:[#allocation144_spill] sm:$0xff] }
 0x2ef   : > { %v4140_v9 = vsel %vm2360_vm3, 1, %v19157_v19  ;;  %v3609_v40 = vsel %vm2107_vm7, %v3543_v38, %v19724_v6  ;;  %v3204_v26 = vsel %vm2046_vm14, 1, %v19157_v19  ;;  %v4376_v39 = vsel %vm18924_vm11, %v4079_v60, -inf  ;;  %v14232_v6 = vld [vmem:[%s18348_s0 + $0x178] sm:$0xff] }
 0x2f0   : > { %4277 = vperm.xlu1 %8563, %v4140_v9   ;;  %v14222_v15 = vsel %vm18940_vm10, %v3609_v40, -inf  ;;  %v18850_v31 = vrot.slane %v14126_v62, 2  ;;  %3345 = vperm.xlu0 %8562, %v3204_v26   ;;  %v14225_v17 = vmax.f32 %v3959_v42, %v4376_v39  ;;  %v18851_v9 = vrot.slane %v14232_v6, 7 }
 0x2f1   : > { %v3960_v38 = vmax.f32 %v19725_v57, %v14222_v15  ;;  %v8333_v60 = vpack.c.bf16 %v6465_v45, %v6464_v59  ;;  %v18852_v40 = vrot.slane %v14035_v54, 6  ;;  %v4644_v42 = vrot.slane %v14024_v21, 6 }
 0x2f2   : > { %v2274_v63 = vsel %vm2265_vm4, %v2255_v28, %v18850_v31  ;;  %v18854_v26 = vrot.slane %v14035_v54, 7  ;;  %v19726_v45 = vmax.f32 %v14090_v55, %v14118_v43  ;;  %v1956_v57 = vsel %vm1949_vm12, %v1941_v24, %v18851_v9  ;;  %7933 = vmatprep.mubr.f32.mxu0 %v14225_v17 }
 0x2f3   : > { %vm2361_vm14 = vcmp.eq.s32.totalorder %v2274_v63, %v14068_v0  ;;  %8334 = vmatprep.subr.bf16.mxu1 %v8333_v60  ;;  %v4717_v15 = vsel %vm1791_vm6, %v18852_v40, %v4644_v42  ;;  %v18855_v31 = vrot.slane %v14024_v21, 7  ;;  %vm2047_vm3 = vcmp.eq.s32.totalorder %v1956_v57, %v14232_v6  ;;  %v14278_v57 = vpop.permute.xlu1 %3742 }
 0x2f4   : > { %v14250_v59 = vmax.f32 %v19726_v45, %v14225_v17  ;;  %v4141_v28 = vsel %vm2361_vm14, 1, %v19157_v19  ;;  %8336 = vmatpush3.bf16.msra.mxu1 %v8333_v60  ;;  %v4728_v55 = vsel %vm18880_vm13, %v4717_v15, -inf  ;;  %v18856_v63 = vrot.slane %v14035_v54, 1  ;;  %19728 = vst [vmem:[#allocation139_spill] sm:$0xff] %v14278_v57 }
 0x2f5   : > { %4280 = vperm.xlu1 %8563, %v4141_v28   ;;  %v4981_v24 = vrot.slane %v14024_v21, 1  ;;  %v3205_v45 = vsel %vm2047_vm3, 1, %v19157_v19  ;;  %v4770_v9 = vmax.f32 %v14024_v21, %v4728_v55  ;;  %v4886_v60 = vsel %vm1949_vm12, %v18854_v26, %v18855_v31 }
 0x2f6   : > { %v4982_v28 = vrot.slane %v14103_v47, 1  ;;  %3348 = vperm.xlu0 %8562, %v3205_v45   ;;  %v4897_v40 = vsel %vm18879_vm8, %v4886_v60, -inf  ;;  %v18858_v39 = vrot.slane %v14035_v54, 2  ;;  %v5150_v0 = vrot.slane %v14024_v21, 2  ;;  %v14295_v60 = vpop.permute.xlu0 %4208 }
 0x2f7   : > { %v5056_v55 = vsel %vm2107_vm7, %v18856_v63, %v4981_v24  ;;  %v4939_v50 = vmax.f32 %v4770_v9, %v4897_v40  ;;  %v5151_v45 = vrot.slane %v14103_v47, 2  ;;  %19731 = vst [vmem:[#allocation14_spill] sm:$0xff] %v14295_v60  ;;  %v19732_v9 = vld [vmem:[#allocation20_spill] sm:$0xff]  ;;  %vm18939_vm14 = vcmp.eq.s32.totalorder %v14278_v57, 1  ;;  %v19908_v57 = vld [vmem:[#allocation170_spill] sm:$0xff] }
 0x2f8   : > { %v5055_v26 = vsel %vm2107_vm7, %v4981_v24, %v4982_v28  ;;  %v14292_v31 = vsel %vm3846_vm9, %v5056_v55, -inf  ;;  %v5225_v63 = vsel %vm2265_vm4, %v18858_v39, %v5150_v0  ;;  %v3545_v40 = vrot.slane %v19732_v9, 1 }
 0x2f9   : > { %19730 = vst [vmem:[#allocation104_spill] sm:$0xff] %v14292_v31  ;;  %v5066_v15 = vsel %vm18872_vm2, %v5055_v26, -inf  ;;  %v5224_v35 = vsel %vm2265_vm4, %v5150_v0, %v5151_v45  ;;  %v14309_v55 = vsel %vm4315_vm15, %v5225_v63, -inf  ;;  %v19734_v31 = vrot.slane %v19721_v12, 1 }
 0x2fa   : > { %v5108_v24 = vmax.f32 %v4939_v50, %v5066_v15  ;;  %19733 = vst [vmem:[#allocation146_spill] sm:$0xff] %v14309_v55  ;;  %v5235_v26 = vsel %vm18870_vm0, %v5224_v35, -inf  ;;  %vm18932_vm9 = vcmp.eq.s32.totalorder %v14295_v60, 1  ;;  %v19735_v50 = vmax.f32 %v14178_v30, %v14007_v36  ;;  %v19738_v35 = vld [vmem:[#allocation150_spill] sm:$0xff]  ;;  %v14340_v36 = vld [vmem:[%s18348_s0 + $0x180] sm:$0xff] }
 0x2fb   : > { %v3608_v39 = vsel %vm2107_vm7, %v19734_v31, %v3545_v40  ;;  %v19737_v15 = vrot.slane %v19712_v25, 2  ;;  %v2099_v31 = vrot.slane %v14232_v6, 1  ;;  %vm19769_vm2 = vcmp.eq.s32.totalorder %v13884_v61, 1 }
 0x2fc   : > { %v14323_v0 = vmax.f32 %v19735_v50, %v14079_v44  ;;  %v14325_v20 = vmax.f32 %v5108_v24, %v5235_v26  ;;  %v3909_v63 = vsel %vm18939_vm14, %v3608_v39, -inf  ;;  %v18862_v24 = vrot.slane %v14340_v36, 1 }
 0x2fd   : > { %v4078_v12 = vsel %vm2265_vm4, %v19737_v15, %v4013_v23  ;;  %v3961_v11 = vmax.f32 %v19738_v35, %v3909_v63  ;;  %v4645_v39 = vrot.slane %v14103_v47, 6  ;;  %v19739_v26 = vrot.slane %v14126_v62, 1 }
 0x2fe   : > { %19736 = vst [vmem:[#allocation45_spill] sm:$0xff] %v14325_v20  ;;  %v4377_v55 = vsel %vm18932_vm9, %v4078_v12, -inf  ;;  %8081 = vmatprep.mubr.f32.mxu1 %v14325_v20  ;;  %v4814_v63 = vrot.slane %v14103_v47, 7  ;;  %v2114_v12 = vsel %vm2107_vm7, %v2099_v31, %v18862_v24  ;;  %v19740_v15 = vmax.f32 %v14169_v56, %v14178_v30 }
 0x2ff   : > { %v14345_v25 = vmax.f32 %v3960_v38, %v4377_v55  ;;  %v2115_v50 = vsel %vm2107_vm7, %v19739_v26, %v2099_v31  ;;  %v4716_v38 = vsel %vm1791_vm6, %v4644_v42, %v4645_v39  ;;  %vm2205_vm3 = vcmp.eq.s32.totalorder %v2114_v12, %v14232_v6  ;;  %v14372_v31 = vpop.permute.xlu1 %4211 }
 0x300   : > { %vm2204_vm15 = vcmp.eq.s32.totalorder %v2115_v50, %v14126_v62  ;;  %19741 = vst [vmem:[#allocation144_spill] sm:$0xff] %v14372_v31  ;;  %v3674_v42 = vsel %vm2205_vm3, 1, %v19157_v19  ;;  %v4729_v35 = vsel %vm18867_vm5, %v4716_v38, -inf  ;;  %v19743_v26 = vrot.slane %v14024_v21, 7 }
 0x301   : > { %v14369_v20 = vmax.f32 %v19740_v15, %v14345_v25  ;;  %7934 = vmatmul.mubr.f32.gmra.mrb[64].mxu0 %v14345_v25  ;;  %v3673_v50 = vsel %vm2204_vm15, 1, %v19157_v19  ;;  %v14383_v15 = vpop.permute.xlu0 %3745  ;;  %3817 = vperm.xlu1 %8563, %v3674_v42   ;;  %v4771_v12 = vmax.f32 %v14103_v47, %v4729_v35  ;;  %v5054_v24 = vsel %vm2107_vm7, %v4982_v28, %v19746_v16 }
 0x302   : > { %v4885_v56 = vsel %vm1949_vm12, %v19743_v26, %v4814_v63  ;;  %19744 = vst [vmem:[#allocation20_spill] sm:$0xff] %v14383_v15  ;;  %3814 = vperm.xlu0 %8562, %v3673_v50   ;;  %v19747_v38 = vrot.slane %v14141_v48, 2  ;;  %vm19748_vm15 = vcmp.eq.s32.totalorder %v13572_v7, 1  ;;  %vm19749_vm3 = vcmp.eq.s32.totalorder %v13709_v8, 1  ;;  %v19751_v50 = vld [vmem:[#allocation50_spill] sm:$0xff] }
 0x303   : > { %v4898_v54 = vsel %vm18866_vm1, %v4885_v56, -inf  ;;  %v5067_v26 = vsel %vm19748_vm15, %v5054_v24, -inf  ;;  %v4014_v47 = vrot.slane %v19732_v9, 2  ;;  %vm18938_vm1 = vcmp.eq.s32.totalorder %v14372_v31, 1 }
 0x304   : > { %v5223_v21 = vsel %vm2265_vm4, %v5151_v45, %v19747_v38  ;;  %v4940_v35 = vmax.f32 %v4771_v12, %v4898_v54  ;;  %v19750_v16 = vmax.f32 %v14225_v17, %v13999_v33  ;;  %v3546_v56 = vrot.slane %v19751_v50, 1 }
 0x305   : > { %v5236_v42 = vsel %vm19749_vm3, %v5223_v21, -inf  ;;  %vm18944_vm5 = vcmp.eq.s32.totalorder %v14383_v15, 1  ;;  %v4077_v45 = vsel %vm2265_vm4, %v4013_v23, %v4014_v47  ;;  %v18868_v24 = vrot.slane %v14340_v36, 7 }
 0x306   : > { %v14406_v28 = vmax.f32 %v19750_v16, %v14118_v43  ;;  %v5109_v54 = vmax.f32 %v4940_v35, %v5067_v26  ;;  %v4378_v12 = vsel %vm18938_vm1, %v4077_v45, -inf  ;;  %v3607_v33 = vsel %vm2107_vm7, %v3545_v40, %v3546_v56 }
 0x307   : > { %v4815_v21 = vrot.slane %v14141_v48, 7  ;;  %v14420_v16 = vmax.f32 %v3961_v11, %v4378_v12  ;;  %v3910_v23 = vsel %vm18944_vm5, %v3607_v33, -inf  ;;  %v19752_v9 = vrot.slane %v14232_v6, 7  ;;  %v19756_v11 = vld [vmem:[#allocation148_spill] sm:$0xff]  ;;  %v19765_v33 = vld [vmem:[#allocation46_spill] sm:$0xff] }
 0x308   : > { %v19753_v35 = vrot.slane %v14232_v6, 2  ;;  %v19754_v45 = vrot.slane %v14126_v62, 2  ;;  %v14436_v38 = vmax.f32 %v5109_v54, %v5236_v42  ;;  %v3962_v12 = vmax.f32 %v19756_v11, %v3910_v23  ;;  %v14452_v54 = vpop.permute.xlu1 %3748  ;;  %v19763_v11 = vld [vmem:[#allocation132_spill] sm:$0xff] }
 0x309   : > { %v1955_v26 = vsel %vm1949_vm12, %v19752_v9, %v18868_v24  ;;  %v19757_v24 = vmax.f32 %v14183_v41, %v14225_v17  ;;  %19758 = vst [vmem:[#allocation50_spill] sm:$0xff] %v14452_v54  ;;  %7936 = vmatprep.mubr.f32.mxu0 %v14420_v16  ;;  %v19759_v23 = vrot.slane %v14141_v48, 6  ;;  %v4884_v41 = vsel %vm1949_vm12, %v4814_v63, %v4815_v21 }
 0x30a   : > { %v2273_v40 = vsel %vm2265_vm4, %v19754_v45, %v19753_v35  ;;  %19755 = vst [vmem:[#allocation150_spill] sm:$0xff] %v14436_v38  ;;  %vm2048_vm15 = vcmp.eq.s32.totalorder %v1955_v26, %v14340_v36  ;;  %8082 = vmatmul.mubr.f32.vlgmr.msra.gmra.mrb[28].mxu1 %v14436_v38  ;;  %v14464_v35 = vpop.permute.xlu0 %4214  ;;  %v19761_v45 = vld [vmem:[#allocation17_spill] sm:$0xff]  ;;  %vm19764_vm0 = vcmp.eq.s32.totalorder %v19763_v11, 1  ;;  %v5153_v9 = vrot.slane %v14203_v37, 2 }
 0x30b   : > { %vm2362_vm3 = vcmp.eq.s32.totalorder %v2273_v40, %v14126_v62  ;;  %v14449_v8 = vmax.f32 %v19757_v24, %v14420_v16  ;;  %v3206_v42 = vsel %vm2048_vm15, 1, %v19157_v19  ;;  %v4715_v26 = vsel %vm1791_vm6, %v4645_v39, %v19759_v23  ;;  %19760 = vst [vmem:[#allocation148_spill] sm:$0xff] %v14464_v35 }
 0x30c   : > { %3351 = vperm.xlu1 %8563, %v3206_v42   ;;  %v4142_v62 = vsel %vm2362_vm3, 1, %v19157_v19  ;;  %v4984_v24 = vrot.slane %v14203_v37, 1  ;;  %vm19762_vm15 = vcmp.eq.s32.totalorder %v19761_v45, 1  ;;  %v4899_v42 = vsel %vm19764_vm0, %v4884_v41, -inf }
 0x30d   : > { %4283 = vperm.xlu0 %8562, %v4142_v62   ;;  %v4730_v40 = vsel %vm19762_vm15, %v4715_v26, -inf  ;;  %v18874_v7 = vrot.slane %v19765_v33, 1  ;;  %v19766_v23 = vrot.slane %v14141_v48, 1  ;;  %vm18945_vm3 = vcmp.eq.s32.totalorder %v14452_v54, 1 }
 0x30e   : > { %v4772_v39 = vmax.f32 %v14141_v48, %v4730_v40  ;;  %v4015_v62 = vrot.slane %v19751_v50, 2  ;;  %vm19767_vm15 = vcmp.eq.s32.totalorder %v13770_v49, 1  ;;  %v19768_v41 = vrot.slane %v14141_v48, 2  ;;  %v19770_v49 = vld [vmem:[#allocation154_spill] sm:$0xff]  ;;  %v14557_v61 = vpop.permute.xlu0 %3751 }
 0x30f   : > { %v5053_v63 = vsel %vm2107_vm7, %v19766_v23, %v4984_v24  ;;  %v3606_v40 = vsel %vm2107_vm7, %v3546_v56, %v18874_v7  ;;  %vm18943_vm0 = vcmp.eq.s32.totalorder %v14464_v35, 1  ;;  %v19771_v56 = vmax.f32 %v14345_v25, %v14079_v44  ;;  %19782 = vst [vmem:[#allocation206_spill] sm:$0xff] %v14557_v61 }
 0x310   : > { %v5068_v26 = vsel %vm19767_vm15, %v5053_v63, -inf  ;;  %v5222_v11 = vsel %vm2265_vm4, %v19768_v41, %v5153_v9  ;;  %v4941_v23 = vmax.f32 %v4772_v39, %v4899_v42  ;;  %v3911_v50 = vsel %vm18945_vm3, %v3606_v40, -inf }
 0x311   : > { %v5237_v45 = vsel %vm19769_vm2, %v5222_v11, -inf  ;;  %v4076_v63 = vsel %vm2265_vm4, %v4014_v47, %v4015_v62  ;;  %v3963_v55 = vmax.f32 %v19770_v49, %v3911_v50  ;;  %v14503_v7 = vmax.f32 %v19771_v56, %v14178_v30  ;;  %v14508_v11 = vld [vmem:[%s18348_s0 + $0x188] sm:$0xff] }
 0x312   : > { %v4379_v41 = vsel %vm18943_vm0, %v4076_v63, -inf  ;;  %v18878_v42 = vrot.slane %v14508_v11, 1  ;;  %v5110_v39 = vmax.f32 %v4941_v23, %v5068_v26  ;;  %v2258_v49 = vrot.slane %v14340_v36, 2 }
 0x313   : > { %v14511_v47 = vmax.f32 %v3962_v12, %v4379_v41  ;;  %v4647_v40 = vrot.slane %v14203_v37, 6  ;;  %v19772_v44 = vrot.slane %v14340_v36, 1  ;;  %v4816_v63 = vrot.slane %v14203_v37, 7 }
 0x314   : > { %v18883_v56 = vrot.slane %v14250_v59, 1  ;;  %v14524_v26 = vmax.f32 %v5110_v39, %v5237_v45  ;;  %v19774_v41 = vmax.f32 %v14323_v0, %v14345_v25  ;;  %v19776_v39 = vrot.slane %v14141_v48, 6  ;;  %v14548_v0 = vpop.permute.xlu1 %4217 }
 0x315   : > { %v2113_v50 = vsel %vm2107_vm7, %v19772_v44, %v18878_v42  ;;  %7937 = vmatmul.mubr.f32.gmra.mrb[66].mxu0 %v14511_v47  ;;  %v19775_v44 = vrot.slane %v14232_v6, 2  ;;  %v4883_v23 = vsel %vm1949_vm12, %v4815_v21, %v4816_v63  ;;  %19777 = vst [vmem:[#allocation154_spill] sm:$0xff] %v14548_v0 }
 0x316   : > { %19773 = vst [vmem:[#allocation46_spill] sm:$0xff] %v14524_v26  ;;  %v14534_v38 = vmax.f32 %v19774_v41, %v14511_v47  ;;  %vm2206_vm2 = vcmp.eq.s32.totalorder %v2113_v50, %v14340_v36  ;;  %v4714_v42 = vsel %vm1791_vm6, %v19776_v39, %v4647_v40  ;;  %8084 = vmatprep.mubr.f32.mxu1 %v14524_v26  ;;  %v19778_v50 = vld [vmem:[#allocation97_spill] sm:$0xff] }
 0x317   : > { %v2272_v45 = vsel %vm2265_vm4, %v19775_v44, %v2258_v49  ;;  %v3675_v41 = vsel %vm2206_vm2, 1, %v19157_v19  ;;  %vm19779_vm8 = vcmp.eq.s32.totalorder %v19778_v50, 1  ;;  %v19780_v44 = vld [vmem:[#allocation131_spill] sm:$0xff]  ;;  %v5052_v26 = vsel %vm2107_vm7, %v4984_v24, %v18883_v56 }
 0x318   : > { %vm2363_vm15 = vcmp.eq.s32.totalorder %v2272_v45, %v14232_v6  ;;  %v4731_v12 = vsel %vm19779_vm8, %v4714_v42, -inf  ;;  %vm19781_vm13 = vcmp.eq.s32.totalorder %v19780_v44, 1  ;;  %3820 = vperm.xlu1 %8563, %v3675_v41   ;;  %v19783_v6 = vrot.slane %v14250_v59, 2  ;;  %v19787_v56 = vld [vmem:[#allocation11_spill] sm:$0xff] }
 0x319   : > { %v4900_v48 = vsel %vm19781_vm13, %v4883_v23, -inf  ;;  %v4143_v39 = vsel %vm2363_vm15, 1, %v19157_v19  ;;  %v4773_v21 = vmax.f32 %v14203_v37, %v4731_v12  ;;  %vm19784_vm13 = vcmp.eq.s32.totalorder %v13826_v3, 1 }
 0x31a   : > { %v5221_v42 = vsel %vm2265_vm4, %v5153_v9, %v19783_v6  ;;  %4286 = vperm.xlu0 %8562, %v4143_v39   ;;  %v5069_v23 = vsel %vm19784_vm13, %v5052_v26, -inf  ;;  %vm19785_vm8 = vcmp.eq.s32.totalorder %v13943_v46, 1  ;;  %v4016_v41 = vrot.slane %v19765_v33, 2 }
 0x31b   : > { %v5238_v45 = vsel %vm19785_vm8, %v5221_v42, -inf  ;;  %vm18887_vm2 = vcmp.eq.s32.totalorder %v14548_v0, 1  ;;  %v4942_v37 = vmax.f32 %v4773_v21, %v4900_v48  ;;  %v19786_v24 = vmax.f32 %v14420_v16, %v14118_v43 }
 0x31c   : > { %v3548_v9 = vrot.slane %v19787_v56, 1  ;;  %vm18886_vm15 = vcmp.eq.s32.totalorder %v14557_v61, 1  ;;  %v4075_v26 = vsel %vm2265_vm4, %v4015_v62, %v4016_v41  ;;  %v1944_v39 = vrot.slane %v14508_v11, 7 }
 0x31d   : > { %v14579_v12 = vmax.f32 %v19786_v24, %v14225_v17  ;;  %v5111_v48 = vmax.f32 %v4942_v37, %v5069_v23  ;;  %v4380_v21 = vsel %vm18887_vm2, %v4075_v26, -inf  ;;  %v19788_v43 = vrot.slane %v19765_v33, 1 }
 0x31e   : > { %v4817_v46 = vrot.slane %v14250_v59, 7  ;;  %v14595_v3 = vmax.f32 %v3963_v55, %v4380_v21  ;;  %v19789_v6 = vrot.slane %v14340_v36, 7  ;;  %v19790_v37 = vrot.slane %v14508_v11, 2  ;;  %v19801_v55 = vld [vmem:[#allocation52_spill] sm:$0xff] }
 0x31f   : > { %v3605_v24 = vsel %vm2107_vm7, %v19788_v43, %v3548_v9  ;;  %v14607_v26 = vmax.f32 %v5111_v48, %v5238_v45  ;;  %v19792_v43 = vld [vmem:[#allocation153_spill] sm:$0xff]  ;;  %v14623_v45 = vpop.permute.xlu1 %3754  ;;  %v19795_v48 = vrot.slane %v14250_v59, 6  ;;  %v5155_v21 = vrot.slane %v14369_v20, 2 }
 0x320   : > { %v3912_v62 = vsel %vm18886_vm15, %v3605_v24, -inf  ;;  %v1954_v23 = vsel %vm1949_vm12, %v19789_v6, %v1944_v39  ;;  %v2271_v33 = vsel %vm2265_vm4, %v2258_v49, %v19790_v37  ;;  %v19793_v6 = vmax.f32 %v14406_v28, %v14420_v16  ;;  %19794 = vst [vmem:[#allocation153_spill] sm:$0xff] %v14623_v45  ;;  %7939 = vmatprep.mubr.f32.mxu0 %v14595_v3  ;;  %v14635_v37 = vpop.permute.xlu0 %4220 }
 0x321   : > { %19791 = vst [vmem:[#allocation11_spill] sm:$0xff] %v14607_v26  ;;  %v3964_v42 = vmax.f32 %v19792_v43, %v3912_v62  ;;  %vm2049_vm13 = vcmp.eq.s32.totalorder %v1954_v23, %v14508_v11  ;;  %vm2364_vm8 = vcmp.eq.s32.totalorder %v2271_v33, %v14340_v36  ;;  %8085 = vmatmul.mubr.f32.gmra.mrb[30].mxu1 %v14607_v26  ;;  %v4986_v23 = vrot.slane %v14369_v20, 1  ;;  %v19797_v33 = vld [vmem:[#allocation78_spill] sm:$0xff] }
 0x322   : > { %v14620_v24 = vmax.f32 %v19793_v6, %v14595_v3  ;;  %v3207_v49 = vsel %vm2049_vm13, 1, %v19157_v19  ;;  %v4144_v36 = vsel %vm2364_vm8, 1, %v19157_v19  ;;  %v4713_v62 = vsel %vm1791_vm6, %v4647_v40, %v19795_v48  ;;  %19796 = vst [vmem:[#allocation207_spill] sm:$0xff] %v14635_v37  ;;  %v19799_v6 = vld [vmem:[#allocation91_spill] sm:$0xff] }
 0x323   : > { %3354 = vperm.xlu1 %8563, %v3207_v49   ;;  %v4882_v28 = vsel %vm1949_vm12, %v4816_v63, %v4817_v46  ;;  %4289 = vperm.xlu0 %8562, %v4144_v36   ;;  %vm19798_vm13 = vcmp.eq.s32.totalorder %v19797_v33, 1  ;;  %vm19800_vm15 = vcmp.eq.s32.totalorder %v19799_v6, 1  ;;  %v18889_v44 = vrot.slane %v19801_v55, 1 }
 0x324   : > { %v4732_v43 = vsel %vm19798_vm13, %v4713_v62, -inf  ;;  %v4901_v49 = vsel %vm19800_vm15, %v4882_v28, -inf  ;;  %v19802_v48 = vrot.slane %v14250_v59, 1  ;;  %vm18891_vm8 = vcmp.eq.s32.totalorder %v14623_v45, 1 }
 0x325   : > { %v4774_v40 = vmax.f32 %v14250_v59, %v4732_v43  ;;  %v4017_v36 = vrot.slane %v19787_v56, 2  ;;  %vm19803_vm13 = vcmp.eq.s32.totalorder %v13817_v10, 1  ;;  %v19804_v28 = vrot.slane %v14250_v59, 2  ;;  %v19806_v10 = vld [vmem:[#allocation158_spill] sm:$0xff] }
 0x326   : > { %v5051_v63 = vsel %vm2107_vm7, %v19802_v48, %v4986_v23  ;;  %v3604_v43 = vsel %vm2107_vm7, %v3548_v9, %v18889_v44  ;;  %vm18892_vm15 = vcmp.eq.s32.totalorder %v14635_v37, 1  ;;  %vm19805_vm2 = vcmp.eq.s32.totalorder %v13934_v27, 1 }
 0x327   : > { %v5070_v62 = vsel %vm19803_vm13, %v5051_v63, -inf  ;;  %v5220_v6 = vsel %vm2265_vm4, %v19804_v28, %v5155_v21  ;;  %v4943_v48 = vmax.f32 %v4774_v40, %v4901_v49  ;;  %v3913_v56 = vsel %vm18891_vm8, %v3604_v43, -inf }
 0x328   : > { %v5239_v33 = vsel %vm19805_vm2, %v5220_v6, -inf  ;;  %v4074_v63 = vsel %vm2265_vm4, %v4016_v41, %v4017_v36  ;;  %v3965_v50 = vmax.f32 %v19806_v10, %v3913_v56  ;;  %v19807_v9 = vmax.f32 %v14511_v47, %v14178_v30  ;;  %v14679_v6 = vld [vmem:[%s18348_s0 + $0x190] sm:$0xff] }
 0x329   : > { %v4381_v28 = vsel %vm18892_vm15, %v4074_v63, -inf  ;;  %v1945_v49 = vrot.slane %v14679_v6, 7  ;;  %v5112_v40 = vmax.f32 %v4943_v48, %v5070_v62  ;;  %v18893_v10 = vrot.slane %v14679_v6, 1  ;;  %v19813_v62 = vld [vmem:[#allocation101_spill] sm:$0xff] }
 0x32a   : > { %v14674_v44 = vmax.f32 %v19807_v9, %v14345_v25  ;;  %v14682_v41 = vmax.f32 %v3964_v42, %v4381_v28  ;;  %v4649_v43 = vrot.slane %v14369_v20, 6  ;;  %v4818_v30 = vrot.slane %v14369_v20, 7 }
 0x32b   : > { %v1953_v56 = vsel %vm1949_vm12, %v1944_v39, %v1945_v49  ;;  %v18896_v63 = vrot.slane %v14449_v8, 1  ;;  %v14691_v27 = vmax.f32 %v5112_v40, %v5239_v33  ;;  %v19809_v48 = vmax.f32 %v14503_v7, %v14511_v47 }
 0x32c   : > { %7940 = vmatmul.mubr.f32.gmra.mrb[68].mxu0 %v14682_v41  ;;  %vm2050_vm2 = vcmp.eq.s32.totalorder %v1953_v56, %v14679_v6  ;;  %v19810_v39 = vrot.slane %v14508_v11, 1  ;;  %v19811_v40 = vrot.slane %v14250_v59, 6  ;;  %v4881_v7 = vsel %vm1949_vm12, %v4817_v46, %v4818_v30 }
 0x32d   : > { %19808 = vst [vmem:[#allocation52_spill] sm:$0xff] %v14691_v27  ;;  %v14701_v28 = vmax.f32 %v19809_v48, %v14682_v41  ;;  %v14717_v48 = vpop.permute.xlu1 %4223  ;;  %8087 = vmatprep.mubr.f32.mxu1 %v14691_v27  ;;  %v3208_v56 = vsel %vm2050_vm2, 1, %v19157_v19  ;;  %vm19814_vm8 = vcmp.eq.s32.totalorder %v19813_v62, 1  ;;  %v5050_v27 = vsel %vm2107_vm7, %v4986_v23, %v18896_v63  ;;  %v19822_v63 = vld [vmem:[#allocation121_spill] sm:$0xff] }
 0x32e   : > { %v2112_v33 = vsel %vm2107_vm7, %v19810_v39, %v18893_v10  ;;  %v4712_v42 = vsel %vm1791_vm6, %v19811_v40, %v4649_v43  ;;  %19812 = vst [vmem:[#allocation158_spill] sm:$0xff] %v14717_v48  ;;  %v19815_v39 = vld [vmem:[#allocation37_spill] sm:$0xff]  ;;  %v14726_v10 = vpop.permute.xlu0 %3757  ;;  %3357 = vperm.xlu1 %8563, %v3208_v56   ;;  %vm18900_vm2 = vcmp.eq.s32.totalorder %v14717_v48, 1  ;;  %v19821_v23 = vmax.f32 %v14595_v3, %v14225_v17 }
 0x32f   : > { %vm2207_vm13 = vcmp.eq.s32.totalorder %v2112_v33, %v14508_v11  ;;  %v4733_v9 = vsel %vm19814_vm8, %v4712_v42, -inf  ;;  %vm19816_vm15 = vcmp.eq.s32.totalorder %v19815_v39, 1  ;;  %19817 = vst [vmem:[#allocation208_spill] sm:$0xff] %v14726_v10  ;;  %v19818_v33 = vrot.slane %v14449_v8, 2 }
 0x330   : > { %v4902_v59 = vsel %vm19816_vm15, %v4881_v7, -inf  ;;  %v3676_v40 = vsel %vm2207_vm13, 1, %v19157_v19  ;;  %v4775_v46 = vmax.f32 %v14369_v20, %v4733_v9  ;;  %vm19819_vm8 = vcmp.eq.s32.totalorder %v13876_v14, 1 }
 0x331   : > { %v5219_v42 = vsel %vm2265_vm4, %v5155_v21, %v19818_v33  ;;  %3823 = vperm.xlu0 %8562, %v3676_v40   ;;  %v5071_v7 = vsel %vm19819_vm8, %v5050_v27, -inf  ;;  %vm19820_vm15 = vcmp.eq.s32.totalorder %v13997_v53, 1  ;;  %v4018_v39 = vrot.slane %v19801_v55, 2  ;;  %v14758_v33 = vld [vmem:[%s18348_s0 + $0x198] sm:$0xff] }
 0x332   : > { %v5240_v56 = vsel %vm19820_vm15, %v5219_v42, -inf  ;;  %v4944_v20 = vmax.f32 %v4775_v46, %v4902_v59  ;;  %v14748_v9 = vmax.f32 %v19821_v23, %v14420_v16  ;;  %v3550_v21 = vrot.slane %v19822_v63, 1 }
 0x333   : > { %vm18899_vm13 = vcmp.eq.s32.totalorder %v14726_v10, 1  ;;  %v4073_v27 = vsel %vm2265_vm4, %v4017_v36, %v4018_v39  ;;  %v19823_v23 = vrot.slane %v19801_v55, 1  ;;  %v4819_v40 = vrot.slane %v14449_v8, 7 }
 0x334   : > { %v5113_v46 = vmax.f32 %v4944_v20, %v5071_v7  ;;  %v4382_v42 = vsel %vm18900_vm2, %v4073_v27, -inf  ;;  %v19824_v59 = vrot.slane %v14679_v6, 2  ;;  %v19825_v17 = vrot.slane %v14508_v11, 2 }
 0x335   : > { %v3603_v36 = vsel %vm2107_vm7, %v19823_v23, %v3550_v21  ;;  %v14769_v53 = vmax.f32 %v3965_v50, %v4382_v42  ;;  %v19826_v20 = vrot.slane %v14758_v33, 7  ;;  %v19828_v23 = vld [vmem:[#allocation157_spill] sm:$0xff]  ;;  %v19837_v42 = vld [vmem:[#allocation15_spill] sm:$0xff]  ;;  %vm19841_vm2 = vcmp.eq.s32.totalorder %v14047_v18, 1 }
 0x336   : > { %v3914_v14 = vsel %vm18899_vm13, %v3603_v36, -inf  ;;  %v2270_v7 = vsel %vm2265_vm4, %v19825_v17, %v19824_v59  ;;  %v14783_v27 = vmax.f32 %v5113_v46, %v5240_v56  ;;  %v19829_v59 = vmax.f32 %v14579_v12, %v14595_v3  ;;  %v14799_v56 = vpop.permute.xlu1 %3760 }
 0x337   : > { %v1952_v55 = vsel %vm1949_vm12, %v1945_v49, %v19826_v20  ;;  %v3966_v50 = vmax.f32 %v19828_v23, %v3914_v14  ;;  %vm2365_vm8 = vcmp.eq.s32.totalorder %v2270_v7, %v14508_v11  ;;  %19830 = vst [vmem:[#allocation157_spill] sm:$0xff] %v14799_v56  ;;  %7942 = vmatprep.mubr.f32.mxu0 %v14769_v53  ;;  %v19831_v11 = vrot.slane %v14449_v8, 6  ;;  %v14811_v20 = vpop.permute.xlu0 %4226 }
 0x338   : > { %19827 = vst [vmem:[#allocation121_spill] sm:$0xff] %v14783_v27  ;;  %vm2051_vm15 = vcmp.eq.s32.totalorder %v1952_v55, %v14758_v33  ;;  %v14796_v17 = vmax.f32 %v19829_v59, %v14769_v53  ;;  %v4145_v49 = vsel %vm2365_vm8, 1, %v19157_v19  ;;  %8088 = vmatmul.mubr.f32.gmra.mrb[0].mxu1 %v14783_v27  ;;  %v4880_v12 = vsel %vm1949_vm12, %v4818_v30, %v4819_v40  ;;  %v19833_v55 = vld [vmem:[#allocation63_spill] sm:$0xff]  ;;  %v19835_v59 = vld [vmem:[#allocation18_spill] sm:$0xff] }
 0x339   : > { %4292 = vperm.xlu1 %8563, %v4145_v49   ;;  %v3209_v14 = vsel %vm2051_vm15, 1, %v19157_v19  ;;  %v4711_v46 = vsel %vm1791_vm6, %v4649_v43, %v19831_v11  ;;  %v4988_v7 = vrot.slane %v14534_v38, 1  ;;  %19832 = vst [vmem:[#allocation209_spill] sm:$0xff] %v14811_v20  ;;  %vm19834_vm8 = vcmp.eq.s32.totalorder %v19833_v55, 1 }
 0x33a   : > { %3360 = vperm.xlu0 %8562, %v3209_v14   ;;  %v4734_v23 = vsel %vm19834_vm8, %v4711_v46, -inf  ;;  %vm19836_vm13 = vcmp.eq.s32.totalorder %v19835_v59, 1  ;;  %v5157_v36 = vrot.slane %v14534_v38, 2  ;;  %v18904_v62 = vrot.slane %v19837_v42, 1 }
 0x33b   : > { %v4903_v49 = vsel %vm19836_vm13, %v4880_v12, -inf  ;;  %v4776_v43 = vmax.f32 %v14449_v8, %v4734_v23  ;;  %v19838_v11 = vrot.slane %v14449_v8, 1  ;;  %vm18906_vm15 = vcmp.eq.s32.totalorder %v14799_v56, 1 }
 0x33c   : > { %v4019_v14 = vrot.slane %v19822_v63, 2  ;;  %vm19839_vm8 = vcmp.eq.s32.totalorder %v13990_v29, 1  ;;  %v19840_v12 = vrot.slane %v14449_v8, 2  ;;  %v3602_v23 = vsel %vm2107_vm7, %v3550_v21, %v18904_v62  ;;  %v19842_v29 = vld [vmem:[#allocation162_spill] sm:$0xff] }
 0x33d   : > { %v5049_v30 = vsel %vm2107_vm7, %v19838_v11, %v4988_v7  ;;  %vm18907_vm13 = vcmp.eq.s32.totalorder %v14811_v20, 1  ;;  %v4945_v11 = vmax.f32 %v4776_v43, %v4903_v49  ;;  %v3915_v63 = vsel %vm18906_vm15, %v3602_v23, -inf }
 0x33e   : > { %v5072_v46 = vsel %vm19839_vm8, %v5049_v30, -inf  ;;  %v5218_v59 = vsel %vm2265_vm4, %v19840_v12, %v5157_v36  ;;  %v4072_v30 = vsel %vm2265_vm4, %v4018_v39, %v4019_v14  ;;  %v3967_v27 = vmax.f32 %v19842_v29, %v3915_v63  ;;  %v14858_v39 = vld [vmem:[%s18348_s0 + $0x1a0] sm:$0xff] }
 0x33f   : > { %v5241_v55 = vsel %vm19841_vm2, %v5218_v59, -inf  ;;  %v4383_v12 = vsel %vm18907_vm13, %v4072_v30, -inf  ;;  %v19843_v21 = vmax.f32 %v14682_v41, %v14345_v25  ;;  %v2103_v49 = vrot.slane %v14758_v33, 1 }
 0x340   : > { %v5114_v59 = vmax.f32 %v4945_v11, %v5072_v46  ;;  %v14853_v43 = vmax.f32 %v3966_v50, %v4383_v12  ;;  %v4651_v23 = vrot.slane %v14534_v38, 6  ;;  %v19844_v63 = vrot.slane %v14679_v6, 1  ;;  %v19850_v50 = vld [vmem:[#allocation105_spill] sm:$0xff] }
 0x341   : > { %v14850_v62 = vmax.f32 %v19843_v21, %v14511_v47  ;;  %v4820_v30 = vrot.slane %v14534_v38, 7  ;;  %v18910_v46 = vrot.slane %v14620_v24, 1  ;;  %v19846_v29 = vmax.f32 %v14674_v44, %v14682_v41  ;;  %v14893_v44 = vpop.permute.xlu1 %4229 }
 0x342   : > { %v2111_v25 = vsel %vm2107_vm7, %v19844_v63, %v2103_v49  ;;  %v14869_v11 = vmax.f32 %v5114_v59, %v5241_v55  ;;  %7943 = vmatmul.mubr.f32.gmra.mrb[70].mxu0 %v14853_v43  ;;  %v19847_v63 = vrot.slane %v14858_v39, 1  ;;  %v19848_v59 = vrot.slane %v14449_v8, 6  ;;  %19849 = vst [vmem:[#allocation162_spill] sm:$0xff] %v14893_v44 }
 0x343   : > { %v14879_v18 = vmax.f32 %v19846_v29, %v14853_v43  ;;  %vm2208_vm2 = vcmp.eq.s32.totalorder %v2111_v25, %v14679_v6  ;;  %v4879_v12 = vsel %vm1949_vm12, %v4819_v40, %v4820_v30  ;;  %vm19851_vm15 = vcmp.eq.s32.totalorder %v19850_v50, 1  ;;  %v19852_v25 = vld [vmem:[#allocation38_spill] sm:$0xff] }
 0x344   : > { %19845 = vst [vmem:[#allocation15_spill] sm:$0xff] %v14869_v11  ;;  %v2110_v55 = vsel %vm2107_vm7, %v2103_v49, %v19847_v63  ;;  %v4710_v21 = vsel %vm1791_vm6, %v19848_v59, %v4651_v23  ;;  %8090 = vmatprep.mubr.f32.mxu1 %v14869_v11  ;;  %v3677_v29 = vsel %vm2208_vm2, 1, %v19157_v19  ;;  %vm19853_vm13 = vcmp.eq.s32.totalorder %v19852_v25, 1  ;;  %v14902_v63 = vpop.permute.xlu0 %3763 }
 0x345   : > { %vm2209_vm8 = vcmp.eq.s32.totalorder %v2110_v55, %v14758_v33  ;;  %v4735_v49 = vsel %vm19851_vm15, %v4710_v21, -inf  ;;  %v4904_v8 = vsel %vm19853_vm13, %v4879_v12, -inf  ;;  %19854 = vst [vmem:[#allocation210_spill] sm:$0xff] %v14902_v63  ;;  %3826 = vperm.xlu0 %8562, %v3677_v29   ;;  %v5048_v55 = vsel %vm2107_vm7, %v4988_v7, %v18910_v46  ;;  %v19859_v46 = vld [vmem:[#allocation56_spill] sm:$0xff] }
 0x346   : > { %v3678_v59 = vsel %vm2209_vm8, 1, %v19157_v19  ;;  %v4777_v40 = vmax.f32 %v14534_v38, %v4735_v49  ;;  %v19855_v11 = vrot.slane %v14620_v24, 2  ;;  %vm19856_vm15 = vcmp.eq.s32.totalorder %v14056_v32, 1 }
 0x347   : > { %3829 = vperm.xlu1 %8563, %v3678_v59   ;;  %v5073_v12 = vsel %vm19856_vm15, %v5048_v55, -inf  ;;  %vm19857_vm13 = vcmp.eq.s32.totalorder %v14115_v4, 1  ;;  %v4020_v29 = vrot.slane %v19837_v42, 2  ;;  %vm19003_vm2 = vcmp.eq.s32.totalorder %v14893_v44, 1 }
 0x348   : > { %v5217_v21 = vsel %vm2265_vm4, %v5157_v36, %v19855_v11  ;;  %v4946_v38 = vmax.f32 %v4777_v40, %v4904_v8  ;;  %v19858_v7 = vmax.f32 %v14769_v53, %v14420_v16  ;;  %v3552_v36 = vrot.slane %v19859_v46, 1 }
 0x349   : > { %v5242_v25 = vsel %vm19857_vm13, %v5217_v21, -inf  ;;  %vm18914_vm8 = vcmp.eq.s32.totalorder %v14902_v63, 1  ;;  %v4071_v11 = vsel %vm2265_vm4, %v4019_v14, %v4020_v29  ;;  %v18913_v59 = vrot.slane %v14858_v39, 7 }
 0x34a   : > { %v14924_v49 = vmax.f32 %v19858_v7, %v14595_v3  ;;  %v18915_v55 = vrot.slane %v14758_v33, 2  ;;  %v5115_v8 = vmax.f32 %v4946_v38, %v5073_v12  ;;  %v4384_v40 = vsel %vm19003_vm2, %v4071_v11, -inf }
 0x34b   : > { %v19860_v16 = vrot.slane %v19837_v42, 1  ;;  %v4821_v4 = vrot.slane %v14620_v24, 7  ;;  %v14940_v32 = vmax.f32 %v3967_v27, %v4384_v40  ;;  %v19861_v21 = vrot.slane %v14758_v33, 7  ;;  %v19864_v27 = vld [vmem:[#allocation161_spill] sm:$0xff] }
 0x34c   : > { %v19862_v42 = vrot.slane %v14679_v6, 2  ;;  %v14956_v11 = vmax.f32 %v5115_v8, %v5242_v25  ;;  %v14972_v8 = vpop.permute.xlu1 %3766  ;;  %v4823_v60 = vrot.slane %v14796_v17, 7 }
 0x34d   : > { %v3601_v7 = vsel %vm2107_vm7, %v19860_v16, %v3552_v36  ;;  %v1951_v12 = vsel %vm1949_vm12, %v19861_v21, %v18913_v59  ;;  %19866 = vst [vmem:[#allocation161_spill] sm:$0xff] %v14972_v8  ;;  %7945 = vmatprep.mubr.f32.mxu0 %v14940_v32  ;;  %v19871_v21 = vld [vmem:[#allocation138_spill] sm:$0xff]  ;;  %v5159_v16 = vrot.slane %v14701_v28, 2 }
 0x34e   : > { %v3916_v14 = vsel %vm18914_vm8, %v3601_v7, -inf  ;;  %v2269_v38 = vsel %vm2265_vm4, %v19862_v42, %v18915_v55  ;;  %19863 = vst [vmem:[#allocation56_spill] sm:$0xff] %v14956_v11  ;;  %vm2052_vm15 = vcmp.eq.s32.totalorder %v1951_v12, %v14858_v39  ;;  %v19865_v7 = vmax.f32 %v14748_v9, %v14769_v53  ;;  %8091 = vmatmul.mubr.f32.gmra.mrb[2].mxu1 %v14956_v11  ;;  %v19873_v55 = vld [vmem:[#allocation122_spill] sm:$0xff] }
 0x34f   : > { %v3968_v40 = vmax.f32 %v19864_v27, %v3916_v14  ;;  %vm2366_vm13 = vcmp.eq.s32.totalorder %v2269_v38, %v14679_v6  ;;  %v3210_v25 = vsel %vm2052_vm15, 1, %v19157_v19  ;;  %v19867_v14 = vrot.slane %v14620_v24, 6  ;;  %v14984_v38 = vpop.permute.xlu0 %4232  ;;  %v19869_v27 = vld [vmem:[#allocation115_spill] sm:$0xff] }
 0x350   : > { %v14969_v59 = vmax.f32 %v19865_v7, %v14940_v32  ;;  %3363 = vperm.xlu1 %8563, %v3210_v25   ;;  %v4146_v6 = vsel %vm2366_vm13, 1, %v19157_v19  ;;  %v4878_v9 = vsel %vm1949_vm12, %v4820_v30, %v4821_v4  ;;  %v4990_v42 = vrot.slane %v14701_v28, 1  ;;  %19868 = vst [vmem:[#allocation211_spill] sm:$0xff] %v14984_v38 }
 0x351   : > { %v4709_v12 = vsel %vm1791_vm6, %v4651_v23, %v19867_v14  ;;  %4295 = vperm.xlu0 %8562, %v4146_v6   ;;  %vm19870_vm15 = vcmp.eq.s32.totalorder %v19869_v27, 1  ;;  %vm19872_vm8 = vcmp.eq.s32.totalorder %v19871_v21, 1  ;;  %v18919_v50 = vrot.slane %v19873_v55, 1 }
 0x352   : > { %v4736_v7 = vsel %vm19870_vm15, %v4709_v12, -inf  ;;  %v4905_v25 = vsel %vm19872_vm8, %v4878_v9, -inf  ;;  %v19874_v14 = vrot.slane %v14620_v24, 1  ;;  %vm18925_vm13 = vcmp.eq.s32.totalorder %v14972_v8, 1  ;;  %v19963_v8 = vld [vmem:[#allocation27_spill] sm:$0xff] }
 0x353   : > { %v4778_v23 = vmax.f32 %v14620_v24, %v4736_v7  ;;  %v4021_v6 = vrot.slane %v19859_v46, 2  ;;  %vm19875_vm15 = vcmp.eq.s32.totalorder %v14107_v5, 1  ;;  %v19876_v9 = vrot.slane %v14620_v24, 2  ;;  %v19877_v5 = vld [vmem:[#allocation166_spill] sm:$0xff]  ;;  %v15077_v51 = vpop.permute.xlu0 %3769 }
 0x354   : > { %v5047_v30 = vsel %vm2107_vm7, %v19874_v14, %v4990_v42  ;;  %v3600_v7 = vsel %vm2107_vm7, %v3552_v36, %v18919_v50  ;;  %vm18926_vm8 = vcmp.eq.s32.totalorder %v14984_v38, 1  ;;  %v19878_v36 = vmax.f32 %v14853_v43, %v14511_v47  ;;  %19889 = vst [vmem:[#allocation212_spill] sm:$0xff] %v15077_v51 }
 0x355   : > { %v5074_v12 = vsel %vm19875_vm15, %v5047_v30, -inf  ;;  %v5216_v21 = vsel %vm2265_vm4, %v19876_v9, %v5159_v16  ;;  %v4947_v14 = vmax.f32 %v4778_v23, %v4905_v25  ;;  %v3917_v46 = vsel %vm18925_vm13, %v3600_v7, -inf }
 0x356   : > { %v5243_v27 = vsel %vm18924_vm11, %v5216_v21, -inf  ;;  %v4070_v30 = vsel %vm2265_vm4, %v4020_v29, %v4021_v6  ;;  %v3969_v11 = vmax.f32 %v19877_v5, %v3917_v46  ;;  %v15023_v50 = vmax.f32 %v19878_v36, %v14682_v41  ;;  %v15028_v21 = vld [vmem:[%s18348_s0 + $0x1a8] sm:$0xff] }
 0x357   : > { %v4385_v9 = vsel %vm18926_vm8, %v4070_v30, -inf  ;;  %v18923_v25 = vrot.slane %v15028_v21, 1  ;;  %v5116_v23 = vmax.f32 %v4947_v14, %v5074_v12  ;;  %v2262_v5 = vrot.slane %v14858_v39, 2 }
 0x358   : > { %v15031_v29 = vmax.f32 %v3968_v40, %v4385_v9  ;;  %v4653_v7 = vrot.slane %v14701_v28, 6  ;;  %v19879_v47 = vrot.slane %v14858_v39, 1  ;;  %v4822_v30 = vrot.slane %v14701_v28, 7 }
 0x359   : > { %v18929_v36 = vrot.slane %v14796_v17, 1  ;;  %v15044_v12 = vmax.f32 %v5116_v23, %v5243_v27  ;;  %v19881_v9 = vmax.f32 %v14850_v62, %v14853_v43  ;;  %v19883_v23 = vrot.slane %v14620_v24, 6  ;;  %v15068_v62 = vpop.permute.xlu1 %4235 }
 0x35a   : > { %v2109_v46 = vsel %vm2107_vm7, %v19879_v47, %v18923_v25  ;;  %7946 = vmatmul.mubr.f32.gmra.mrb[72].mxu0 %v15031_v29  ;;  %v19882_v47 = vrot.slane %v14758_v33, 2  ;;  %v4877_v14 = vsel %vm1949_vm12, %v4821_v4, %v4822_v30  ;;  %19884 = vst [vmem:[#allocation166_spill] sm:$0xff] %v15068_v62 }
 0x35b   : > { %19880 = vst [vmem:[#allocation122_spill] sm:$0xff] %v15044_v12  ;;  %v15054_v26 = vmax.f32 %v19881_v9, %v15031_v29  ;;  %vm2210_vm15 = vcmp.eq.s32.totalorder %v2109_v46, %v14858_v39  ;;  %v4708_v25 = vsel %vm1791_vm6, %v19883_v23, %v4653_v7  ;;  %8093 = vmatprep.mubr.f32.mxu1 %v15044_v12  ;;  %v19885_v46 = vld [vmem:[#allocation22_spill] sm:$0xff] }
 0x35c   : > { %v2268_v27 = vsel %vm2265_vm4, %v19882_v47, %v2262_v5  ;;  %v3679_v9 = vsel %vm2210_vm15, 1, %v19157_v19  ;;  %vm19886_vm13 = vcmp.eq.s32.totalorder %v19885_v46, 1  ;;  %v19887_v47 = vld [vmem:[#allocation102_spill] sm:$0xff]  ;;  %v5046_v12 = vsel %vm2107_vm7, %v4990_v42, %v18929_v36  ;;  %v19892_v36 = vld [vmem:[#allocation59_spill] sm:$0xff] }
 0x35d   : > { %vm2367_vm11 = vcmp.eq.s32.totalorder %v2268_v27, %v14758_v33  ;;  %v4737_v40 = vsel %vm19886_vm13, %v4708_v25, -inf  ;;  %vm19888_vm8 = vcmp.eq.s32.totalorder %v19887_v47, 1  ;;  %3832 = vperm.xlu1 %8563, %v3679_v9   ;;  %v19890_v33 = vrot.slane %v14796_v17, 2 }
 0x35e   : > { %v4906_v24 = vsel %vm19888_vm8, %v4877_v14, -inf  ;;  %v4147_v23 = vsel %vm2367_vm11, 1, %v19157_v19  ;;  %v4779_v4 = vmax.f32 %v14701_v28, %v4737_v40  ;;  %v5075_v14 = vsel %vm18940_vm10, %v5046_v12, -inf }
 0x35f   : > { %v5215_v25 = vsel %vm2265_vm4, %v5159_v16, %v19890_v33  ;;  %4298 = vperm.xlu0 %8562, %v4147_v23   ;;  %v4022_v9 = vrot.slane %v19873_v55, 2  ;;  %vm19002_vm11 = vcmp.eq.s32.totalorder %v15068_v62, 1  ;;  %v19891_v42 = vmax.f32 %v14940_v32, %v14595_v3 }
 0x360   : > { %v5244_v27 = vsel %vm18932_vm9, %v5215_v25, -inf  ;;  %v4948_v28 = vmax.f32 %v4779_v4, %v4906_v24  ;;  %v3554_v16 = vrot.slane %v19892_v36, 1  ;;  %vm19025_vm13 = vcmp.eq.s32.totalorder %v15077_v51, 1 }
 0x361   : > { %v15099_v40 = vmax.f32 %v19891_v42, %v14769_v53  ;;  %v4069_v12 = vsel %vm2265_vm4, %v4021_v6, %v4022_v9  ;;  %v2263_v23 = vrot.slane %v15028_v21, 2  ;;  %v1948_v33 = vrot.slane %v15028_v21, 7 }
 0x362   : > { %v5117_v24 = vmax.f32 %v4948_v28, %v5075_v14  ;;  %v4386_v4 = vsel %vm19002_vm11, %v4069_v12, -inf  ;;  %v19893_v3 = vrot.slane %v19873_v55, 1  ;;  %v19894_v14 = vrot.slane %v14858_v39, 7  ;;  %v19896_v55 = vld [vmem:[#allocation165_spill] sm:$0xff] }
 0x363   : > { %v15115_v13 = vmax.f32 %v3969_v11, %v4386_v4  ;;  %v2267_v47 = vsel %vm2265_vm4, %v2262_v5, %v2263_v23  ;;  %v19897_v5 = vmax.f32 %v14924_v49, %v14940_v32  ;;  %v4876_v49 = vsel %vm1949_vm12, %v4822_v30, %v4823_v60  ;;  %v19905_v4 = vld [vmem:[#allocation58_spill] sm:$0xff] }
 0x364   : > { %v3599_v42 = vsel %vm2107_vm7, %v19893_v3, %v3554_v16  ;;  %v1950_v28 = vsel %vm1949_vm12, %v19894_v14, %v1948_v33  ;;  %v15125_v12 = vmax.f32 %v5117_v24, %v5244_v27  ;;  %vm2368_vm8 = vcmp.eq.s32.totalorder %v2267_v47, %v14858_v39  ;;  %v15141_v33 = vpop.permute.xlu1 %3772  ;;  %v19901_v14 = vld [vmem:[#allocation34_spill] sm:$0xff] }
 0x365   : > { %v3918_v6 = vsel %vm19025_vm13, %v3599_v42, -inf  ;;  %vm2053_vm15 = vcmp.eq.s32.totalorder %v1950_v28, %v15028_v21  ;;  %v15138_v3 = vmax.f32 %v19897_v5, %v15115_v13  ;;  %v4148_v27 = vsel %vm2368_vm8, 1, %v19157_v19  ;;  %19898 = vst [vmem:[#allocation165_spill] sm:$0xff] %v15141_v33  ;;  %7948 = vmatprep.mubr.f32.mxu0 %v15115_v13 }
 0x366   : > { %19895 = vst [vmem:[#allocation59_spill] sm:$0xff] %v15125_v12  ;;  %v3970_v25 = vmax.f32 %v19896_v55, %v3918_v6  ;;  %8094 = vmatmul.mubr.f32.gmra.mrb[4].mxu1 %v15125_v12  ;;  %4301 = vperm.xlu1 %8563, %v4148_v27   ;;  %v3211_v39 = vsel %vm2053_vm15, 1, %v19157_v19  ;;  %v19899_v47 = vrot.slane %v14796_v17, 6  ;;  %v4992_v42 = vrot.slane %v14879_v18, 1  ;;  %v15153_v6 = vpop.permute.xlu0 %4238  ;;  %v19903_v55 = vld [vmem:[#allocation141_spill] sm:$0xff] }
 0x367   : > { %19900 = vst [vmem:[#allocation213_spill] sm:$0xff] %v15153_v6  ;;  %3366 = vperm.xlu0 %8562, %v3211_v39   ;;  %vm19902_vm8 = vcmp.eq.s32.totalorder %v19901_v14, 1  ;;  %vm19904_vm9 = vcmp.eq.s32.totalorder %v19903_v55, 1  ;;  %v5161_v27 = vrot.slane %v14879_v18, 2  ;;  %v18934_v11 = vrot.slane %v19905_v4, 1 }
 0x368   : > { %v4707_v24 = vsel %vm1791_vm6, %v4653_v7, %v19899_v47  ;;  %v4907_v5 = vsel %vm19904_vm9, %v4876_v49, -inf  ;;  %v19906_v47 = vrot.slane %v14796_v17, 1  ;;  %vm19031_vm15 = vcmp.eq.s32.totalorder %v15141_v33, 1  ;;  %v19957_v33 = vld [vmem:[#allocation173_spill] sm:$0xff] }
 0x369   : > { %v4738_v28 = vsel %vm19902_vm8, %v4707_v24, -inf  ;;  %v4023_v39 = vrot.slane %v19892_v36, 2  ;;  %v19907_v49 = vrot.slane %v14796_v17, 2  ;;  %vm19023_vm9 = vcmp.eq.s32.totalorder %v15153_v6, 1  ;;  %v19960_v6 = vld [vmem:[#allocation149_spill] sm:$0xff] }
 0x36a   : > { %v4780_v7 = vmax.f32 %v14796_v17, %v4738_v28  ;;  %v5045_v30 = vsel %vm2107_vm7, %v19906_v47, %v4992_v42  ;;  %v3598_v28 = vsel %vm2107_vm7, %v3554_v16, %v18934_v11  ;;  %v19909_v16 = vmax.f32 %v15031_v29, %v14682_v41 }
 0x36b   : > { %v5076_v24 = vsel %vm18939_vm14, %v5045_v30, -inf  ;;  %v5214_v55 = vsel %vm2265_vm4, %v19907_v49, %v5161_v27  ;;  %v3919_v36 = vsel %vm19031_vm15, %v3598_v28, -inf  ;;  %v4068_v30 = vsel %vm2265_vm4, %v4022_v9, %v4023_v39 }
 0x36c   : > { %v4949_v47 = vmax.f32 %v4780_v7, %v4907_v5  ;;  %v5245_v14 = vsel %vm18938_vm1, %v5214_v55, -inf  ;;  %v3971_v46 = vmax.f32 %v19908_v57, %v3919_v36  ;;  %v4387_v49 = vsel %vm19023_vm9, %v4068_v30, -inf  ;;  %v9003_v55 = vld [vmem:[%s18348_s0 + $0x1b0] sm:$0xff] }
 0x36d   : > { %v15192_v11 = vmax.f32 %v19909_v16, %v14853_v43  ;;  %v2264_v5 = vrot.slane %v9003_v55, 2  ;;  %v15197_v28 = vmax.f32 %v3970_v25, %v4387_v49  ;;  %v2106_v9 = vrot.slane %v9003_v55, 1 }
 0x36e   : > { %v5118_v7 = vmax.f32 %v4949_v47, %v5076_v24  ;;  %v4655_v57 = vrot.slane %v14879_v18, 6  ;;  %v4824_v30 = vrot.slane %v14879_v18, 7  ;;  %v4993_v41 = vrot.slane %v14969_v59, 1 }
 0x36f   : > { %v2266_v36 = vsel %vm2265_vm4, %v2263_v23, %v2264_v5  ;;  %v5162_v16 = vrot.slane %v14969_v59, 2  ;;  %v19911_v24 = vmax.f32 %v15023_v50, %v15031_v29  ;;  %7949 = vmatmul.mubr.f32.gmra.mrb[74].mxu0 %v15197_v28  ;;  %v19912_v23 = vrot.slane %v15028_v21, 1  ;;  %v15229_v50 = vpop.permute.xlu1 %4241 }
 0x370   : > { %v15205_v31 = vmax.f32 %v5118_v7, %v5245_v14  ;;  %vm2369_vm8 = vcmp.eq.s32.totalorder %v2266_v36, %v15028_v21  ;;  %v19913_v49 = vrot.slane %v14796_v17, 6  ;;  %v4875_v5 = vsel %vm1949_vm12, %v4823_v60, %v4824_v30  ;;  %19914 = vst [vmem:[#allocation170_spill] sm:$0xff] %v15229_v50  ;;  %v19915_v36 = vld [vmem:[#allocation24_spill] sm:$0xff] }
 0x371   : > { %v15215_v47 = vmax.f32 %v19911_v24, %v15197_v28  ;;  %v2108_v14 = vsel %vm2107_vm7, %v19912_v23, %v2106_v9  ;;  %v4149_v7 = vsel %vm2369_vm8, 1, %v19157_v19  ;;  %vm19916_vm14 = vcmp.eq.s32.totalorder %v19915_v36, 1  ;;  %v19917_v9 = vld [vmem:[#allocation140_spill] sm:$0xff]  ;;  %v15238_v23 = vpop.permute.xlu0 %3775 }
 0x372   : > { %19910 = vst [vmem:[#allocation58_spill] sm:$0xff] %v15205_v31  ;;  %v4706_v55 = vsel %vm1791_vm6, %v19913_v49, %v4655_v57  ;;  %8096 = vmatprep.mubr.f32.mxu1 %v15205_v31  ;;  %vm2211_vm1 = vcmp.eq.s32.totalorder %v2108_v14, %v15028_v21  ;;  %vm19918_vm10 = vcmp.eq.s32.totalorder %v19917_v9, 1  ;;  %19919 = vst [vmem:[#allocation214_spill] sm:$0xff] %v15238_v23  ;;  %4304 = vperm.xlu1 %8563, %v4149_v7   ;;  %v19942_v31 = vld [vmem:[#allocation143_spill] sm:$0xff] }
 0x373   : > { %v4739_v24 = vsel %vm19916_vm14, %v4706_v55, -inf  ;;  %v4908_v17 = vsel %vm19918_vm10, %v4875_v5, -inf  ;;  %v3680_v49 = vsel %vm2211_vm1, 1, %v19157_v19  ;;  %v5044_v25 = vsel %vm2107_vm7, %v4992_v42, %v4993_v41  ;;  %v19921_v5 = vld [vmem:[#allocation33_spill] sm:$0xff] }
 0x374   : > { %v4781_v60 = vmax.f32 %v14879_v18, %v4739_v24  ;;  %v5213_v12 = vsel %vm2265_vm4, %v5161_v27, %v5162_v16  ;;  %3835 = vperm.xlu0 %8562, %v3680_v49   ;;  %v5077_v21 = vsel %vm18944_vm5, %v5044_v25, -inf  ;;  %v4024_v55 = vrot.slane %v19905_v4, 2 }
 0x375   : > { %v5246_v14 = vsel %vm18943_vm0, %v5213_v12, -inf  ;;  %vm18967_vm10 = vcmp.eq.s32.totalorder %v15229_v50, 1  ;;  %v19920_v18 = vmax.f32 %v15115_v13, %v14769_v53  ;;  %v3556_v27 = vrot.slane %v19921_v5, 1  ;;  %v19954_v50 = vld [vmem:[#allocation87_spill] sm:$0xff] }
 0x376   : > { %v4950_v19 = vmax.f32 %v4781_v60, %v4908_v17  ;;  %vm18964_vm1 = vcmp.eq.s32.totalorder %v15238_v23, 1  ;;  %v4067_v25 = vsel %vm2265_vm4, %v4023_v39, %v4024_v55  ;;  %v4656_v12 = vrot.slane %v14969_v59, 6 }
 0x377   : > { %v15256_v42 = vmax.f32 %v19920_v18, %v14940_v32  ;;  %v4825_v7 = vrot.slane %v14969_v59, 7  ;;  %v4994_v24 = vrot.slane %v15054_v26, 1  ;;  %v4388_v49 = vsel %vm18967_vm10, %v4067_v25, -inf }
 0x378   : > { %v5119_v17 = vmax.f32 %v4950_v19, %v5077_v21  ;;  %v19922_v53 = vrot.slane %v19905_v4, 1  ;;  %v5163_v18 = vrot.slane %v15054_v26, 2  ;;  %v15272_v35 = vmax.f32 %v3971_v46, %v4388_v49  ;;  %v15280_v19 = vpop.permute.xlu1 %3778  ;;  %v19925_v4 = vld [vmem:[#allocation169_spill] sm:$0xff] }
 0x379   : > { %v4705_v15 = vsel %vm1791_vm6, %v4655_v57, %v4656_v12  ;;  %v4874_v21 = vsel %vm1949_vm12, %v4824_v30, %v4825_v7  ;;  %19923 = vst [vmem:[#allocation33_spill] sm:$0xff] %v15280_v19  ;;  %v19928_v46 = vld [vmem:[#allocation145_spill] sm:$0xff]  ;;  %v19930_v30 = vmax.f32 %v15099_v40, %v15115_v13  ;;  %v4826_v54 = vrot.slane %v15054_v26, 7 }
 0x37a   : > { %v3597_v60 = vsel %vm2107_vm7, %v19922_v53, %v3556_v27  ;;  %v15282_v25 = vmax.f32 %v5119_v17, %v5246_v14  ;;  %v19926_v53 = vld [vmem:[#allocation119_spill] sm:$0xff]  ;;  %vm19929_vm8 = vcmp.eq.s32.totalorder %v19928_v46, 1  ;;  %7951 = vmatprep.mubr.f32.mxu0 %v15272_v35  ;;  %vm3370_vm10 = vcmp.eq.s32.totalorder %v19954_v50, 1 }
 0x37b   : > { %v3920_v39 = vsel %vm18964_vm1, %v3597_v60, -inf  ;;  %vm19927_vm14 = vcmp.eq.s32.totalorder %v19926_v53, 1  ;;  %v4909_v49 = vsel %vm19929_vm8, %v4874_v21, -inf  ;;  %v15297_v14 = vmax.f32 %v19930_v30, %v15272_v35  ;;  %v19934_v60 = vld [vmem:[#allocation79_spill] sm:$0xff] }
 0x37c   : > { %19924 = vst [vmem:[#allocation215_spill] sm:$0xff] %v15282_v25  ;;  %v3972_v9 = vmax.f32 %v19925_v4, %v3920_v39  ;;  %v4740_v36 = vsel %vm19927_vm14, %v4705_v15, -inf  ;;  %v15300_v39 = vpop.permute.xlu0 %4244  ;;  %8097 = vmatmul.mubr.f32.gmra.mrb[6].mxu1 %v15282_v25  ;;  %v5043_v15 = vsel %vm2107_vm7, %v4993_v41, %v4994_v24  ;;  %v5212_v21 = vsel %vm2265_vm4, %v5162_v16, %v5163_v18  ;;  %v19932_v4 = vld [vmem:[#allocation110_spill] sm:$0xff]  ;;  %v19940_v25 = vld [vmem:[#allocation109_spill] sm:$0xff] }
 0x37d   : > { %v4782_v17 = vmax.f32 %v14969_v59, %v4740_v36  ;;  %19931 = vst [vmem:[#allocation169_spill] sm:$0xff] %v15300_v39  ;;  %v3557_v57 = vrot.slane %v19932_v4, 1  ;;  %vm18952_vm14 = vcmp.eq.s32.totalorder %v15280_v19, 1  ;;  %v5078_v59 = vsel %vm18945_vm3, %v5043_v15, -inf  ;;  %v19936_v15 = vld [vmem:[#allocation66_spill] sm:$0xff] }
 0x37e   : > { %vm19933_vm8 = vcmp.eq.s32.totalorder %v14548_v0, 1  ;;  %vm2899_vm0 = vcmp.eq.s32.totalorder %v19934_v60, 1  ;;  %vm18955_vm5 = vcmp.eq.s32.totalorder %v15300_v39, 1  ;;  %v19935_v16 = vmax.f32 %v15197_v28, %v14853_v43  ;;  %v19938_v43 = vld [vmem:[#allocation174_spill] sm:$0xff] }
 0x37f   : > { %v4951_v40 = vmax.f32 %v4782_v17, %v4909_v49  ;;  %v5247_v36 = vsel %vm19933_vm8, %v5212_v21, -inf  ;;  %v3596_v41 = vsel %vm2107_vm7, %v3556_v27, %v3557_v57  ;;  %v4657_v17 = vrot.slane %v15054_v26, 6 }
 0x380   : > { %v15323_v49 = vmax.f32 %v19935_v16, %v15031_v29  ;;  %vm3368_vm3 = vcmp.eq.s32.totalorder %v19936_v15, 1  ;;  %v15329_v30 = vsel %vm18952_vm14, %v3596_v41, -inf  ;;  %v19937_v0 = vrot.slane %v19921_v5, 2 }
 0x381   : > { %v5120_v21 = vmax.f32 %v4951_v40, %v5078_v59  ;;  %v4704_v40 = vsel %vm1791_vm6, %v4656_v12, %v4657_v17  ;;  %v4995_v59 = vrot.slane %v15138_v3, 1  ;;  %vm19941_vm8 = vcmp.eq.s32.totalorder %v19940_v25, 1  ;;  %v19949_v25 = vld [vmem:[#allocation82_spill] sm:$0xff] }
 0x382   : > { %v4066_v27 = vsel %vm2265_vm4, %v4024_v55, %v19937_v0  ;;  %v4741_v0 = vsel %vm19941_vm8, %v4704_v40, -inf  ;;  %v4873_v55 = vsel %vm1949_vm12, %v4825_v7, %v4826_v54  ;;  %vm19943_vm14 = vcmp.eq.s32.totalorder %v19942_v31, 1  ;;  %v15375_v31 = vpop.permute.xlu0 %3781 }
 0x383   : > { %v4389_v46 = vsel %vm18955_vm5, %v4066_v27, -inf  ;;  %v15343_v41 = vmax.f32 %v5120_v21, %v5247_v36  ;;  %v4783_v16 = vmax.f32 %v15054_v26, %v4741_v0  ;;  %v4910_v27 = vsel %vm19943_vm14, %v4873_v55, -inf  ;;  %v19946_v0 = vld [vmem:[#allocation133_spill] sm:$0xff]  ;;  %19948 = vst [vmem:[#allocation79_spill] sm:$0xff] %v15375_v31 }
 0x384   : > { %v15345_v53 = vmax.f32 %v3972_v9, %v4389_v46  ;;  %v5042_v12 = vsel %vm2107_vm7, %v4994_v24, %v4995_v59  ;;  %v5164_v19 = vrot.slane %v15138_v3, 2  ;;  %v19944_v26 = vmax.f32 %v15192_v11, %v15197_v28  ;;  %v3683_v24 = vpop.permute.xlu1 %3682  ;;  %v19947_v9 = vld [vmem:[#allocation26_spill] sm:$0xff] }
 0x385   : > { %19939 = vst [vmem:[#allocation110_spill] sm:$0xff] %v15343_v41  ;;  %8099 = vmatprep.mubr.f32.mxu1 %v15343_v41  ;;  %vm19945_vm14 = vcmp.eq.s32.totalorder %v14557_v61, 1  ;;  %v4952_v21 = vmax.f32 %v4783_v16, %v4910_v27  ;;  %v2586_v55 = vrot.slane %v19946_v0, 6  ;;  %v2587_v46 = vrot.slane %v19947_v9, 6  ;;  %v19951_v61 = vld [vmem:[#allocation135_spill] sm:$0xff] }
 0x386   : > { %v15366_v7 = vmax.f32 %v19944_v26, %v15345_v53  ;;  %v5079_v36 = vsel %vm19945_vm14, %v5042_v12, -inf  ;;  %7952 = vmatmul.mubr.f32.gmra.mrb[76].mxu0 %v15345_v53  ;;  %v5211_v40 = vsel %vm2265_vm4, %v5163_v18, %v5164_v19  ;;  %vm2901_vm8 = vcmp.eq.s32.totalorder %v19949_v25, 1  ;;  %v3686_v2 = vpop.permute.xlu0 %3685 }
 0x387   : > { %vm19950_vm5 = vcmp.eq.s32.totalorder %v14635_v37, 1  ;;  %v3055_v12 = vrot.slane %v19946_v0, 7  ;;  %v3056_v26 = vrot.slane %v19947_v9, 7  ;;  %v3524_v16 = vrot.slane %v19947_v9, 1  ;;  %v19953_v0 = vld [vmem:[#allocation77_spill] sm:$0xff] }
 0x388   : > { %v5248_v11 = vsel %vm19950_vm5, %v5211_v40, -inf  ;;  %v5121_v27 = vmax.f32 %v4952_v21, %v5079_v36  ;;  %v2690_v18 = vsel %vm1791_vm6, %v2586_v55, %v2587_v46  ;;  %v3525_v41 = vrot.slane %v19951_v61, 1  ;;  %v19952_v40 = vld [vmem:[#allocation30_spill] sm:$0xff]  ;;  %v19956_v55 = vld [vmem:[#allocation124_spill] sm:$0xff] }
 0x389   : > { %vm3837_vm14 = vcmp.eq.s32.totalorder %v3683_v24, 1  ;;  %v2951_v39 = vsel %vm2899_vm0, %v2690_v18, -inf  ;;  %v3159_v37 = vsel %vm1949_vm12, %v3055_v12, %v3056_v26  ;;  %v18970_v23 = vrot.slane %v19952_v40, 1 }
 0x38a   : > { %vm18981_vm5 = vcmp.eq.s32.totalorder %v15375_v31, 1  ;;  %vm2900_vm1 = vcmp.eq.s32.totalorder %v19953_v0, 1  ;;  %v15394_v36 = vmax.f32 %v5121_v27, %v5248_v11  ;;  %v3003_v21 = vmax.f32 %v19947_v9, %v2951_v39 }
 0x38b   : > { %v3420_v24 = vsel %vm3368_vm3, %v3159_v37, -inf  ;;  %v3628_v60 = vsel %vm2107_vm7, %v3524_v16, %v3525_v41  ;;  %vm3369_vm0 = vcmp.eq.s32.totalorder %v19956_v55, 1  ;;  %v3595_v18 = vsel %vm2107_vm7, %v3557_v57, %v18970_v23 }
 0x38c   : > { %19955 = vst [vmem:[#allocation66_spill] sm:$0xff] %v15394_v36  ;;  %v15402_v12 = vsel %vm3837_vm14, %v3628_v60, -inf  ;;  %v4658_v11 = vrot.slane %v15138_v3, 6  ;;  %v4827_v27 = vrot.slane %v15138_v3, 7  ;;  %8100 = vmatmul.mubr.f32.gmra.mrb[8].mxu1 %v15394_v36  ;;  %v15411_v39 = vmax.f32 %v3003_v21, %v3420_v24  ;;  %v3689_v60 = vpop.permute.xlu1 %3688 }
 0x38d   : > { %v15415_v37 = vsel %vm18981_vm5, %v3595_v18, -inf  ;;  %v4996_v15 = vrot.slane %v15215_v47, 1  ;;  %v5165_v16 = vrot.slane %v15215_v47, 2  ;;  %v2588_v21 = vrot.slane %v19951_v61, 6  ;;  %v19958_v18 = vld [vmem:[#allocation92_spill] sm:$0xff] }
 0x38e   : > { %v4703_v23 = vsel %vm1791_vm6, %v4657_v17, %v4658_v11  ;;  %v4872_v36 = vsel %vm1949_vm12, %v4826_v54, %v4827_v27  ;;  %vm19959_vm3 = vcmp.eq.s32.totalorder %v19958_v18, 1  ;;  %vm19961_vm14 = vcmp.eq.s32.totalorder %v19960_v6, 1 }
 0x38f   : > { %v4742_v31 = vsel %vm19959_vm3, %v4703_v23, -inf  ;;  %v4911_v51 = vsel %vm19961_vm14, %v4872_v36, -inf  ;;  %v5041_v57 = vsel %vm2107_vm7, %v4995_v59, %v4996_v15  ;;  %vm19962_vm5 = vcmp.eq.s32.totalorder %v14623_v45, 1  ;;  %v19966_v45 = vld [vmem:[#allocation54_spill] sm:$0xff] }
 0x390   : > { %v4784_v17 = vmax.f32 %v15138_v3, %v4742_v31  ;;  %v5080_v54 = vsel %vm19962_vm5, %v5041_v57, -inf  ;;  %v5210_v62 = vsel %vm2265_vm4, %v5164_v19, %v5165_v16  ;;  %v19964_v24 = vrot.slane %v19963_v8, 6 }
 0x391   : > { %vm19965_vm3 = vcmp.eq.s32.totalorder %v14717_v48, 1  ;;  %v3057_v6 = vrot.slane %v19951_v61, 7  ;;  %v3526_v31 = vrot.slane %v19963_v8, 1  ;;  %v18987_v19 = vrot.slane %v19966_v45, 1 }
 0x392   : > { %v2688_v23 = vsel %vm1791_vm6, %v2588_v21, %v19964_v24  ;;  %v5249_v36 = vsel %vm19965_vm3, %v5210_v62, -inf  ;;  %v4953_v3 = vmax.f32 %v4784_v17, %v4911_v51  ;;  %vm3839_vm5 = vcmp.eq.s32.totalorder %v3689_v60, 1  ;;  %v15461_v51 = vpop.permute.xlu1 %4247 }
 0x393   : > { %v2953_v59 = vsel %vm2901_vm8, %v2688_v23, -inf  ;;  %v19967_v18 = vrot.slane %v19963_v8, 7  ;;  %v2689_v62 = vsel %vm1791_vm6, %v2587_v46, %v2588_v21  ;;  %v3158_v25 = vsel %vm1949_vm12, %v3056_v26, %v3057_v6  ;;  %19968 = vst [vmem:[#allocation174_spill] sm:$0xff] %v15461_v51 }
 0x394   : > { %v3005_v57 = vmax.f32 %v19963_v8, %v2953_v59  ;;  %v3627_v23 = vsel %vm2107_vm7, %v3525_v41, %v3526_v31  ;;  %v5122_v17 = vmax.f32 %v4953_v3, %v5080_v54  ;;  %v2952_v46 = vsel %vm2900_vm1, %v2689_v62, -inf  ;;  %v3695_v54 = vpop.permute.xlu0 %3694 }
 0x395   : > { %v3157_v24 = vsel %vm1949_vm12, %v3057_v6, %v19967_v18  ;;  %v3626_v18 = vsel %vm2107_vm7, %v3526_v31, %v18987_v19  ;;  %v3004_v41 = vmax.f32 %v19951_v61, %v2952_v46  ;;  %v3421_v26 = vsel %vm3369_vm0, %v3158_v25, -inf }
 0x396   : > { %v3422_v60 = vsel %vm3370_vm10, %v3157_v24, -inf  ;;  %v15473_v6 = vsel %vm3839_vm5, %v3626_v18, -inf  ;;  %v15478_v50 = vmax.f32 %v5122_v17, %v5249_v36  ;;  %vm3838_vm10 = vcmp.eq.s32.totalorder %v3686_v2, 1  ;;  %v19970_v17 = vld [vmem:[#allocation116_spill] sm:$0xff] }
 0x397   : > { %v15471_v21 = vmax.f32 %v3005_v57, %v3422_v60  ;;  %v4659_v59 = vrot.slane %v15215_v47, 6  ;;  %v4828_v31 = vrot.slane %v15215_v47, 7  ;;  %v15484_v3 = vmax.f32 %v3004_v41, %v3421_v26  ;;  %v19972_v60 = vld [vmem:[#allocation147_spill] sm:$0xff] }
 0x398   : > { %19969 = vst [vmem:[#allocation133_spill] sm:$0xff] %v15478_v50  ;;  %v15486_v57 = vsel %vm3838_vm10, %v3627_v23, -inf  ;;  %v4997_v24 = vrot.slane %v15297_v14, 1  ;;  %8102 = vmatprep.mubr.f32.mxu1 %v15478_v50  ;;  %v5166_v36 = vrot.slane %v15297_v14, 2  ;;  %v4026_v62 = vrot.slane %v19932_v4, 2  ;;  %v3692_v25 = vpop.permute.xlu0 %3691 }
 0x399   : > { %v4702_v55 = vsel %vm1791_vm6, %v4658_v11, %v4659_v59  ;;  %v4871_v2 = vsel %vm1949_vm12, %v4827_v27, %v4828_v31  ;;  %vm19971_vm1 = vcmp.eq.s32.totalorder %v19970_v17, 1  ;;  %vm19973_vm8 = vcmp.eq.s32.totalorder %v19972_v60, 1  ;;  %v15504_v11 = vpop.permute.xlu1 %4250  ;;  %v20084_v60 = vld [vmem:[#allocation83_spill] sm:$0xff] }
 0x39a   : > { %v4743_v23 = vsel %vm19971_vm1, %v4702_v55, -inf  ;;  %v4912_v18 = vsel %vm19973_vm8, %v4871_v2, -inf  ;;  %v5040_v46 = vsel %vm2107_vm7, %v4996_v15, %v4997_v24  ;;  %19974 = vst [vmem:[#allocation26_spill] sm:$0xff] %v15504_v11  ;;  %vm19975_vm0 = vcmp.eq.s32.totalorder %v14726_v10, 1 }
 0x39b   : > { %v4785_v27 = vmax.f32 %v15215_v47, %v4743_v23  ;;  %v5081_v41 = vsel %vm19975_vm0, %v5040_v46, -inf  ;;  %v5209_v4 = vsel %vm2265_vm4, %v5165_v16, %v5166_v36  ;;  %v19976_v26 = vrot.slane %v19921_v5, 2  ;;  %v19979_v23 = vld [vmem:[#allocation113_spill] sm:$0xff] }
 0x39c   : > { %vm19977_vm14 = vcmp.eq.s32.totalorder %v14811_v20, 1  ;;  %vm19051_vm3 = vcmp.eq.s32.totalorder %v15461_v51, 1  ;;  %v19978_v47 = vmax.f32 %v15272_v35, %v14940_v32  ;;  %v3528_v46 = vrot.slane %v19979_v23, 1 }
 0x39d   : > { %v4065_v55 = vsel %vm2265_vm4, %v19976_v26, %v4026_v62  ;;  %v5250_v2 = vsel %vm19977_vm14, %v5209_v4, -inf  ;;  %v4954_v16 = vmax.f32 %v4785_v27, %v4912_v18  ;;  %vm3841_vm5 = vcmp.eq.s32.totalorder %v3695_v54, 1 }
 0x39e   : > { %v15522_v15 = vmax.f32 %v19978_v47, %v15115_v13  ;;  %v4390_v5 = vsel %vm19051_vm3, %v4065_v55, -inf  ;;  %v18989_v26 = vrot.slane %v15297_v14, 6  ;;  %v19980_v4 = vmax.f32 %v19938_v43, %v15329_v30 }
 0x39f   : > { %v19981_v19 = vrot.slane %v19483_v34, 1  ;;  %v18992_v47 = vrot.slane %v15297_v14, 7  ;;  %v18991_v18 = vrot.slane %v15366_v7, 1  ;;  %v5123_v27 = vmax.f32 %v4954_v16, %v5081_v41  ;;  %v19983_v16 = vld [vmem:[#allocation70_spill] sm:$0xff] }
 0x3a0   : > { %v15531_v0 = vmax.f32 %v19980_v4, %v4390_v5  ;;  %v4701_v54 = vsel %vm1791_vm6, %v4659_v59, %v18989_v26  ;;  %v18990_v30 = vrot.slane %v15366_v7, 2  ;;  %v19982_v55 = vmax.f32 %v15256_v42, %v15272_v35  ;;  %v4152_v59 = vpop.permute.xlu1 %4151  ;;  %v19987_v5 = vld [vmem:[#allocation152_spill] sm:$0xff] }
 0x3a1   : > { %v3624_v32 = vsel %vm2107_vm7, %v3528_v46, %v19981_v19  ;;  %v15559_v4 = vmax.f32 %v5123_v27, %v5250_v2  ;;  %v4870_v19 = vsel %vm1949_vm12, %v4828_v31, %v18992_v47  ;;  %v5039_v42 = vsel %vm2107_vm7, %v4997_v24, %v18991_v18 }
 0x3a2   : > { %v15539_v20 = vsel %vm3841_vm5, %v3624_v32, -inf  ;;  %v15554_v41 = vmax.f32 %v19982_v55, %v15531_v0  ;;  %7954 = vmatprep.mubr.f32.mxu0 %v15531_v0  ;;  %v19985_v32 = vld [vmem:[#allocation94_spill] sm:$0xff]  ;;  %vm19988_vm1 = vcmp.eq.s32.totalorder %v19987_v5, 1  ;;  %vm19989_vm8 = vcmp.eq.s32.totalorder %v14799_v56, 1 }
 0x3a3   : > { %19984 = vst [vmem:[#allocation82_spill] sm:$0xff] %v15559_v4  ;;  %vm19986_vm10 = vcmp.eq.s32.totalorder %v19985_v32, 1  ;;  %v4913_v26 = vsel %vm19988_vm1, %v4870_v19, -inf  ;;  %v5082_v2 = vsel %vm19989_vm8, %v5039_v42, -inf  ;;  %v5208_v27 = vsel %vm2265_vm4, %v5166_v36, %v18990_v30  ;;  %8103 = vmatmul.mubr.f32.gmra.mrb[10].mxu1 %v15559_v4 }
 0x3a4   : > { %v4744_v43 = vsel %vm19986_vm10, %v4701_v54, -inf  ;;  %v15580_v54 = vpop.permute.xlu0 %3784  ;;  %v5251_v31 = vsel %vm19003_vm2, %v5208_v27, -inf  ;;  %v18996_v24 = vrot.slane %v19952_v40, 2  ;;  %vm19059_vm0 = vcmp.eq.s32.totalorder %v15504_v11, 1  ;;  %v20206_v11 = vld [vmem:[#allocation31_spill] sm:$0xff] }
 0x3a5   : > { %v4786_v55 = vmax.f32 %v15297_v14, %v4744_v43  ;;  %19990 = vst [vmem:[#allocation135_spill] sm:$0xff] %v15580_v54  ;;  %v19991_v43 = vmax.f32 %v15345_v53, %v15031_v29  ;;  %v19992_v36 = vrot.slane %v19966_v45, 1  ;;  %vm3840_vm14 = vcmp.eq.s32.totalorder %v3692_v25, 1  ;;  %v19994_v25 = vld [vmem:[#allocation60_spill] sm:$0xff] }
 0x3a6   : > { %v3993_v18 = vrot.slane %v19947_v9, 2  ;;  %v4064_v27 = vsel %vm2265_vm4, %v4026_v62, %v18996_v24  ;;  %v3994_v29 = vrot.slane %v19951_v61, 2  ;;  %vm4306_vm5 = vcmp.eq.s32.totalorder %v4152_v59, 1  ;;  %v4158_v9 = vpop.permute.xlu1 %4157  ;;  %v20010_v24 = vld [vmem:[#allocation151_spill] sm:$0xff] }
 0x3a7   : > { %v15591_v19 = vmax.f32 %v19991_v43, %v15197_v28  ;;  %v4955_v42 = vmax.f32 %v4786_v55, %v4913_v26  ;;  %v3625_v30 = vsel %vm2107_vm7, %v19992_v36, %v3528_v46  ;;  %v4391_v26 = vsel %vm19059_vm0, %v4064_v27, -inf  ;;  %v19993_v55 = vld [vmem:[#allocation62_spill] sm:$0xff] }
 0x3a8   : > { %v15602_v47 = vsel %vm3840_vm14, %v3625_v30, -inf  ;;  %v3559_v36 = vrot.slane %v19994_v25, 1  ;;  %v19995_v44 = vmax.f32 %v19957_v33, %v15415_v37  ;;  %v4097_v62 = vsel %vm2265_vm4, %v3993_v18, %v3994_v29  ;;  %v4155_v33 = vpop.permute.xlu0 %4154 }
 0x3a9   : > { %v5124_v43 = vmax.f32 %v4955_v42, %v5082_v2  ;;  %vm19066_vm10 = vcmp.eq.s32.totalorder %v15580_v54, 1  ;;  %v3995_v61 = vrot.slane %v19963_v8, 2  ;;  %v4358_v59 = vsel %vm4306_vm5, %v4097_v62, -inf }
 0x3aa   : > { %v15613_v56 = vmax.f32 %v19995_v44, %v4391_v26  ;;  %v19997_v2 = vrot.slane %v19952_v40, 1  ;;  %v18995_v27 = vrot.slane %v19966_v45, 2  ;;  %v19998_v8 = vmax.f32 %v15323_v49, %v15345_v53 }
 0x3ab   : > { %v15619_v30 = vmax.f32 %v5124_v43, %v5251_v31  ;;  %v19999_v31 = vmax.f32 %v15411_v39, %v15402_v12  ;;  %vm4308_vm1 = vcmp.eq.s32.totalorder %v4158_v9, 1  ;;  %v4096_v62 = vsel %vm2265_vm4, %v3994_v29, %v3995_v61  ;;  %v20000_v12 = vld [vmem:[#allocation178_spill] sm:$0xff]  ;;  %v15661_v9 = vpop.permute.xlu1 %3787 }
 0x3ac   : > { %v3594_v42 = vsel %vm2107_vm7, %v19997_v2, %v3559_v36  ;;  %v15634_v18 = vmax.f32 %v19998_v8, %v15613_v56  ;;  %7955 = vmatmul.mubr.f32.gmra.mrb[78].mxu0 %v15613_v56  ;;  %v4095_v49 = vsel %vm2265_vm4, %v3995_v61, %v18995_v27  ;;  %vm4307_vm8 = vcmp.eq.s32.totalorder %v4155_v33, 1  ;;  %20002 = vst [vmem:[#allocation77_spill] sm:$0xff] %v15661_v9 }
 0x3ad   : > { %19996 = vst [vmem:[#allocation30_spill] sm:$0xff] %v15619_v30  ;;  %v15639_v43 = vmax.f32 %v19999_v31, %v4358_v59  ;;  %8105 = vmatprep.mubr.f32.mxu1 %v15619_v30  ;;  %v15645_v26 = vsel %vm19066_vm10, %v3594_v42, -inf  ;;  %v4360_v59 = vsel %vm4308_vm1, %v4095_v49, -inf  ;;  %v4661_v2 = vrot.slane %v15366_v7, 6 }
 0x3ae   : > { %v20001_v42 = vmax.f32 %v15471_v21, %v15473_v6  ;;  %v4359_v31 = vsel %vm4307_vm8, %v4096_v62, -inf  ;;  %v4830_v37 = vrot.slane %v15366_v7, 7  ;;  %v4999_v44 = vrot.slane %v15554_v41, 1  ;;  %v20005_v6 = vld [vmem:[#allocation16_spill] sm:$0xff] }
 0x3af   : > { %v20003_v29 = vmax.f32 %v15484_v3, %v15486_v57  ;;  %v20004_v33 = vrot.slane %v15297_v14, 6  ;;  %v5168_v21 = vrot.slane %v15554_v41, 2  ;;  %v20008_v39 = vrot.slane %v15297_v14, 7 }
 0x3b0   : > { %v4412_v8 = vmax.f32 %v20001_v42, %v4360_v59  ;;  %v20006_v42 = vld [vmem:[#allocation118_spill] sm:$0xff]  ;;  %v20009_v57 = vrot.slane %v15366_v7, 1  ;;  %vm20011_vm5 = vcmp.eq.s32.totalorder %v20010_v24, 1  ;;  %vm20012_vm1 = vcmp.eq.s32.totalorder %v14902_v63, 1  ;;  %v20078_v24 = vld [vmem:[#allocation93_spill] sm:$0xff] }
 0x3b1   : > { %v15666_v61 = vmax.f32 %v20003_v29, %v4359_v31  ;;  %v4700_v49 = vsel %vm1791_vm6, %v20004_v33, %v4661_v2  ;;  %vm20007_vm14 = vcmp.eq.s32.totalorder %v20006_v42, 1  ;;  %v4869_v3 = vsel %vm1949_vm12, %v20008_v39, %v4830_v37  ;;  %v4164_v29 = vpop.permute.xlu0 %4163 }
 0x3b2   : > { %v4464_v59 = vmax.f32 %v13714_v52, %v4412_v8  ;;  %v4745_v46 = vsel %vm20007_vm14, %v4700_v49, -inf  ;;  %v5038_v31 = vsel %vm2107_vm7, %v20009_v57, %v4999_v44  ;;  %v4914_v62 = vsel %vm20011_vm5, %v4869_v3, -inf }
 0x3b3   : > { %v4787_v27 = vmax.f32 %v15366_v7, %v4745_v46  ;;  %v5083_v14 = vsel %vm20012_vm1, %v5038_v31, -inf  ;;  %v20013_v49 = vrot.slane %v15366_v7, 2  ;;  %v20014_v42 = vrot.slane %v20005_v6, 1  ;;  %v20016_v7 = vld [vmem:[#allocation177_spill] sm:$0xff] }
 0x3b4   : > { %vm19076_vm8 = vcmp.eq.s32.totalorder %v15661_v9, 1  ;;  %v3997_v46 = vrot.slane %v19979_v23, 2  ;;  %vm20015_vm14 = vcmp.eq.s32.totalorder %v14984_v38, 1  ;;  %vm4310_vm5 = vcmp.eq.s32.totalorder %v4164_v29, 1 }
 0x3b5   : > { %v5207_v39 = vsel %vm2265_vm4, %v20013_v49, %v5168_v21  ;;  %v3593_v57 = vsel %vm2107_vm7, %v3559_v36, %v20014_v42  ;;  %v4956_v33 = vmax.f32 %v4787_v27, %v4914_v62  ;;  %v20017_v63 = vrot.slane %v19483_v34, 2  ;;  %v15716_v27 = vpop.permute.xlu1 %4253 }
 0x3b6   : > { %v5252_v3 = vsel %vm20015_vm14, %v5207_v39, -inf  ;;  %v15706_v31 = vsel %vm19076_vm8, %v3593_v57, -inf  ;;  %v19000_v42 = vrot.slane %v15554_v41, 6  ;;  %v18999_v23 = vrot.slane %v15554_v41, 7  ;;  %20018 = vst [vmem:[#allocation87_spill] sm:$0xff] %v15716_v27  ;;  %v20023_v57 = vld [vmem:[#allocation156_spill] sm:$0xff] }
 0x3b7   : > { %v4093_v36 = vsel %vm2265_vm4, %v3997_v46, %v20017_v63  ;;  %v5125_v62 = vmax.f32 %v4956_v33, %v5083_v14  ;;  %v20019_v49 = vmax.f32 %v19983_v16, %v15539_v20  ;;  %v19001_v33 = vrot.slane %v19994_v25, 2 }
 0x3b8   : > { %v4362_v39 = vsel %vm4310_vm5, %v4093_v36, -inf  ;;  %v4699_v34 = vsel %vm1791_vm6, %v4661_v2, %v19000_v42  ;;  %v4868_v63 = vsel %vm1949_vm12, %v4830_v37, %v18999_v23  ;;  %v20021_v36 = vld [vmem:[#allocation19_spill] sm:$0xff]  ;;  %vm20024_vm14 = vcmp.eq.s32.totalorder %v20023_v57, 1 }
 0x3b9   : > { %v4414_v38 = vmax.f32 %v20019_v49, %v4362_v39  ;;  %v15732_v14 = vmax.f32 %v5125_v62, %v5252_v3  ;;  %vm20022_vm1 = vcmp.eq.s32.totalorder %v20021_v36, 1  ;;  %v4915_v20 = vsel %vm20024_vm14, %v4868_v63, -inf  ;;  %v4161_v3 = vpop.permute.xlu0 %4160  ;;  %v20026_v62 = vld [vmem:[#allocation161_spill] sm:$0xff] }
 0x3ba   : > { %v4746_v29 = vsel %vm20022_vm1, %v4699_v34, -inf  ;;  %v20025_v16 = vrot.slane %v15634_v18, 1  ;;  %vm20027_vm5 = vcmp.eq.s32.totalorder %v20026_v62, 1  ;;  %v20028_v63 = vrot.slane %v15634_v18, 2 }
 0x3bb   : > { %20020 = vst [vmem:[#allocation124_spill] sm:$0xff] %v15732_v14  ;;  %v4462_v49 = vmax.f32 %v4414_v38, %v15639_v43  ;;  %v4466_v39 = vmax.f32 %v13839_v58, %v4414_v38  ;;  %v4508_v37 = vmax.f32 %v4464_v59, %v4414_v38  ;;  %v4788_v23 = vmax.f32 %v15554_v41, %v4746_v29 }
 0x3bc   : > { %v5037_v2 = vsel %vm2107_vm7, %v4999_v44, %v20025_v16  ;;  %8106 = vmatmul.mubr.f32.gmra.mrb[12].mxu1 %v15732_v14  ;;  %v5206_v42 = vsel %vm2265_vm4, %v5168_v21, %v20028_v63  ;;  %v20029_v44 = vrot.slane %v19952_v40, 2  ;;  %vm19065_vm1 = vcmp.eq.s32.totalorder %v15716_v27, 1  ;;  %v20220_v27 = vld [vmem:[#allocation96_spill] sm:$0xff] }
 0x3bd   : > { %v5084_v34 = vsel %vm20027_vm5, %v5037_v2, -inf  ;;  %v4506_v43 = vmax.f32 %v4462_v49, %v4412_v8  ;;  %v4510_v59 = vmax.f32 %v4466_v39, %v13714_v52  ;;  %v4552_v29 = vmax.f32 %v4508_v37, %v13839_v58  ;;  %v15761_v2 = vpop.permute.xlu1 %3790 }
 0x3be   : > { %v4063_v38 = vsel %vm2265_vm4, %v20029_v44, %v19001_v33  ;;  %v4957_v16 = vmax.f32 %v4788_v23, %v4915_v20  ;;  %20030 = vst [vmem:[#allocation173_spill] sm:$0xff] %v15761_v2  ;;  %v5253_v21 = vsel %vm19002_vm11, %v5206_v42, -inf  ;;  %v20032_v40 = vmax.f32 %v15531_v0, %v15115_v13  ;;  %v20034_v20 = vld [vmem:[#allocation195_spill] sm:$0xff]  ;;  %v20036_v13 = vld [vmem:[#allocation64_spill] sm:$0xff] }
 0x3bf   : > { %v4392_v63 = vsel %vm19065_vm1, %v4063_v38, -inf  ;;  %v20033_v8 = vrot.slane %v19966_v45, 2  ;;  %v4550_v23 = vmax.f32 %v4506_v43, %v13714_v52  ;;  %v4554_v39 = vmax.f32 %v4510_v59, %v20034_v20  ;;  %v20037_v52 = vld [vmem:[#allocation39_spill] sm:$0xff]  ;;  %v15797_v59 = vpop.permute.xlu0 %4256  ;;  %v20049_v43 = vld [vmem:[#allocation129_spill] sm:$0xff] }
 0x3c0   : > { %v15771_v44 = vmax.f32 %v20032_v40, %v15272_v35  ;;  %v15780_v42 = vmax.f32 %v4552_v29, %v20034_v20  ;;  %v5126_v37 = vmax.f32 %v4957_v16, %v5084_v34  ;;  %v20035_v38 = vmax.f32 %v20000_v12, %v15645_v26  ;;  %20039 = vst [vmem:[#allocation54_spill] sm:$0xff] %v15797_v59  ;;  %v20046_v34 = vld [vmem:[#allocation88_spill] sm:$0xff] }
 0x3c1   : > { %v4094_v49 = vsel %vm2265_vm4, %v20033_v8, %v3997_v46  ;;  %vm4309_vm14 = vcmp.eq.s32.totalorder %v4161_v3, 1  ;;  %v3561_v40 = vrot.slane %v20036_v13, 1  ;;  %vm19013_vm5 = vcmp.eq.s32.totalorder %v15761_v2, 1 }
 0x3c2   : > { %v15785_v33 = vmax.f32 %v20035_v38, %v4392_v63  ;;  %v15790_v45 = vmax.f32 %v4550_v23, %v13839_v58  ;;  %v15793_v46 = vmax.f32 %v4554_v39, %v20037_v52  ;;  %v15801_v29 = vmax.f32 %v5126_v37, %v5253_v21  ;;  %v20042_v38 = vld [vmem:[#allocation98_spill] sm:$0xff] }
 0x3c3   : > { %v20043_v52 = vrot.slane %v20042_v38, 6  ;;  %v20044_v26 = vrot.slane %v20042_v38, 7  ;;  %v4361_v8 = vsel %vm4309_vm14, %v4094_v49, -inf  ;;  %vm20047_vm11 = vcmp.eq.s32.totalorder %v20046_v34, 1 }
 0x3c4   : > { %20038 = vst [vmem:[#allocation27_spill] sm:$0xff] %v15793_v46  ;;  %20040 = vst [vmem:[#allocation113_spill] sm:$0xff] %v15801_v29  ;;  %v4492_v16 = vmax.f32 %v15785_v33, %v15272_v35  ;;  %7957 = vmatprep.mubr.f32.mxu0 %v15785_v33  ;;  %v19004_v63 = vrot.slane %v15793_v46, 6  ;;  %v19006_v23 = vrot.slane %v15793_v46, 7  ;;  %v19005_v20 = vrot.slane %v15793_v46, 1  ;;  %8108 = vmatprep.mubr.f32.mxu1 %v15801_v29 }
 0x3c5   : > { %v19007_v39 = vrot.slane %v15793_v46, 2  ;;  %v4578_v21 = vmax.f32 %v15771_v44, %v15785_v33  ;;  %v20041_v35 = vmax.f32 %v15522_v15, %v15531_v0  ;;  %v20045_v15 = vrot.slane %v20005_v6, 1 }
 0x3c6   : > { %v4718_v12 = vsel %vm1791_vm6, %v19004_v63, %v20043_v52  ;;  %v4887_v44 = vsel %vm1949_vm12, %v19006_v23, %v20044_v26  ;;  %vm20050_vm2 = vcmp.eq.s32.totalorder %v20049_v43, 1  ;;  %v20052_v63 = vrot.slane %v20042_v38, 1  ;;  %v15860_v26 = vpop.permute.xlu1 %4259  ;;  %v15873_v23 = vpop.permute.xlu0 %3793  ;;  %v20063_v43 = vld [vmem:[#allocation200_spill] sm:$0xff] }
 0x3c7   : > { %v15819_v37 = vmax.f32 %v20041_v35, %v15785_v33  ;;  %v3592_v35 = vsel %vm2107_vm7, %v20045_v15, %v3561_v40  ;;  %v15840_v58 = vsel %vm20047_vm11, %v4718_v12, -inf  ;;  %v15844_v52 = vsel %vm20050_vm2, %v4887_v44, -inf  ;;  %20055 = vst [vmem:[#allocation178_spill] sm:$0xff] %v15860_v26  ;;  %v20056_v12 = vld [vmem:[#allocation187_spill] sm:$0xff]  ;;  %20060 = vst [vmem:[#allocation177_spill] sm:$0xff] %v15873_v23 }
 0x3c8   : > { %20048 = vst [vmem:[#allocation70_spill] sm:$0xff] %v15840_v58  ;;  %20051 = vst [vmem:[#allocation62_spill] sm:$0xff] %v15844_v52  ;;  %v5057_v3 = vsel %vm2107_vm7, %v19005_v20, %v20052_v63  ;;  %v20053_v49 = vrot.slane %v20042_v38, 2  ;;  %vm20057_vm2 = vcmp.eq.s32.totalorder %v20056_v12, 1  ;;  %v20059_v63 = vmax.f32 %v19993_v55, %v15602_v47 }
 0x3c9   : > { %v15866_v44 = vsel %vm20057_vm2, %v5057_v3, -inf  ;;  %v3925_v20 = vsel %vm19013_vm5, %v3592_v35, -inf  ;;  %v4029_v62 = vrot.slane %v20005_v6, 2  ;;  %vm19014_vm11 = vcmp.eq.s32.totalorder %v15797_v59, 1 }
 0x3ca   : > { %v15858_v34 = vsel %vm2265_vm4, %v19007_v39, %v20053_v49  ;;  %20058 = vst [vmem:[#allocation16_spill] sm:$0xff] %v15866_v44  ;;  %v4413_v15 = vmax.f32 %v20059_v63, %v4361_v8  ;;  %v20061_v49 = vld [vmem:[#allocation182_spill] sm:$0xff]  ;;  %v20062_v3 = vmax.f32 %v15613_v56, %v15197_v28  ;;  %v20064_v55 = vmax.f32 %v13724_v1, %v15666_v61  ;;  %v20066_v28 = vld [vmem:[#allocation67_spill] sm:$0xff] }
 0x3cb   : > { %20054 = vst [vmem:[#allocation60_spill] sm:$0xff] %v15858_v34  ;;  %v3977_v39 = vmax.f32 %v20061_v49, %v3925_v20  ;;  %v19008_v35 = vrot.slane %v20036_v13, 2  ;;  %vm19010_vm14 = vcmp.eq.s32.totalorder %v15860_v26, 1  ;;  %v20065_v6 = vrot.slane %v19994_v25, 2 }
 0x3cc   : > { %v15882_v12 = vmax.f32 %v20062_v3, %v15345_v53  ;;  %v4465_v47 = vmax.f32 %v20063_v43, %v4413_v15  ;;  %v4507_v8 = vmax.f32 %v20064_v55, %v4413_v15  ;;  %v15895_v63 = vmax.f32 %v4492_v16, %v15531_v0 }
 0x3cd   : > { %v4062_v20 = vsel %vm2265_vm4, %v20065_v6, %v4029_v62  ;;  %v3562_v49 = vrot.slane %v20066_v28, 1  ;;  %vm19009_vm2 = vcmp.eq.s32.totalorder %v15873_v23, 1  ;;  %v4061_v25 = vsel %vm2265_vm4, %v4029_v62, %v19008_v35 }
 0x3ce   : > { %v4509_v3 = vmax.f32 %v4465_v47, %v13724_v1  ;;  %v4551_v61 = vmax.f32 %v4507_v8, %v20063_v43  ;;  %v4393_v15 = vsel %vm19014_vm11, %v4062_v20, -inf  ;;  %v20067_v16 = vmax.f32 %v20016_v7, %v15706_v31  ;;  %v20068_v43 = vld [vmem:[#allocation65_spill] sm:$0xff] }
 0x3cf   : > { %v4394_v6 = vsel %vm19010_vm14, %v4061_v25, -inf  ;;  %v3591_v1 = vsel %vm2107_vm7, %v3561_v40, %v3562_v49  ;;  %v20069_v8 = vld [vmem:[#allocation197_spill] sm:$0xff]  ;;  %v20070_v40 = vmax.f32 %v15591_v19, %v15613_v56  ;;  %v20075_v31 = vrot.slane %v15790_v45, 6 }
 0x3d0   : > { %v15910_v55 = vmax.f32 %v20067_v16, %v4393_v15  ;;  %v4553_v20 = vmax.f32 %v4509_v3, %v20069_v8  ;;  %v4595_v57 = vmax.f32 %v4551_v61, %v20069_v8  ;;  %v15919_v36 = vmax.f32 %v3977_v39, %v4394_v6  ;;  %v20071_v3 = vld [vmem:[#allocation181_spill] sm:$0xff]  ;;  %v20072_v61 = vld [vmem:[#allocation199_spill] sm:$0xff] }
 0x3d1   : > { %v15923_v62 = vsel %vm19009_vm2, %v3591_v1, -inf  ;;  %v20076_v47 = vld [vmem:[#allocation81_spill] sm:$0xff]  ;;  %vm20079_vm14 = vcmp.eq.s32.totalorder %v20078_v24, 1  ;;  %v20080_v5 = vrot.slane %v15780_v42, 7 }
 0x3d2   : > { %v15933_v15 = vmax.f32 %v20070_v40, %v15910_v55  ;;  %7958 = vmatmul.mubr.f32.gmra.mrb[80].mxu0 %v15910_v55  ;;  %v15939_v25 = vmax.f32 %v4553_v20, %v20072_v61  ;;  %v4639_v16 = vrot.slane %v4595_v57, 6  ;;  %v4808_v6 = vrot.slane %v4595_v57, 7 }
 0x3d3   : > { %v4976_v1 = vrot.slane %v4595_v57, 1  ;;  %7960 = vmatprep.mubr.f32.mxu0 %v15919_v36  ;;  %v5145_v8 = vrot.slane %v4595_v57, 2  ;;  %v15947_v40 = vmax.f32 %v4578_v21, %v15919_v36  ;;  %v20074_v20 = vrot.slane %v15780_v42, 6 }
 0x3d4   : > { %20073 = vst [vmem:[#allocation195_spill] sm:$0xff] %v15939_v25  ;;  %v4641_v39 = vrot.slane %v15939_v25, 6  ;;  %v4722_v35 = vsel %vm1791_vm6, %v20075_v31, %v4639_v16  ;;  %v4810_v7 = vrot.slane %v15939_v25, 7  ;;  %vm20077_vm2 = vcmp.eq.s32.totalorder %v20076_v47, 1 }
 0x3d5   : > { %v4721_v61 = vsel %vm1791_vm6, %v4639_v16, %v20074_v20  ;;  %v4723_v19 = vsel %vm20077_vm2, %v4722_v35, -inf  ;;  %v4890_v32 = vsel %vm1949_vm12, %v4808_v6, %v20080_v5  ;;  %v20081_v20 = vrot.slane %v15790_v45, 7  ;;  %v20086_v45 = vld [vmem:[#allocation99_spill] sm:$0xff] }
 0x3d6   : > { %v4724_v21 = vsel %vm20079_vm14, %v4721_v61, -inf  ;;  %v20082_v31 = vrot.slane %v15793_v46, 6  ;;  %v20083_v35 = vrot.slane %v15780_v42, 6  ;;  %v4765_v47 = vmax.f32 %v4595_v57, %v4723_v19  ;;  %v20090_v19 = vld [vmem:[#allocation126_spill] sm:$0xff] }
 0x3d7   : > { %v4891_v10 = vsel %vm1949_vm12, %v20081_v20, %v4808_v6  ;;  %v4766_v61 = vmax.f32 %v15780_v42, %v4724_v21  ;;  %vm20085_vm14 = vcmp.eq.s32.totalorder %v20084_v60, 1  ;;  %vm20087_vm2 = vcmp.eq.s32.totalorder %v20086_v45, 1  ;;  %v20092_v21 = vld [vmem:[#allocation127_spill] sm:$0xff] }
 0x3d8   : > { %v4719_v16 = vsel %vm1791_vm6, %v4641_v39, %v20082_v31  ;;  %v4720_v24 = vsel %vm1791_vm6, %v20083_v35, %v4641_v39  ;;  %v20088_v6 = vrot.slane %v15793_v46, 7  ;;  %v20089_v31 = vrot.slane %v15780_v42, 7  ;;  %v15998_v35 = vpop.permute.xlu1 %3796 }
 0x3d9   : > { %v4725_v5 = vsel %vm20085_vm14, %v4720_v24, -inf  ;;  %v4726_v17 = vsel %vm20087_vm2, %v4719_v16, -inf  ;;  %vm20091_vm5 = vcmp.eq.s32.totalorder %v20090_v19, 1  ;;  %vm20093_vm14 = vcmp.eq.s32.totalorder %v20092_v21, 1  ;;  %20094 = vst [vmem:[#allocation64_spill] sm:$0xff] %v15998_v35  ;;  %v20095_v24 = vld [vmem:[#allocation111_spill] sm:$0xff]  ;;  %v16015_v19 = vpop.permute.xlu0 %4262 }
 0x3da   : > { %v4888_v20 = vsel %vm1949_vm12, %v4810_v7, %v20088_v6  ;;  %v4889_v48 = vsel %vm1949_vm12, %v20089_v31, %v4810_v7  ;;  %v4767_v57 = vmax.f32 %v15939_v25, %v4725_v5  ;;  %v4768_v39 = vmax.f32 %v15793_v46, %v4726_v17  ;;  %v20097_v6 = vld [vmem:[#allocation74_spill] sm:$0xff]  ;;  %20103 = vst [vmem:[#allocation187_spill] sm:$0xff] %v16015_v19 }
 0x3db   : > { %v4892_v60 = vsel %vm20091_vm5, %v4891_v10, -inf  ;;  %v4893_v16 = vsel %vm20093_vm14, %v4890_v32, -inf  ;;  %vm20096_vm2 = vcmp.eq.s32.totalorder %v20095_v24, 1  ;;  %vm20098_vm11 = vcmp.eq.s32.totalorder %v20097_v6, 1  ;;  %v6725_v24 = vld [vmem:[#allocation5 + $0x188] sm:$0xff] }
 0x3dc   : > { %v4894_v45 = vsel %vm20096_vm2, %v4889_v48, -inf  ;;  %v4895_v29 = vsel %vm20098_vm11, %v4888_v20, -inf  ;;  %v16004_v14 = vmax.f32 %v4765_v47, %v4892_v60  ;;  %v4935_v7 = vmax.f32 %v4766_v61, %v4893_v16  ;;  %v20104_v48 = vld [vmem:[#allocation179_spill] sm:$0xff] }
 0x3dd   : > { %v16006_v5 = vmax.f32 %v4767_v57, %v4894_v45  ;;  %v16008_v17 = vmax.f32 %v4768_v39, %v4895_v29  ;;  %v19020_v10 = vrot.slane %v15939_v25, 1  ;;  %v20102_v31 = vrot.slane %v15780_v42, 1  ;;  %v6724_v16 = vld [vmem:[#allocation5 + $0x180] sm:$0xff] }
 0x3de   : > { %20099 = vst [vmem:[#allocation39_spill] sm:$0xff] %v16004_v14  ;;  %vm20105_vm5 = vcmp.eq.s32.totalorder %v20104_v48, 1  ;;  %v19019_v47 = vrot.slane %v15939_v25, 2  ;;  %v20107_v61 = vrot.slane %v15780_v42, 2  ;;  %v20109_v20 = vrot.slane %v20068_v43, 1  ;;  %v20111_v45 = vld [vmem:[#allocation55_spill] sm:$0xff]  ;;  %v16060_v42 = vpop.permute.xlu1 %4265 }
 0x3df   : > { %20100 = vst [vmem:[#allocation88_spill] sm:$0xff] %v16006_v5  ;;  %20101 = vst [vmem:[#allocation129_spill] sm:$0xff] %v16008_v17  ;;  %v5060_v32 = vsel %vm2107_vm7, %v4976_v1, %v20102_v31  ;;  %v20110_v1 = vmov %v20102_v31  ;;  %vm19105_vm11 = vcmp.eq.s32.totalorder %v15998_v35, 1  ;;  %vm20112_vm14 = vcmp.eq.s32.totalorder %v20111_v45, 1  ;;  %v6737_v35 = vld [vmem:[#allocation5 + $0x1e8] sm:$0xff] }
 0x3e0   : > { %v16019_v21 = vsel %vm20105_vm5, %v5060_v32, -inf  ;;  %v16026_v29 = vsel %vm2265_vm4, %v5145_v8, %v20107_v61  ;;  %v3590_v57 = vsel %vm2107_vm7, %v3562_v49, %v20109_v20  ;;  %v5059_v39 = vsel %vm2107_vm7, %v20110_v1, %v19020_v10  ;;  %v20116_v20 = vld [vmem:[#allocation186_spill] sm:$0xff]  ;;  %20118 = vst [vmem:[#allocation67_spill] sm:$0xff] %v16060_v42  ;;  %v20136_v10 = vld [vmem:[#allocation23_spill] sm:$0xff] }
 0x3e1   : > { %20106 = vst [vmem:[#allocation182_spill] sm:$0xff] %v16019_v21  ;;  %20108 = vst [vmem:[#allocation200_spill] sm:$0xff] %v16026_v29  ;;  %v4031_v8 = vrot.slane %v20066_v28, 2  ;;  %v5062_v6 = vsel %vm20112_vm14, %v5059_v39, -inf  ;;  %v20113_v49 = vmov %v20107_v61  ;;  %v3927_v32 = vsel %vm19105_vm11, %v3590_v57, -inf  ;;  %v20114_v61 = vld [vmem:[#allocation190_spill] sm:$0xff] }
 0x3e2   : > { %v5228_v31 = vsel %vm2265_vm4, %v20113_v49, %v19019_v47  ;;  %vm4343_vm2 = vcmp.eq.s32.totalorder %v16015_v19, 1  ;;  %v5104_v48 = vmax.f32 %v4935_v7, %v5062_v6  ;;  %vm20115_vm5 = vcmp.eq.s32.totalorder %v20114_v61, 1  ;;  %v20130_v47 = vld [vmem:[#allocation155_spill] sm:$0xff] }
 0x3e3   : > { %v5231_v28 = vsel %vm20115_vm5, %v5228_v31, -inf  ;;  %v3979_v1 = vmax.f32 %v20116_v20, %v3927_v32  ;;  %v20117_v39 = vrot.slane %v20036_v13, 2  ;;  %v20119_v57 = vmax.f32 %v15910_v55, %v15345_v53 }
 0x3e4   : > { %v8337_v6 = vpack.c.bf16 %v6725_v24, %v6724_v16  ;;  %v4663_v31 = vrot.slane %v15634_v18, 6  ;;  %v16071_v32 = vmax.f32 %v5104_v48, %v5231_v28  ;;  %v20121_v13 = vmax.f32 %v20071_v3, %v15923_v62 }
 0x3e5   : > { %v4060_v45 = vsel %vm2265_vm4, %v20117_v39, %v4031_v8  ;;  %v16068_v7 = vmax.f32 %v20119_v57, %v15613_v56  ;;  %v4832_v20 = vrot.slane %v15634_v18, 7  ;;  %v5001_v39 = vrot.slane %v15819_v37, 1 }
 0x3e6   : > { %v4395_v49 = vsel %vm4343_vm2, %v4060_v45, -inf  ;;  %20120 = vst [vmem:[#allocation65_spill] sm:$0xff] %v16071_v32  ;;  %8338 = vmatprep.subr.bf16.mxu1 %v8337_v6  ;;  %v20122_v45 = vrot.slane %v15554_v41, 6  ;;  %v5170_v16 = vrot.slane %v15819_v37, 2  ;;  %v4032_v24 = vrot.slane %v20068_v43, 2 }
 0x3e7   : > { %v16076_v61 = vmax.f32 %v20121_v13, %v4395_v49  ;;  %vm19102_vm14 = vcmp.eq.s32.totalorder %v16060_v42, 1  ;;  %v20123_v48 = vmax.f32 %v15882_v12, %v15910_v55  ;;  %v20124_v49 = vld [vmem:[#allocation89_spill] sm:$0xff]  ;;  %8340 = vmatpush3.bf16.msra.mxu1 %v8337_v6  ;;  %v20127_v60 = vrot.slane %v15634_v18, 1  ;;  %v16113_v6 = vpop.permute.xlu0 %3799 }
 0x3e8   : > { %v4698_v53 = vsel %vm1791_vm6, %v20122_v45, %v4663_v31  ;;  %vm20125_vm5 = vcmp.eq.s32.totalorder %v20124_v49, 1  ;;  %v20126_v45 = vrot.slane %v15554_v41, 7  ;;  %20129 = vst [vmem:[#allocation197_spill] sm:$0xff] %v16113_v6  ;;  %v4059_v49 = vsel %vm2265_vm4, %v4031_v8, %v4032_v24 }
 0x3e9   : > { %v4495_v62 = vmax.f32 %v16076_v61, %v15613_v56  ;;  %v16095_v28 = vmax.f32 %v20123_v48, %v16076_v61  ;;  %v4747_v57 = vsel %vm20125_vm5, %v4698_v53, -inf  ;;  %7961 = vmatmul.mubr.f32.gmra.mrb[82].mxu0 %v16076_v61  ;;  %v5036_v12 = vsel %vm2107_vm7, %v20127_v60, %v5001_v39 }
 0x3ea   : > { %v4789_v13 = vmax.f32 %v15634_v18, %v4747_v57  ;;  %v4867_v56 = vsel %vm1949_vm12, %v20126_v45, %v4832_v20  ;;  %v20128_v48 = vrot.slane %v15634_v18, 2  ;;  %vm20131_vm5 = vcmp.eq.s32.totalorder %v20130_v47, 1 }
 0x3eb   : > { %v4916_v57 = vsel %vm20131_vm5, %v4867_v56, -inf  ;;  %v5085_v41 = vsel %vm19025_vm13, %v5036_v12, -inf  ;;  %v4396_v18 = vsel %vm19102_vm14, %v4059_v49, -inf  ;;  %v20135_v56 = vld [vmem:[#allocation68_spill] sm:$0xff]  ;;  %vm19038_vm5 = vcmp.eq.s32.totalorder %v20136_v10, 1 }
 0x3ec   : > { %v5205_v53 = vsel %vm2265_vm4, %v20128_v48, %v5170_v16  ;;  %v4958_v60 = vmax.f32 %v4789_v13, %v4916_v57  ;;  %v20134_v48 = vmax.f32 %v15919_v36, %v15531_v0  ;;  %v19024_v47 = vrot.slane %v20135_v56, 1 }
 0x3ed   : > { %v5254_v45 = vsel %vm19023_vm9, %v5205_v53, -inf  ;;  %v16133_v12 = vmax.f32 %v3979_v1, %v4396_v18  ;;  %vm19028_vm9 = vcmp.eq.s32.totalorder %v16113_v6, 1  ;;  %v4664_v8 = vrot.slane %v15819_v37, 6 }
 0x3ee   : > { %v16129_v30 = vmax.f32 %v20134_v48, %v15785_v33  ;;  %v4833_v13 = vrot.slane %v15819_v37, 7  ;;  %v5127_v53 = vmax.f32 %v4958_v60, %v5085_v41  ;;  %v20137_v49 = vrot.slane %v20068_v43, 1  ;;  %v16158_v60 = vpop.permute.xlu1 %4268  ;;  %v20142_v48 = vld [vmem:[#allocation100_spill] sm:$0xff] }
 0x3ef   : > { %v5002_v57 = vrot.slane %v15933_v15, 1  ;;  %v20138_v18 = vmax.f32 %v15895_v63, %v15919_v36  ;;  %v4697_v43 = vsel %vm1791_vm6, %v4663_v31, %v4664_v8  ;;  %20139 = vst [vmem:[#allocation181_spill] sm:$0xff] %v16158_v60  ;;  %7963 = vmatprep.mubr.f32.mxu0 %v16133_v12  ;;  %vm20143_vm13 = vcmp.eq.s32.totalorder %v20142_v48, 1 }
 0x3f0   : > { %v3589_v0 = vsel %vm2107_vm7, %v20137_v49, %v19024_v47  ;;  %v16161_v49 = vmax.f32 %v5127_v53, %v5254_v45  ;;  %v20141_v47 = vld [vmem:[#allocation183_spill] sm:$0xff]  ;;  %v4748_v4 = vsel %vm20143_vm13, %v4697_v43, -inf  ;;  %v4866_v63 = vsel %vm1949_vm12, %v4832_v20, %v4833_v13  ;;  %v6726_v53 = vld [vmem:[#allocation5 + $0x190] sm:$0xff] }
 0x3f1   : > { %v16152_v3 = vmax.f32 %v20138_v18, %v16133_v12  ;;  %v3928_v41 = vsel %vm19028_vm9, %v3589_v0, -inf  ;;  %v4790_v18 = vmax.f32 %v15819_v37, %v4748_v4  ;;  %v20144_v0 = vld [vmem:[#allocation160_spill] sm:$0xff]  ;;  %v5035_v31 = vsel %vm2107_vm7, %v5001_v39, %v5002_v57  ;;  %v20149_v37 = vld [vmem:[#allocation170_spill] sm:$0xff] }
 0x3f2   : > { %20140 = vst [vmem:[#allocation199_spill] sm:$0xff] %v16161_v49  ;;  %v3980_v1 = vmax.f32 %v20141_v47, %v3928_v41  ;;  %vm20145_vm9 = vcmp.eq.s32.totalorder %v20144_v0, 1  ;;  %v20146_v32 = vrot.slane %v15933_v15, 2  ;;  %v16177_v47 = vpop.permute.xlu0 %3336  ;;  %v6727_v41 = vld [vmem:[#allocation5 + $0x198] sm:$0xff]  ;;  %8109 = vmatmul.mubr.f32.gmra.mrb[14].mxu1 %v16161_v49  ;;  %v5086_v4 = vsel %vm19031_vm15, %v5035_v31, -inf }
 0x3f3   : > { %v4917_v50 = vsel %vm20145_vm9, %v4866_v63, -inf  ;;  %20147 = vst [vmem:[#allocation81_spill] sm:$0xff] %v16177_v47  ;;  %vm20150_vm13 = vcmp.eq.s32.totalorder %v20149_v37, 1  ;;  %v19033_v63 = vrot.slane %v20135_v56, 2  ;;  %vm19039_vm9 = vcmp.eq.s32.totalorder %v16158_v60, 1 }
 0x3f4   : > { %v5204_v45 = vsel %vm2265_vm4, %v5170_v16, %v20146_v32  ;;  %v4959_v39 = vmax.f32 %v4790_v18, %v4917_v50  ;;  %v16187_v0 = vmax.f32 %v4495_v62, %v15910_v55  ;;  %v20151_v32 = vld [vmem:[#allocation36_spill] sm:$0xff]  ;;  %vm19037_vm15 = vcmp.eq.s32.totalorder %v16177_v47, 1 }
 0x3f5   : > { %v5255_v43 = vsel %vm20150_vm13, %v5204_v45, -inf  ;;  %v19032_v16 = vrot.slane %v20151_v32, 6  ;;  %v19036_v48 = vrot.slane %v20151_v32, 7  ;;  %v4058_v31 = vsel %vm2265_vm4, %v4032_v24, %v19033_v63  ;;  %v20155_v63 = vld [vmem:[#allocation120_spill] sm:$0xff] }
 0x3f6   : > { %v8341_v45 = vpack.c.bf16 %v6727_v41, %v6726_v53  ;;  %v4665_v37 = vrot.slane %v15933_v15, 6  ;;  %v5128_v20 = vmax.f32 %v4959_v39, %v5086_v4  ;;  %v4397_v50 = vsel %vm19039_vm9, %v4058_v31, -inf }
 0x3f7   : > { %v20152_v62 = vrot.slane %v20135_v56, 6  ;;  %v20153_v24 = vrot.slane %v20135_v56, 7  ;;  %v16211_v41 = vmax.f32 %v3980_v1, %v4397_v50  ;;  %vm20156_vm13 = vcmp.eq.s32.totalorder %v20155_v63, 1  ;;  %v16225_v50 = vpop.permute.xlu1 %3805 }
 0x3f8   : > { %8342 = vmatprep.subr.bf16.mxu1 %v8341_v45  ;;  %v4696_v31 = vsel %vm1791_vm6, %v4664_v8, %v4665_v37  ;;  %v4834_v1 = vrot.slane %v15933_v15, 7  ;;  %20157 = vst [vmem:[#allocation83_spill] sm:$0xff] %v16225_v50  ;;  %v20166_v21 = vrot.slane %v15933_v15, 2  ;;  %v5173_v5 = vrot.slane %v16095_v28, 2 }
 0x3f9   : > { %v2649_v18 = vsel %vm1791_vm6, %v20152_v62, %v19032_v16  ;;  %v3118_v53 = vsel %vm1949_vm12, %v20153_v24, %v19036_v48  ;;  %v16219_v62 = vmax.f32 %v5128_v20, %v5255_v43  ;;  %v4749_v49 = vsel %vm20156_vm13, %v4696_v31, -inf  ;;  %8344 = vmatpush3.bf16.msra.mxu1 %v8341_v45  ;;  %7964 = vmatmul.mubr.f32.gmra.mrb[84].mxu0 %v16211_v41  ;;  %v20162_v48 = vld [vmem:[#allocation125_spill] sm:$0xff] }
 0x3fa   : > { %v2992_v4 = vsel %vm19038_vm5, %v2649_v18, -inf  ;;  %v3461_v39 = vsel %vm19037_vm15, %v3118_v53, -inf  ;;  %v20158_v24 = vmax.f32 %v16068_v7, %v16076_v61  ;;  %v4791_v20 = vmax.f32 %v15933_v15, %v4749_v49  ;;  %v16245_v7 = vpop.permute.xlu0 %3802 }
 0x3fb   : > { %20154 = vst [vmem:[#allocation93_spill] sm:$0xff] %v16219_v62  ;;  %v3044_v16 = vmax.f32 %v20151_v32, %v2992_v4  ;;  %v5003_v43 = vrot.slane %v15947_v40, 1  ;;  %8111 = vmatprep.mubr.f32.mxu1 %v16219_v62  ;;  %v4865_v53 = vsel %vm1949_vm12, %v4833_v13, %v4834_v1  ;;  %v5172_v4 = vrot.slane %v15947_v40, 2  ;;  %20159 = vst [vmem:[#allocation99_spill] sm:$0xff] %v16245_v7  ;;  %v20164_v13 = vld [vmem:[#allocation214_spill] sm:$0xff] }
 0x3fc   : > { %v16233_v8 = vmax.f32 %v20158_v24, %v16211_v41  ;;  %v3565_v31 = vrot.slane %v20151_v32, 1  ;;  %v20160_v24 = vld [vmem:[#allocation159_spill] sm:$0xff]  ;;  %vm19044_vm15 = vcmp.eq.s32.totalorder %v16225_v50, 1  ;;  %vm20165_vm9 = vcmp.eq.s32.totalorder %v20164_v13, 1 }
 0x3fd   : > { %v16239_v45 = vmax.f32 %v3044_v16, %v3461_v39  ;;  %vm20161_vm13 = vcmp.eq.s32.totalorder %v20160_v24, 1  ;;  %v5034_v18 = vsel %vm2107_vm7, %v5002_v57, %v5003_v43  ;;  %v20163_v16 = vld [vmem:[#allocation57_spill] sm:$0xff]  ;;  %v5203_v14 = vsel %vm2265_vm4, %v20166_v21, %v5172_v4 }
 0x3fe   : > { %v4918_v49 = vsel %vm20161_vm13, %v4865_v53, -inf  ;;  %vm2941_vm5 = vcmp.eq.s32.totalorder %v20163_v16, 1  ;;  %v5087_v62 = vsel %vm20165_vm9, %v5034_v18, -inf  ;;  %v20167_v53 = vrot.slane %v20135_v56, 1  ;;  %v20168_v24 = vld [vmem:[#allocation169_spill] sm:$0xff] }
 0x3ff   : > { %v4960_v39 = vmax.f32 %v4791_v20, %v4918_v49  ;;  %vm20169_vm13 = vcmp.eq.s32.totalorder %v20168_v24, 1  ;;  %v20170_v34 = vrot.slane %v20162_v48, 1  ;;  %vm19045_vm9 = vcmp.eq.s32.totalorder %v16245_v7, 1  ;;  %v20171_v24 = vld [vmem:[#allocation189_spill] sm:$0xff] }
 0x400   : > { %v3588_v57 = vsel %vm2107_vm7, %v20167_v53, %v3565_v31  ;;  %v5256_v63 = vsel %vm20169_vm13, %v5203_v14, -inf  ;;  %v4666_v15 = vrot.slane %v15947_v40, 6  ;;  %v4835_v53 = vrot.slane %v15947_v40, 7 }
 0x401   : > { %v3587_v20 = vsel %vm2107_vm7, %v3565_v31, %v20170_v34  ;;  %v5129_v18 = vmax.f32 %v4960_v39, %v5087_v62  ;;  %v3929_v49 = vsel %vm19045_vm9, %v3588_v57, -inf  ;;  %v5004_v31 = vrot.slane %v16095_v28, 1  ;;  %v16285_v62 = vpop.permute.xlu1 %4271 }
 0x402   : > { %v16274_v21 = vsel %vm19044_vm15, %v3587_v20, -inf  ;;  %v3981_v13 = vmax.f32 %v20171_v24, %v3929_v49  ;;  %v4695_v34 = vsel %vm1791_vm6, %v4665_v37, %v4666_v15  ;;  %20172 = vst [vmem:[#allocation126_spill] sm:$0xff] %v16285_v62  ;;  %v20174_v20 = vld [vmem:[#allocation41_spill] sm:$0xff]  ;;  %v4864_v57 = vsel %vm1949_vm12, %v4834_v1, %v4835_v53  ;;  %v20176_v24 = vld [vmem:[#allocation164_spill] sm:$0xff] }
 0x403   : > { %v16287_v39 = vmax.f32 %v5129_v18, %v5256_v63  ;;  %vm20175_vm13 = vcmp.eq.s32.totalorder %v20174_v20, 1  ;;  %vm20177_vm15 = vcmp.eq.s32.totalorder %v20176_v24, 1  ;;  %v5033_v37 = vsel %vm2107_vm7, %v5003_v43, %v5004_v31  ;;  %v16300_v63 = vpop.permute.xlu0 %3339  ;;  %v6728_v18 = vld [vmem:[#allocation5 + $0x1a0] sm:$0xff]  ;;  %v6729_v20 = vld [vmem:[#allocation5 + $0x1a8] sm:$0xff] }
 0x404   : > { %v4750_v29 = vsel %vm20175_vm13, %v4695_v34, -inf  ;;  %v4919_v49 = vsel %vm20177_vm15, %v4864_v57, -inf  ;;  %v4034_v17 = vrot.slane %v20151_v32, 2  ;;  %v20178_v34 = vld [vmem:[#allocation33_spill] sm:$0xff]  ;;  %vm19055_vm9 = vcmp.eq.s32.totalorder %v16285_v62, 1 }
 0x405   : > { %20173 = vst [vmem:[#allocation127_spill] sm:$0xff] %v16287_v39  ;;  %v4792_v14 = vmax.f32 %v15947_v40, %v4750_v29  ;;  %8112 = vmatmul.mubr.f32.gmra.mrb[16].mxu1 %v16287_v39  ;;  %vm20179_vm13 = vcmp.eq.s32.totalorder %v20178_v34, 1  ;;  %v5202_v40 = vsel %vm2265_vm4, %v5172_v4, %v5173_v5  ;;  %v2629_v29 = vrot.slane %v20162_v48, 6 }
 0x406   : > { %v5088_v1 = vsel %vm20179_vm13, %v5033_v37, -inf  ;;  %v5257_v43 = vsel %vm19051_vm3, %v5202_v40, -inf  ;;  %v20180_v24 = vrot.slane %v20135_v56, 2  ;;  %v3098_v39 = vrot.slane %v20162_v48, 7 }
 0x407   : > { %v4961_v57 = vmax.f32 %v4792_v14, %v4919_v49  ;;  %v20181_v4 = vrot.slane %v20151_v32, 6  ;;  %vm19052_vm15 = vcmp.eq.s32.totalorder %v16300_v63, 1  ;;  %v8345_v14 = vpack.c.bf16 %v6729_v20, %v6728_v18  ;;  %v20182_v49 = vld [vmem:[#allocation49_spill] sm:$0xff] }
 0x408   : > { %v4057_v44 = vsel %vm2265_vm4, %v20180_v24, %v4034_v17  ;;  %vm2942_vm13 = vcmp.eq.s32.totalorder %v20182_v49, 1  ;;  %v20183_v51 = vrot.slane %v20151_v32, 7  ;;  %v4667_v20 = vrot.slane %v16095_v28, 6 }
 0x409   : > { %v4398_v37 = vsel %vm19055_vm9, %v4057_v44, -inf  ;;  %v2648_v34 = vsel %vm1791_vm6, %v20181_v4, %v2629_v29  ;;  %v5130_v40 = vmax.f32 %v4961_v57, %v5088_v1  ;;  %8346 = vmatprep.subr.bf16.mxu1 %v8345_v14  ;;  %v4836_v18 = vrot.slane %v16095_v28, 7 }
 0x40a   : > { %v16324_v56 = vmax.f32 %v3981_v13, %v4398_v37  ;;  %v2993_v24 = vsel %vm2941_vm5, %v2648_v34, -inf  ;;  %v3117_v44 = vsel %vm1949_vm12, %v20183_v51, %v3098_v39  ;;  %v16337_v13 = vpop.permute.xlu1 %4274  ;;  %v20186_v32 = vmax.f32 %v16129_v30, %v16133_v12  ;;  %8348 = vmatpush3.bf16.msra.mxu1 %v8345_v14  ;;  %v16357_v30 = vpop.permute.xlu0 %3342  ;;  %v20189_v14 = vld [vmem:[#allocation163_spill] sm:$0xff] }
 0x40b   : > { %v3045_v25 = vmax.f32 %v20162_v48, %v2993_v24  ;;  %v3462_v4 = vsel %vm19052_vm15, %v3117_v44, -inf  ;;  %20184 = vst [vmem:[#allocation111_spill] sm:$0xff] %v16337_v13  ;;  %v16339_v1 = vmax.f32 %v5130_v40, %v5257_v43  ;;  %v5005_v51 = vrot.slane %v16152_v3, 1  ;;  %v20187_v44 = vld [vmem:[#allocation95_spill] sm:$0xff] }
 0x40c   : > { %v16345_v34 = vmax.f32 %v20186_v32, %v16324_v56  ;;  %v5174_v57 = vrot.slane %v16152_v3, 2  ;;  %7966 = vmatprep.mubr.f32.mxu0 %v16324_v56  ;;  %v4694_v24 = vsel %vm1791_vm6, %v4666_v15, %v4667_v20  ;;  %v4863_v43 = vsel %vm1949_vm12, %v4835_v53, %v4836_v18 }
 0x40d   : > { %20185 = vst [vmem:[#allocation74_spill] sm:$0xff] %v16339_v1  ;;  %v16350_v37 = vmax.f32 %v3045_v25, %v3462_v4  ;;  %8114 = vmatprep.mubr.f32.mxu1 %v16339_v1  ;;  %vm20188_vm3 = vcmp.eq.s32.totalorder %v20187_v44, 1  ;;  %vm20190_vm15 = vcmp.eq.s32.totalorder %v20189_v14, 1  ;;  %v5032_v25 = vsel %vm2107_vm7, %v5004_v31, %v5005_v51  ;;  %v20191_v4 = vld [vmem:[#allocation79_spill] sm:$0xff] }
 0x40e   : > { %v4751_v32 = vsel %vm20188_vm3, %v4694_v24, -inf  ;;  %v4920_v46 = vsel %vm20190_vm15, %v4863_v43, -inf  ;;  %v5201_v15 = vsel %vm2265_vm4, %v5173_v5, %v5174_v57  ;;  %vm20192_vm9 = vcmp.eq.s32.totalorder %v20191_v4, 1  ;;  %v20194_v43 = vld [vmem:[#allocation69_spill] sm:$0xff] }
 0x40f   : > { %v4793_v53 = vmax.f32 %v16095_v28, %v4751_v32  ;;  %v5089_v40 = vsel %vm20192_vm9, %v5032_v25, -inf  ;;  %v5258_v1 = vsel %vm19059_vm0, %v5201_v15, -inf  ;;  %v20193_v44 = vrot.slane %v20162_v48, 2  ;;  %v16385_v15 = vpop.permute.xlu1 %3811 }
 0x410   : > { %vm19061_vm3 = vcmp.eq.s32.totalorder %v16337_v13, 1  ;;  %v19058_v31 = vrot.slane %v20194_v43, 6  ;;  %vm3411_vm15 = vcmp.eq.s32.totalorder %v16357_v30, 1  ;;  %20195 = vst [vmem:[#allocation179_spill] sm:$0xff] %v16385_v15  ;;  %v4036_v54 = vrot.slane %v20194_v43, 2 }
 0x411   : > { %v4056_v24 = vsel %vm2265_vm4, %v4034_v17, %v20193_v44  ;;  %v4962_v5 = vmax.f32 %v4793_v53, %v4920_v46  ;;  %v20196_v17 = vmax.f32 %v16239_v45, %v16274_v21  ;;  %v20197_v46 = vrot.slane %v20194_v43, 7 }
 0x412   : > { %v4399_v28 = vsel %vm19061_vm3, %v4056_v24, -inf  ;;  %v2647_v14 = vsel %vm1791_vm6, %v2629_v29, %v19058_v31  ;;  %v19062_v24 = vrot.slane %v16233_v8, 1  ;;  %v20198_v21 = vrot.slane %v16152_v3, 6  ;;  %v16409_v29 = vpop.permute.xlu0 %3808  ;;  %v20203_v31 = vld [vmem:[#allocation168_spill] sm:$0xff] }
 0x413   : > { %v16390_v44 = vmax.f32 %v20196_v17, %v4399_v28  ;;  %v3116_v53 = vsel %vm1949_vm12, %v3098_v39, %v20197_v46  ;;  %v5131_v25 = vmax.f32 %v4962_v5, %v5089_v40  ;;  %v2994_v32 = vsel %vm2942_vm13, %v2647_v14, -inf  ;;  %v20200_v5 = vld [vmem:[#allocation43_spill] sm:$0xff] }
 0x414   : > { %v3463_v45 = vsel %vm3411_vm15, %v3116_v53, -inf  ;;  %v4693_v28 = vsel %vm1791_vm6, %v4667_v20, %v20198_v21  ;;  %v20199_v39 = vmax.f32 %v16187_v0, %v16211_v41  ;;  %v3046_v40 = vmax.f32 %v20194_v43, %v2994_v32 }
 0x415   : > { %vm20201_vm9 = vcmp.eq.s32.totalorder %v20200_v5, 1  ;;  %v20202_v46 = vrot.slane %v16152_v3, 7  ;;  %7967 = vmatmul.mubr.f32.gmra.mrb[86].mxu0 %v16390_v44  ;;  %v16425_v20 = vmax.f32 %v5131_v25, %v5258_v1  ;;  %vm20204_vm0 = vcmp.eq.s32.totalorder %v20203_v31, 1  ;;  %v6731_v5 = vld [vmem:[#allocation5 + $0x1b8] sm:$0xff] }
 0x416   : > { %v16415_v17 = vmax.f32 %v20199_v39, %v16390_v44  ;;  %v4752_v14 = vsel %vm20201_vm9, %v4693_v28, -inf  ;;  %v5031_v32 = vsel %vm2107_vm7, %v5005_v51, %v19062_v24  ;;  %v20205_v28 = vld [vmem:[#allocation117_spill] sm:$0xff]  ;;  %vm19084_vm9 = vcmp.eq.s32.totalorder %v20206_v11, 1  ;;  %v16464_v58 = vpop.permute.xlu0 %3345  ;;  %v20225_v11 = vld [vmem:[#allocation167_spill] sm:$0xff] }
 0x417   : > { %v4862_v53 = vsel %vm1949_vm12, %v4836_v18, %v20202_v46  ;;  %v4794_v21 = vmax.f32 %v16152_v3, %v4752_v14  ;;  %8001 = vmatprep.mubr.f32.mxu0 %v20205_v28  ;;  %v6730_v39 = vld [vmem:[#allocation5 + $0x1b0] sm:$0xff]  ;;  %v16436_v18 = vmax.f32 %v3046_v40, %v3463_v45  ;;  %v5090_v1 = vsel %vm19066_vm10, %v5031_v32, -inf  ;;  %8115 = vmatmul.mubr.f32.gmra.mrb[18].mxu1 %v16425_v20  ;;  %v16446_v28 = vpop.permute.xlu1 %4277 }
 0x418   : > { %v4921_v0 = vsel %vm20204_vm0, %v4862_v53, -inf  ;;  %v5175_v25 = vrot.slane %v16233_v8, 2  ;;  %v3567_v14 = vrot.slane %v20194_v43, 1  ;;  %v20207_v53 = vld [vmem:[#allocation72_spill] sm:$0xff]  ;;  %vm19067_vm0 = vcmp.eq.s32.totalorder %v16385_v15, 1  ;;  %20211 = vst [vmem:[#allocation55_spill] sm:$0xff] %v16464_v58 }
 0x419   : > { %v4963_v46 = vmax.f32 %v4794_v21, %v4921_v0  ;;  %vm3879_vm3 = vcmp.eq.s32.totalorder %v16409_v29, 1  ;;  %v20208_v40 = vrot.slane %v20162_v48, 1  ;;  %v8349_v24 = vpack.c.bf16 %v6731_v5, %v6730_v39  ;;  %v20209_v21 = vld [vmem:[#allocation114_spill] sm:$0xff] }
 0x41a   : > { %v5200_v45 = vsel %vm2265_vm4, %v5174_v57, %v5175_v25  ;;  %8002 = vmatmul.mubr.f32.vlgmr.msra.gmra.mrb[56].mxu0 %v20209_v21  ;;  %v20210_v31 = vrot.slane %v20207_v53, 1  ;;  %vm19073_vm10 = vcmp.eq.s32.totalorder %v16464_v58, 1  ;;  %v20214_v21 = vld [vmem:[#allocation35_spill] sm:$0xff]  ;;  %v20223_v15 = vrot.slane %v16345_v34, 1 }
 0x41b   : > { %v3586_v32 = vsel %vm2107_vm7, %v20208_v40, %v3567_v14  ;;  %v5132_v0 = vmax.f32 %v4963_v46, %v5090_v1  ;;  %v5259_v51 = vsel %vm19065_vm1, %v5200_v45, -inf  ;;  %v20212_v40 = vld [vmem:[#allocation84_spill] sm:$0xff]  ;;  %8350 = vmatprep.subr.bf16.mxu1 %v8349_v24  ;;  %v20213_v1 = vrot.slane %v20162_v48, 2 }
 0x41c   : > { %v3585_v4 = vsel %vm2107_vm7, %v3567_v14, %v20210_v31  ;;  %v3931_v57 = vsel %vm3879_vm3, %v3586_v32, -inf  ;;  %8004 = vmatprep.mubr.f32.mxu0 %v20212_v40  ;;  %vm19069_vm1 = vcmp.eq.s32.totalorder %v16446_v28, 1  ;;  %8352 = vmatpush3.bf16.msra.mxu1 %v8349_v24  ;;  %v2631_v48 = vrot.slane %v20207_v53, 6 }
 0x41d   : > { %v3932_v5 = vsel %vm19067_vm0, %v3585_v4, -inf  ;;  %v3983_v39 = vmax.f32 %v16350_v37, %v3931_v57  ;;  %v4055_v46 = vsel %vm2265_vm4, %v20213_v1, %v4036_v54  ;;  %v16475_v31 = vmax.f32 %v5132_v0, %v5259_v51  ;;  %v20215_v0 = vld [vmem:[#allocation12_spill] sm:$0xff] }
 0x41e   : > { %v3984_v14 = vmax.f32 %v16436_v18, %v3932_v5  ;;  %v4400_v45 = vsel %vm19069_vm1, %v4055_v46, -inf  ;;  %v4496_v4 = vmax.f32 %v16133_v12, %v15785_v33  ;;  %v3100_v32 = vrot.slane %v20207_v53, 7  ;;  %8005 = vmatmul.mubr.f32.gmra.mrb[58].mxu0 %v20214_v21 }
 0x41f   : > { %v16482_v37 = vmax.f32 %v3983_v39, %v4400_v45  ;;  %8117 = vmatprep.mubr.f32.mxu1 %v16475_v31  ;;  %v4669_v18 = vrot.slane %v16233_v8, 6  ;;  %v4838_v51 = vrot.slane %v16233_v8, 7  ;;  %vm19079_vm0 = vcmp.eq.s32.totalorder %v20215_v0, 1 }
 0x420   : > { %v4540_v24 = vmax.f32 %v4496_v4, %v15919_v36  ;;  %v20216_v57 = vrot.slane %v20194_v43, 6  ;;  %v20217_v5 = vrot.slane %v20194_v43, 7  ;;  %v5176_v1 = vrot.slane %v16345_v34, 2 }
 0x421   : > { %v20218_v33 = vrot.slane %v16152_v3, 6  ;;  %vm20221_vm1 = vcmp.eq.s32.totalorder %v20220_v27, 1  ;;  %v20227_v38 = vrot.slane %v20207_v53, 2 }
 0x422   : > { %v2646_v40 = vsel %vm1791_vm6, %v20216_v57, %v2631_v48  ;;  %v3115_v39 = vsel %vm1949_vm12, %v20217_v5, %v3100_v32  ;;  %v4584_v45 = vmax.f32 %v4540_v24, %v16324_v56  ;;  %v16513_v57 = vpop.permute.xlu1 %4280  ;;  %v20222_v24 = vrot.slane %v16152_v3, 7 }
 0x423   : > { %v2995_v4 = vsel %vm19084_vm9, %v2646_v40, -inf  ;;  %v3464_v21 = vsel %vm19073_vm10, %v3115_v39, -inf  ;;  %v4692_v43 = vsel %vm1791_vm6, %v20218_v33, %v4669_v18  ;;  %20219 = vst [vmem:[#allocation190_spill] sm:$0xff] %v16513_v57  ;;  %v20224_v39 = vrot.slane %v16233_v8, 1 }
 0x424   : > { %v3047_v5 = vmax.f32 %v20207_v53, %v2995_v4  ;;  %v4753_v46 = vsel %vm20221_vm1, %v4692_v43, -inf  ;;  %v4861_v40 = vsel %vm1949_vm12, %v20222_v24, %v4838_v51  ;;  %v16529_v33 = vmax.f32 %v4584_v45, %v16482_v37  ;;  %v16545_v45 = vpop.permute.xlu0 %3348 }
 0x425   : > { %v5030_v58 = vsel %vm2107_vm7, %v20224_v39, %v20223_v15  ;;  %v4795_v4 = vmax.f32 %v16233_v8, %v4753_v46  ;;  %vm20226_vm10 = vcmp.eq.s32.totalorder %v20225_v11, 1  ;;  %v5199_v24 = vsel %vm2265_vm4, %v5175_v25, %v5176_v1  ;;  %20228 = vst [vmem:[#allocation186_spill] sm:$0xff] %v16545_v45  ;;  %v6732_v8 = vld [vmem:[#allocation5 + $0x1c0] sm:$0xff]  ;;  %v6733_v46 = vld [vmem:[#allocation5 + $0x1c8] sm:$0xff] }
 0x426   : > { %v4922_v43 = vsel %vm20226_vm10, %v4861_v40, -inf  ;;  %v5091_v3 = vsel %vm19076_vm8, %v5030_v58, -inf  ;;  %v16536_v27 = vmax.f32 %v3047_v5, %v3464_v21  ;;  %v4054_v15 = vsel %vm2265_vm4, %v4036_v54, %v20227_v38  ;;  %v20230_v38 = vld [vmem:[#allocation71_spill] sm:$0xff]  ;;  %v20232_v40 = vld [vmem:[#allocation80_spill] sm:$0xff] }
 0x427   : > { %vm19083_vm1 = vcmp.eq.s32.totalorder %v16513_v57, 1  ;;  %v4964_v21 = vmax.f32 %v4795_v4, %v4922_v43  ;;  %vm20229_vm10 = vcmp.eq.s32.totalorder %v15797_v59, 1  ;;  %v4497_v54 = vmax.f32 %v16211_v41, %v15910_v55  ;;  %v16560_v4 = vpop.permute.xlu1 %3817 }
 0x428   : > { %v5260_v5 = vsel %vm20229_vm10, %v5199_v24, -inf  ;;  %v4401_v25 = vsel %vm19083_vm1, %v4054_v15, -inf  ;;  %v2632_v39 = vrot.slane %v20230_v38, 6  ;;  %v3101_v9 = vrot.slane %v20230_v38, 7  ;;  %20231 = vst [vmem:[#allocation68_spill] sm:$0xff] %v16560_v4 }
 0x429   : > { %v5133_v11 = vmax.f32 %v4964_v21, %v5091_v3  ;;  %v16557_v52 = vmax.f32 %v3984_v14, %v4401_v25  ;;  %vm19077_vm8 = vcmp.eq.s32.totalorder %v16545_v45, 1  ;;  %v8353_v58 = vpack.c.bf16 %v6733_v46, %v6732_v8  ;;  %v20233_v25 = vld [vmem:[#allocation48_spill] sm:$0xff] }
 0x42a   : > { %v4541_v43 = vmax.f32 %v4497_v54, %v16076_v61  ;;  %v2645_v24 = vsel %vm1791_vm6, %v2631_v48, %v2632_v39  ;;  %v3114_v55 = vsel %vm1949_vm12, %v3100_v32, %v3101_v9  ;;  %v19078_v15 = vrot.slane %v16345_v34, 6  ;;  %v20238_v45 = vld [vmem:[#allocation128_spill] sm:$0xff] }
 0x42b   : > { %vm19092_vm10 = vcmp.eq.s32.totalorder %v20232_v40, 1  ;;  %v16569_v3 = vmax.f32 %v5133_v11, %v5260_v5  ;;  %v2996_v14 = vsel %vm19079_vm0, %v2645_v24, -inf  ;;  %v3465_v8 = vsel %vm19077_vm8, %v3114_v55, -inf  ;;  %8354 = vmatprep.subr.bf16.mxu1 %v8353_v58  ;;  %v16583_v5 = vpop.permute.xlu0 %3814 }
 0x42c   : > { %v4839_v46 = vrot.slane %v16345_v34, 7  ;;  %v4585_v48 = vmax.f32 %v4541_v43, %v16390_v44  ;;  %v3048_v21 = vmax.f32 %v20230_v38, %v2996_v14  ;;  %v4691_v32 = vsel %vm1791_vm6, %v4669_v18, %v19078_v15  ;;  %8356 = vmatpush3.bf16.msra.mxu1 %v8353_v58  ;;  %v20235_v15 = vld [vmem:[#allocation172_spill] sm:$0xff] }
 0x42d   : > { %v5008_v11 = vrot.slane %v16415_v17, 1  ;;  %8118 = vmatmul.mubr.f32.gmra.mrb[20].mxu1 %v16569_v3  ;;  %vm20234_vm8 = vcmp.eq.s32.totalorder %v20233_v25, 1  ;;  %v5177_v24 = vrot.slane %v16415_v17, 2  ;;  %v3569_v55 = vrot.slane %v20230_v38, 1 }
 0x42e   : > { %v4754_v54 = vsel %vm20234_vm8, %v4691_v32, -inf  ;;  %v4860_v43 = vsel %vm1949_vm12, %v4838_v51, %v4839_v46  ;;  %v16593_v14 = vmax.f32 %v4585_v48, %v16557_v52  ;;  %v16595_v18 = vmax.f32 %v3048_v21, %v3465_v8  ;;  %v16608_v48 = vpop.permute.xlu1 %3351 }
 0x42f   : > { %v4796_v58 = vmax.f32 %v16345_v34, %v4754_v54  ;;  %vm20236_vm0 = vcmp.eq.s32.totalorder %v20235_v15, 1  ;;  %v20237_v25 = vrot.slane %v16345_v34, 1  ;;  %v5198_v51 = vsel %vm2265_vm4, %v5176_v1, %v5177_v24  ;;  %20239 = vst [vmem:[#allocation183_spill] sm:$0xff] %v16608_v48 }
 0x430   : > { %v4923_v59 = vsel %vm20236_vm0, %v4860_v43, -inf  ;;  %v3570_v0 = vrot.slane %v20238_v45, 1  ;;  %vm19090_vm8 = vcmp.eq.s32.totalorder %v16560_v4, 1  ;;  %vm20240_vm1 = vcmp.eq.s32.totalorder %v15761_v2, 1  ;;  %v6735_v2 = vld [vmem:[#allocation5 + $0x1d8] sm:$0xff] }
 0x431   : > { %v5029_v32 = vsel %vm2107_vm7, %v20237_v25, %v5008_v11  ;;  %v4965_v8 = vmax.f32 %v4796_v58, %v4923_v59  ;;  %vm20241_vm0 = vcmp.eq.s32.totalorder %v15860_v26, 1  ;;  %v20242_v43 = vrot.slane %v20207_v53, 1  ;;  %v16628_v26 = vpop.permute.xlu0 %4283 }
 0x432   : > { %v5092_v21 = vsel %vm20240_vm1, %v5029_v32, -inf  ;;  %v5261_v54 = vsel %vm20241_vm0, %v5198_v51, -inf  ;;  %v3583_v1 = vsel %vm2107_vm7, %v3569_v55, %v3570_v0  ;;  %vm19096_vm9 = vcmp.eq.s32.totalorder %v16583_v5, 1 }
 0x433   : > { %v3584_v25 = vsel %vm2107_vm7, %v20242_v43, %v3569_v55  ;;  %v19089_v15 = vrot.slane %v20238_v45, 6  ;;  %v19088_v59 = vrot.slane %v20238_v45, 7  ;;  %v5134_v58 = vmax.f32 %v4965_v8, %v5092_v21  ;;  %v6734_v43 = vld [vmem:[#allocation5 + $0x1d0] sm:$0xff] }
 0x434   : > { %v3934_v32 = vsel %vm19090_vm8, %v3583_v1, -inf  ;;  %v3933_v51 = vsel %vm19096_vm9, %v3584_v25, -inf  ;;  %vm19091_vm1 = vcmp.eq.s32.totalorder %v16608_v48, 1  ;;  %vm19094_vm0 = vcmp.eq.s32.totalorder %v16628_v26, 1  ;;  %v20251_v48 = vld [vmem:[#allocation21_spill] sm:$0xff] }
 0x435   : > { %v3986_v55 = vmax.f32 %v16595_v18, %v3934_v32  ;;  %v3985_v57 = vmax.f32 %v16536_v27, %v3933_v51  ;;  %v2644_v8 = vsel %vm1791_vm6, %v2632_v39, %v19089_v15  ;;  %v3113_v21 = vsel %vm1949_vm12, %v3101_v9, %v19088_v59  ;;  %v20245_v15 = vld [vmem:[#allocation40_spill] sm:$0xff] }
 0x436   : > { %v16640_v25 = vmax.f32 %v5134_v58, %v5261_v54  ;;  %v2997_v1 = vsel %vm19092_vm10, %v2644_v8, -inf  ;;  %v3466_v18 = vsel %vm19091_vm1, %v3113_v21, -inf  ;;  %v4038_v27 = vrot.slane %v20230_v38, 2 }
 0x437   : > { %v3049_v32 = vmax.f32 %v20238_v45, %v2997_v1  ;;  %v4498_v39 = vmax.f32 %v16324_v56, %v15919_v36  ;;  %v8357_v51 = vpack.c.bf16 %v6735_v2, %v6734_v43  ;;  %v20243_v9 = vrot.slane %v20207_v53, 2  ;;  %v16665_v53 = vpop.permute.xlu1 %3820 }
 0x438   : > { %8120 = vmatprep.mubr.f32.mxu1 %v16640_v25  ;;  %v4671_v58 = vrot.slane %v16415_v17, 6  ;;  %v4840_v8 = vrot.slane %v16415_v17, 7  ;;  %v5009_v38 = vrot.slane %v16529_v33, 1  ;;  %v5178_v2 = vrot.slane %v16529_v33, 2 }
 0x439   : > { %v4053_v54 = vsel %vm2265_vm4, %v20243_v9, %v4038_v27  ;;  %v16659_v21 = vmax.f32 %v3049_v32, %v3466_v18  ;;  %v4542_v36 = vmax.f32 %v4498_v39, %v16133_v12  ;;  %8358 = vmatprep.subr.bf16.mxu1 %v8357_v51  ;;  %v20244_v9 = vrot.slane %v16345_v34, 6  ;;  %v16677_v39 = vpop.permute.xlu0 %4286 }
 0x43a   : > { %v4402_v1 = vsel %vm19094_vm0, %v4053_v54, -inf  ;;  %v4859_v18 = vsel %vm1949_vm12, %v4839_v46, %v4840_v8  ;;  %v5028_v32 = vsel %vm2107_vm7, %v5008_v11, %v5009_v38  ;;  %8360 = vmatpush3.bf16.msra.mxu1 %v8357_v51  ;;  %vm20246_vm8 = vcmp.eq.s32.totalorder %v20245_v15, 1  ;;  %v20250_v11 = vld [vmem:[#allocation73_spill] sm:$0xff] }
 0x43b   : > { %v16667_v43 = vmax.f32 %v3985_v57, %v4402_v1  ;;  %v4690_v59 = vsel %vm1791_vm6, %v20244_v9, %v4671_v58  ;;  %v4586_v54 = vmax.f32 %v4542_v36, %v16482_v37  ;;  %v20247_v1 = vld [vmem:[#allocation171_spill] sm:$0xff]  ;;  %vm20249_vm10 = vcmp.eq.s32.totalorder %v15873_v23, 1 }
 0x43c   : > { %v4755_v57 = vsel %vm20246_vm8, %v4690_v59, -inf  ;;  %vm20248_vm1 = vcmp.eq.s32.totalorder %v20247_v1, 1  ;;  %v5093_v9 = vsel %vm20249_vm10, %v5028_v32, -inf  ;;  %v5197_v46 = vsel %vm2265_vm4, %v5177_v24, %v5178_v2 }
 0x43d   : > { %v4924_v34 = vsel %vm20248_vm1, %v4859_v18, -inf  ;;  %v4797_v4 = vmax.f32 %v16415_v17, %v4755_v57  ;;  %v19099_v51 = vrot.slane %v20250_v11, 1  ;;  %vm3883_vm0 = vcmp.eq.s32.totalorder %v16665_v53, 1 }
 0x43e   : > { %vm2946_vm9 = vcmp.eq.s32.totalorder %v20251_v48, 1  ;;  %v16693_v36 = vmax.f32 %v4586_v54, %v16667_v43  ;;  %v5262_v59 = vsel %vm4343_vm2, %v5197_v46, -inf  ;;  %v4039_v18 = vrot.slane %v20238_v45, 2 }
 0x43f   : > { %vm4351_vm10 = vcmp.eq.s32.totalorder %v16677_v39, 1  ;;  %v4966_v17 = vmax.f32 %v4797_v4, %v4924_v34  ;;  %v3582_v24 = vsel %vm2107_vm7, %v3570_v0, %v19099_v51  ;;  %v4499_v32 = vmax.f32 %v16390_v44, %v16076_v61  ;;  %v20253_v34 = vld [vmem:[#allocation53_spill] sm:$0xff]  ;;  %v20450_v39 = vld [vmem:[#allocation18_spill] sm:$0xff] }
 0x440   : > { %v20252_v57 = vrot.slane %v16529_v33, 6  ;;  %v3935_v19 = vsel %vm3883_vm0, %v3582_v24, -inf  ;;  %v4052_v4 = vsel %vm2265_vm4, %v4038_v27, %v4039_v18  ;;  %vm20254_vm8 = vcmp.eq.s32.totalorder %v20253_v34, 1 }
 0x441   : > { %v5135_v0 = vmax.f32 %v4966_v17, %v5093_v9  ;;  %v3987_v51 = vmax.f32 %v16659_v21, %v3935_v19  ;;  %v4403_v61 = vsel %vm4351_vm10, %v4052_v4, -inf  ;;  %v4543_v1 = vmax.f32 %v4499_v32, %v16211_v41  ;;  %v20256_v9 = vld [vmem:[#allocation112_spill] sm:$0xff]  ;;  %v16735_v4 = vpop.permute.xlu0 %4289 }
 0x442   : > { %v4689_v54 = vsel %vm1791_vm6, %v4671_v58, %v20252_v57  ;;  %v3355_v58 = vpop.permute.xlu1 %3354  ;;  %v16720_v57 = vmax.f32 %v3986_v55, %v4403_v61  ;;  %v20255_v24 = vrot.slane %v16529_v33, 7  ;;  %vm2947_vm1 = vcmp.eq.s32.totalorder %v20256_v9, 1  ;;  %v20257_v17 = vld [vmem:[#allocation176_spill] sm:$0xff]  ;;  %20259 = vst [vmem:[#allocation36_spill] sm:$0xff] %v16735_v4 }
 0x443   : > { %v4756_v23 = vsel %vm20254_vm8, %v4689_v54, -inf  ;;  %v19100_v54 = vrot.slane %v16593_v14, 1  ;;  %v16729_v19 = vmax.f32 %v5135_v0, %v5262_v59  ;;  %v4587_v21 = vmax.f32 %v4543_v1, %v16557_v52 }
 0x444   : > { %v4798_v46 = vmax.f32 %v16529_v33, %v4756_v23  ;;  %v4858_v27 = vsel %vm1949_vm12, %v4840_v8, %v20255_v24  ;;  %vm20258_vm8 = vcmp.eq.s32.totalorder %v20257_v17, 1  ;;  %v19103_v55 = vrot.slane %v16593_v14, 2 }
 0x445   : > { %v4925_v32 = vsel %vm20258_vm8, %v4858_v27, -inf  ;;  %v5027_v8 = vsel %vm2107_vm7, %v5009_v38, %v19100_v54  ;;  %v2634_v61 = vrot.slane %v20250_v11, 6  ;;  %v3103_v59 = vrot.slane %v20250_v11, 7  ;;  %8121 = vmatmul.mubr.f32.gmra.mrb[22].mxu1 %v16729_v19  ;;  %v6736_v54 = vld [vmem:[#allocation5 + $0x1e0] sm:$0xff] }
 0x446   : > { %v4967_v23 = vmax.f32 %v4798_v46, %v4925_v32  ;;  %v16745_v1 = vmax.f32 %v4587_v21, %v16720_v57  ;;  %v5094_v0 = vsel %vm19105_vm11, %v5027_v8, -inf  ;;  %v5196_v46 = vsel %vm2265_vm4, %v5178_v2, %v19103_v55  ;;  %v20262_v55 = vld [vmem:[#allocation134_spill] sm:$0xff] }
 0x447   : > { %vm3415_vm8 = vcmp.eq.s32.totalorder %v3355_v58, 1  ;;  %v5263_v38 = vsel %vm19102_vm14, %v5196_v46, -inf  ;;  %v20260_v27 = vrot.slane %v20238_v45, 6  ;;  %v20261_v21 = vrot.slane %v20238_v45, 7 }
 0x448   : > { %v5136_v24 = vmax.f32 %v4967_v23, %v5094_v0  ;;  %v4040_v23 = vrot.slane %v20250_v11, 2  ;;  %v3358_v0 = vpop.permute.xlu1 %3357  ;;  %vm4352_vm14 = vcmp.eq.s32.totalorder %v16735_v4, 1  ;;  %v4500_v45 = vmax.f32 %v16482_v37, %v16133_v12  ;;  %v6738_v4 = vld [vmem:[#allocation5 + $0x1f0] sm:$0xff] }
 0x449   : > { %v2643_v32 = vsel %vm1791_vm6, %v20260_v27, %v2634_v61  ;;  %v3112_v8 = vsel %vm1949_vm12, %v20261_v21, %v3103_v59  ;;  %v8361_v17 = vpack.c.bf16 %v6737_v35, %v6736_v54  ;;  %v2635_v48 = vrot.slane %v20262_v55, 6 }
 0x44a   : > { %v2998_v2 = vsel %vm2946_vm9, %v2643_v32, -inf  ;;  %v3467_v58 = vsel %vm3415_vm8, %v3112_v8, -inf  ;;  %v16767_v46 = vmax.f32 %v5136_v24, %v5263_v38  ;;  %v4051_v21 = vsel %vm2265_vm4, %v4039_v18, %v4040_v23  ;;  %v3824_v8 = vpop.permute.xlu0 %3823 }
 0x44b   : > { %v3050_v27 = vmax.f32 %v20250_v11, %v2998_v2  ;;  %v3104_v32 = vrot.slane %v20262_v55, 7  ;;  %v4404_v38 = vsel %vm4352_vm14, %v4051_v21, -inf  ;;  %v4544_v2 = vmax.f32 %v4500_v45, %v16324_v56  ;;  %8362 = vmatprep.subr.bf16.mxu1 %v8361_v17 }
 0x44c   : > { %8123 = vmatprep.mubr.f32.mxu1 %v16767_v46  ;;  %vm3416_vm9 = vcmp.eq.s32.totalorder %v3358_v0, 1  ;;  %v16781_v42 = vmax.f32 %v3987_v51, %v4404_v38  ;;  %v2642_v35 = vsel %vm1791_vm6, %v2634_v61, %v2635_v48  ;;  %v19106_v18 = vrot.slane %v20262_v55, 1  ;;  %8364 = vmatpush3.bf16.msra.mxu1 %v8361_v17  ;;  %v20264_v17 = vld [vmem:[#allocation28_spill] sm:$0xff]  ;;  %v20266_v51 = vld [vmem:[#allocation42_spill] sm:$0xff] }
 0x44d   : > { %v3519_v24 = vmax.f32 %v3050_v27, %v3467_v58  ;;  %v3111_v12 = vsel %vm1949_vm12, %v3103_v59, %v3104_v32  ;;  %v4588_v54 = vmax.f32 %v4544_v2, %v16667_v43  ;;  %v2999_v58 = vsel %vm2947_vm1, %v2642_v35, -inf }
 0x44e   : > { %v3468_v27 = vsel %vm3416_vm9, %v3111_v12, -inf  ;;  %vm3884_vm8 = vcmp.eq.s32.totalorder %v3824_v8, 1  ;;  %v3051_v0 = vmax.f32 %v20262_v55, %v2999_v58  ;;  %v20263_v61 = vrot.slane %v20250_v11, 1 }
 0x44f   : > { %v4673_v45 = vrot.slane %v16593_v14, 6  ;;  %vm2948_vm11 = vcmp.eq.s32.totalorder %v20264_v17, 1  ;;  %v16803_v9 = vmax.f32 %v4588_v54, %v16781_v42  ;;  %v4842_v8 = vrot.slane %v16593_v14, 7  ;;  %v20278_v17 = vld [vmem:[#allocation123_spill] sm:$0xff] }
 0x450   : > { %v3581_v59 = vsel %vm2107_vm7, %v20263_v61, %v19106_v18  ;;  %v5011_v38 = vrot.slane %v16693_v36, 1  ;;  %v16807_v2 = vmax.f32 %v3051_v0, %v3468_v27  ;;  %v20265_v11 = vrot.slane %v16529_v33, 6 }
 0x451   : > { %v3936_v21 = vsel %vm3884_vm8, %v3581_v59, -inf  ;;  %v5180_v58 = vrot.slane %v16693_v36, 2  ;;  %v4676_v61 = vrot.slane %v16803_v9, 6  ;;  %vm20267_vm1 = vcmp.eq.s32.totalorder %v20266_v51, 1  ;;  %v3361_v51 = vpop.permute.xlu0 %3360 }
 0x452   : > { %v3988_v35 = vmax.f32 %v3519_v24, %v3936_v21  ;;  %v4688_v12 = vsel %vm1791_vm6, %v20265_v11, %v4673_v45  ;;  %v20268_v18 = vrot.slane %v16529_v33, 7  ;;  %v4293_v24 = vpop.permute.xlu1 %4292  ;;  %v20269_v21 = vld [vmem:[#allocation175_spill] sm:$0xff]  ;;  %v20271_v34 = vrot.slane %v16593_v14, 1 }
 0x453   : > { %v4757_v59 = vsel %vm20267_vm1, %v4688_v12, -inf  ;;  %vm20270_vm9 = vcmp.eq.s32.totalorder %v20269_v21, 1  ;;  %v20272_v54 = vrot.slane %v16593_v14, 2  ;;  %v20273_v33 = vrot.slane %v16745_v1, 6 }
 0x454   : > { %v4857_v27 = vsel %vm1949_vm12, %v20268_v18, %v4842_v8  ;;  %v4799_v0 = vmax.f32 %v16593_v14, %v4757_v59  ;;  %v5026_v15 = vsel %vm2107_vm7, %v20271_v34, %v5011_v38  ;;  %vm20274_vm8 = vcmp.eq.s32.totalorder %v16113_v6, 1 }
 0x455   : > { %v4926_v11 = vsel %vm20270_vm9, %v4857_v27, -inf  ;;  %v5195_v12 = vsel %vm2265_vm4, %v20272_v54, %v5180_v58  ;;  %v4685_v18 = vsel %vm1791_vm6, %v20273_v33, %v4676_v61  ;;  %v5095_v59 = vsel %vm20274_vm8, %v5026_v15, -inf  ;;  %v6739_v33 = vld [vmem:[#allocation5 + $0x1f8] sm:$0xff] }
 0x456   : > { %vm20275_vm1 = vcmp.eq.s32.totalorder %v16158_v60, 1  ;;  %v19110_v21 = vrot.slane %v20262_v55, 2  ;;  %v16844_v14 = vsel %vm2941_vm5, %v4685_v18, -inf  ;;  %v4968_v34 = vmax.f32 %v4799_v0, %v4926_v11  ;;  %v20276_v60 = vld [vmem:[#allocation86_spill] sm:$0xff] }
 0x457   : > { %v5264_v27 = vsel %vm20275_vm1, %v5195_v12, -inf  ;;  %vm4353_vm9 = vcmp.eq.s32.totalorder %v4293_v24, 1  ;;  %v4501_v54 = vmax.f32 %v16557_v52, %v16211_v41  ;;  %v19112_v6 = vrot.slane %v20276_v60, 6 }
 0x458   : > { %v4050_v12 = vsel %vm2265_vm4, %v4040_v23, %v19110_v21  ;;  %v19111_v16 = vrot.slane %v20276_v60, 7  ;;  %v5137_v18 = vmax.f32 %v4968_v34, %v5095_v59  ;;  %vm3417_vm5 = vcmp.eq.s32.totalorder %v3361_v51, 1 }
 0x459   : > { %v4405_v0 = vsel %vm4353_vm9, %v4050_v12, -inf  ;;  %v4545_v24 = vmax.f32 %v4501_v54, %v16390_v44  ;;  %v2641_v11 = vsel %vm1791_vm6, %v2635_v48, %v19112_v6  ;;  %v8365_v21 = vpack.c.bf16 %v6739_v33, %v6738_v4  ;;  %v3827_v6 = vpop.permute.xlu0 %3826 }
 0x45a   : > { %v16857_v41 = vmax.f32 %v3988_v35, %v4405_v0  ;;  %v3110_v23 = vsel %vm1949_vm12, %v3104_v32, %v19111_v16  ;;  %v16867_v15 = vmax.f32 %v5137_v18, %v5264_v27  ;;  %v3000_v51 = vsel %vm2948_vm11, %v2641_v11, -inf }
 0x45b   : > { %v4589_v59 = vmax.f32 %v4545_v24, %v16720_v57  ;;  %v3469_v35 = vsel %vm3417_vm5, %v3110_v23, -inf  ;;  %v3052_v54 = vmax.f32 %v20276_v60, %v3000_v51  ;;  %8366 = vmatprep.subr.bf16.mxu1 %v8365_v21  ;;  %v20277_v48 = vrot.slane %v16693_v36, 6 }
 0x45c   : > { %v4843_v4 = vrot.slane %v16693_v36, 7  ;;  %8124 = vmatmul.mubr.f32.gmra.mrb[24].mxu1 %v16867_v15  ;;  %vm20279_vm11 = vcmp.eq.s32.totalorder %v20278_v17, 1  ;;  %v5012_v12 = vrot.slane %v16745_v1, 1  ;;  %v5181_v18 = vrot.slane %v16745_v1, 2  ;;  %v20362_v17 = vld [vmem:[#allocation103_spill] sm:$0xff] }
 0x45d   : > { %v4687_v32 = vsel %vm1791_vm6, %v4673_v45, %v20277_v48  ;;  %v16882_v27 = vmax.f32 %v4589_v59, %v16857_v41  ;;  %v16888_v0 = vmax.f32 %v3052_v54, %v3469_v35  ;;  %v5343_v11 = vmax.f32 %v16767_v46, %v16475_v31  ;;  %8368 = vmatpush3.bf16.msra.mxu1 %v8365_v21  ;;  %v3830_v21 = vpop.permute.xlu1 %3829 }
 0x45e   : > { %v4758_v33 = vsel %vm20279_vm11, %v4687_v32, -inf  ;;  %v4856_v45 = vsel %vm1949_vm12, %v4842_v8, %v4843_v4  ;;  %v20280_v32 = vld [vmem:[#allocation180_spill] sm:$0xff]  ;;  %v5025_v54 = vsel %vm2107_vm7, %v5011_v38, %v5012_v12  ;;  %v5194_v8 = vsel %vm2265_vm4, %v5180_v58, %v5181_v18 }
 0x45f   : > { %v4800_v24 = vmax.f32 %v16693_v36, %v4758_v33  ;;  %v19113_v23 = vrot.slane %v16882_v27, 6  ;;  %v19118_v59 = vrot.slane %v16882_v27, 7  ;;  %vm20281_vm8 = vcmp.eq.s32.totalorder %v20280_v32, 1 }
 0x460   : > { %v4927_v35 = vsel %vm20281_vm8, %v4856_v45, -inf  ;;  %v16906_v33 = vmax.f32 %v5343_v11, %v16640_v25  ;;  %v20282_v16 = vrot.slane %v16803_v9, 7  ;;  %vm20283_vm1 = vcmp.eq.s32.totalorder %v16245_v7, 1  ;;  %v20361_v7 = vld [vmem:[#allocation15_spill] sm:$0xff] }
 0x461   : > { %v4684_v34 = vsel %vm1791_vm6, %v4676_v61, %v19113_v23  ;;  %v4969_v38 = vmax.f32 %v4800_v24, %v4927_v35  ;;  %v5096_v58 = vsel %vm20283_vm1, %v5025_v54, -inf  ;;  %vm20284_vm9 = vcmp.eq.s32.totalorder %v16285_v62, 1 }
 0x462   : > { %v4853_v45 = vsel %vm1949_vm12, %v20282_v16, %v19118_v59  ;;  %v4761_v11 = vsel %vm2942_vm13, %v4684_v34, -inf  ;;  %v5265_v61 = vsel %vm20284_vm9, %v5194_v8, -inf  ;;  %v3573_v23 = vrot.slane %v20276_v60, 1  ;;  %v20285_v16 = vld [vmem:[#allocation137_spill] sm:$0xff] }
 0x463   : > { %v4930_v48 = vsel %vm3411_vm15, %v4853_v45, -inf  ;;  %v4803_v51 = vmax.f32 %v16882_v27, %v4761_v11  ;;  %v5138_v32 = vmax.f32 %v4969_v38, %v5096_v58  ;;  %v19117_v24 = vrot.slane %v20285_v16, 1  ;;  %v20337_v59 = vld [vmem:[#allocation45_spill] sm:$0xff] }
 0x464   : > { %vm3886_vm5 = vcmp.eq.s32.totalorder %v3830_v21, 1  ;;  %v20286_v35 = vrot.slane %v20262_v55, 1  ;;  %vm3885_vm13 = vcmp.eq.s32.totalorder %v3827_v6, 1  ;;  %v20287_v30 = vrot.slane %v16745_v1, 6 }
 0x465   : > { %v20288_v34 = vrot.slane %v16693_v36, 6  ;;  %v4844_v8 = vrot.slane %v16745_v1, 7  ;;  %v16940_v45 = vmax.f32 %v4803_v51, %v4930_v48  ;;  %v16942_v38 = vmax.f32 %v5138_v32, %v5265_v61  ;;  %v20291_v48 = vld [vmem:[#allocation61_spill] sm:$0xff] }
 0x466   : > { %v3580_v49 = vsel %vm2107_vm7, %v20286_v35, %v3573_v23  ;;  %v3579_v21 = vsel %vm2107_vm7, %v3573_v23, %v19117_v24  ;;  %vm20289_vm15 = vcmp.eq.s32.totalorder %v20136_v10, 1  ;;  %v20290_v35 = vrot.slane %v16803_v9, 7  ;;  %v3364_v23 = vpop.permute.xlu1 %3363  ;;  %v20319_v24 = vld [vmem:[#allocation129_spill] sm:$0xff] }
 0x467   : > { %v4686_v54 = vsel %vm1791_vm6, %v20288_v34, %v20287_v30  ;;  %v3937_v58 = vsel %vm3885_vm13, %v3580_v49, -inf  ;;  %v16948_v6 = vsel %vm3886_vm5, %v3579_v21, -inf  ;;  %vm2949_vm11 = vcmp.eq.s32.totalorder %v20291_v48, 1  ;;  %8126 = vmatprep.mubr.f32.mxu1 %v16942_v38 }
 0x468   : > { %v3989_v11 = vmax.f32 %v16807_v2, %v3937_v58  ;;  %v4759_v36 = vsel %vm20289_vm15, %v4686_v54, -inf  ;;  %v4854_v51 = vsel %vm1949_vm12, %v4844_v8, %v20290_v35  ;;  %v5345_v32 = vmax.f32 %v16942_v38, %v16640_v25 }
 0x469   : > { %v4801_v61 = vmax.f32 %v16745_v1, %v4759_v36  ;;  %v4855_v49 = vsel %vm1949_vm12, %v4843_v4, %v4844_v8  ;;  %vm20292_vm8 = vcmp.eq.s32.totalorder %v16300_v63, 1  ;;  %v5013_v34 = vrot.slane %v16803_v9, 1 }
 0x46a   : > { %v4929_v30 = vsel %vm20292_vm8, %v4854_v51, -inf  ;;  %v5182_v54 = vrot.slane %v16803_v9, 2  ;;  %v16973_v21 = vmax.f32 %v5345_v32, %v16767_v46  ;;  %vm20294_vm1 = vcmp.eq.s32.totalorder %v16177_v47, 1  ;;  %v20351_v47 = vld [vmem:[#allocation190_spill] sm:$0xff] }
 0x46b   : > { %v4928_v58 = vsel %vm20294_vm1, %v4855_v49, -inf  ;;  %v20295_v35 = vmax.f32 %v16803_v9, %v16844_v14  ;;  %v5342_v4 = vmax.f32 %v16729_v19, %v16425_v20  ;;  %v20296_v63 = vrot.slane %v16882_v27, 1 }
 0x46c   : > { %20293 = vst [vmem:[#allocation125_spill] sm:$0xff] %v16973_v21  ;;  %v4970_v8 = vmax.f32 %v4801_v61, %v4928_v58  ;;  %v5024_v51 = vsel %vm2107_vm7, %v5012_v12, %v5013_v34  ;;  %v20297_v32 = vrot.slane %v16882_v27, 2  ;;  %vm20298_vm9 = vcmp.eq.s32.totalorder %v16225_v50, 1 }
 0x46d   : > { %v4971_v1 = vmax.f32 %v20295_v35, %v4929_v30  ;;  %v5023_v36 = vsel %vm2107_vm7, %v5013_v34, %v20296_v63  ;;  %v5097_v9 = vsel %vm20298_vm9, %v5024_v51, -inf  ;;  %v5193_v61 = vsel %vm2265_vm4, %v5181_v18, %v5182_v54  ;;  %v4296_v63 = vpop.permute.xlu0 %4295 }
 0x46e   : > { %v5192_v49 = vsel %vm2265_vm4, %v5182_v54, %v20297_v32  ;;  %v5098_v14 = vsel %vm3879_vm3, %v5023_v36, -inf  ;;  %vm20299_vm5 = vcmp.eq.s32.totalorder %v16446_v28, 1  ;;  %v5139_v58 = vmax.f32 %v4970_v8, %v5097_v9 }
 0x46f   : > { %v5267_v30 = vsel %vm20299_vm5, %v5192_v49, -inf  ;;  %v5140_v12 = vmax.f32 %v4971_v1, %v5098_v14  ;;  %vm20300_vm13 = vcmp.eq.s32.totalorder %v16337_v13, 1  ;;  %v5344_v35 = vmax.f32 %v16867_v15, %v16569_v3  ;;  %v20338_v13 = vld [vmem:[#allocation130_spill] sm:$0xff] }
 0x470   : > { %v5266_v34 = vsel %vm20300_vm13, %v5193_v61, -inf  ;;  %v5376_v51 = vmax.f32 %v5342_v4, %v16569_v3  ;;  %v19115_v29 = vrot.slane %v20285_v16, 6  ;;  %v19114_v36 = vrot.slane %v20285_v16, 7 }
 0x471   : > { %vm3418_vm3 = vcmp.eq.s32.totalorder %v3364_v23, 1  ;;  %v17007_v18 = vmax.f32 %v5139_v58, %v5266_v34  ;;  %v17009_v28 = vmax.f32 %v5140_v12, %v5267_v30  ;;  %v17012_v54 = vmax.f32 %v5344_v35, %v16729_v19 }
 0x472   : > { %v19116_v1 = vrot.slane %v20276_v60, 2  ;;  %v5410_v8 = vmax.f32 %v5376_v51, %v16867_v15  ;;  %v20303_v4 = vrot.slane %v20276_v60, 6  ;;  %v20304_v23 = vrot.slane %v20276_v60, 7 }
 0x473   : > { %20301 = vst [vmem:[#allocation57_spill] sm:$0xff] %v17007_v18  ;;  %20302 = vst [vmem:[#allocation189_spill] sm:$0xff] %v17012_v54  ;;  %vm4354_vm15 = vcmp.eq.s32.totalorder %v4296_v63, 1  ;;  %v5346_v9 = vmax.f32 %v17007_v18, %v16729_v19  ;;  %8127 = vmatmul.mubr.f32.gmra.mrb[26].mxu1 %v17007_v18  ;;  %v20305_v34 = vrot.slane %v20262_v55, 2  ;;  %v4502_v63 = vmax.f32 %v16667_v43, %v16324_v56  ;;  %v20366_v54 = vld [vmem:[#allocation185_spill] sm:$0xff] }
 0x474   : > { %v2640_v32 = vsel %vm1791_vm6, %v20303_v4, %v19115_v29  ;;  %v3109_v49 = vsel %vm1949_vm12, %v20304_v23, %v19114_v36  ;;  %v17036_v58 = vmax.f32 %v5410_v8, %v17007_v18  ;;  %v20307_v8 = vmax.f32 %v16781_v42, %v16482_v37  ;;  %v20309_v23 = vld [vmem:[#allocation98_spill] sm:$0xff] }
 0x475   : > { %v3001_v61 = vsel %vm2949_vm11, %v2640_v32, -inf  ;;  %v3470_v30 = vsel %vm3418_vm3, %v3109_v49, -inf  ;;  %v4049_v35 = vsel %vm2265_vm4, %v20305_v34, %v19116_v1  ;;  %v17048_v51 = vmax.f32 %v5346_v9, %v16867_v15  ;;  %v20308_v32 = vld [vmem:[#allocation62_spill] sm:$0xff]  ;;  %v20312_v9 = vld [vmem:[#allocation27_spill] sm:$0xff]  ;;  %v20318_v1 = vld [vmem:[#allocation16_spill] sm:$0xff] }
 0x476   : > { %v3053_v12 = vmax.f32 %v20285_v16, %v3001_v61  ;;  %v4406_v48 = vsel %vm4354_vm15, %v4049_v35, -inf  ;;  %v17054_v4 = vmax.f32 %v20307_v8, %v16667_v43  ;;  %v20310_v49 = vld [vmem:[#allocation70_spill] sm:$0xff]  ;;  %v4546_v56 = vmax.f32 %v4502_v63, %v16482_v37  ;;  %v20314_v35 = vld [vmem:[#allocation195_spill] sm:$0xff]  ;;  %v20316_v43 = vld [vmem:[#allocation184_spill] sm:$0xff] }
 0x477   : > { %20306 = vst [vmem:[#allocation49_spill] sm:$0xff] %v17048_v51  ;;  %v20311_v55 = vmax.f32 %v20309_v23, %v20310_v49  ;;  %v17062_v34 = vmax.f32 %v3989_v11, %v4406_v48  ;;  %v20313_v36 = vrot.slane %v20312_v9, 1  ;;  %v20315_v29 = vrot.slane %v20314_v35, 1  ;;  %v20325_v49 = vld [vmem:[#allocation191_spill] sm:$0xff] }
 0x478   : > { %v17060_v14 = vmax.f32 %v3053_v12, %v3470_v30  ;;  %vm20317_vm11 = vcmp.eq.s32.totalorder %v20316_v43, 1  ;;  %v5106_v23 = vmax.f32 %v20319_v24, %v20318_v1  ;;  %v20321_v11 = vrot.slane %v20312_v9, 2  ;;  %v3833_v1 = vpop.permute.xlu1 %3832  ;;  %v20329_v9 = vld [vmem:[#allocation60_spill] sm:$0xff] }
 0x479   : > { %v4938_v61 = vmax.f32 %v20311_v55, %v20308_v32  ;;  %v5058_v2 = vsel %vm2107_vm7, %v20315_v29, %v20313_v36  ;;  %v20320_v32 = vld [vmem:[#allocation104_spill] sm:$0xff]  ;;  %v20322_v12 = vrot.slane %v20314_v35, 2  ;;  %v4590_v63 = vmax.f32 %v4546_v56, %v16781_v42  ;;  %v20327_v55 = vld [vmem:[#allocation194_spill] sm:$0xff] }
 0x47a   : > { %v5063_v8 = vsel %vm20317_vm11, %v5058_v2, -inf  ;;  %v20323_v36 = vld [vmem:[#allocation88_spill] sm:$0xff]  ;;  %vm20326_vm8 = vcmp.eq.s32.totalorder %v20325_v49, 1  ;;  %vm20328_vm1 = vcmp.eq.s32.totalorder %v20327_v55, 1  ;;  %v20336_v49 = vld [vmem:[#allocation65_spill] sm:$0xff]  ;;  %vm3887_vm5 = vcmp.eq.s32.totalorder %v3833_v1, 1 }
 0x47b   : > { %v5107_v30 = vmax.f32 %v4938_v61, %v20320_v32  ;;  %v5227_v37 = vsel %vm2265_vm4, %v20322_v12, %v20321_v11  ;;  %v5105_v48 = vmax.f32 %v20323_v36, %v5063_v8  ;;  %v20324_v2 = vld [vmem:[#allocation200_spill] sm:$0xff]  ;;  %v20332_v32 = vld [vmem:[#allocation39_spill] sm:$0xff]  ;;  %v20333_v11 = vld [vmem:[#allocation182_spill] sm:$0xff]  ;;  %v17101_v8 = vmax.f32 %v4590_v63, %v17062_v34 }
 0x47c   : > { %v5230_v24 = vsel %vm20326_vm8, %v20324_v2, -inf  ;;  %v5232_v61 = vsel %vm20328_vm1, %v5227_v37, -inf  ;;  %v20330_v35 = vld [vmem:[#allocation196_spill] sm:$0xff]  ;;  %v20334_v42 = vmax.f32 %v20332_v32, %v20333_v11  ;;  %v20335_v12 = vld [vmem:[#allocation146_spill] sm:$0xff]  ;;  %v5315_v55 = vmax.f32 %v20337_v59, %v20336_v49 }
 0x47d   : > { %vm20331_vm9 = vcmp.eq.s32.totalorder %v20330_v35, 1  ;;  %v17098_v29 = vmax.f32 %v5107_v30, %v20335_v12  ;;  %v5274_v36 = vmax.f32 %v5105_v48, %v5232_v61  ;;  %v19121_v30 = vrot.slane %v17101_v8, 7  ;;  %v20339_v48 = vld [vmem:[#allocation150_spill] sm:$0xff] }
 0x47e   : > { %v5233_v43 = vsel %vm20331_vm9, %v20329_v9, -inf  ;;  %v5272_v56 = vmax.f32 %v20334_v42, %v5230_v24  ;;  %v19120_v24 = vrot.slane %v17101_v8, 6  ;;  %v19125_v32 = vrot.slane %v17101_v8, 1  ;;  %v20340_v61 = vld [vmem:[#allocation46_spill] sm:$0xff] }
 0x47f   : > { %v5275_v2 = vmax.f32 %v5106_v23, %v5233_v43  ;;  %v19126_v63 = vrot.slane %v17101_v8, 2  ;;  %v5316_v23 = vmax.f32 %v20339_v48, %v5274_v36  ;;  %v20342_v49 = vrot.slane %v16882_v27, 7 }
 0x480   : > { %v5314_v37 = vmax.f32 %v17098_v29, %v5272_v56  ;;  %v20341_v56 = vrot.slane %v16882_v27, 6  ;;  %v20343_v35 = vrot.slane %v16882_v27, 1  ;;  %vm20352_vm11 = vcmp.eq.s32.totalorder %v20351_v47, 1 }
 0x481   : > { %v5317_v43 = vmax.f32 %v20340_v61, %v5275_v2  ;;  %v5349_v42 = vmax.f32 %v5315_v55, %v5275_v2  ;;  %v4852_v9 = vsel %vm1949_vm12, %v20342_v49, %v19121_v30  ;;  %v20344_v2 = vrot.slane %v16882_v27, 2  ;;  %v20349_v30 = vld [vmem:[#allocation179_spill] sm:$0xff] }
 0x482   : > { %v5348_v11 = vmax.f32 %v5314_v37, %v5274_v36  ;;  %v4683_v12 = vsel %vm1791_vm6, %v20341_v56, %v19120_v24  ;;  %v5022_v36 = vsel %vm2107_vm7, %v20343_v35, %v19125_v32  ;;  %v20345_v37 = vld [vmem:[#allocation31_spill] sm:$0xff]  ;;  %vm20350_vm15 = vcmp.eq.s32.totalorder %v20349_v30, 1 }
 0x483   : > { %v5191_v55 = vsel %vm2265_vm4, %v20344_v2, %v19126_v63  ;;  %vm20346_vm13 = vcmp.eq.s32.totalorder %v20345_v37, 1  ;;  %v20347_v24 = vld [vmem:[#allocation55_spill] sm:$0xff]  ;;  %v5099_v50 = vsel %vm20350_vm15, %v5022_v36, -inf  ;;  %v5350_v27 = vmax.f32 %v5316_v23, %v17098_v29  ;;  %v4299_v63 = vpop.permute.xlu0 %4298 }
 0x484   : > { %v4762_v56 = vsel %vm20346_vm13, %v4683_v12, -inf  ;;  %vm20348_vm3 = vcmp.eq.s32.totalorder %v20347_v24, 1  ;;  %v5268_v62 = vsel %vm20352_vm11, %v5191_v55, -inf  ;;  %v5141_v32 = vmax.f32 %v16940_v45, %v5099_v50  ;;  %v20359_v55 = vld [vmem:[#allocation52_spill] sm:$0xff] }
 0x485   : > { %v4931_v49 = vsel %vm20348_vm3, %v4852_v9, -inf  ;;  %v4804_v35 = vmax.f32 %v17101_v8, %v4762_v56  ;;  %v5351_v2 = vmax.f32 %v5317_v43, %v20337_v59  ;;  %v5382_v12 = vmax.f32 %v5348_v11, %v20339_v48  ;;  %v20358_v11 = vld [vmem:[#allocation11_spill] sm:$0xff] }
 0x486   : > { %v5383_v24 = vmax.f32 %v5349_v42, %v20340_v61  ;;  %v20353_v9 = vrot.slane %v20338_v13, 1  ;;  %v20354_v30 = vrot.slane %v20285_v16, 1  ;;  %v20355_v36 = vrot.slane %v20285_v16, 2 }
 0x487   : > { %v20356_v50 = vrot.slane %v20276_v60, 2  ;;  %v17164_v23 = vmax.f32 %v4804_v35, %v4931_v49  ;;  %v17166_v43 = vmax.f32 %v5141_v32, %v5268_v62  ;;  %v5384_v42 = vmax.f32 %v5350_v27, %v20358_v11  ;;  %v20360_v60 = vld [vmem:[#allocation121_spill] sm:$0xff] }
 0x488   : > { %v3578_v47 = vsel %vm2107_vm7, %v20354_v30, %v20353_v9  ;;  %v5385_v37 = vmax.f32 %v5351_v2, %v20359_v55  ;;  %v5416_v56 = vmax.f32 %v5382_v12, %v20358_v11  ;;  %v5417_v10 = vmax.f32 %v5383_v24, %v20359_v55 }
 0x489   : > { %v4048_v45 = vsel %vm2265_vm4, %v20356_v50, %v20355_v36  ;;  %20357 = vst [vmem:[#allocation69_spill] sm:$0xff] %v17166_v43  ;;  %v17173_v9 = vsel %vm3887_vm5, %v3578_v47, -inf  ;;  %vm4355_vm8 = vcmp.eq.s32.totalorder %v4299_v63, 1  ;;  %v5418_v30 = vmax.f32 %v5384_v42, %v20360_v60  ;;  %v20368_v43 = vld [vmem:[#allocation192_spill] sm:$0xff] }
 0x48a   : > { %v17177_v36 = vmax.f32 %v5385_v37, %v20361_v7  ;;  %v4407_v32 = vsel %vm4355_vm8, %v4048_v45, -inf  ;;  %v5450_v49 = vrot.slane %v5416_v56, 6  ;;  %v5451_v35 = vrot.slane %v5417_v10, 6  ;;  %v20364_v45 = vld [vmem:[#allocation107_spill] sm:$0xff] }
 0x48b   : > { %v5579_v27 = vrot.slane %v5416_v56, 7  ;;  %v5580_v2 = vrot.slane %v5417_v10, 7  ;;  %v5708_v12 = vrot.slane %v5417_v10, 1  ;;  %v5709_v50 = vrot.slane %v5418_v30, 1 }
 0x48c   : > { %v5837_v24 = vrot.slane %v5417_v10, 2  ;;  %v5838_v1 = vrot.slane %v5418_v30, 2  ;;  %v5514_v63 = vsel %vm1791_vm6, %v5450_v49, %v5451_v35  ;;  %v5452_v42 = vrot.slane %v5418_v30, 6 }
 0x48d   : > { %v5643_v47 = vsel %vm1949_vm12, %v5579_v27, %v5580_v2  ;;  %v5581_v37 = vrot.slane %v5418_v30, 7  ;;  %vm20363_vm1 = vcmp.eq.s32.totalorder %v20362_v17, 1  ;;  %vm20365_vm9 = vcmp.eq.s32.totalorder %v20364_v45, 1 }
 0x48e   : > { %v5515_v62 = vsel %vm20363_vm1, %v5514_v63, -inf  ;;  %v5644_v51 = vsel %vm20365_vm9, %v5643_v47, -inf  ;;  %v5772_v56 = vsel %vm2107_vm7, %v5708_v12, %v5709_v50  ;;  %v5901_v21 = vsel %vm2265_vm4, %v5837_v24, %v5838_v1  ;;  %v20370_v63 = vld [vmem:[#allocation90_spill] sm:$0xff] }
 0x48f   : > { %v5547_v18 = vmax.f32 %v5417_v10, %v5515_v62  ;;  %vm20367_vm5 = vcmp.eq.s32.totalorder %v20366_v54, 1  ;;  %vm20369_vm13 = vcmp.eq.s32.totalorder %v20368_v43, 1  ;;  %v5513_v17 = vsel %vm1791_vm6, %v5451_v35, %v5452_v42  ;;  %v20372_v54 = vld [vmem:[#allocation75_spill] sm:$0xff]  ;;  %v17212_v35 = vpop.f32.mrb[60].mxu0 }
 0x490   : > { %v5773_v49 = vsel %vm20367_vm5, %v5772_v56, -inf  ;;  %v5902_v27 = vsel %vm20369_vm13, %v5901_v21, -inf  ;;  %vm20371_vm3 = vcmp.eq.s32.totalorder %v20370_v63, 1  ;;  %v5642_v47 = vsel %vm1949_vm12, %v5580_v2, %v5581_v37 }
 0x491   : > { %v5516_v45 = vsel %vm20371_vm3, %v5513_v17, -inf  ;;  %v5710_v12 = vrot.slane %v17177_v36, 1  ;;  %v5839_v24 = vrot.slane %v17177_v36, 2  ;;  %v5676_v10 = vmax.f32 %v5547_v18, %v5644_v51  ;;  %v20376_v17 = vld [vmem:[#allocation188_spill] sm:$0xff] }
 0x492   : > { %v5548_v62 = vmax.f32 %v5418_v30, %v5516_v45  ;;  %vm20373_vm15 = vcmp.eq.s32.totalorder %v20372_v54, 1  ;;  %v20374_v21 = vmax.f32 %v16888_v0, %v16948_v6  ;;  %v4503_v51 = vmax.f32 %v16720_v57, %v16390_v44 }
 0x493   : > { %v5645_v56 = vsel %vm20373_vm15, %v5642_v47, -inf  ;;  %v5771_v2 = vsel %vm2107_vm7, %v5709_v50, %v5710_v12  ;;  %v5900_v18 = vsel %vm2265_vm4, %v5838_v1, %v5839_v24  ;;  %v20375_v0 = vmax.f32 %v16857_v41, %v16557_v52  ;;  %v20378_v50 = vld [vmem:[#allocation193_spill] sm:$0xff]  ;;  %v20394_v1 = vld [vmem:[#allocation186_spill] sm:$0xff] }
 0x494   : > { %v17210_v43 = vmax.f32 %v20374_v21, %v4407_v32  ;;  %v5805_v30 = vmax.f32 %v5676_v10, %v5773_v49  ;;  %v5677_v32 = vmax.f32 %v5548_v62, %v5645_v56  ;;  %vm20377_vm11 = vcmp.eq.s32.totalorder %v20376_v17, 1  ;;  %v17243_v62 = vpop.f32.mrb[61].mxu0  ;;  %v20382_v17 = vld [vmem:[#allocation132_spill] sm:$0xff] }
 0x495   : > { %v17228_v6 = vmax.f32 %v20375_v0, %v16720_v57  ;;  %v5774_v63 = vsel %vm20377_vm11, %v5771_v2, -inf  ;;  %vm20379_vm8 = vcmp.eq.s32.totalorder %v20378_v50, 1  ;;  %v4547_v47 = vmax.f32 %v4503_v51, %v16557_v52  ;;  %v20380_v51 = vld [vmem:[#allocation17_spill] sm:$0xff] }
 0x496   : > { %v5903_v45 = vsel %vm20379_vm8, %v5900_v18, -inf  ;;  %v5318_v44 = vmax.f32 %v20358_v11, %v17098_v29  ;;  %v5453_v54 = vrot.slane %v17177_v36, 6  ;;  %v5934_v57 = vmax.f32 %v5805_v30, %v5902_v27  ;;  %v4302_v18 = vpop.permute.xlu1 %4301 }
 0x497   : > { %v5806_v21 = vmax.f32 %v5677_v32, %v5774_v63  ;;  %v5582_v49 = vrot.slane %v17177_v36, 7  ;;  %v5319_v10 = vmax.f32 %v20359_v55, %v20337_v59  ;;  %v4591_v56 = vmax.f32 %v4547_v47, %v16857_v41 }
 0x498   : > { %v5352_v52 = vmax.f32 %v5318_v44, %v20339_v48  ;;  %v5512_v2 = vsel %vm1791_vm6, %v5452_v42, %v5453_v54  ;;  %v19132_v29 = vrot.slane %v20338_v13, 2  ;;  %8161 = vmatprep.mubr.f32.mxu1 %v5934_v57  ;;  %vm20381_vm1 = vcmp.eq.s32.totalorder %v20380_v51, 1 }
 0x499   : > { %v5935_v27 = vmax.f32 %v5806_v21, %v5903_v45  ;;  %v5517_v0 = vsel %vm20381_vm1, %v5512_v2, -inf  ;;  %v5641_v59 = vsel %vm1949_vm12, %v5581_v37, %v5582_v49  ;;  %v5353_v30 = vmax.f32 %v5319_v10, %v20340_v61 }
 0x49a   : > { %v17256_v41 = vmax.f32 %v4591_v56, %v17210_v43  ;;  %v5386_v32 = vmax.f32 %v5352_v52, %v20360_v60  ;;  %v5549_v42 = vmax.f32 %v17177_v36, %v5517_v0  ;;  %vm20383_vm9 = vcmp.eq.s32.totalorder %v20382_v17, 1  ;;  %v20385_v56 = vld [vmem:[#allocation56_spill] sm:$0xff]  ;;  %v20404_v36 = vld [vmem:[#allocation131_spill] sm:$0xff] }
 0x49b   : > { %v5646_v63 = vsel %vm20383_vm9, %v5641_v59, -inf  ;;  %8162 = vmatmul.mubr.f32.vlgmr.msra.gmra.mrb[28].mxu1 %v5935_v27  ;;  %v5387_v50 = vmax.f32 %v5353_v30, %v20361_v7  ;;  %v20384_v45 = vrot.slane %v20285_v16, 2  ;;  %vm4356_vm5 = vcmp.eq.s32.totalorder %v4302_v18, 1  ;;  %v20386_v27 = vld [vmem:[#allocation122_spill] sm:$0xff]  ;;  %v20387_v59 = vld [vmem:[#allocation108_spill] sm:$0xff] }
 0x49c   : > { %v2638_v47 = vrot.slane %v20338_v13, 6  ;;  %v19136_v44 = vrot.slane %v17256_v41, 6  ;;  %v19133_v57 = vrot.slane %v17256_v41, 7  ;;  %v19134_v21 = vrot.slane %v17256_v41, 1 }
 0x49d   : > { %v4047_v37 = vsel %vm2265_vm4, %v20384_v45, %v19132_v29  ;;  %v19135_v10 = vrot.slane %v17256_v41, 2  ;;  %v17275_v52 = vmax.f32 %v5386_v32, %v20385_v56  ;;  %v5678_v2 = vmax.f32 %v5549_v42, %v5646_v63 }
 0x49e   : > { %v17278_v51 = vmax.f32 %v5387_v50, %v20386_v27  ;;  %v4408_v0 = vsel %vm4356_vm5, %v4047_v37, -inf  ;;  %vm2950_vm13 = vcmp.eq.s32.totalorder %v20387_v59, 1  ;;  %v20388_v18 = vrot.slane %v17101_v8, 6  ;;  %v20392_v37 = vld [vmem:[#allocation12_spill] sm:$0xff] }
 0x49f   : > { %v20389_v17 = vrot.slane %v17101_v8, 7  ;;  %v20390_v42 = vrot.slane %v17101_v8, 1  ;;  %v20391_v50 = vrot.slane %v17101_v8, 2  ;;  %vm20393_vm3 = vcmp.eq.s32.totalorder %v20392_v37, 1 }
 0x4a0   : > { %v4682_v30 = vsel %vm1791_vm6, %v20388_v18, %v19136_v44  ;;  %vm20395_vm15 = vcmp.eq.s32.totalorder %v20394_v1, 1  ;;  %vm20396_vm11 = vcmp.eq.s32.totalorder %v16583_v5, 1  ;;  %vm20397_vm8 = vcmp.eq.s32.totalorder %v16628_v26, 1 }
 0x4a1   : > { %v4851_v32 = vsel %vm1949_vm12, %v20389_v17, %v19133_v57  ;;  %v5021_v63 = vsel %vm2107_vm7, %v20390_v42, %v19134_v21  ;;  %v5190_v45 = vsel %vm2265_vm4, %v20391_v50, %v19135_v10  ;;  %v4763_v18 = vsel %vm20393_vm3, %v4682_v30, -inf }
 0x4a2   : > { %v4932_v17 = vsel %vm20395_vm15, %v4851_v32, -inf  ;;  %v5100_v29 = vsel %vm20396_vm11, %v5021_v63, -inf  ;;  %v5269_v57 = vsel %vm20397_vm8, %v5190_v45, -inf  ;;  %v4805_v42 = vmax.f32 %v17256_v41, %v4763_v18  ;;  %v20398_v63 = vld [vmem:[#allocation198_spill] sm:$0xff]  ;;  %v20400_v18 = vld [vmem:[#allocation203_spill] sm:$0xff] }
 0x4a3   : > { %v5142_v21 = vmax.f32 %v17164_v23, %v5100_v29  ;;  %v5711_v8 = vrot.slane %v17275_v52, 1  ;;  %v5840_v50 = vrot.slane %v17275_v52, 2  ;;  %v5454_v37 = vrot.slane %v17275_v52, 6 }
 0x4a4   : > { %v5583_v30 = vrot.slane %v17275_v52, 7  ;;  %v5712_v1 = vrot.slane %v17278_v51, 1  ;;  %v5841_v5 = vrot.slane %v17278_v51, 2  ;;  %v17321_v32 = vmax.f32 %v4805_v42, %v4932_v17  ;;  %v20402_v42 = vld [vmem:[#allocation97_spill] sm:$0xff] }
 0x4a5   : > { %v17323_v26 = vmax.f32 %v5142_v21, %v5269_v57  ;;  %v5770_v23 = vsel %vm2107_vm7, %v5710_v12, %v5711_v8  ;;  %v5899_v29 = vsel %vm2265_vm4, %v5839_v24, %v5840_v50  ;;  %vm20399_vm1 = vcmp.eq.s32.totalorder %v20398_v63, 1  ;;  %v20406_v63 = vld [vmem:[#allocation202_spill] sm:$0xff] }
 0x4a6   : > { %v5775_v45 = vsel %vm20399_vm1, %v5770_v23, -inf  ;;  %vm20401_vm9 = vcmp.eq.s32.totalorder %v20400_v18, 1  ;;  %v5511_v57 = vsel %vm1791_vm6, %v5453_v54, %v5454_v37  ;;  %v5640_v21 = vsel %vm1949_vm12, %v5582_v49, %v5583_v30  ;;  %v3367_v23 = vpop.permute.xlu0 %3366 }
 0x4a7   : > { %v5904_v10 = vsel %vm20401_vm9, %v5899_v29, -inf  ;;  %v5807_v17 = vmax.f32 %v5678_v2, %v5775_v45  ;;  %vm20403_vm5 = vcmp.eq.s32.totalorder %v20402_v42, 1  ;;  %vm20405_vm3 = vcmp.eq.s32.totalorder %v20404_v36, 1 }
 0x4a8   : > { %v5518_v12 = vsel %vm20403_vm5, %v5511_v57, -inf  ;;  %v5647_v44 = vsel %vm20405_vm3, %v5640_v21, -inf  ;;  %v5769_v24 = vsel %vm2107_vm7, %v5711_v8, %v5712_v1  ;;  %vm20407_vm15 = vcmp.eq.s32.totalorder %v20406_v63, 1  ;;  %v20409_v57 = vld [vmem:[#allocation76_spill] sm:$0xff] }
 0x4a9   : > { %v5550_v29 = vmax.f32 %v17275_v52, %v5518_v12  ;;  %v5776_v54 = vsel %vm20407_vm15, %v5769_v24, -inf  ;;  %v5898_v49 = vsel %vm2265_vm4, %v5840_v50, %v5841_v5  ;;  %v20408_v2 = vmax.f32 %v17060_v14, %v17173_v9  ;;  %v17373_v9 = vpop.f32.mrb[62].mxu0 }
 0x4aa   : > { %v5936_v18 = vmax.f32 %v5807_v17, %v5904_v10  ;;  %vm20410_vm11 = vcmp.eq.s32.totalorder %v20409_v57, 1  ;;  %v20411_v8 = vrot.slane %v20285_v16, 6  ;;  %v3107_v42 = vrot.slane %v20338_v13, 7  ;;  %v4305_v57 = vpop.permute.xlu1 %4304 }
 0x4ab   : > { %v4460_v45 = vmax.f32 %v20408_v2, %v4408_v0  ;;  %v5905_v21 = vsel %vm20410_vm11, %v5898_v49, -inf  ;;  %v5679_v12 = vmax.f32 %v5550_v29, %v5647_v44  ;;  %v20412_v36 = vmax.f32 %v17054_v4, %v17062_v34  ;;  %v20415_v2 = vld [vmem:[#allocation78_spill] sm:$0xff] }
 0x4ac   : > { %v2639_v52 = vsel %vm1791_vm6, %v20411_v8, %v2638_v47  ;;  %vm3419_vm8 = vcmp.eq.s32.totalorder %v3367_v23, 1  ;;  %8164 = vmatprep.mubr.f32.mxu1 %v5936_v18  ;;  %v20413_v0 = vrot.slane %v20285_v16, 7  ;;  %v5320_v44 = vmax.f32 %v20360_v60, %v20339_v48  ;;  %v3836_v8 = vpop.permute.xlu0 %3835 }
 0x4ad   : > { %v17369_v50 = vmax.f32 %v20412_v36, %v4460_v45  ;;  %v3002_v14 = vsel %vm2950_vm13, %v2639_v52, -inf  ;;  %v5455_v4 = vrot.slane %v17278_v51, 6  ;;  %v5808_v34 = vmax.f32 %v5679_v12, %v5776_v54  ;;  %v17405_v12 = vpop.f32.mrb[63].mxu0 }
 0x4ae   : > { %v3054_v10 = vmax.f32 %v20338_v13, %v3002_v14  ;;  %v3108_v47 = vsel %vm1949_vm12, %v20413_v0, %v3107_v42  ;;  %v5354_v29 = vmax.f32 %v5320_v44, %v20358_v11  ;;  %v5584_v63 = vrot.slane %v17278_v51, 7  ;;  %v20418_v14 = vld [vmem:[#allocation91_spill] sm:$0xff]  ;;  %v20420_v0 = vld [vmem:[#allocation85_spill] sm:$0xff] }
 0x4af   : > { %v4680_v59 = vrot.slane %v17369_v50, 6  ;;  %v4849_v17 = vrot.slane %v17369_v50, 7  ;;  %v3471_v24 = vsel %vm3419_vm8, %v3108_v47, -inf  ;;  %v5510_v16 = vsel %vm1791_vm6, %v5454_v37, %v5455_v4  ;;  %v20422_v44 = vld [vmem:[#allocation59_spill] sm:$0xff] }
 0x4b0   : > { %v17385_v23 = vmax.f32 %v3054_v10, %v3471_v24  ;;  %v5937_v49 = vmax.f32 %v5808_v34, %v5905_v21  ;;  %v20414_v48 = vrot.slane %v17256_v41, 6  ;;  %vm20416_vm13 = vcmp.eq.s32.totalorder %v20415_v2, 1  ;;  %v20423_v24 = vld [vmem:[#allocation25_spill] sm:$0xff] }
 0x4b1   : > { %v5519_v45 = vsel %vm20416_vm13, %v5510_v16, -inf  ;;  %v5321_v18 = vmax.f32 %v20361_v7, %v20340_v61  ;;  %vm20417_vm1 = vcmp.eq.s32.totalorder %v20232_v40, 1  ;;  %v5388_v37 = vmax.f32 %v5354_v29, %v20385_v56  ;;  %v20421_v40 = vld [vmem:[#allocation136_spill] sm:$0xff] }
 0x4b2   : > { %v4681_v54 = vsel %vm1791_vm6, %v20414_v48, %v4680_v59  ;;  %v5551_v21 = vmax.f32 %v17278_v51, %v5519_v45  ;;  %v5639_v42 = vsel %vm1949_vm12, %v5583_v30, %v5584_v63  ;;  %8165 = vmatmul.mubr.f32.gmra.mrb[30].mxu1 %v5937_v49  ;;  %vm20419_vm9 = vcmp.eq.s32.totalorder %v20418_v14, 1  ;;  %v20426_v14 = vld [vmem:[#allocation183_spill] sm:$0xff] }
 0x4b3   : > { %v4764_v52 = vsel %vm20417_vm1, %v4681_v54, -inf  ;;  %v5648_v61 = vsel %vm20419_vm9, %v5639_v42, -inf  ;;  %v5355_v10 = vmax.f32 %v5321_v18, %v20359_v55  ;;  %v2531_v47 = vmax.f32 %v20421_v40, %v20420_v0 }
 0x4b4   : > { %v4806_v36 = vmax.f32 %v17369_v50, %v4764_v52  ;;  %v5422_v34 = vmax.f32 %v5388_v37, %v20422_v44  ;;  %v5680_v59 = vmax.f32 %v5551_v21, %v5648_v61  ;;  %vm4357_vm5 = vcmp.eq.s32.totalorder %v4305_v57, 1  ;;  %v20425_v52 = vld [vmem:[#allocation58_spill] sm:$0xff] }
 0x4b5   : > { %vm3888_vm3 = vcmp.eq.s32.totalorder %v3836_v8, 1  ;;  %v5389_v30 = vmax.f32 %v5355_v10, %v20386_v27  ;;  %v2585_v29 = vmax.f32 %v2531_v47, %v20423_v24  ;;  %v20424_v16 = vrot.slane %v17256_v41, 7  ;;  %v20428_v47 = vld [vmem:[#allocation201_spill] sm:$0xff]  ;;  %v20430_v24 = vld [vmem:[#allocation32_spill] sm:$0xff] }
 0x4b6   : > { %v5713_v54 = vrot.slane %v5422_v34, 1  ;;  %v5842_v2 = vrot.slane %v5422_v34, 2  ;;  %v5456_v45 = vrot.slane %v5422_v34, 6  ;;  %v5585_v18 = vrot.slane %v5422_v34, 7 }
 0x4b7   : > { %v4850_v49 = vsel %vm1949_vm12, %v20424_v16, %v4849_v17  ;;  %v17422_v37 = vmax.f32 %v5389_v30, %v20425_v52  ;;  %v4045_v21 = vrot.slane %v2585_v29, 2  ;;  %v3576_v42 = vrot.slane %v2585_v29, 1  ;;  %v20432_v16 = vld [vmem:[#allocation101_spill] sm:$0xff] }
 0x4b8   : > { %vm20427_vm15 = vcmp.eq.s32.totalorder %v20426_v14, 1  ;;  %v5768_v10 = vsel %vm2107_vm7, %v5712_v1, %v5713_v54  ;;  %v5897_v17 = vsel %vm2265_vm4, %v5841_v5, %v5842_v2  ;;  %v5509_v0 = vsel %vm1791_vm6, %v5455_v4, %v5456_v45 }
 0x4b9   : > { %v4933_v61 = vsel %vm20427_vm15, %v4850_v49, -inf  ;;  %v5638_v40 = vsel %vm1949_vm12, %v5584_v63, %v5585_v18  ;;  %vm20429_vm11 = vcmp.eq.s32.totalorder %v20428_v47, 1  ;;  %vm20431_vm8 = vcmp.eq.s32.totalorder %v20430_v24, 1  ;;  %v20434_v49 = vld [vmem:[#allocation37_spill] sm:$0xff] }
 0x4ba   : > { %v5777_v30 = vsel %vm20429_vm11, %v5768_v10, -inf  ;;  %v5906_v29 = vsel %vm20431_vm8, %v5897_v17, -inf  ;;  %vm20433_vm13 = vcmp.eq.s32.totalorder %v20432_v16, 1  ;;  %vm20435_vm1 = vcmp.eq.s32.totalorder %v20434_v49, 1 }
 0x4bb   : > { %v5520_v1 = vsel %vm20433_vm13, %v5509_v0, -inf  ;;  %v5649_v51 = vsel %vm20435_vm1, %v5638_v40, -inf  ;;  %v5809_v14 = vmax.f32 %v5680_v59, %v5777_v30  ;;  %v5714_v48 = vrot.slane %v17422_v37, 1 }
 0x4bc   : > { %v5552_v5 = vmax.f32 %v5422_v34, %v5520_v1  ;;  %v5843_v4 = vrot.slane %v17422_v37, 2  ;;  %v20436_v63 = vrot.slane %v20338_v13, 2  ;;  %v20437_v47 = vrot.slane %v20338_v13, 1 }
 0x4bd   : > { %v17456_v0 = vmax.f32 %v4806_v36, %v4933_v61  ;;  %v20438_v40 = vrot.slane %v17369_v50, 1  ;;  %v20439_v34 = vrot.slane %v17256_v41, 1  ;;  %v5938_v30 = vmax.f32 %v5809_v14, %v5906_v29  ;;  %v20440_v36 = vld [vmem:[#allocation29_spill] sm:$0xff]  ;;  %v20442_v61 = vld [vmem:[#allocation204_spill] sm:$0xff] }
 0x4be   : > { %v4046_v10 = vsel %vm2265_vm4, %v20436_v63, %v4045_v21  ;;  %v3577_v17 = vsel %vm2107_vm7, %v20437_v47, %v3576_v42  ;;  %v5681_v24 = vmax.f32 %v5552_v5, %v5649_v51  ;;  %v5767_v21 = vsel %vm2107_vm7, %v5713_v54, %v5714_v48  ;;  %v20444_v54 = vld [vmem:[#allocation68_spill] sm:$0xff] }
 0x4bf   : > { %v5020_v59 = vsel %vm2107_vm7, %v20439_v34, %v20438_v40  ;;  %v5896_v13 = vsel %vm2265_vm4, %v5842_v2, %v5843_v4  ;;  %vm20441_vm9 = vcmp.eq.s32.totalorder %v20440_v36, 1  ;;  %vm20443_vm15 = vcmp.eq.s32.totalorder %v20442_v61, 1  ;;  %8167 = vmatprep.mubr.f32.mxu1 %v5938_v30  ;;  %v17482_v2 = vpop.f32.mrb[64].mxu0 }
 0x4c0   : > { %v5778_v42 = vsel %vm20441_vm9, %v5767_v21, -inf  ;;  %v5907_v16 = vsel %vm20443_vm15, %v5896_v13, -inf  ;;  %v4409_v1 = vsel %vm4357_vm5, %v4046_v10, -inf  ;;  %v3940_v29 = vsel %vm3888_vm3, %v3577_v17, -inf  ;;  %v20448_v13 = vld [vmem:[#allocation63_spill] sm:$0xff] }
 0x4c1   : > { %v5810_v49 = vmax.f32 %v5681_v24, %v5778_v42  ;;  %v3992_v51 = vmax.f32 %v17385_v23, %v3940_v29  ;;  %vm20445_vm11 = vcmp.eq.s32.totalorder %v20444_v54, 1  ;;  %v5186_v5 = vrot.slane %v17369_v50, 2  ;;  %v17511_v42 = vpop.f32.mrb[65].mxu0  ;;  %v20452_v29 = vld [vmem:[#allocation215_spill] sm:$0xff] }
 0x4c2   : > { %v5101_v14 = vsel %vm20445_vm11, %v5020_v59, -inf  ;;  %v5322_v47 = vmax.f32 %v20385_v56, %v20358_v11  ;;  %v5457_v57 = vrot.slane %v17422_v37, 6  ;;  %v5586_v8 = vrot.slane %v17422_v37, 7 }
 0x4c3   : > { %v5143_v63 = vmax.f32 %v17321_v32, %v5101_v14  ;;  %v5939_v10 = vmax.f32 %v5810_v49, %v5907_v16  ;;  %v4461_v17 = vmax.f32 %v3992_v51, %v4409_v1  ;;  %v20446_v23 = vrot.slane %v17256_v41, 2 }
 0x4c4   : > { %v5323_v34 = vmax.f32 %v20386_v27, %v20359_v55  ;;  %v5356_v59 = vmax.f32 %v5322_v47, %v20360_v60  ;;  %v5508_v11 = vsel %vm1791_vm6, %v5456_v45, %v5457_v57  ;;  %v5637_v30 = vsel %vm1949_vm12, %v5585_v18, %v5586_v8 }
 0x4c5   : > { %v5189_v40 = vsel %vm2265_vm4, %v20446_v23, %v5186_v5  ;;  %8168 = vmatmul.mubr.f32.gmra.mrb[0].mxu1 %v5939_v10  ;;  %v20447_v41 = vmax.f32 %v17228_v6, %v17210_v43  ;;  %vm20449_vm5 = vcmp.eq.s32.totalorder %v20448_v13, 1  ;;  %v5324_v43 = vmax.f32 %v20422_v44, %v20360_v60 }
 0x4c6   : > { %v5270_v32 = vsel %vm4351_vm10, %v5189_v40, -inf  ;;  %v5521_v55 = vsel %vm20449_vm5, %v5508_v11, -inf  ;;  %vm20451_vm10 = vcmp.eq.s32.totalorder %v20450_v39, 1  ;;  %v5390_v45 = vmax.f32 %v5356_v59, %v20422_v44  ;;  %v20455_v59 = vld [vmem:[#allocation110_spill] sm:$0xff]  ;;  %v20456_v39 = vld [vmem:[#allocation44_spill] sm:$0xff] }
 0x4c7   : > { %v4637_v24 = vmax.f32 %v20447_v41, %v4461_v17  ;;  %v17505_v21 = vmax.f32 %v5143_v63, %v5270_v32  ;;  %v5650_v36 = vsel %vm20451_vm10, %v5637_v30, -inf  ;;  %v5553_v61 = vmax.f32 %v17422_v37, %v5521_v55 }
 0x4c8   : > { %v5357_v18 = vmax.f32 %v5323_v34, %v20361_v7  ;;  %v5325_v1 = vmax.f32 %v20425_v52, %v20361_v7  ;;  %v5326_v49 = vmax.f32 %v20452_v29, %v20385_v56  ;;  %v5424_v51 = vmax.f32 %v5390_v45, %v20452_v29  ;;  %v20458_v45 = vld [vmem:[#allocation47_spill] sm:$0xff] }
 0x4c9   : > { %v5018_v6 = vrot.slane %v4637_v24, 1  ;;  %v5187_v16 = vrot.slane %v4637_v24, 2  ;;  %v5682_v54 = vmax.f32 %v5553_v61, %v5650_v36  ;;  %v5358_v63 = vmax.f32 %v5324_v43, %v20385_v56 }
 0x4ca   : > { %v5391_v14 = vmax.f32 %v5357_v18, %v20425_v52  ;;  %v20453_v47 = vrot.slane %v17369_v50, 1  ;;  %v5359_v7 = vmax.f32 %v5325_v1, %v20386_v27  ;;  %v17533_v17 = vmax.f32 %v5326_v49, %v20422_v44  ;;  %v20460_v18 = vld [vmem:[#allocation105_spill] sm:$0xff] }
 0x4cb   : > { %v5188_v10 = vsel %vm2265_vm4, %v5186_v5, %v5187_v16  ;;  %v5715_v56 = vrot.slane %v5424_v51, 1  ;;  %v5844_v32 = vrot.slane %v5424_v51, 2  ;;  %v5458_v30 = vrot.slane %v5424_v51, 6 }
 0x4cc   : > { %v5019_v60 = vsel %vm2107_vm7, %v20453_v47, %v5018_v6  ;;  %v5271_v34 = vsel %vm4352_vm14, %v5188_v10, -inf  ;;  %v17541_v11 = vmax.f32 %v5391_v14, %v20455_v59  ;;  %v5587_v5 = vrot.slane %v5424_v51, 7  ;;  %v20462_v14 = vld [vmem:[#allocation38_spill] sm:$0xff] }
 0x4cd   : > { %v5102_v23 = vsel %vm3883_vm0, %v5019_v60, -inf  ;;  %v5766_v41 = vsel %vm2107_vm7, %v5714_v48, %v5715_v56  ;;  %v5895_v53 = vsel %vm2265_vm4, %v5843_v4, %v5844_v32  ;;  %v5392_v24 = vmax.f32 %v5358_v63, %v20452_v29 }
 0x4ce   : > { %v5144_v50 = vmax.f32 %v17456_v0, %v5102_v23  ;;  %v5393_v13 = vmax.f32 %v5359_v7, %v20455_v59  ;;  %v17553_v0 = vpop.f32.mrb[66].mxu0  ;;  %vm20457_vm14 = vcmp.eq.s32.totalorder %v20456_v39, 1  ;;  %vm20459_vm0 = vcmp.eq.s32.totalorder %v20458_v45, 1  ;;  %v20467_v39 = vld [vmem:[#allocation51_spill] sm:$0xff] }
 0x4cf   : > { %v5779_v36 = vsel %vm20457_vm14, %v5766_v41, -inf  ;;  %v5908_v61 = vsel %vm20459_vm0, %v5895_v53, -inf  ;;  %v5507_v48 = vsel %vm1791_vm6, %v5457_v57, %v5458_v30  ;;  %v17563_v37 = vpop.f32.mrb[67].mxu0  ;;  %vm20461_vm3 = vcmp.eq.s32.totalorder %v20460_v18, 1  ;;  %v20464_v57 = vld [vmem:[#allocation66_spill] sm:$0xff]  ;;  %v20469_v18 = vld [vmem:[#allocation115_spill] sm:$0xff] }
 0x4d0   : > { %v17555_v55 = vmax.f32 %v5144_v50, %v5271_v34  ;;  %v5811_v4 = vmax.f32 %v5682_v54, %v5779_v36  ;;  %v5522_v43 = vsel %vm20461_vm3, %v5507_v48, -inf  ;;  %v5636_v6 = vsel %vm1949_vm12, %v5586_v8, %v5587_v5  ;;  %v17570_v1 = vpop.f32.mrb[68].mxu0  ;;  %v20465_v34 = vld [vmem:[#allocation205_spill] sm:$0xff] }
 0x4d1   : > { %v5716_v16 = vrot.slane %v17541_v11, 1  ;;  %v5554_v49 = vmax.f32 %v5424_v51, %v5522_v43  ;;  %vm20463_vm8 = vcmp.eq.s32.totalorder %v20462_v14, 1  ;;  %v5845_v47 = vrot.slane %v17541_v11, 2  ;;  %v17576_v10 = vpop.f32.mrb[69].mxu0  ;;  %v20471_v43 = vld [vmem:[#allocation138_spill] sm:$0xff] }
 0x4d2   : > { %v5651_v63 = vsel %vm20463_vm8, %v5636_v6, -inf  ;;  %v5426_v60 = vmax.f32 %v5392_v24, %v20464_v57  ;;  %v5940_v54 = vmax.f32 %v5811_v4, %v5908_v61  ;;  %v5459_v8 = vrot.slane %v17541_v11, 6  ;;  %v17582_v40 = vpop.f32.mrb[70].mxu0 }
 0x4d3   : > { %v5765_v7 = vsel %vm2107_vm7, %v5715_v56, %v5716_v16  ;;  %v5588_v23 = vrot.slane %v17541_v11, 7  ;;  %v5683_v51 = vmax.f32 %v5554_v49, %v5651_v63  ;;  %vm20466_vm13 = vcmp.eq.s32.totalorder %v20465_v34, 1  ;;  %v17588_v24 = vpop.f32.mrb[71].mxu0  ;;  %v20474_v63 = vld [vmem:[#allocation142_spill] sm:$0xff] }
 0x4d4   : > { %v5780_v50 = vsel %vm20466_vm13, %v5765_v7, -inf  ;;  %v5894_v41 = vsel %vm2265_vm4, %v5844_v32, %v5845_v47  ;;  %v5717_v53 = vrot.slane %v5426_v60, 1  ;;  %8170 = vmatprep.mubr.f32.mxu1 %v5940_v54  ;;  %vm20468_vm1 = vcmp.eq.s32.totalorder %v20467_v39, 1  ;;  %v17596_v48 = vpop.f32.mrb[72].mxu0  ;;  %v20476_v7 = vld [vmem:[#allocation133_spill] sm:$0xff] }
 0x4d5   : > { %v5909_v56 = vsel %vm20468_vm1, %v5894_v41, -inf  ;;  %v5506_v36 = vsel %vm1791_vm6, %v5458_v30, %v5459_v8  ;;  %v5635_v45 = vsel %vm1949_vm12, %v5587_v5, %v5588_v23  ;;  %v5846_v61 = vrot.slane %v5426_v60, 2  ;;  %v17604_v14 = vpop.f32.mrb[73].mxu0  ;;  %v20478_v41 = vld [vmem:[#allocation106_spill] sm:$0xff] }
 0x4d6   : > { %v5812_v4 = vmax.f32 %v5683_v51, %v5780_v50  ;;  %vm20470_vm9 = vcmp.eq.s32.totalorder %v20469_v18, 1  ;;  %vm20472_vm15 = vcmp.eq.s32.totalorder %v20471_v43, 1  ;;  %v5764_v49 = vsel %vm2107_vm7, %v5716_v16, %v5717_v53  ;;  %20473 = vst [vmem:[#allocation117_spill] sm:$0xff] %v17604_v14  ;;  %v17612_v34 = vpop.f32.mrb[74].mxu0  ;;  %v20521_v14 = vld [vmem:[#allocation199_spill] sm:$0xff] }
 0x4d7   : > { %v5523_v32 = vsel %vm20470_vm9, %v5506_v36, -inf  ;;  %v5652_v6 = vsel %vm20472_vm15, %v5635_v45, -inf  ;;  %vm20475_vm11 = vcmp.eq.s32.totalorder %v20474_v63, 1  ;;  %v5893_v54 = vsel %vm2265_vm4, %v5845_v47, %v5846_v61  ;;  %20477 = vst [vmem:[#allocation72_spill] sm:$0xff] %v17612_v34  ;;  %v17616_v45 = vpop.f32.mrb[75].mxu0 }
 0x4d8   : > { %v5555_v30 = vmax.f32 %v17541_v11, %v5523_v32  ;;  %v5781_v5 = vsel %vm20475_vm11, %v5764_v49, -inf  ;;  %v5427_v51 = vmax.f32 %v5393_v13, %v20476_v7  ;;  %v5941_v50 = vmax.f32 %v5812_v4, %v5909_v56  ;;  %20480 = vst [vmem:[#allocation114_spill] sm:$0xff] %v17616_v45  ;;  %v17620_v49 = vpop.f32.mrb[76].mxu0  ;;  %v20488_v45 = vld [vmem:[#allocation13_spill] sm:$0xff] }
 0x4d9   : > { %vm20479_vm5 = vcmp.eq.s32.totalorder %v20478_v41, 1  ;;  %v5460_v36 = vrot.slane %v5426_v60, 6  ;;  %v5589_v16 = vrot.slane %v5426_v60, 7  ;;  %v5394_v43 = vmax.f32 %v17533_v17, %v20464_v57  ;;  %20481 = vst [vmem:[#allocation84_spill] sm:$0xff] %v17620_v49  ;;  %v17626_v63 = vpop.f32.mrb[77].mxu0  ;;  %v20485_v41 = vld [vmem:[#allocation102_spill] sm:$0xff] }
 0x4da   : > { %v5910_v39 = vsel %vm20479_vm5, %v5893_v54, -inf  ;;  %v5684_v18 = vmax.f32 %v5555_v30, %v5652_v6  ;;  %v5718_v11 = vrot.slane %v5427_v51, 1  ;;  %v5847_v32 = vrot.slane %v5427_v51, 2  ;;  %8171 = vmatmul.mubr.f32.gmra.mrb[2].mxu1 %v5941_v50  ;;  %20482 = vst [vmem:[#allocation35_spill] sm:$0xff] %v17626_v63  ;;  %v20483_v6 = vld [vmem:[#allocation22_spill] sm:$0xff]  ;;  %v17634_v49 = vpop.f32.mrb[78].mxu0 }
 0x4db   : > { %v5505_v13 = vsel %vm1791_vm6, %v5459_v8, %v5460_v36  ;;  %v5634_v47 = vsel %vm1949_vm12, %v5588_v23, %v5589_v16  ;;  %v5461_v56 = vrot.slane %v5427_v51, 6  ;;  %v5590_v4 = vrot.slane %v5427_v51, 7  ;;  %20487 = vst [vmem:[#allocation71_spill] sm:$0xff] %v17634_v49  ;;  %v20490_v63 = vld [vmem:[#allocation82_spill] sm:$0xff] }
 0x4dc   : > { %v5813_v54 = vmax.f32 %v5684_v18, %v5781_v5  ;;  %vm20484_vm10 = vcmp.eq.s32.totalorder %v20483_v6, 1  ;;  %vm20486_vm14 = vcmp.eq.s32.totalorder %v20485_v41, 1  ;;  %v5763_v50 = vsel %vm2107_vm7, %v5717_v53, %v5718_v11  ;;  %v17641_v18 = vpop.f32.mrb[79].mxu0  ;;  %v20492_v6 = vld [vmem:[#allocation14_spill] sm:$0xff] }
 0x4dd   : > { %v5524_v30 = vsel %vm20484_vm10, %v5505_v13, -inf  ;;  %v5653_v17 = vsel %vm20486_vm14, %v5634_v47, -inf  ;;  %vm20489_vm0 = vcmp.eq.s32.totalorder %v20488_v45, 1  ;;  %v5892_v34 = vsel %vm2265_vm4, %v5846_v61, %v5847_v32  ;;  %20491 = vst [vmem:[#allocation80_spill] sm:$0xff] %v17641_v18  ;;  %v20495_v41 = vld [vmem:[#allocation34_spill] sm:$0xff] }
 0x4de   : > { %v5556_v8 = vmax.f32 %v5426_v60, %v5524_v30  ;;  %v5782_v23 = vsel %vm20489_vm0, %v5763_v50, -inf  ;;  %v5428_v5 = vmax.f32 %v5394_v43, %v20490_v63  ;;  %v5942_v13 = vmax.f32 %v5813_v54, %v5910_v39  ;;  %v17649_v30 = vpop.f32.mrb[80].mxu0  ;;  %v20497_v50 = vld [vmem:[#allocation141_spill] sm:$0xff] }
 0x4df   : > { %vm20493_vm3 = vcmp.eq.s32.totalorder %v20492_v6, 1  ;;  %v5504_v53 = vsel %vm1791_vm6, %v5460_v36, %v5461_v56  ;;  %v5633_v60 = vsel %vm1949_vm12, %v5589_v16, %v5590_v4  ;;  %20494 = vst [vmem:[#allocation128_spill] sm:$0xff] %v17649_v30  ;;  %vm20496_vm8 = vcmp.eq.s32.totalorder %v20495_v41, 1  ;;  %v17655_v39 = vpop.f32.mrb[81].mxu0 }
 0x4e0   : > { %v5911_v47 = vsel %vm20493_vm3, %v5892_v34, -inf  ;;  %v5685_v45 = vmax.f32 %v5556_v8, %v5653_v17  ;;  %v5525_v61 = vsel %vm20496_vm8, %v5504_v53, -inf  ;;  %vm20498_vm13 = vcmp.eq.s32.totalorder %v20497_v50, 1  ;;  %20499 = vst [vmem:[#allocation73_spill] sm:$0xff] %v17655_v39  ;;  %8173 = vmatprep.mubr.f32.mxu1 %v5942_v13 }
 0x4e1   : > { %v5654_v43 = vsel %vm20498_vm13, %v5633_v60, -inf  ;;  %v5719_v18 = vrot.slane %v5428_v5, 1  ;;  %v5557_v34 = vmax.f32 %v5427_v51, %v5525_v61  ;;  %v5848_v54 = vrot.slane %v5428_v5, 2  ;;  %v20500_v60 = vld [vmem:[#allocation139_spill] sm:$0xff] }
 0x4e2   : > { %v5327_v36 = vmax.f32 %v20455_v59, %v20386_v27  ;;  %v5462_v6 = vrot.slane %v5428_v5, 6  ;;  %v5814_v16 = vmax.f32 %v5685_v45, %v5782_v23  ;;  %v5591_v8 = vrot.slane %v5428_v5, 7  ;;  %v20502_v27 = vld [vmem:[#allocation144_spill] sm:$0xff] }
 0x4e3   : > { %v5762_v17 = vsel %vm2107_vm7, %v5718_v11, %v5719_v18  ;;  %v5328_v53 = vmax.f32 %v20464_v57, %v20422_v44  ;;  %v5686_v41 = vmax.f32 %v5557_v34, %v5654_v43  ;;  %vm20501_vm1 = vcmp.eq.s32.totalorder %v20500_v60, 1  ;;  %v20504_v34 = vld [vmem:[#allocation24_spill] sm:$0xff] }
 0x4e4   : > { %v5783_v50 = vsel %vm20501_vm1, %v5762_v17, -inf  ;;  %v5891_v51 = vsel %vm2265_vm4, %v5847_v32, %v5848_v54  ;;  %v5361_v13 = vmax.f32 %v5327_v36, %v20425_v52  ;;  %v5943_v61 = vmax.f32 %v5814_v16, %v5911_v47  ;;  %v20506_v60 = vld [vmem:[#allocation140_spill] sm:$0xff] }
 0x4e5   : > { %vm20503_vm9 = vcmp.eq.s32.totalorder %v20502_v27, 1  ;;  %v5503_v11 = vsel %vm1791_vm6, %v5461_v56, %v5462_v6  ;;  %v5632_v45 = vsel %vm1949_vm12, %v5590_v4, %v5591_v8  ;;  %v5815_v44 = vmax.f32 %v5686_v41, %v5783_v50  ;;  %v17684_v4 = vpop.f32.mrb[82].mxu0  ;;  %v20509_v50 = vld [vmem:[#allocation30_spill] sm:$0xff]  ;;  %v20510_v27 = vld [vmem:[#allocation124_spill] sm:$0xff] }
 0x4e6   : > { %v5912_v23 = vsel %vm20503_vm9, %v5891_v51, -inf  ;;  %v5395_v43 = vmax.f32 %v5361_v13, %v20476_v7  ;;  %vm20505_vm15 = vcmp.eq.s32.totalorder %v20504_v34, 1  ;;  %vm20507_vm11 = vcmp.eq.s32.totalorder %v20506_v60, 1  ;;  %8174 = vmatmul.mubr.f32.gmra.mrb[4].mxu1 %v5943_v61  ;;  %20508 = vst [vmem:[#allocation21_spill] sm:$0xff] %v17684_v4 }
 0x4e7   : > { %v5526_v17 = vsel %vm20505_vm15, %v5503_v11, -inf  ;;  %v5655_v32 = vsel %vm20507_vm11, %v5632_v45, -inf  ;;  %v5362_v36 = vmax.f32 %v5328_v53, %v20452_v29  ;;  %v5329_v16 = vmax.f32 %v20476_v7, %v20425_v52 }
 0x4e8   : > { %v5558_v47 = vmax.f32 %v5428_v5, %v5526_v17  ;;  %v5330_v56 = vmax.f32 %v20490_v63, %v20452_v29  ;;  %v5944_v41 = vmax.f32 %v5815_v44, %v5912_v23  ;;  %v5429_v51 = vmax.f32 %v5395_v43, %v20509_v50  ;;  %v17691_v5 = vpop.f32.mrb[83].mxu0 }
 0x4e9   : > { %v5331_v13 = vmax.f32 %v20509_v50, %v20455_v59  ;;  %20511 = vst [vmem:[#allocation112_spill] sm:$0xff] %v17691_v5  ;;  %v5396_v11 = vmax.f32 %v5362_v36, %v20490_v63  ;;  %v5363_v52 = vmax.f32 %v5329_v16, %v20455_v59  ;;  %v20512_v16 = vld [vmem:[#allocation20_spill] sm:$0xff] }
 0x4ea   : > { %v5687_v53 = vmax.f32 %v5558_v47, %v5655_v32  ;;  %v5364_v29 = vmax.f32 %v5330_v56, %v20464_v57  ;;  %8176 = vmatprep.mubr.f32.mxu1 %v5944_v41  ;;  %v5720_v45 = vrot.slane %v5429_v51, 1  ;;  %v5849_v23 = vrot.slane %v5429_v51, 2  ;;  %v20514_v41 = vld [vmem:[#allocation148_spill] sm:$0xff] }
 0x4eb   : > { %v5463_v44 = vrot.slane %v5429_v51, 6  ;;  %v5592_v43 = vrot.slane %v5429_v51, 7  ;;  %v5430_v34 = vmax.f32 %v5396_v11, %v20510_v27  ;;  %v5397_v17 = vmax.f32 %v5363_v52, %v20509_v50  ;;  %v20516_v52 = vld [vmem:[#allocation119_spill] sm:$0xff] }
 0x4ec   : > { %v5398_v60 = vmax.f32 %v5364_v29, %v20510_v27  ;;  %v5365_v61 = vmax.f32 %v5331_v13, %v20476_v7  ;;  %v5761_v32 = vsel %vm2107_vm7, %v5719_v18, %v5720_v45  ;;  %v5890_v59 = vsel %vm2265_vm4, %v5848_v54, %v5849_v23  ;;  %v20518_v29 = vld [vmem:[#allocation145_spill] sm:$0xff] }
 0x4ed   : > { %v5502_v47 = vsel %vm1791_vm6, %v5462_v6, %v5463_v44  ;;  %v5631_v36 = vsel %vm1949_vm12, %v5591_v8, %v5592_v43  ;;  %vm20513_vm5 = vcmp.eq.s32.totalorder %v20512_v16, 1  ;;  %vm20515_vm10 = vcmp.eq.s32.totalorder %v20514_v41, 1  ;;  %v20520_v6 = vld [vmem:[#allocation113_spill] sm:$0xff] }
 0x4ee   : > { %v5784_v56 = vsel %vm20513_vm5, %v5761_v32, -inf  ;;  %v5913_v11 = vsel %vm20515_vm10, %v5890_v59, -inf  ;;  %vm20517_vm14 = vcmp.eq.s32.totalorder %v20516_v52, 1  ;;  %vm20519_vm0 = vcmp.eq.s32.totalorder %v20518_v29, 1  ;;  %v20528_v52 = vld [vmem:[#allocation143_spill] sm:$0xff] }
 0x4ef   : > { %v5527_v13 = vsel %vm20517_vm14, %v5502_v47, -inf  ;;  %v5656_v18 = vsel %vm20519_vm0, %v5631_v36, -inf  ;;  %v5816_v5 = vmax.f32 %v5687_v53, %v5784_v56  ;;  %v5721_v4 = vrot.slane %v5430_v34, 1  ;;  %v20522_v36 = vld [vmem:[#allocation50_spill] sm:$0xff] }
 0x4f0   : > { %v5559_v54 = vmax.f32 %v5429_v51, %v5527_v13  ;;  %v5850_v39 = vrot.slane %v5430_v34, 2  ;;  %v5431_v30 = vmax.f32 %v5397_v17, %v20520_v6  ;;  %v5464_v49 = vrot.slane %v5430_v34, 6  ;;  %v20524_v53 = vld [vmem:[#allocation154_spill] sm:$0xff] }
 0x4f1   : > { %v5593_v8 = vrot.slane %v5430_v34, 7  ;;  %v17718_v16 = vmax.f32 %v5398_v60, %v20521_v14  ;;  %v5945_v32 = vmax.f32 %v5816_v5, %v5913_v11  ;;  %v5760_v59 = vsel %vm2107_vm7, %v5720_v45, %v5721_v4  ;;  %v20526_v11 = vld [vmem:[#allocation109_spill] sm:$0xff] }
 0x4f2   : > { %v5688_v41 = vmax.f32 %v5559_v54, %v5656_v18  ;;  %v5889_v47 = vsel %vm2265_vm4, %v5849_v23, %v5850_v39  ;;  %vm20523_vm3 = vcmp.eq.s32.totalorder %v20522_v36, 1  ;;  %vm20525_vm8 = vcmp.eq.s32.totalorder %v20524_v53, 1 }
 0x4f3   : > { %v5785_v51 = vsel %vm20523_vm3, %v5760_v59, -inf  ;;  %v5914_v56 = vsel %vm20525_vm8, %v5889_v47, -inf  ;;  %v5501_v17 = vsel %vm1791_vm6, %v5463_v44, %v5464_v49  ;;  %v5630_v60 = vsel %vm1949_vm12, %v5592_v43, %v5593_v8  ;;  %8177 = vmatmul.mubr.f32.gmra.mrb[6].mxu1 %v5945_v32 }
 0x4f4   : > { %v5817_v5 = vmax.f32 %v5688_v41, %v5785_v51  ;;  %vm20527_vm13 = vcmp.eq.s32.totalorder %v20526_v11, 1  ;;  %vm20529_vm1 = vcmp.eq.s32.totalorder %v20528_v52, 1  ;;  %v5722_v13 = vrot.slane %v5431_v30, 1  ;;  %v20530_v41 = vld [vmem:[#allocation206_spill] sm:$0xff] }
 0x4f5   : > { %v5528_v45 = vsel %vm20527_vm13, %v5501_v17, -inf  ;;  %v5657_v23 = vsel %vm20529_vm1, %v5630_v60, -inf  ;;  %v5851_v18 = vrot.slane %v5431_v30, 2  ;;  %v5465_v54 = vrot.slane %v5431_v30, 6  ;;  %v20532_v17 = vld [vmem:[#allocation207_spill] sm:$0xff]  ;;  %v20534_v60 = vld [vmem:[#allocation92_spill] sm:$0xff] }
 0x4f6   : > { %v5560_v29 = vmax.f32 %v5430_v34, %v5528_v45  ;;  %v5594_v59 = vrot.slane %v5431_v30, 7  ;;  %v5946_v47 = vmax.f32 %v5817_v5, %v5914_v56  ;;  %v5759_v44 = vsel %vm2107_vm7, %v5721_v4, %v5722_v13  ;;  %v17754_v45 = vpop.f32.mrb[84].mxu0 }
 0x4f7   : > { %v5723_v36 = vrot.slane %v17718_v16, 1  ;;  %v5852_v43 = vrot.slane %v17718_v16, 2  ;;  %vm20531_vm9 = vcmp.eq.s32.totalorder %v20530_v41, 1  ;;  %v5888_v53 = vsel %vm2265_vm4, %v5850_v39, %v5851_v18 }
 0x4f8   : > { %v5689_v32 = vmax.f32 %v5560_v29, %v5657_v23  ;;  %v5786_v51 = vsel %vm20531_vm9, %v5759_v44, -inf  ;;  %v5500_v34 = vsel %vm1791_vm6, %v5464_v49, %v5465_v54  ;;  %8179 = vmatprep.mubr.f32.mxu1 %v5946_v47  ;;  %vm20533_vm15 = vcmp.eq.s32.totalorder %v20532_v17, 1  ;;  %v20536_v23 = vld [vmem:[#allocation149_spill] sm:$0xff]  ;;  %v17760_v44 = vpop.f32.mrb[85].mxu0 }
 0x4f9   : > { %v5915_v56 = vsel %vm20533_vm15, %v5888_v53, -inf  ;;  %vm20535_vm11 = vcmp.eq.s32.totalorder %v20534_v60, 1  ;;  %v5629_v5 = vsel %vm1949_vm12, %v5593_v8, %v5594_v59  ;;  %v5758_v11 = vsel %vm2107_vm7, %v5722_v13, %v5723_v36  ;;  %v20538_v29 = vld [vmem:[#allocation153_spill] sm:$0xff]  ;;  %20540 = vst [vmem:[#allocation134_spill] sm:$0xff] %v17760_v44 }
 0x4fa   : > { %v5529_v4 = vsel %vm20535_vm11, %v5500_v34, -inf  ;;  %v5818_v52 = vmax.f32 %v5689_v32, %v5786_v51  ;;  %vm20537_vm5 = vcmp.eq.s32.totalorder %v20536_v23, 1  ;;  %vm20539_vm10 = vcmp.eq.s32.totalorder %v20538_v29, 1  ;;  %v20547_v23 = vld [vmem:[#allocation147_spill] sm:$0xff] }
 0x4fb   : > { %v5561_v39 = vmax.f32 %v5431_v30, %v5529_v4  ;;  %v5658_v49 = vsel %vm20537_vm5, %v5629_v5, -inf  ;;  %v5787_v47 = vsel %vm20539_vm10, %v5758_v11, -inf  ;;  %v5887_v41 = vsel %vm2265_vm4, %v5851_v18, %v5852_v43  ;;  %v20541_v30 = vld [vmem:[#allocation158_spill] sm:$0xff]  ;;  %v20544_v4 = vld [vmem:[#allocation93_spill] sm:$0xff] }
 0x4fc   : > { %v5399_v8 = vmax.f32 %v5365_v61, %v20520_v6  ;;  %v5466_v53 = vrot.slane %v17718_v16, 6  ;;  %v5595_v13 = vrot.slane %v17718_v16, 7  ;;  %v5947_v34 = vmax.f32 %v5818_v52, %v5915_v56  ;;  %v20545_v52 = vld [vmem:[#allocation116_spill] sm:$0xff] }
 0x4fd   : > { %v5690_v32 = vmax.f32 %v5561_v39, %v5658_v49  ;;  %vm20542_vm14 = vcmp.eq.s32.totalorder %v20541_v30, 1  ;;  %v20543_v17 = vmax.f32 %v20510_v27, %v20464_v57  ;;  %v5333_v56 = vmax.f32 %v20520_v6, %v20476_v7 }
 0x4fe   : > { %v5916_v51 = vsel %vm20542_vm14, %v5887_v41, -inf  ;;  %v5433_v5 = vmax.f32 %v5399_v8, %v20544_v4  ;;  %v5499_v18 = vsel %vm1791_vm6, %v5465_v54, %v5466_v53  ;;  %v5628_v61 = vsel %vm1949_vm12, %v5594_v59, %v5595_v13  ;;  %8180 = vmatmul.mubr.f32.gmra.mrb[8].mxu1 %v5947_v34  ;;  %v20549_v59 = vld [vmem:[#allocation127_spill] sm:$0xff] }
 0x4ff   : > { %v5366_v60 = vmax.f32 %v20543_v17, %v20490_v63  ;;  %v5819_v11 = vmax.f32 %v5690_v32, %v5787_v47  ;;  %vm20546_vm0 = vcmp.eq.s32.totalorder %v20545_v52, 1  ;;  %vm20548_vm3 = vcmp.eq.s32.totalorder %v20547_v23, 1  ;;  %v20556_v23 = vld [vmem:[#allocation152_spill] sm:$0xff] }
 0x500   : > { %v5530_v39 = vsel %vm20546_vm0, %v5499_v18, -inf  ;;  %v5659_v57 = vsel %vm20548_vm3, %v5628_v61, -inf  ;;  %v5724_v41 = vrot.slane %v5433_v5, 1  ;;  %v5853_v54 = vrot.slane %v5433_v5, 2 }
 0x501   : > { %v5400_v49 = vmax.f32 %v5366_v60, %v20521_v14  ;;  %v5562_v29 = vmax.f32 %v17718_v16, %v5530_v39  ;;  %v5467_v8 = vrot.slane %v5433_v5, 6  ;;  %v5948_v30 = vmax.f32 %v5819_v11, %v5916_v51  ;;  %v20550_v16 = vld [vmem:[#allocation208_spill] sm:$0xff]  ;;  %v20552_v51 = vld [vmem:[#allocation209_spill] sm:$0xff]  ;;  %v20554_v11 = vld [vmem:[#allocation94_spill] sm:$0xff] }
 0x502   : > { %v5596_v44 = vrot.slane %v5433_v5, 7  ;;  %v5367_v7 = vmax.f32 %v5333_v56, %v20509_v50  ;;  %v5757_v34 = vsel %vm2107_vm7, %v5723_v36, %v5724_v41  ;;  %v5886_v32 = vsel %vm2265_vm4, %v5852_v43, %v5853_v54 }
 0x503   : > { %v5434_v17 = vmax.f32 %v5400_v49, %v20549_v59  ;;  %v5691_v47 = vmax.f32 %v5562_v29, %v5659_v57  ;;  %v5498_v60 = vsel %vm1791_vm6, %v5466_v53, %v5467_v8  ;;  %8182 = vmatprep.mubr.f32.mxu1 %v5948_v30  ;;  %vm20551_vm8 = vcmp.eq.s32.totalorder %v20550_v16, 1 }
 0x504   : > { %v5788_v18 = vsel %vm20551_vm8, %v5757_v34, -inf  ;;  %vm20553_vm13 = vcmp.eq.s32.totalorder %v20552_v51, 1  ;;  %vm20555_vm1 = vcmp.eq.s32.totalorder %v20554_v11, 1  ;;  %v5627_v52 = vsel %vm1949_vm12, %v5595_v13, %v5596_v44  ;;  %v20558_v13 = vld [vmem:[#allocation157_spill] sm:$0xff]  ;;  %v20561_v11 = vld [vmem:[#allocation162_spill] sm:$0xff] }
 0x505   : > { %v5917_v61 = vsel %vm20553_vm13, %v5886_v32, -inf  ;;  %v5531_v56 = vsel %vm20555_vm1, %v5498_v60, -inf  ;;  %v5820_v36 = vmax.f32 %v5691_v47, %v5788_v18  ;;  %vm20557_vm9 = vcmp.eq.s32.totalorder %v20556_v23, 1  ;;  %v20560_v18 = vld [vmem:[#allocation74_spill] sm:$0xff] }
 0x506   : > { %v5563_v39 = vmax.f32 %v5433_v5, %v5531_v56  ;;  %v5660_v43 = vsel %vm20557_vm9, %v5627_v52, -inf  ;;  %v5725_v57 = vrot.slane %v5434_v17, 1  ;;  %v5854_v53 = vrot.slane %v5434_v17, 2 }
 0x507   : > { %v5401_v49 = vmax.f32 %v5367_v7, %v20544_v4  ;;  %v5468_v29 = vrot.slane %v5434_v17, 6  ;;  %v5597_v30 = vrot.slane %v5434_v17, 7  ;;  %v5949_v34 = vmax.f32 %v5820_v36, %v5917_v61 }
 0x508   : > { %v5692_v16 = vmax.f32 %v5563_v39, %v5660_v43  ;;  %v5756_v32 = vsel %vm2107_vm7, %v5724_v41, %v5725_v57  ;;  %v5334_v60 = vmax.f32 %v20521_v14, %v20490_v63  ;;  %vm20559_vm15 = vcmp.eq.s32.totalorder %v20558_v13, 1  ;;  %v20563_v41 = vld [vmem:[#allocation118_spill] sm:$0xff]  ;;  %v20565_v39 = vld [vmem:[#allocation151_spill] sm:$0xff] }
 0x509   : > { %v5789_v5 = vsel %vm20559_vm15, %v5756_v32, -inf  ;;  %v5885_v47 = vsel %vm2265_vm4, %v5853_v54, %v5854_v53  ;;  %v5435_v51 = vmax.f32 %v5401_v49, %v20560_v18  ;;  %v5497_v7 = vsel %vm1791_vm6, %v5467_v8, %v5468_v29  ;;  %8183 = vmatmul.mubr.f32.gmra.mrb[10].mxu1 %v5949_v34 }
 0x50a   : > { %v5821_v61 = vmax.f32 %v5692_v16, %v5789_v5  ;;  %vm20562_vm11 = vcmp.eq.s32.totalorder %v20561_v11, 1  ;;  %vm20564_vm5 = vcmp.eq.s32.totalorder %v20563_v41, 1  ;;  %v5626_v63 = vsel %vm1949_vm12, %v5596_v44, %v5597_v30 }
 0x50b   : > { %v5918_v56 = vsel %vm20562_vm11, %v5885_v47, -inf  ;;  %v5532_v52 = vsel %vm20564_vm5, %v5497_v7, -inf  ;;  %vm20566_vm10 = vcmp.eq.s32.totalorder %v20565_v39, 1  ;;  %v5726_v23 = vrot.slane %v5435_v51, 1  ;;  %v20569_v7 = vld [vmem:[#allocation211_spill] sm:$0xff] }
 0x50c   : > { %v5564_v36 = vmax.f32 %v5434_v17, %v5532_v52  ;;  %v5661_v54 = vsel %vm20566_vm10, %v5626_v63, -inf  ;;  %v5855_v43 = vrot.slane %v5435_v51, 2  ;;  %v5950_v49 = vmax.f32 %v5821_v61, %v5918_v56  ;;  %v20567_v17 = vld [vmem:[#allocation210_spill] sm:$0xff] }
 0x50d   : > { %v5368_v8 = vmax.f32 %v5334_v60, %v20510_v27  ;;  %v5469_v34 = vrot.slane %v5435_v51, 6  ;;  %v5598_v16 = vrot.slane %v5435_v51, 7  ;;  %v5755_v13 = vsel %vm2107_vm7, %v5725_v57, %v5726_v23  ;;  %v20571_v57 = vld [vmem:[#allocation19_spill] sm:$0xff] }
 0x50e   : > { %v5693_v32 = vmax.f32 %v5564_v36, %v5661_v54  ;;  %v5884_v5 = vsel %vm2265_vm4, %v5854_v53, %v5855_v43  ;;  %v5335_v44 = vmax.f32 %v20544_v4, %v20509_v50  ;;  %8185 = vmatprep.mubr.f32.mxu1 %v5950_v49  ;;  %vm20568_vm14 = vcmp.eq.s32.totalorder %v20567_v17, 1  ;;  %v20573_v36 = vld [vmem:[#allocation156_spill] sm:$0xff] }
 0x50f   : > { %v5790_v47 = vsel %vm20568_vm14, %v5755_v13, -inf  ;;  %vm20570_vm0 = vcmp.eq.s32.totalorder %v20569_v7, 1  ;;  %v5402_v60 = vmax.f32 %v5368_v8, %v20549_v59  ;;  %v5496_v11 = vsel %vm1791_vm6, %v5468_v29, %v5469_v34 }
 0x510   : > { %v5919_v61 = vsel %vm20570_vm0, %v5884_v5, -inf  ;;  %v5822_v56 = vmax.f32 %v5693_v32, %v5790_v47  ;;  %vm20572_vm3 = vcmp.eq.s32.totalorder %v20571_v57, 1  ;;  %v5625_v53 = vsel %vm1949_vm12, %v5597_v30, %v5598_v16  ;;  %v20575_v57 = vld [vmem:[#allocation161_spill] sm:$0xff] }
 0x511   : > { %v5533_v41 = vsel %vm20572_vm3, %v5496_v11, -inf  ;;  %v5369_v50 = vmax.f32 %v5335_v44, %v20520_v6  ;;  %v5436_v52 = vmax.f32 %v5402_v60, %v16425_v20  ;;  %vm20574_vm8 = vcmp.eq.s32.totalorder %v20573_v36, 1 }
 0x512   : > { %v5565_v63 = vmax.f32 %v5435_v51, %v5533_v41  ;;  %v5662_v39 = vsel %vm20574_vm8, %v5625_v53, -inf  ;;  %v5336_v54 = vmax.f32 %v20549_v59, %v20510_v27  ;;  %v5951_v49 = vmax.f32 %v5822_v56, %v5919_v61  ;;  %v17853_v51 = vpop.f32.mrb[86].mxu0  ;;  %v20577_v53 = vld [vmem:[#allocation166_spill] sm:$0xff] }
 0x513   : > { %v5403_v29 = vmax.f32 %v5369_v50, %v20560_v18  ;;  %v5337_v8 = vmax.f32 %v20560_v18, %v20520_v6  ;;  %v5338_v30 = vmax.f32 %v16425_v20, %v20521_v14  ;;  %v5727_v13 = vrot.slane %v5436_v52, 1  ;;  %v17858_v61 = vpop.f32.mrb[87].mxu0  ;;  %v20579_v50 = vld [vmem:[#allocation89_spill] sm:$0xff] }
 0x514   : > { %v5694_v32 = vmax.f32 %v5565_v63, %v5662_v39  ;;  %v5856_v5 = vrot.slane %v5436_v52, 2  ;;  %v5470_v44 = vrot.slane %v5436_v52, 6  ;;  %8186 = vmatmul.mubr.f32.gmra.mrb[12].mxu1 %v5951_v49  ;;  %v5599_v47 = vrot.slane %v5436_v52, 7  ;;  %v17877_v49 = vpop.f32.mrb[56].mxu0 }
 0x515   : > { %v5437_v17 = vmax.f32 %v5403_v29, %v16475_v31  ;;  %v5370_v27 = vmax.f32 %v5336_v54, %v20521_v14  ;;  %v5371_v7 = vmax.f32 %v5337_v8, %v20544_v4  ;;  %v5754_v6 = vsel %vm2107_vm7, %v5726_v23, %v5727_v13 }
 0x516   : > { %v5883_v60 = vsel %vm2265_vm4, %v5855_v43, %v5856_v5  ;;  %v5495_v11 = vsel %vm1791_vm6, %v5469_v34, %v5470_v44  ;;  %v5372_v56 = vmax.f32 %v5338_v30, %v20549_v59  ;;  %vm20576_vm13 = vcmp.eq.s32.totalorder %v20575_v57, 1  ;;  %v20581_v43 = vld [vmem:[#allocation155_spill] sm:$0xff] }
 0x517   : > { %v5791_v41 = vsel %vm20576_vm13, %v5754_v6, -inf  ;;  %vm20578_vm1 = vcmp.eq.s32.totalorder %v20577_v53, 1  ;;  %vm20580_vm9 = vcmp.eq.s32.totalorder %v20579_v50, 1  ;;  %v5624_v23 = vsel %vm1949_vm12, %v5598_v16, %v5599_v47 }
 0x518   : > { %v5920_v14 = vsel %vm20578_vm1, %v5883_v60, -inf  ;;  %v5534_v63 = vsel %vm20580_vm9, %v5495_v11, -inf  ;;  %v5823_v36 = vmax.f32 %v5694_v32, %v5791_v41  ;;  %vm20582_vm15 = vcmp.eq.s32.totalorder %v20581_v43, 1  ;;  %v17880_v60 = vpop.f32.mrb[57].mxu0  ;;  %v20583_v32 = vld [vmem:[#allocation212_spill] sm:$0xff] }
 0x519   : > { %v5566_v39 = vmax.f32 %v5436_v52, %v5534_v63  ;;  %v5663_v54 = vsel %vm20582_vm15, %v5624_v23, -inf  ;;  %v5728_v34 = vrot.slane %v5437_v17, 1  ;;  %v5857_v29 = vrot.slane %v5437_v17, 2 }
 0x51a   : > { %v5404_v8 = vmax.f32 %v5370_v27, %v16425_v20  ;;  %v5471_v30 = vrot.slane %v5437_v17, 6  ;;  %v5600_v6 = vrot.slane %v5437_v17, 7  ;;  %v5952_v57 = vmax.f32 %v5823_v36, %v5920_v14  ;;  %v20585_v14 = vld [vmem:[#allocation213_spill] sm:$0xff]  ;;  %v20587_v36 = vld [vmem:[#allocation100_spill] sm:$0xff] }
 0x51b   : > { %v5695_v11 = vmax.f32 %v5566_v39, %v5663_v54  ;;  %v5753_v16 = vsel %vm2107_vm7, %v5727_v13, %v5728_v34  ;;  %v5405_v52 = vmax.f32 %v5371_v7, %v16475_v31  ;;  %vm20584_vm11 = vcmp.eq.s32.totalorder %v20583_v32, 1  ;;  %v17898_v39 = vpop.f32.mrb[58].mxu0 }
 0x51c   : > { %v5792_v41 = vsel %vm20584_vm11, %v5753_v16, -inf  ;;  %v5882_v53 = vsel %vm2265_vm4, %v5856_v5, %v5857_v29  ;;  %v5438_v50 = vmax.f32 %v5404_v8, %v16569_v3  ;;  %v5494_v27 = vsel %vm1791_vm6, %v5470_v44, %v5471_v30  ;;  %8188 = vmatprep.mubr.f32.mxu1 %v5952_v57  ;;  %v20589_v5 = vld [vmem:[#allocation160_spill] sm:$0xff]  ;;  %v17902_v44 = vpop.f32.mrb[59].mxu0 }
 0x51d   : > { %v5824_v63 = vmax.f32 %v5695_v11, %v5792_v41  ;;  %vm20586_vm5 = vcmp.eq.s32.totalorder %v20585_v14, 1  ;;  %vm20588_vm10 = vcmp.eq.s32.totalorder %v20587_v36, 1  ;;  %v5623_v7 = vsel %vm1949_vm12, %v5599_v47, %v5600_v6  ;;  %v20591_v14 = vld [vmem:[#allocation165_spill] sm:$0xff] }
 0x51e   : > { %v5921_v23 = vsel %vm20586_vm5, %v5882_v53, -inf  ;;  %v5535_v13 = vsel %vm20588_vm10, %v5494_v27, -inf  ;;  %vm20590_vm14 = vcmp.eq.s32.totalorder %v20589_v5, 1  ;;  %v5729_v8 = vrot.slane %v5438_v50, 1 }
 0x51f   : > { %v5567_v43 = vmax.f32 %v5437_v17, %v5535_v13  ;;  %v5664_v54 = vsel %vm20590_vm14, %v5623_v7, -inf  ;;  %v5858_v16 = vrot.slane %v5438_v50, 2  ;;  %v5953_v57 = vmax.f32 %v5824_v63, %v5921_v23  ;;  %v20593_v13 = vld [vmem:[#allocation170_spill] sm:$0xff] }
 0x520   : > { %v5439_v11 = vmax.f32 %v5405_v52, %v16640_v25  ;;  %v5472_v32 = vrot.slane %v5438_v50, 6  ;;  %v5601_v41 = vrot.slane %v5438_v50, 7  ;;  %v5752_v27 = vsel %vm2107_vm7, %v5728_v34, %v5729_v8  ;;  %v20595_v34 = vld [vmem:[#allocation120_spill] sm:$0xff] }
 0x521   : > { %v5696_v53 = vmax.f32 %v5567_v43, %v5664_v54  ;;  %v5881_v47 = vsel %vm2265_vm4, %v5857_v29, %v5858_v16  ;;  %v5406_v17 = vmax.f32 %v5372_v56, %v16569_v3  ;;  %8189 = vmatmul.mubr.f32.gmra.mrb[14].mxu1 %v5953_v57  ;;  %vm20592_vm0 = vcmp.eq.s32.totalorder %v20591_v14, 1  ;;  %v20597_v29 = vld [vmem:[#allocation159_spill] sm:$0xff] }
 0x522   : > { %v5793_v36 = vsel %vm20592_vm0, %v5752_v27, -inf  ;;  %vm20594_vm3 = vcmp.eq.s32.totalorder %v20593_v13, 1  ;;  %v5493_v52 = vsel %vm1791_vm6, %v5471_v30, %v5472_v32  ;;  %v5622_v23 = vsel %vm1949_vm12, %v5600_v6, %v5601_v41 }
 0x523   : > { %v5922_v63 = vsel %vm20594_vm3, %v5881_v47, -inf  ;;  %v5825_v7 = vmax.f32 %v5696_v53, %v5793_v36  ;;  %vm20596_vm8 = vcmp.eq.s32.totalorder %v20595_v34, 1  ;;  %vm20598_vm13 = vcmp.eq.s32.totalorder %v20597_v29, 1  ;;  %v20599_v36 = vld [vmem:[#allocation214_spill] sm:$0xff] }
 0x524   : > { %v5536_v43 = vsel %vm20596_vm8, %v5493_v52, -inf  ;;  %v5665_v56 = vsel %vm20598_vm13, %v5622_v23, -inf  ;;  %v5730_v5 = vrot.slane %v5439_v11, 1  ;;  %v5859_v57 = vrot.slane %v5439_v11, 2  ;;  %v20601_v23 = vld [vmem:[#allocation169_spill] sm:$0xff] }
 0x525   : > { %v5568_v54 = vmax.f32 %v5438_v50, %v5536_v43  ;;  %v17923_v27 = vmax.f32 %v5406_v17, %v16729_v19  ;;  %v5473_v47 = vrot.slane %v5439_v11, 6  ;;  %v5954_v14 = vmax.f32 %v5825_v7, %v5922_v63  ;;  %v20603_v7 = vld [vmem:[#allocation41_spill] sm:$0xff] }
 0x526   : > { %v5751_v30 = vsel %vm2107_vm7, %v5729_v8, %v5730_v5  ;;  %v5602_v13 = vrot.slane %v5439_v11, 7  ;;  %v5339_v6 = vmax.f32 %v16475_v31, %v20544_v4  ;;  %vm20600_vm1 = vcmp.eq.s32.totalorder %v20599_v36, 1 }
 0x527   : > { %v5697_v53 = vmax.f32 %v5568_v54, %v5665_v56  ;;  %v5794_v52 = vsel %vm20600_vm1, %v5751_v30, -inf  ;;  %v5880_v50 = vsel %vm2265_vm4, %v5858_v16, %v5859_v57  ;;  %v5492_v17 = vsel %vm1791_vm6, %v5472_v32, %v5473_v47  ;;  %8191 = vmatprep.mubr.f32.mxu1 %v5954_v14  ;;  %v20605_v56 = vld [vmem:[#allocation164_spill] sm:$0xff] }
 0x528   : > { %vm20602_vm9 = vcmp.eq.s32.totalorder %v20601_v23, 1  ;;  %vm20604_vm15 = vcmp.eq.s32.totalorder %v20603_v7, 1  ;;  %v5621_v4 = vsel %vm1949_vm12, %v5601_v41, %v5602_v13  ;;  %v5731_v34 = vrot.slane %v17923_v27, 1 }
 0x529   : > { %v5923_v63 = vsel %vm20602_vm9, %v5880_v50, -inf  ;;  %v5537_v8 = vsel %vm20604_vm15, %v5492_v17, -inf  ;;  %v5826_v43 = vmax.f32 %v5697_v53, %v5794_v52  ;;  %vm20606_vm11 = vcmp.eq.s32.totalorder %v20605_v56, 1  ;;  %v20607_v17 = vld [vmem:[#allocation33_spill] sm:$0xff]  ;;  %v20609_v52 = vld [vmem:[#allocation174_spill] sm:$0xff] }
 0x52a   : > { %v5569_v29 = vmax.f32 %v5439_v11, %v5537_v8  ;;  %v5666_v16 = vsel %vm20606_vm11, %v5621_v4, -inf  ;;  %v5860_v54 = vrot.slane %v17923_v27, 2  ;;  %v5750_v32 = vsel %vm2107_vm7, %v5730_v5, %v5731_v34  ;;  %v20611_v8 = vld [vmem:[#allocation95_spill] sm:$0xff] }
 0x52b   : > { %v5373_v14 = vmax.f32 %v5339_v6, %v20560_v18  ;;  %v5474_v30 = vrot.slane %v17923_v27, 6  ;;  %v5603_v36 = vrot.slane %v17923_v27, 7  ;;  %v5955_v50 = vmax.f32 %v5826_v43, %v5923_v63  ;;  %v20613_v43 = vld [vmem:[#allocation163_spill] sm:$0xff] }
 0x52c   : > { %v5698_v41 = vmax.f32 %v5569_v29, %v5666_v16  ;;  %vm20608_vm5 = vcmp.eq.s32.totalorder %v20607_v17, 1  ;;  %v5879_v11 = vsel %vm2265_vm4, %v5859_v57, %v5860_v54  ;;  %vm20610_vm10 = vcmp.eq.s32.totalorder %v20609_v52, 1 }
 0x52d   : > { %v5795_v53 = vsel %vm20608_vm5, %v5750_v32, -inf  ;;  %v5924_v23 = vsel %vm20610_vm10, %v5879_v11, -inf  ;;  %v5407_v7 = vmax.f32 %v5373_v14, %v16640_v25  ;;  %v5491_v5 = vsel %vm1791_vm6, %v5473_v47, %v5474_v30  ;;  %8192 = vmatmul.mubr.f32.gmra.mrb[16].mxu1 %v5955_v50 }
 0x52e   : > { %v5620_v6 = vsel %vm1949_vm12, %v5602_v13, %v5603_v36  ;;  %v5827_v63 = vmax.f32 %v5698_v41, %v5795_v53  ;;  %vm20612_vm14 = vcmp.eq.s32.totalorder %v20611_v8, 1  ;;  %vm20614_vm0 = vcmp.eq.s32.totalorder %v20613_v43, 1  ;;  %v20620_v8 = vld [vmem:[#allocation43_spill] sm:$0xff] }
 0x52f   : > { %v5538_v4 = vsel %vm20612_vm14, %v5491_v5, -inf  ;;  %v5667_v29 = vsel %vm20614_vm0, %v5620_v6, -inf  ;;  %v5340_v57 = vmax.f32 %v16569_v3, %v20549_v59  ;;  %v5441_v56 = vmax.f32 %v5407_v7, %v16767_v46  ;;  %v20616_v5 = vld [vmem:[#allocation79_spill] sm:$0xff] }
 0x530   : > { %v5570_v16 = vmax.f32 %v17923_v27, %v5538_v4  ;;  %v5341_v47 = vmax.f32 %v16640_v25, %v20560_v18  ;;  %v5735_v13 = vrot.slane %v17036_v58, 1  ;;  %v5956_v32 = vmax.f32 %v5827_v63, %v5924_v23 }
 0x531   : > { %v5374_v14 = vmax.f32 %v5340_v57, %v16425_v20  ;;  %v5864_v50 = vrot.slane %v17036_v58, 2  ;;  %v20615_v41 = vmax.f32 %v16906_v33, %v16942_v38  ;;  %v5732_v59 = vrot.slane %v5441_v56, 1 }
 0x532   : > { %v5699_v3 = vmax.f32 %v5570_v16, %v5667_v29  ;;  %v5861_v53 = vrot.slane %v5441_v56, 2  ;;  %v5475_v27 = vrot.slane %v5441_v56, 6  ;;  %8194 = vmatprep.mubr.f32.mxu1 %v5956_v32  ;;  %v5604_v18 = vrot.slane %v5441_v56, 7  ;;  %v20622_v29 = vld [vmem:[#allocation168_spill] sm:$0xff] }
 0x533   : > { %v17978_v17 = vmax.f32 %v20615_v41, %v17009_v28  ;;  %v5408_v25 = vmax.f32 %v5374_v14, %v16729_v19  ;;  %v5375_v11 = vmax.f32 %v5341_v47, %v16475_v31  ;;  %v5478_v20 = vrot.slane %v17036_v58, 6  ;;  %v20618_v19 = vld [vmem:[#allocation26_spill] sm:$0xff] }
 0x534   : > { %v5749_v52 = vsel %vm2107_vm7, %v5731_v34, %v5732_v59  ;;  %v5878_v33 = vsel %vm2265_vm4, %v5860_v54, %v5861_v53  ;;  %v5490_v23 = vsel %vm1791_vm6, %v5474_v30, %v5475_v27  ;;  %v5607_v7 = vrot.slane %v17036_v58, 7 }
 0x535   : > { %vm20617_vm3 = vcmp.eq.s32.totalorder %v20616_v5, 1  ;;  %vm20619_vm8 = vcmp.eq.s32.totalorder %v20618_v19, 1  ;;  %v5442_v31 = vmax.f32 %v5408_v25, %v16867_v15  ;;  %vm20621_vm13 = vcmp.eq.s32.totalorder %v20620_v8, 1  ;;  %v20630_v8 = vld [vmem:[#allocation167_spill] sm:$0xff] }
 0x536   : > { %v5796_v6 = vsel %vm20617_vm3, %v5749_v52, -inf  ;;  %v5925_v63 = vsel %vm20619_vm8, %v5878_v33, -inf  ;;  %v5539_v4 = vsel %vm20621_vm13, %v5490_v23, -inf  ;;  %v5619_v54 = vsel %vm1949_vm12, %v5603_v36, %v5604_v18  ;;  %v20624_v52 = vld [vmem:[#allocation135_spill] sm:$0xff] }
 0x537   : > { %v5828_v34 = vmax.f32 %v5699_v3, %v5796_v6  ;;  %v5571_v43 = vmax.f32 %v5441_v56, %v5539_v4  ;;  %v5409_v30 = vmax.f32 %v5375_v11, %v16767_v46  ;;  %vm20623_vm1 = vcmp.eq.s32.totalorder %v20622_v29, 1  ;;  %v20626_v23 = vld [vmem:[#allocation87_spill] sm:$0xff]  ;;  %v20628_v6 = vld [vmem:[#allocation96_spill] sm:$0xff] }
 0x538   : > { %v5668_v57 = vsel %vm20623_vm1, %v5619_v54, -inf  ;;  %v5733_v16 = vrot.slane %v5442_v31, 1  ;;  %v5862_v47 = vrot.slane %v5442_v31, 2  ;;  %v5476_v32 = vrot.slane %v5442_v31, 6 }
 0x539   : > { %v5957_v14 = vmax.f32 %v5828_v34, %v5925_v63  ;;  %v5700_v41 = vmax.f32 %v5571_v43, %v5668_v57  ;;  %v5443_v15 = vmax.f32 %v5409_v30, %v16942_v38  ;;  %v5605_v25 = vrot.slane %v5442_v31, 7 }
 0x53a   : > { %v5748_v3 = vsel %vm2107_vm7, %v5732_v59, %v5733_v16  ;;  %v5877_v56 = vsel %vm2265_vm4, %v5861_v53, %v5862_v47  ;;  %v5489_v36 = vsel %vm1791_vm6, %v5475_v27, %v5476_v32  ;;  %v5736_v11 = vrot.slane %v17978_v17, 1 }
 0x53b   : > { %8195 = vmatmul.mubr.f32.gmra.mrb[18].mxu1 %v5957_v14  ;;  %vm20625_vm9 = vcmp.eq.s32.totalorder %v20624_v52, 1  ;;  %vm20627_vm15 = vcmp.eq.s32.totalorder %v20626_v23, 1  ;;  %vm20629_vm11 = vcmp.eq.s32.totalorder %v20628_v6, 1  ;;  %v5618_v59 = vsel %vm1949_vm12, %v5604_v18, %v5605_v25  ;;  %v20636_v23 = vld [vmem:[#allocation48_spill] sm:$0xff] }
 0x53c   : > { %v5797_v33 = vsel %vm20625_vm9, %v5748_v3, -inf  ;;  %v5926_v5 = vsel %vm20627_vm15, %v5877_v56, -inf  ;;  %v5540_v19 = vsel %vm20629_vm11, %v5489_v36, -inf  ;;  %vm20631_vm5 = vcmp.eq.s32.totalorder %v20630_v8, 1 }
 0x53d   : > { %v5829_v63 = vmax.f32 %v5700_v41, %v5797_v33  ;;  %v5572_v53 = vmax.f32 %v5442_v31, %v5540_v19  ;;  %v5669_v27 = vsel %vm20631_vm5, %v5618_v59, -inf  ;;  %v5734_v4 = vrot.slane %v5443_v15, 1  ;;  %v20632_v41 = vld [vmem:[#allocation77_spill] sm:$0xff]  ;;  %v20634_v33 = vld [vmem:[#allocation54_spill] sm:$0xff] }
 0x53e   : > { %v5863_v34 = vrot.slane %v5443_v15, 2  ;;  %v5477_v43 = vrot.slane %v5443_v15, 6  ;;  %v5606_v54 = vrot.slane %v5443_v15, 7  ;;  %v5745_v30 = vsel %vm2107_vm7, %v5735_v13, %v5736_v11  ;;  %v20640_v59 = vld [vmem:[#allocation173_spill] sm:$0xff] }
 0x53f   : > { %v5958_v29 = vmax.f32 %v5829_v63, %v5926_v5  ;;  %v5701_v57 = vmax.f32 %v5572_v53, %v5669_v27  ;;  %v5747_v14 = vsel %vm2107_vm7, %v5733_v16, %v5734_v4  ;;  %v5746_v18 = vsel %vm2107_vm7, %v5734_v4, %v5735_v13  ;;  %v20638_v5 = vld [vmem:[#allocation172_spill] sm:$0xff]  ;;  %v20642_v53 = vld [vmem:[#allocation178_spill] sm:$0xff] }
 0x540   : > { %vm20633_vm10 = vcmp.eq.s32.totalorder %v20632_v41, 1  ;;  %v5876_v3 = vsel %vm2265_vm4, %v5862_v47, %v5863_v34  ;;  %v5488_v56 = vsel %vm1791_vm6, %v5476_v32, %v5477_v43  ;;  %v5617_v36 = vsel %vm1949_vm12, %v5605_v25, %v5606_v54  ;;  %v20644_v27 = vld [vmem:[#allocation40_spill] sm:$0xff] }
 0x541   : > { %v5798_v31 = vsel %vm20633_vm10, %v5747_v14, -inf  ;;  %8197 = vmatprep.mubr.f32.mxu1 %v5958_v29  ;;  %vm20635_vm14 = vcmp.eq.s32.totalorder %v20634_v33, 1  ;;  %vm20637_vm0 = vcmp.eq.s32.totalorder %v20636_v23, 1  ;;  %vm20639_vm3 = vcmp.eq.s32.totalorder %v20638_v5, 1 }
 0x542   : > { %v5830_v52 = vmax.f32 %v5701_v57, %v5798_v31  ;;  %v5927_v16 = vsel %vm20635_vm14, %v5876_v3, -inf  ;;  %v5541_v13 = vsel %vm20637_vm0, %v5488_v56, -inf  ;;  %v5670_v6 = vsel %vm20639_vm3, %v5617_v36, -inf  ;;  %v20646_v57 = vld [vmem:[#allocation171_spill] sm:$0xff]  ;;  %v20650_v31 = vld [vmem:[#allocation69_spill] sm:$0xff] }
 0x543   : > { %v5573_v19 = vmax.f32 %v5443_v15, %v5541_v13  ;;  %vm20641_vm8 = vcmp.eq.s32.totalorder %v20640_v59, 1  ;;  %v5875_v32 = vsel %vm2265_vm4, %v5863_v34, %v5864_v50  ;;  %v5487_v25 = vsel %vm1791_vm6, %v5477_v43, %v5478_v20  ;;  %v20651_v3 = vld [vmem:[#allocation189_spill] sm:$0xff] }
 0x544   : > { %v5799_v47 = vsel %vm20641_vm8, %v5746_v18, -inf  ;;  %v5959_v63 = vmax.f32 %v5830_v52, %v5927_v16  ;;  %vm20643_vm13 = vcmp.eq.s32.totalorder %v20642_v53, 1  ;;  %vm20645_vm1 = vcmp.eq.s32.totalorder %v20644_v27, 1  ;;  %v20648_v18 = vld [vmem:[#allocation177_spill] sm:$0xff] }
 0x545   : > { %v5928_v8 = vsel %vm20643_vm13, %v5875_v32, -inf  ;;  %v5542_v15 = vsel %vm20645_vm1, %v5487_v25, -inf  ;;  %v5616_v4 = vsel %vm1949_vm12, %v5606_v54, %v5607_v7  ;;  %v5702_v29 = vmax.f32 %v5573_v19, %v5670_v6  ;;  %v20652_v56 = vld [vmem:[#allocation57_spill] sm:$0xff] }
 0x546   : > { %v5574_v34 = vmax.f32 %v17036_v58, %v5542_v15  ;;  %vm20647_vm9 = vcmp.eq.s32.totalorder %v20646_v57, 1  ;;  %vm20649_vm15 = vcmp.eq.s32.totalorder %v20648_v18, 1  ;;  %8198 = vmatmul.mubr.f32.gmra.mrb[20].mxu1 %v5959_v63  ;;  %v5865_v41 = vrot.slane %v17978_v17, 2  ;;  %v20654_v13 = vld [vmem:[#allocation125_spill] sm:$0xff]  ;;  %v20661_v57 = vld [vmem:[#allocation64_spill] sm:$0xff] }
 0x547   : > { %v5671_v14 = vsel %vm20647_vm9, %v5616_v4, -inf  ;;  %v5800_v43 = vsel %vm20649_vm15, %v5745_v30, -inf  ;;  %v20653_v36 = vmax.f32 %v20651_v3, %v20652_v56  ;;  %v5479_v33 = vrot.slane %v17978_v17, 6  ;;  %v20655_v6 = vld [vmem:[#allocation49_spill] sm:$0xff]  ;;  %v20663_v56 = vld [vmem:[#allocation67_spill] sm:$0xff] }
 0x548   : > { %v5608_v54 = vrot.slane %v17978_v17, 7  ;;  %v5831_v16 = vmax.f32 %v5702_v29, %v5799_v47  ;;  %v5703_v23 = vmax.f32 %v5574_v34, %v5671_v14  ;;  %v5413_v5 = vmax.f32 %v20654_v13, %v17009_v28  ;;  %v20657_v15 = vld [vmem:[#allocation53_spill] sm:$0xff]  ;;  %v20659_v29 = vld [vmem:[#allocation176_spill] sm:$0xff] }
 0x549   : > { %v5446_v52 = vmax.f32 %v20653_v36, %v20650_v31  ;;  %v5414_v30 = vmax.f32 %v20655_v6, %v20650_v31  ;;  %v5874_v19 = vsel %vm2265_vm4, %v5864_v50, %v5865_v41  ;;  %v5486_v59 = vsel %vm1791_vm6, %v5478_v20, %v5479_v33  ;;  %v20665_v6 = vld [vmem:[#allocation42_spill] sm:$0xff] }
 0x54a   : > { %v5615_v47 = vsel %vm1949_vm12, %v5607_v7, %v5608_v54  ;;  %v5960_v25 = vmax.f32 %v5831_v16, %v5928_v8  ;;  %v5832_v63 = vmax.f32 %v5703_v23, %v5800_v43  ;;  %v5929_v27 = vsel %vm4343_vm2, %v5874_v19, -inf }
 0x54b   : > { %v5737_v32 = vrot.slane %v5446_v52, 1  ;;  %vm20658_vm11 = vcmp.eq.s32.totalorder %v20657_v15, 1  ;;  %vm20660_vm5 = vcmp.eq.s32.totalorder %v20659_v29, 1  ;;  %v5866_v20 = vrot.slane %v5446_v52, 2 }
 0x54c   : > { %v5543_v4 = vsel %vm20658_vm11, %v5486_v59, -inf  ;;  %v5672_v34 = vsel %vm20660_vm5, %v5615_v47, -inf  ;;  %8200 = vmatprep.mubr.f32.mxu1 %v5960_v25  ;;  %v5961_v7 = vmax.f32 %v5832_v63, %v5929_v27  ;;  %vm20662_vm10 = vcmp.eq.s32.totalorder %v20661_v57, 1  ;;  %v20667_v47 = vld [vmem:[#allocation175_spill] sm:$0xff]  ;;  %v20669_v63 = vld [vmem:[#allocation197_spill] sm:$0xff] }
 0x54d   : > { %v5575_v50 = vmax.f32 %v17978_v17, %v5543_v4  ;;  %v5744_v58 = vsel %vm2107_vm7, %v5736_v11, %v5737_v32  ;;  %v5447_v14 = vmax.f32 %v5413_v5, %v17323_v26  ;;  %v5480_v18 = vrot.slane %v5446_v52, 6  ;;  %v20671_v27 = vld [vmem:[#allocation181_spill] sm:$0xff]  ;;  %v20673_v4 = vld [vmem:[#allocation123_spill] sm:$0xff] }
 0x54e   : > { %v5801_v8 = vsel %vm20662_vm10, %v5744_v58, -inf  ;;  %v5873_v31 = vsel %vm2265_vm4, %v5865_v41, %v5866_v20  ;;  %v5609_v17 = vrot.slane %v5446_v52, 7  ;;  %v5448_v3 = vmax.f32 %v5414_v30, %v17505_v21  ;;  %8201 = vmatmul.mubr.f32.gmra.mrb[22].mxu1 %v5961_v7 }
 0x54f   : > { %v5704_v43 = vmax.f32 %v5575_v50, %v5672_v34  ;;  %vm20664_vm2 = vcmp.eq.s32.totalorder %v20663_v56, 1  ;;  %v5485_v36 = vsel %vm1791_vm6, %v5479_v33, %v5480_v18  ;;  %v5738_v16 = vrot.slane %v5447_v14, 1 }
 0x550   : > { %v5930_v11 = vsel %vm20664_vm2, %v5873_v31, -inf  ;;  %v5867_v23 = vrot.slane %v5447_v14, 2  ;;  %vm20666_vm14 = vcmp.eq.s32.totalorder %v20665_v6, 1  ;;  %v5614_v19 = vsel %vm1949_vm12, %v5608_v54, %v5609_v17  ;;  %v20675_v31 = vld [vmem:[#allocation180_spill] sm:$0xff] }
 0x551   : > { %v5833_v13 = vmax.f32 %v5704_v43, %v5801_v8  ;;  %v5544_v5 = vsel %vm20666_vm14, %v5485_v36, -inf  ;;  %v5481_v41 = vrot.slane %v5447_v14, 6  ;;  %vm20668_vm0 = vcmp.eq.s32.totalorder %v20667_v47, 1 }
 0x552   : > { %v5576_v59 = vmax.f32 %v5446_v52, %v5544_v5  ;;  %v5673_v21 = vsel %vm20668_vm0, %v5614_v19, -inf  ;;  %v5743_v30 = vsel %vm2107_vm7, %v5737_v32, %v5738_v16  ;;  %v5872_v33 = vsel %vm2265_vm4, %v5866_v20, %v5867_v23 }
 0x553   : > { %v5962_v25 = vmax.f32 %v5833_v13, %v5930_v11  ;;  %vm20670_vm3 = vcmp.eq.s32.totalorder %v20669_v63, 1  ;;  %vm20672_vm8 = vcmp.eq.s32.totalorder %v20671_v27, 1  ;;  %v5484_v54 = vsel %vm1791_vm6, %v5480_v18, %v5481_v41  ;;  %v20677_v11 = vld [vmem:[#allocation99_spill] sm:$0xff] }
 0x554   : > { %v5802_v53 = vsel %vm20670_vm3, %v5743_v30, -inf  ;;  %v5931_v15 = vsel %vm20672_vm8, %v5872_v33, -inf  ;;  %v5705_v52 = vmax.f32 %v5576_v59, %v5673_v21  ;;  %vm20674_vm13 = vcmp.eq.s32.totalorder %v20673_v4, 1  ;;  %v20681_v21 = vld [vmem:[#allocation126_spill] sm:$0xff]  ;;  %v20683_v30 = vld [vmem:[#allocation81_spill] sm:$0xff] }
 0x555   : > { %v5545_v50 = vsel %vm20674_vm13, %v5484_v54, -inf  ;;  %v5610_v29 = vrot.slane %v5447_v14, 7  ;;  %v5739_v34 = vrot.slane %v5448_v3, 1  ;;  %8203 = vmatprep.mubr.f32.mxu1 %v5962_v25  ;;  %v5868_v58 = vrot.slane %v5448_v3, 2 }
 0x556   : > { %v5577_v32 = vmax.f32 %v5447_v14, %v5545_v50  ;;  %v5347_v20 = vmax.f32 %v17009_v28, %v16767_v46  ;;  %v5482_v7 = vrot.slane %v5448_v3, 6  ;;  %v5834_v57 = vmax.f32 %v5705_v52, %v5802_v53  ;;  %v20687_v52 = vld [vmem:[#allocation111_spill] sm:$0xff] }
 0x557   : > { %v5613_v8 = vsel %vm1949_vm12, %v5609_v17, %v5610_v29  ;;  %v5742_v18 = vsel %vm2107_vm7, %v5738_v16, %v5739_v34  ;;  %v5611_v43 = vrot.slane %v5448_v3, 7  ;;  %vm20676_vm1 = vcmp.eq.s32.totalorder %v20675_v31, 1  ;;  %v20679_v16 = vld [vmem:[#allocation23_spill] sm:$0xff] }
 0x558   : > { %v5674_v56 = vsel %vm20676_vm1, %v5613_v8, -inf  ;;  %vm20678_vm9 = vcmp.eq.s32.totalorder %v20677_v11, 1  ;;  %v5871_v14 = vsel %vm2265_vm4, %v5867_v23, %v5868_v58  ;;  %v5381_v46 = vmax.f32 %v5347_v20, %v16942_v38 }
 0x559   : > { %v5803_v36 = vsel %vm20678_vm9, %v5742_v18, -inf  ;;  %v5963_v28 = vmax.f32 %v5834_v57, %v5931_v15  ;;  %v5706_v13 = vmax.f32 %v5577_v32, %v5674_v56  ;;  %v5483_v17 = vsel %vm1791_vm6, %v5481_v41, %v5482_v7 }
 0x55a   : > { %v5415_v6 = vmax.f32 %v5381_v46, %v17323_v26  ;;  %vm20680_vm15 = vcmp.eq.s32.totalorder %v20679_v16, 1  ;;  %v5612_v19 = vsel %vm1949_vm12, %v5610_v29, %v5611_v43  ;;  %vm20682_vm11 = vcmp.eq.s32.totalorder %v20681_v21, 1  ;;  %v18159_v29 = vld [vmem:[%s18353_s5] ss:$0 sm:$0xff] }
 0x55b   : > { %v5546_v5 = vsel %vm20680_vm15, %v5483_v17, -inf  ;;  %8204 = vmatmul.mubr.f32.gmra.mrb[24].mxu1 %v5963_v28  ;;  %v5835_v59 = vmax.f32 %v5706_v13, %v5803_v36  ;;  %v5932_v23 = vsel %vm20682_vm11, %v5871_v14, -inf  ;;  %vm20684_vm5 = vcmp.eq.s32.totalorder %v20683_v30, 1 }
 0x55c   : > { %v5578_v47 = vmax.f32 %v5448_v3, %v5546_v5  ;;  %v5449_v38 = vmax.f32 %v5415_v6, %v17555_v55  ;;  %v5675_v33 = vsel %vm20684_vm5, %v5612_v19, -inf  ;;  %v20685_v3 = vld [vmem:[#allocation83_spill] sm:$0xff]  ;;  %vm20688_vm12 = vcmp.eq.s32.totalorder %v20687_v52, 1 }
 0x55d   : > { %v5964_v41 = vmax.f32 %v5835_v59, %v5932_v23  ;;  %vm20686_vm6 = vcmp.eq.s32.totalorder %v20685_v3, 1 }
 0x55e   : > { %v5707_v25 = vmax.f32 %v5578_v47, %v5675_v33  ;;  %v5740_v26 = vrot.slane %v5449_v38, 1  ;;  %v5869_v63 = vrot.slane %v5449_v38, 2 }
 0x55f   : > { %8206 = vmatprep.mubr.f32.mxu1 %v5964_v41 }
 0x560   : > { %v5741_v53 = vsel %vm2107_vm7, %v5739_v34, %v5740_v26  ;;  %v5870_v27 = vsel %vm2265_vm4, %v5868_v58, %v5869_v63 }
 0x561   : > { %v5804_v15 = vsel %vm20686_vm6, %v5741_v53, -inf  ;;  %v5933_v55 = vsel %vm20688_vm12, %v5870_v27, -inf }
 0x562   : > { %v5836_v54 = vmax.f32 %v5707_v25, %v5804_v15 }
 0x564   : > { %v5965_v4 = vmax.f32 %v5836_v54, %v5933_v55 }
 0x566   : > { %8207 = vmatmul.mubr.f32.gmra.mrb[26].mxu1 %v5965_v4 }
 0x56e   : > { %v8163_v50 = vpop.f32.mrb[28].mxu1 }
 0x56f   : > { %v8385_v34 = vadd.f32 %v8163_v50, %v17877_v49  ;;  %v6806_v32 = vpop.f32.mrb[29].mxu1 }
 0x570   : > { %v8386_v22 = vadd.f32 %v6806_v32, %v17880_v60 }
 0x571   : > { %v7005_v58 = vadd.f32 %v8385_v34, %v18159_v29 }
 0x572   : > { %v7004_v20 = vadd.f32 %v8386_v22, %v18159_v29 }
 0x573   : > { %v7472_v7 = vmul.f32 -1.442695, %v7005_v58 }
 0x574   : > { %v7471_v57 = vmul.f32 -1.442695, %v7004_v20 }
 0x575   : > { %8788 = vpow2.f32 %v7472_v7 }
 0x576   : > { %8790 = vpow2.f32 %v7471_v57 }
 0x57f   : > { %v8789_v8 = vpop.eup %8788 }
 0x580   : > { %v8791_v18 = vpop.eup %8790  ;;  %v7133_v43 = vadd.f32 1.0, %v8789_v8 }
 0x581   : > { %v7132_v56 = vadd.f32 1.0, %v8791_v18 }
 0x582   : > { %8792 = vrcp.f32 %v7133_v43 }
 0x583   : > { %8794 = vrcp.f32 %v7132_v56 }
 0x585   : > { %v8166_v31 = vpop.f32.mrb[30].mxu1 }
 0x586   : > { %v8387_v11 = vadd.f32 %v8166_v31, %v17898_v39  ;;  %v6816_v49 = vpop.f32.mrb[31].mxu1 }
 0x587   : > { %v8388_v60 = vadd.f32 %v6816_v49, %v17902_v44 }
 0x588   : > { %v7007_v36 = vadd.f32 %v8387_v11, %v18159_v29 }
 0x589   : > { %v7006_v14 = vadd.f32 %v8388_v60, %v18159_v29 }
 0x58a   : > { %v7474_v46 = vmul.f32 -1.442695, %v7007_v36 }
 0x58b   : > { %v7473_v28 = vmul.f32 -1.442695, %v7006_v14 }
 0x58c   : > { %8796 = vpow2.f32 %v7474_v46  ;;  %v8793_v13 = vpop.eup %8792 }
 0x58d   : > { %8798 = vpow2.f32 %v7473_v28  ;;  %v8795_v17 = vpop.eup %8794  ;;  %v7229_v6 = vmul.f32 %v8793_v13, %v7005_v58 }
 0x58e   : > { %v7228_v16 = vmul.f32 %v8795_v17, %v7004_v20 }
 0x58f   : > { %7261 = vst [vmem:[%s18170_s28 + $0x8] sm:$0xff] %v7229_v6 }
 0x590   : > { %7260 = vst [vmem:[%s18170_s28] sm:$0xff] %v7228_v16 }
 0x596   : > { %v8797_v19 = vpop.eup %8796 }
 0x597   : > { %v8799_v47 = vpop.eup %8798  ;;  %v7135_v21 = vadd.f32 1.0, %v8797_v19 }
 0x598   : > { %v8169_v39 = vpop.f32.mrb[0].mxu1  ;;  %v7134_v38 = vadd.f32 1.0, %v8799_v47 }
 0x599   : > { %v8389_v44 = vadd.f32 %v8169_v39, %v17212_v35  ;;  %v6826_v5 = vpop.f32.mrb[1].mxu1  ;;  %8800 = vrcp.f32 %v7135_v21 }
 0x59a   : > { %v8390_v59 = vadd.f32 %v6826_v5, %v17243_v62  ;;  %8802 = vrcp.f32 %v7134_v38 }
 0x59b   : > { %v7009_v23 = vadd.f32 %v8389_v44, %v18159_v29 }
 0x59c   : > { %v7008_v30 = vadd.f32 %v8390_v59, %v18159_v29 }
 0x59d   : > { %v7476_v33 = vmul.f32 -1.442695, %v7009_v23 }
 0x59e   : > { %v7475_v41 = vmul.f32 -1.442695, %v7008_v30 }
 0x59f   : > { %8804 = vpow2.f32 %v7476_v33 }
 0x5a0   : > { %8806 = vpow2.f32 %v7475_v41 }
 0x5a3   : > { %v8801_v35 = vpop.eup %8800 }
 0x5a4   : > { %v8803_v25 = vpop.eup %8802  ;;  %v7231_v26 = vmul.f32 %v8801_v35, %v7007_v36 }
 0x5a5   : > { %v7230_v62 = vmul.f32 %v8803_v25, %v7006_v14 }
 0x5a6   : > { %7263 = vst [vmem:[%s18170_s28 + $0x18] sm:$0xff] %v7231_v26 }
 0x5a7   : > { %7262 = vst [vmem:[%s18170_s28 + $0x10] sm:$0xff] %v7230_v62 }
 0x5a9   : > { %v8805_v63 = vpop.eup %8804 }
 0x5aa   : > { %v8807_v53 = vpop.eup %8806  ;;  %v7137_v27 = vadd.f32 1.0, %v8805_v63 }
 0x5ab   : > { %v7136_v15 = vadd.f32 1.0, %v8807_v53 }
 0x5ac   : > { %8808 = vrcp.f32 %v7137_v27 }
 0x5ad   : > { %v8172_v3 = vpop.f32.mrb[2].mxu1  ;;  %8810 = vrcp.f32 %v7136_v15 }
 0x5ae   : > { %v8391_v54 = vadd.f32 %v8172_v3, %v17373_v9  ;;  %v6836_v52 = vpop.f32.mrb[3].mxu1 }
 0x5af   : > { %v8392_v55 = vadd.f32 %v6836_v52, %v17405_v12 }
 0x5b0   : > { %v7011_v4 = vadd.f32 %v8391_v54, %v18159_v29 }
 0x5b1   : > { %v7010_v50 = vadd.f32 %v8392_v55, %v18159_v29 }
 0x5b2   : > { %v7478_v34 = vmul.f32 -1.442695, %v7011_v4 }
 0x5b3   : > { %v7477_v32 = vmul.f32 -1.442695, %v7010_v50 }
 0x5b4   : > { %8812 = vpow2.f32 %v7478_v34 }
 0x5b5   : > { %8814 = vpow2.f32 %v7477_v32 }
 0x5b6   : > { %v8809_v9 = vpop.eup %8808 }
 0x5b7   : > { %v8811_v57 = vpop.eup %8810  ;;  %v7233_v12 = vmul.f32 %v8809_v9, %v7009_v23 }
 0x5b8   : > { %v7232_v18 = vmul.f32 %v8811_v57, %v7008_v30 }
 0x5b9   : > { %v8175_v22 = vpop.f32.mrb[4].mxu1  ;;  %7265 = vst [vmem:[%s18170_s28 + $0x28] sm:$0xff] %v7233_v12 }
 0x5ba   : > { %v8393_v58 = vadd.f32 %v8175_v22, %v17482_v2  ;;  %v6846_v20 = vpop.f32.mrb[5].mxu1  ;;  %7264 = vst [vmem:[%s18170_s28 + $0x20] sm:$0xff] %v7232_v18 }
 0x5bb   : > { %v8394_v7 = vadd.f32 %v6846_v20, %v17511_v42 }
 0x5bc   : > { %v7013_v8 = vadd.f32 %v8393_v58, %v18159_v29 }
 0x5bd   : > { %v7012_v43 = vadd.f32 %v8394_v7, %v18159_v29  ;;  %v20689_v7 = vld [vmem:[#allocation117_spill] sm:$0xff] }
 0x5be   : > { %v7480_v31 = vmul.f32 -1.442695, %v7013_v8  ;;  %v8813_v11 = vpop.eup %8812 }
 0x5bf   : > { %v7479_v56 = vmul.f32 -1.442695, %v7012_v43  ;;  %v8815_v49 = vpop.eup %8814  ;;  %v7139_v60 = vadd.f32 1.0, %v8813_v11 }
 0x5c0   : > { %8816 = vpow2.f32 %v7480_v31  ;;  %v7138_v2 = vadd.f32 1.0, %v8815_v49 }
 0x5c1   : > { %8818 = vpow2.f32 %v7479_v56 }
 0x5c2   : > { %8820 = vrcp.f32 %v7139_v60 }
 0x5c3   : > { %8822 = vrcp.f32 %v7138_v2 }
 0x5c6   : > { %v8178_v42 = vpop.f32.mrb[6].mxu1 }
 0x5c7   : > { %v8395_v36 = vadd.f32 %v8178_v42, %v17553_v0  ;;  %v6856_v14 = vpop.f32.mrb[7].mxu1 }
 0x5c8   : > { %v8396_v46 = vadd.f32 %v6856_v14, %v17563_v37 }
 0x5c9   : > { %v18193_v28 = vadd.f32 %v8395_v36, %v18159_v29 }
 0x5ca   : > { %v18196_v13 = vadd.f32 %v8396_v46, %v18159_v29  ;;  %v8817_v6 = vpop.eup %8816  ;;  %v20690_v46 = vld [vmem:[#allocation72_spill] sm:$0xff] }
 0x5cb   : > { %v7482_v17 = vmul.f32 -1.442695, %v18193_v28  ;;  %v8819_v39 = vpop.eup %8818  ;;  %v7141_v44 = vadd.f32 1.0, %v8817_v6 }
 0x5cc   : > { %v7481_v16 = vmul.f32 -1.442695, %v18196_v13  ;;  %v7140_v0 = vadd.f32 1.0, %v8819_v39  ;;  %v8821_v5 = vpop.eup %8820 }
 0x5cd   : > { %8824 = vpow2.f32 %v7482_v17  ;;  %v8823_v19 = vpop.eup %8822  ;;  %v7235_v59 = vmul.f32 %v8821_v5, %v7011_v4 }
 0x5ce   : > { %8826 = vpow2.f32 %v7481_v16  ;;  %v7234_v23 = vmul.f32 %v8823_v19, %v7010_v50  ;;  %v20691_v16 = vld [vmem:[#allocation114_spill] sm:$0xff] }
 0x5cf   : > { %8828 = vrcp.f32 %v7141_v44  ;;  %7267 = vst [vmem:[%s18170_s28 + $0x38] sm:$0xff] %v7235_v59 }
 0x5d0   : > { %8830 = vrcp.f32 %v7140_v0  ;;  %7266 = vst [vmem:[%s18170_s28 + $0x30] sm:$0xff] %v7234_v23 }
 0x5d1   : > { %v8181_v37 = vpop.f32.mrb[8].mxu1 }
 0x5d2   : > { %v8397_v47 = vadd.f32 %v8181_v37, %v17570_v1  ;;  %v6866_v21 = vpop.f32.mrb[9].mxu1 }
 0x5d3   : > { %v8398_v38 = vadd.f32 %v6866_v21, %v17576_v10 }
 0x5d4   : > { %v7017_v30 = vadd.f32 %v8397_v47, %v18159_v29 }
 0x5d5   : > { %v7016_v33 = vadd.f32 %v8398_v38, %v18159_v29 }
 0x5d6   : > { %v7484_v41 = vmul.f32 -1.442695, %v7017_v30 }
 0x5d7   : > { %v7483_v35 = vmul.f32 -1.442695, %v7016_v33  ;;  %v8825_v25 = vpop.eup %8824 }
 0x5d8   : > { %8832 = vpow2.f32 %v7484_v41  ;;  %v8827_v26 = vpop.eup %8826  ;;  %v7143_v63 = vadd.f32 1.0, %v8825_v25 }
 0x5d9   : > { %8834 = vpow2.f32 %v7483_v35  ;;  %v8829_v62 = vpop.eup %8828  ;;  %v7142_v53 = vadd.f32 1.0, %v8827_v26  ;;  %v20692_v35 = vld [vmem:[#allocation84_spill] sm:$0xff] }
 0x5da   : > { %v8831_v3 = vpop.eup %8830  ;;  %v7237_v15 = vmul.f32 %v8829_v62, %v7013_v8  ;;  %8836 = vrcp.f32 %v7143_v63 }
 0x5db   : > { %v7236_v52 = vmul.f32 %v8831_v3, %v7012_v43  ;;  %8838 = vrcp.f32 %v7142_v53 }
 0x5dc   : > { %v8184_v1 = vpop.f32.mrb[10].mxu1  ;;  %7269 = vst [vmem:[%s18170_s28 + $0x48] sm:$0xff] %v7237_v15 }
 0x5dd   : > { %v8399_v10 = vadd.f32 %v8184_v1, %v17582_v40  ;;  %v6876_v27 = vpop.f32.mrb[11].mxu1  ;;  %7268 = vst [vmem:[%s18170_s28 + $0x40] sm:$0xff] %v7236_v52  ;;  %v20693_v1 = vld [vmem:[#allocation35_spill] sm:$0xff] }
 0x5de   : > { %v8400_v54 = vadd.f32 %v6876_v27, %v17588_v24 }
 0x5df   : > { %v7019_v55 = vadd.f32 %v8399_v10, %v18159_v29 }
 0x5e0   : > { %v7018_v4 = vadd.f32 %v8400_v54, %v18159_v29 }
 0x5e1   : > { %v7486_v50 = vmul.f32 -1.442695, %v7019_v55 }
 0x5e2   : > { %v7485_v34 = vmul.f32 -1.442695, %v7018_v4  ;;  %v8833_v32 = vpop.eup %8832 }
 0x5e3   : > { %8840 = vpow2.f32 %v7486_v50  ;;  %v8835_v40 = vpop.eup %8834  ;;  %v7145_v22 = vadd.f32 1.0, %v8833_v32 }
 0x5e4   : > { %8842 = vpow2.f32 %v7485_v34  ;;  %v7144_v20 = vadd.f32 1.0, %v8835_v40  ;;  %v8837_v12 = vpop.eup %8836 }
 0x5e5   : > { %8844 = vrcp.f32 %v7145_v22  ;;  %v8839_v18 = vpop.eup %8838  ;;  %v7239_v43 = vmul.f32 %v8837_v12, %v18193_v28  ;;  %v20694_v22 = vld [vmem:[#allocation71_spill] sm:$0xff] }
 0x5e6   : > { %8846 = vrcp.f32 %v7144_v20  ;;  %v7238_v56 = vmul.f32 %v8839_v18, %v18196_v13 }
 0x5e7   : > { %v8187_v58 = vpop.f32.mrb[12].mxu1  ;;  %7271 = vst [vmem:[%s18170_s28 + $0x58] sm:$0xff] %v7239_v43 }
 0x5e8   : > { %v8401_v24 = vadd.f32 %v8187_v58, %v17596_v48  ;;  %v6886_v9 = vpop.f32.mrb[13].mxu1  ;;  %7270 = vst [vmem:[%s18170_s28 + $0x50] sm:$0xff] %v7238_v56 }
 0x5e9   : > { %v8402_v57 = vadd.f32 %v6886_v9, %v20689_v7 }
 0x5ea   : > { %v7021_v8 = vadd.f32 %v8401_v24, %v18159_v29  ;;  %v20695_v24 = vld [vmem:[#allocation80_spill] sm:$0xff] }
 0x5eb   : > { %v7020_v31 = vadd.f32 %v8402_v57, %v18159_v29 }
 0x5ec   : > { %v7488_v11 = vmul.f32 -1.442695, %v7021_v8 }
 0x5ed   : > { %v7487_v49 = vmul.f32 -1.442695, %v7020_v31  ;;  %v8841_v48 = vpop.eup %8840 }
 0x5ee   : > { %8848 = vpow2.f32 %v7488_v11  ;;  %v8843_v60 = vpop.eup %8842  ;;  %v7147_v2 = vadd.f32 1.0, %v8841_v48 }
 0x5ef   : > { %8850 = vpow2.f32 %v7487_v49  ;;  %v7146_v42 = vadd.f32 1.0, %v8843_v60  ;;  %v8845_v14 = vpop.eup %8844 }
 0x5f0   : > { %8852 = vrcp.f32 %v7147_v2  ;;  %v8847_v13 = vpop.eup %8846  ;;  %v7241_v6 = vmul.f32 %v8845_v14, %v7017_v30  ;;  %v20696_v2 = vld [vmem:[#allocation128_spill] sm:$0xff] }
 0x5f1   : > { %8854 = vrcp.f32 %v7146_v42  ;;  %v7240_v44 = vmul.f32 %v8847_v13, %v7016_v33 }
 0x5f2   : > { %7273 = vst [vmem:[%s18170_s28 + $0x68] sm:$0xff] %v7241_v6 }
 0x5f3   : > { %7272 = vst [vmem:[%s18170_s28 + $0x60] sm:$0xff] %v7240_v44 }
 0x5f4   : > { %v8190_v36 = vpop.f32.mrb[14].mxu1 }
 0x5f5   : > { %v8403_v28 = vadd.f32 %v8190_v36, %v20690_v46  ;;  %v6896_v17 = vpop.f32.mrb[15].mxu1  ;;  %v20697_v46 = vld [vmem:[#allocation73_spill] sm:$0xff] }
 0x5f6   : > { %v8404_v39 = vadd.f32 %v6896_v17, %v20691_v16 }
 0x5f7   : > { %v7023_v0 = vadd.f32 %v8403_v28, %v18159_v29 }
 0x5f8   : > { %v7022_v5 = vadd.f32 %v8404_v39, %v18159_v29  ;;  %v8849_v19 = vpop.eup %8848 }
 0x5f9   : > { %v7490_v37 = vmul.f32 -1.442695, %v7023_v0  ;;  %v8851_v47 = vpop.eup %8850  ;;  %v7149_v21 = vadd.f32 1.0, %v8849_v19 }
 0x5fa   : > { %v7489_v59 = vmul.f32 -1.442695, %v7022_v5  ;;  %v7148_v23 = vadd.f32 1.0, %v8851_v47  ;;  %v8853_v38 = vpop.eup %8852  ;;  %v20699_v47 = vld [vmem:[#allocation112_spill] sm:$0xff] }
 0x5fb   : > { %8856 = vpow2.f32 %v7490_v37  ;;  %v8855_v33 = vpop.eup %8854  ;;  %v7243_v41 = vmul.f32 %v8853_v38, %v7019_v55 }
 0x5fc   : > { %8858 = vpow2.f32 %v7489_v59  ;;  %v7242_v63 = vmul.f32 %v8855_v33, %v7018_v4 }
 0x5fd   : > { %8860 = vrcp.f32 %v7149_v21  ;;  %7275 = vst [vmem:[%s18170_s28 + $0x78] sm:$0xff] %v7243_v41 }
 0x5fe   : > { %8862 = vrcp.f32 %v7148_v23  ;;  %7274 = vst [vmem:[%s18170_s28 + $0x70] sm:$0xff] %v7242_v63 }
 0x600   : > { %v8193_v30 = vpop.f32.mrb[16].mxu1 }
 0x601   : > { %v8405_v25 = vadd.f32 %v8193_v30, %v20692_v35  ;;  %v6906_v26 = vpop.f32.mrb[17].mxu1 }
 0x602   : > { %v8406_v62 = vadd.f32 %v6906_v26, %v20693_v1 }
 0x603   : > { %v7025_v53 = vadd.f32 %v8405_v25, %v18159_v29 }
 0x604   : > { %v18232_v10 = vadd.f32 %v8406_v62, %v18159_v29 }
 0x605   : > { %v7492_v27 = vmul.f32 -1.442695, %v7025_v53  ;;  %v8857_v15 = vpop.eup %8856 }
 0x606   : > { %v7491_v3 = vmul.f32 -1.442695, %v18232_v10  ;;  %v8859_v54 = vpop.eup %8858  ;;  %v7151_v52 = vadd.f32 1.0, %v8857_v15 }
 0x607   : > { %8864 = vpow2.f32 %v7492_v27  ;;  %v8861_v55 = vpop.eup %8860  ;;  %v7150_v4 = vadd.f32 1.0, %v8859_v54 }
 0x608   : > { %8866 = vpow2.f32 %v7491_v3  ;;  %v8863_v50 = vpop.eup %8862  ;;  %v7245_v34 = vmul.f32 %v8861_v55, %v7021_v8 }
 0x609   : > { %8868 = vrcp.f32 %v7151_v52  ;;  %v7244_v32 = vmul.f32 %v8863_v50, %v7020_v31  ;;  %v20700_v52 = vld [vmem:[#allocation134_spill] sm:$0xff] }
 0x60a   : > { %8870 = vrcp.f32 %v7150_v4  ;;  %7277 = vst [vmem:[%s18170_s28 + $0x88] sm:$0xff] %v7245_v34 }
 0x60b   : > { %7276 = vst [vmem:[%s18170_s28 + $0x80] sm:$0xff] %v7244_v32 }
 0x60e   : > { %v8196_v40 = vpop.f32.mrb[18].mxu1 }
 0x60f   : > { %v8407_v58 = vadd.f32 %v8196_v40, %v20694_v22  ;;  %v6916_v20 = vpop.f32.mrb[19].mxu1 }
 0x610   : > { %v8408_v9 = vadd.f32 %v6916_v20, %v20695_v24 }
 0x611   : > { %v18240_v7 = vadd.f32 %v8407_v58, %v18159_v29  ;;  %v8865_v8 = vpop.eup %8864 }
 0x612   : > { %v18243_v57 = vadd.f32 %v8408_v9, %v18159_v29  ;;  %v8867_v43 = vpop.eup %8866  ;;  %v7153_v31 = vadd.f32 1.0, %v8865_v8 }
 0x613   : > { %v7494_v12 = vmul.f32 -1.442695, %v18240_v7  ;;  %v7152_v56 = vadd.f32 1.0, %v8867_v43  ;;  %v8869_v11 = vpop.eup %8868 }
 0x614   : > { %v7493_v18 = vmul.f32 -1.442695, %v18243_v57  ;;  %v8871_v48 = vpop.eup %8870  ;;  %v7247_v60 = vmul.f32 %v8869_v11, %v7023_v0  ;;  %v20698_v0 = vld [vmem:[#allocation21_spill] sm:$0xff] }
 0x615   : > { %8872 = vpow2.f32 %v7494_v12  ;;  %v7246_v14 = vmul.f32 %v8871_v48, %v7022_v5 }
 0x616   : > { %8874 = vpow2.f32 %v7493_v18  ;;  %7279 = vst [vmem:[%s18170_s28 + $0x98] sm:$0xff] %v7247_v60 }
 0x617   : > { %8876 = vrcp.f32 %v7153_v31  ;;  %7278 = vst [vmem:[%s18170_s28 + $0x90] sm:$0xff] %v7246_v14 }
 0x618   : > { %8878 = vrcp.f32 %v7152_v56 }
 0x619   : > { %v8199_v49 = vpop.f32.mrb[20].mxu1 }
 0x61a   : > { %v8409_v42 = vadd.f32 %v8199_v49, %v20696_v2  ;;  %v6926_v36 = vpop.f32.mrb[21].mxu1 }
 0x61b   : > { %v8410_v28 = vadd.f32 %v6926_v36, %v20697_v46 }
 0x61c   : > { %v18251_v17 = vadd.f32 %v8409_v42, %v18159_v29 }
 0x61d   : > { %v18255_v13 = vadd.f32 %v8410_v28, %v18159_v29 }
 0x61e   : > { %v7496_v6 = vmul.f32 -1.442695, %v18251_v17 }
 0x61f   : > { %v7495_v16 = vmul.f32 -1.442695, %v18255_v13  ;;  %v8873_v44 = vpop.eup %8872 }
 0x620   : > { %8880 = vpow2.f32 %v7496_v6  ;;  %v8875_v19 = vpop.eup %8874  ;;  %v7155_v59 = vadd.f32 1.0, %v8873_v44 }
 0x621   : > { %v8202_v39 = vpop.f32.mrb[22].mxu1  ;;  %8882 = vpow2.f32 %v7495_v16  ;;  %v8877_v23 = vpop.eup %8876  ;;  %v7154_v38 = vadd.f32 1.0, %v8875_v19 }
 0x622   : > { %v8411_v5 = vadd.f32 %v8202_v39, %v20698_v0  ;;  %v6936_v37 = vpop.f32.mrb[23].mxu1  ;;  %v8879_v33 = vpop.eup %8878  ;;  %v7249_v41 = vmul.f32 %v8877_v23, %v7025_v53  ;;  %8884 = vrcp.f32 %v7155_v59 }
 0x623   : > { %v8412_v21 = vadd.f32 %v6936_v37, %v20699_v47  ;;  %v7248_v25 = vmul.f32 %v8879_v33, %v18232_v10  ;;  %8886 = vrcp.f32 %v7154_v38 }
 0x624   : > { %v18262_v30 = vadd.f32 %v8411_v5, %v18159_v29  ;;  %7281 = vst [vmem:[%s18170_s28 + $0xa8] sm:$0xff] %v7249_v41 }
 0x625   : > { %v7030_v35 = vadd.f32 %v8412_v21, %v18159_v29  ;;  %7280 = vst [vmem:[%s18170_s28 + $0xa0] sm:$0xff] %v7248_v25 }
 0x626   : > { %v7498_v26 = vmul.f32 -1.442695, %v18262_v30 }
 0x627   : > { %v7497_v63 = vmul.f32 -1.442695, %v7030_v35 }
 0x628   : > { %8888 = vpow2.f32 %v7498_v26 }
 0x629   : > { %8890 = vpow2.f32 %v7497_v63 }
 0x62a   : > { %v8881_v1 = vpop.eup %8880 }
 0x62b   : > { %v8883_v27 = vpop.eup %8882  ;;  %v7157_v3 = vadd.f32 1.0, %v8881_v1 }
 0x62c   : > { %v7156_v54 = vadd.f32 1.0, %v8883_v27  ;;  %v8885_v4 = vpop.eup %8884 }
 0x62d   : > { %8892 = vrcp.f32 %v7157_v3  ;;  %v8887_v34 = vpop.eup %8886  ;;  %v7251_v32 = vmul.f32 %v8885_v4, %v18240_v7 }
 0x62e   : > { %v8205_v62 = vpop.f32.mrb[24].mxu1  ;;  %8894 = vrcp.f32 %v7156_v54  ;;  %v7250_v22 = vmul.f32 %v8887_v34, %v18243_v57 }
 0x62f   : > { %v8413_v53 = vadd.f32 %v8205_v62, %v17754_v45  ;;  %v6946_v15 = vpop.f32.mrb[25].mxu1  ;;  %7283 = vst [vmem:[%s18170_s28 + $0xb8] sm:$0xff] %v7251_v32 }
 0x630   : > { %v8414_v10 = vadd.f32 %v6946_v15, %v20700_v52  ;;  %7282 = vst [vmem:[%s18170_s28 + $0xb0] sm:$0xff] %v7250_v22 }
 0x631   : > { %v7033_v55 = vadd.f32 %v8413_v53, %v18159_v29 }
 0x632   : > { %v7032_v50 = vadd.f32 %v8414_v10, %v18159_v29  ;;  %v8889_v45 = vpop.eup %8888 }
 0x633   : > { %v7500_v40 = vmul.f32 -1.442695, %v7033_v55  ;;  %v8891_v20 = vpop.eup %8890  ;;  %v7159_v24 = vadd.f32 1.0, %v8889_v45 }
 0x634   : > { %v7499_v58 = vmul.f32 -1.442695, %v7032_v50  ;;  %v7158_v9 = vadd.f32 1.0, %v8891_v20 }
 0x635   : > { %8896 = vpow2.f32 %v7500_v40 }
 0x636   : > { %8898 = vpow2.f32 %v7499_v58 }
 0x637   : > { %8900 = vrcp.f32 %v7159_v24  ;;  %v8893_v18 = vpop.eup %8892 }
 0x638   : > { %8902 = vrcp.f32 %v7158_v9  ;;  %v8895_v43 = vpop.eup %8894  ;;  %v7253_v31 = vmul.f32 %v8893_v18, %v18251_v17 }
 0x639   : > { %v8208_v12 = vpop.f32.mrb[26].mxu1  ;;  %v7252_v11 = vmul.f32 %v8895_v43, %v18255_v13 }
 0x63a   : > { %v8415_v8 = vadd.f32 %v8208_v12, %v17853_v51  ;;  %v6956_v7 = vpop.f32.mrb[27].mxu1  ;;  %7285 = vst [vmem:[%s18170_s28 + $0xc8] sm:$0xff] %v7253_v31 }
 0x63b   : > { %v8416_v57 = vadd.f32 %v6956_v7, %v17858_v61  ;;  %7284 = vst [vmem:[%s18170_s28 + $0xc0] sm:$0xff] %v7252_v11 }
 0x63c   : > { %v7035_v56 = vadd.f32 %v8415_v8, %v18159_v29 }
 0x63d   : > { %v7034_v49 = vadd.f32 %v8416_v57, %v18159_v29 }
 0x63e   : > { %v7502_v48 = vmul.f32 -1.442695, %v7035_v56 }
 0x63f   : > { %v8897_v60 = vpop.eup %8896  ;;  %v7501_v51 = vmul.f32 -1.442695, %v7034_v49 }
 0x640   : > { %v8899_v2 = vpop.eup %8898  ;;  %v7161_v42 = vadd.f32 1.0, %v8897_v60  ;;  %8904 = vpow2.f32 %v7502_v48 }
 0x641   : > { %v7160_v61 = vadd.f32 1.0, %v8899_v2  ;;  %8906 = vpow2.f32 %v7501_v51  ;;  %v8901_v36 = vpop.eup %8900 }
 0x642   : > { %8908 = vrcp.f32 %v7161_v42  ;;  %v8903_v14 = vpop.eup %8902  ;;  %v7255_v46 = vmul.f32 %v8901_v36, %v18262_v30 }
 0x643   : > { %8910 = vrcp.f32 %v7160_v61  ;;  %v7254_v29 = vmul.f32 %v8903_v14, %v7030_v35 }
 0x644   : > { %7287 = vst [vmem:[%s18170_s28 + $0xd8] sm:$0xff] %v7255_v46 }
 0x645   : > { %7286 = vst [vmem:[%s18170_s28 + $0xd0] sm:$0xff] %v7254_v29 }
 0x64a   : > { %v8905_v28 = vpop.eup %8904 }
 0x64b   : > { %v8907_v17 = vpop.eup %8906  ;;  %v7163_v13 = vadd.f32 1.0, %v8905_v28 }
 0x64c   : > { %v8909_v6 = vpop.eup %8908  ;;  %v7162_v16 = vadd.f32 1.0, %v8907_v17 }
 0x64d   : > { %v8911_v39 = vpop.eup %8910  ;;  %v7257_v44 = vmul.f32 %v8909_v6, %v7033_v55  ;;  %8912 = vrcp.f32 %v7163_v13 }
 0x64e   : > { %v7256_v0 = vmul.f32 %v8911_v39, %v7032_v50  ;;  %8914 = vrcp.f32 %v7162_v16 }
 0x64f   : > { %7289 = vst [vmem:[%s18170_s28 + $0xe8] sm:$0xff] %v7257_v44 }
 0x650   : > { %7288 = vst [vmem:[%s18170_s28 + $0xe0] sm:$0xff] %v7256_v0 }
 0x657   : > { %v8913_v5 = vpop.eup %8912 }
 0x658   : > { %v8915_v37 = vpop.eup %8914  ;;  %v7259_v19 = vmul.f32 %v8913_v5, %v7035_v56 }
 0x659   : > { %v7258_v59 = vmul.f32 %v8915_v37, %v7034_v49 }
 0x65a   : > { %7291 = vst [vmem:[%s18170_s28 + $0xf8] sm:$0xff] %v7259_v19 }
 0x65b   : > { %7290 = vst [vmem:[%s18170_s28 + $0xf0] sm:$0xff] %v7258_v59 }
 0x65c   : > { %9075 = shalt.err (!%p9072_p5)
}
 0x65d   : > { %s9076_s12 = scalar_lea.hbm %s18295_s15, 4096  ;;  %s9080_s28 = scalar_lea.hbm %s18354_s6, 8192 }
 0x65e   : > { %p9077_p9 = scmp.ne.s32.totalorder %s18295_s15, %s9076_s12  ;;  %p9081_p3 = scmp.lt.u32.totalorder %s18295_s15, %s18354_s6 }
 0x65f   : > { %p9082_p7 = scmp.lt.u32.totalorder %s9080_s28, %s9076_s12  ;;  %p9084_p4 = scmp.lt.u32.totalorder %s9076_s12, %s18295_s15 }
 0x660   : > { %p9078_p1 = pnand %p9077_p9, %p9288_p10 }
 0x661   : > { %p9083_p11 = por %p9082_p7, %p9081_p3 }
 0x662   : > { %p9079_p2 = pneg %p9078_p1 }
 0x663   : > { %p9085_p6 = por %p9084_p4, %p9083_p11 }
 0x665   : > { %p9086_p8 = pnand %p9085_p6, %p9079_p2 }
 0x667   : > { %9089 = shalt.err (!%p9086_p8)
}
 0x668   : > { %s9156_s14 = smov 128   ;;  %s9157_s16 = smov 8  }
 0x669   : > { %8490 = dma.vmem_to_hbm [thread:$0]  (%p9288_p10), %s18297_s9, 4096, %s18295_s15, %s7293_s7, %s9156_s14, %s9156_s14, %s9157_s16  }
 0x66a PF: > { %s7323_s24 = sand.u32 1, %s9128_s21   ;;  %p20701_p12 = scmp.ne.s32.totalorder %s19140_s8, 0 }
 0x66b   : > { %p20702_p13 = scmp.ge.s32.totalorder %s9148_s26, 2  ;;  %s7324_s29 = scalar_lea.sflag [#allocation4], %s7323_s24 }
 0x66d   : > { %p8501_p0 = pnand %p20702_p13, %p20701_p12 }
 0x66f   : > { %9123 = dma.done.wait (!%p8501_p0), %s7324_s29, 4096  }
 0x670   : > { %9125 = vsyncadd (!%p8501_p0), %s7324_s29, 4294963200  ;;  %s23_s26 = sadd.s32 1, %s9148_s26   ;;  %s20703_s21 = smov %s9132_s22 }
 0x671   : > { %p20_p5 = scmp.ge.s32.totalorder %s23_s26, 4   ;;  %s20704_s22 = smov %s9136_s23 }
 0x672   : > { %s20705_s23 = smov %s9297_s20  ;;  %s20706_s24 = smov %s9144_s25 }
 0x673   : > { %s20707_s25 = smov %s20709_s13  ;;  %22 = sbr.rel (!%p20_p5) target bundleno = 7 (0x7), region = 97 }
 0x67a   :  { %7329 = vsyncpa [#allocation3], 1 }
 0x67b   :  { %7331 = vsyncpa [#allocation3 + $0x1], 1 }
 0x67c   :  { %7332 = vsyncpa [#allocation6], 1 }
 0x67d   :  { %7333 = vsyncpa [#allocation4], 1 }
 0x67e   :  { %7335 = vsyncpa [#allocation4 + $0x1], 1 }

</bundles_post_ra>
